<compile_context>
chip_gen: v6e
topology: v6e:2x2x1
jax: 0.10.0
libtpu: 0.0.40
codegen_flags: <defaults>
</compile_context>

<pallas_src>
import math

import jax
import jax.numpy as jnp
from jax import lax
from jax.experimental import pallas as pl
from jax.experimental.pallas import tpu as pltpu

EPS = 1e-5  # PyTorch BatchNorm2d default eps


def _round_up(v, m):
    return (v + m - 1) // m * m


def _bilinear_matrix(in_size, out_size):
    """(out_size, in_size) 1-D bilinear interpolation matrix matching
    nn.Upsample(scale_factor=2, mode='bilinear', align_corners=True)."""
    scale = (in_size - 1) / (out_size - 1)
    src = jnp.arange(out_size, dtype=jnp.float32) * scale
    i0 = jnp.clip(jnp.floor(src).astype(jnp.int32), 0, in_size - 1)
    i1 = jnp.clip(i0 + 1, 0, in_size - 1)
    frac = src - i0.astype(jnp.float32)
    rows = jnp.arange(out_size)
    A = jnp.zeros((out_size, in_size), jnp.float32)
    A = A.at[rows, i0].add(1.0 - frac)
    A = A.at[rows, i1].add(frac)
    return A


def _height_taps(in_size, out_size):
    """Compile-time (src0, src1, w0, w1) taps for the height axis."""
    scale = (in_size - 1) / (out_size - 1)
    taps = []
    for i in range(out_size):
        s = i * scale
        a = min(int(math.floor(s)), in_size - 1)
        b = min(a + 1, in_size - 1)
        fr = s - a
        taps.append((a, b, 1.0 - fr, fr))
    return taps


def _fold_bn(gamma, beta, mean, var):
    s = gamma / jnp.sqrt(var + EPS)
    return s, beta - mean * s


def init_params(key, in_c, out_c):
    """Deterministic synthetic parameters for decoder_block(in_c, out_c)."""
    cc = in_c + out_c
    ks = jax.random.split(key, 16)
    n = lambda k, s, sc=1.0: sc * jax.random.normal(k, s, jnp.float32)
    return dict(
        bn1=(1.0 + 0.1 * n(ks[0], (cc,)),                 # gamma
             0.05 * n(ks[1], (cc,)),                      # beta
             0.1 * n(ks[2], (cc,)),                       # running_mean
             1.0 + 0.1 * jnp.abs(n(ks[3], (cc,)))),       # running_var
        w1=n(ks[4], (out_c, cc, 3, 3), 0.15),
        b1=n(ks[5], (out_c,), 0.1),
        bn2=(1.0 + 0.1 * n(ks[6], (out_c,)),
             0.05 * n(ks[7], (out_c,)),
             0.1 * n(ks[8], (out_c,)),
             1.0 + 0.1 * jnp.abs(n(ks[9], (out_c,)))),
        w2=n(ks[10], (out_c, out_c, 3, 3), 0.15),
        b2=n(ks[11], (out_c,), 0.1),
        ws=n(ks[12], (out_c, cc, 1, 1), 0.25),
        bs=n(ks[13], (out_c,), 0.1),
    )


def decoder_block_forward(x, skip, params):
    """x: (N, in_c, H, W) f32 NCHW; skip: (N, out_c, 2H, 2W) f32 NCHW.
    Returns (N, out_c, 2H, 2W) f32 NCHW (inference semantics)."""
    N, cin, H, W = x.shape
    Ns, cskip, H2, W2 = skip.shape
    assert Ns == N and H2 == 2 * H and W2 == 2 * W
    cout = params['w1'].shape[0]
    cc = cin + cskip
    assert params['w1'].shape[1] == cc
    assert W2 % 8 == 0, "W2 must be a multiple of 8"
    HW2 = H2 * W2
    f32, bf16 = jnp.float32, jnp.bfloat16

    # Lane-dense padded channel counts (review: >=128-wide lane axis).
    ccp = _round_up(cc, 128)
    coutp = _round_up(cout, 128)

    Pd = _round_up(W2, 8)           # zero-pad rows each side (8-aligned, >= W2)

    # Conv row bands: band boundary coincides with an image-row boundary so the
    # circular sublane roll wrap lands on masked (x==0 / x==W2-1) positions.
    max_rows = max(1, 128 // W2) if W2 <= 128 else 1
    band_rows = 1
    for d in range(1, H2 + 1):
        if H2 % d == 0 and d <= max_rows:
            band_rows = d
    RB = band_rows * W2
    n_bands = H2 // band_rows

    # ---------------- parameter prep (plain-JAX glue) ----------------
    s1, t1 = _fold_bn(*params['bn1'])
    s2, t2 = _fold_bn(*params['bn2'])

    def padv(v, n):
        return jnp.zeros((n,), f32).at[:v.shape[0]].set(v)

    bn1 = jnp.stack([padv(s1, ccp), padv(t1, ccp)], axis=0)           # (2, ccp)
    t2p = t2 + params['b1'] * s2                     # conv1 bias folded into BN2
    bsum = params['b2'] + params['bs']               # conv2 + shortcut biases
    cvec = jnp.stack([padv(s2, coutp), padv(t2p, coutp), padv(bsum, coutp)], 0)

    # conv weights: zero-pad channels, fuse the 3 kx taps into one K axis.
    w1_pad = jnp.zeros((coutp, ccp, 3, 3), f32).at[:cout, :cc].set(params['w1'])
    w1f = jnp.transpose(w1_pad, (2, 3, 1, 0)).reshape(3, 3 * ccp, coutp)
    w2_pad = jnp.zeros((coutp, coutp, 3, 3), f32).at[:cout, :cout].set(params['w2'])
    w2f = jnp.transpose(w2_pad, (2, 3, 1, 0)).reshape(3, 3 * coutp, coutp)
    ws_pad = jnp.zeros((coutp, ccp), f32).at[:cout, :cc].set(params['ws'][:, :, 0, 0])
    wsp = ws_pad.T                                                    # (ccp, coutp)

    aw2 = _bilinear_matrix(W, W2)                                     # (W2, W)
    htaps = _height_taps(H, H2)

    # bf16 HBM streams (halves the per-image DMA bytes); compute stays f32.
    # x pre-transposed so the width-pass matmul needs no in-kernel transpose.
    x_t = jnp.transpose(x, (0, 3, 2, 1)).reshape(N, W, H * cin).astype(bf16)
    sk_r = jnp.transpose(skip, (0, 2, 3, 1)).reshape(N, HW2, cskip).astype(bf16)

    # ---------------- fused Pallas kernel (one image per grid step) ----------
    # Note: at production N, several images per step (or images folded into the
    # row axis) would amortize the ~0.35us/step overhead; kept at 1 here so the
    # tiny demo batch still shards across TensorCores via the 'parallel' axis.
    def kernel(x_ref, sk_ref, aw_ref, bn1_ref, w1_ref, w2_ref, ws_ref, cv_ref,
               out_ref, pb, pb2):
        # Zero the pad rows and the padded channel lanes; the real interior
        # lanes are fully overwritten below.
        pb[0:Pd, :] = jnp.zeros((Pd, ccp), f32)
        pb[Pd + HW2:2 * Pd + HW2, :] = jnp.zeros((Pd, ccp), f32)
        pb2[0:Pd, :] = jnp.zeros((Pd, coutp), f32)
        pb2[Pd + HW2:2 * Pd + HW2, :] = jnp.zeros((Pd, coutp), f32)
        if ccp > cc:
            pb[Pd:Pd + HW2, cc:ccp] = jnp.zeros((HW2, ccp - cc), f32)

        # -- separable bilinear 2x upsample (align_corners=True) --
        # width: (W2, W) @ (W, H*cin) MXU dot; height: 2-tap scalar blends.
        t1t = jnp.dot(aw_ref[...], x_ref[0].astype(f32),
                      preferred_element_type=f32)                    # (W2, H*cin)
        for i, (a, b, fa, fb) in enumerate(htaps):
            blk = (fa * t1t[:, a * cin:(a + 1) * cin]
                   + fb * t1t[:, b * cin:(b + 1) * cin])             # (W2, cin)
            pb[Pd + i * W2:Pd + (i + 1) * W2, 0:cin] = blk
        # TODO(synk): for production H2 replace this unrolled loop with a
        # fori_loop over SMEM tap tables (or a second matmul).

        # skip half of the channel concat
        pb[Pd:Pd + HW2, cin:cc] = sk_ref[0].astype(f32)

        # Shortcut 1x1 conv on the pre-BN concat (bias folded into bsum).
        out_ref[0] = jnp.dot(pb[Pd:Pd + HW2, :], ws_ref[...],
                             preferred_element_type=f32)

        # BN1 + ReLU in place (padded channels have scale=bias=0 -> stay 0).
        pb[Pd:Pd + HW2, :] = jnp.maximum(
            pb[Pd:Pd + HW2, :] * bn1_ref[0:1, :] + bn1_ref[1:2, :], 0.0)

        def conv3x3(src, w_ref, band):
            """3x3 / pad-1 conv on one row band.  The dx=+/-1 taps come from a
            sublane roll (XLU) + in-kernel iota column mask; the 3 kx taps are
            lane-concatenated so each ky is a single MXU dot (K = 3*C)."""
            Cw = src.shape[1]
            col = lax.broadcasted_iota(jnp.int32, (RB, Cw), 0) % W2
            mask_l = (col != 0).astype(f32)
            mask_r = (col != W2 - 1).astype(f32)
            acc = None
            for ky in range(3):
                r0 = Pd + band * RB + (ky - 1) * W2     # 8-aligned static start
                c = src[r0:r0 + RB, :]
                left = pltpu.roll(c, 1, axis=0) * mask_l        # dx = -1 tap
                right = pltpu.roll(c, RB - 1, axis=0) * mask_r  # dx = +1 tap
                op = jnp.concatenate([left, c, right], axis=1)  # (RB, 3*Cw)
                d = jnp.dot(op, w_ref[ky], preferred_element_type=f32)
                acc = d if acc is None else acc + d
            return acc

        # conv1 (3x3, pad 1) -> BN2 + ReLU (conv1 bias folded into BN2 affine).
        for band in range(n_bands):
            a1 = conv3x3(pb, w1_ref, band)
            pb2[Pd + band * RB:Pd + (band + 1) * RB, :] = jnp.maximum(
                a1 * cv_ref[0:1, :] + cv_ref[1:2, :], 0.0)

        # conv2 (3x3, pad 1) + residual add (+ merged conv2/shortcut biases).
        for band in range(n_bands):
            a2 = conv3x3(pb2, w2_ref, band)
            r0 = band * RB
            out_ref[0, r0:r0 + RB, :] = (out_ref[0, r0:r0 + RB, :] + a2
                                         + cv_ref[2:3, :])

    def fixed(arr):
        zeros = (0,) * arr.ndim
        return pl.BlockSpec(arr.shape, lambda n, _z=zeros: _z)

    in_specs = [
        pl.BlockSpec((1, W, H * cin), lambda n: (n, 0, 0)),
        pl.BlockSpec((1, HW2, cskip), lambda n: (n, 0, 0)),
        fixed(aw2), fixed(bn1), fixed(w1f), fixed(w2f), fixed(wsp), fixed(cvec),
    ]

    # Derive the VMEM budget from the actual buffers (no fixed 32 MiB constant).
    def vmem_tile_bytes(shape, itemsize):
        s = list(shape)
        s[-1] = _round_up(s[-1], 128)
        if len(s) >= 2:
            s[-2] = _round_up(s[-2], 8)
        n = 1
        for d in s:
            n *= d
        return n * itemsize

    scratch_bytes = (vmem_tile_bytes((2 * Pd + HW2, ccp), 4)
                     + vmem_tile_bytes((2 * Pd + HW2, coutp), 4))
    stream_bytes = 2 * (vmem_tile_bytes((W, H * cin), 2)
                        + vmem_tile_bytes((HW2, cskip), 2)
                        + vmem_tile_bytes((HW2, coutp), 4))
    const_bytes = sum(vmem_tile_bytes(a.shape, 4)
                      for a in (aw2, bn1, w1f, w2f, wsp, cvec))
    vmem_limit = int(min(64 * 2 ** 20,
                         max(8 * 2 ** 20,
                             2 * (scratch_bytes + stream_bytes + const_bytes))))
    # TODO(synk): production image sizes need an extra H2 row-band grid axis so
    # the per-image scratch fits v7x's 64 MiB VMEM; demo shapes fit whole.

    out_flat = pl.pallas_call(
        kernel,
        out_shape=jax.ShapeDtypeStruct((N, HW2, coutp), f32),
        grid_spec=pltpu.PrefetchScalarGridSpec(
            num_scalar_prefetch=0,
            grid=(N,),
            in_specs=in_specs,
            out_specs=pl.BlockSpec((1, HW2, coutp), lambda n: (n, 0, 0)),
            scratch_shapes=[
                pltpu.VMEM((2 * Pd + HW2, ccp), f32),    # concat / BN1 activations
                pltpu.VMEM((2 * Pd + HW2, coutp), f32),  # BN2 activations
            ]),
        compiler_params=pltpu.CompilerParams(
            dimension_semantics=("parallel",),
            vmem_limit_bytes=vmem_limit),
    )(x_t, sk_r, aw2, bn1, w1f, w2f, wsp, cvec)

    out = out_flat[..., :cout].reshape(N, H2, W2, cout)
    return jnp.transpose(out, (0, 3, 1, 2))


def decoder_block_reference(x, skip, params):
    """Pure-JAX reference (NCHW) for validation."""
    N, cin, H, W = x.shape
    _, cskip, H2, W2 = skip.shape
    M = jnp.kron(_bilinear_matrix(H, H2), _bilinear_matrix(W, W2))
    up = jnp.einsum('oq,ncq->nco', M,
                    x.reshape(N, cin, H * W)).reshape(N, cin, H2, W2)
    xc = jnp.concatenate([up, skip], axis=1)

    def bn_relu(v, p):
        s, t = _fold_bn(*p)
        return jax.nn.relu(v * s[None, :, None, None] + t[None, :, None, None])

    def conv(v, w, b, pad):
        o = lax.conv_general_dilated(v, w, (1, 1), ((pad, pad), (pad, pad)),
                                     dimension_numbers=('NCHW', 'OIHW', 'NCHW'))
        return o + b[None, :, None, None]

    y = bn_relu(xc, params['bn1'])
    z1 = conv(y, params['w1'], params['b1'], 1)
    y2 = bn_relu(z1, params['bn2'])
    z2 = conv(y2, params['w2'], params['b2'], 1)
    s = conv(xc, params['ws'], params['bs'], 0)
    return z2 + s


if __name__ == "__main__":
    key = jax.random.PRNGKey(0)
    N, in_c, out_c, H, W = 2, 8, 4, 8, 8            # decoder_block(in_c=8, out_c=4)
    kx, ks, kp = jax.random.split(key, 3)
    x = jax.random.normal(kx, (N, in_c, H, W), jnp.float32)
    skip = jax.random.normal(ks, (N, out_c, 2 * H, 2 * W), jnp.float32)
    # The kernel streams x/skip as bf16; round here so the f32 reference sees
    # identical input values (precision choice, not a semantic change).
    x = x.astype(jnp.bfloat16).astype(jnp.float32)
    skip = skip.astype(jnp.bfloat16).astype(jnp.float32)
    params = init_params(kp, in_c, out_c)

    out = decoder_block_forward(x, skip, params)
    out = jax.block_until_ready(out)

    ref = decoder_block_reference(x, skip, params)
    assert out.shape == (N, out_c, 2 * H, 2 * W), out.shape
    max_err = float(jnp.max(jnp.abs(out - ref)))
    assert max_err < 5e-2, f"max abs err {max_err}"
    print("KERNEL_OK")
</pallas_src>

<mosaic_0001>
module attributes {stable_mosaic.version = 11 : i64} {
  func.func @kernel(%arg0: i32, %arg1: memref<1x8x64xbf16, #tpu.memory_space<vmem>>, %arg2: memref<1x256x4xbf16, #tpu.memory_space<vmem>>, %arg3: memref<16x8xf32, #tpu.memory_space<vmem>>, %arg4: memref<2x128xf32, #tpu.memory_space<vmem>>, %arg5: memref<3x384x128xf32, #tpu.memory_space<vmem>>, %arg6: memref<3x384x128xf32, #tpu.memory_space<vmem>>, %arg7: memref<128x128xf32, #tpu.memory_space<vmem>>, %arg8: memref<3x128xf32, #tpu.memory_space<vmem>>, %arg9: memref<1x256x128xf32, #tpu.memory_space<vmem>>, %arg10: memref<288x128xf32, #tpu.memory_space<vmem>>, %arg11: memref<288x128xf32, #tpu.memory_space<vmem>>) attributes {dimension_semantics = [#tpu.dimension_semantics<parallel>], iteration_bounds = array<i64: 2>, scalar_prefetch = 0 : i64, scratch_operands = 2 : i64, tpu.core_type = #tpu.core_type<tc>, window_params = [{transform_indices = @transform_0, window_bounds = array<i64: 1, 8, 64>}, {transform_indices = @transform_1, window_bounds = array<i64: 1, 256, 4>}, {pipeline_mode = #tpu.pipeline_mode<synchronous>, transform_indices = @transform_2, window_bounds = array<i64: 16, 8>}, {pipeline_mode = #tpu.pipeline_mode<synchronous>, transform_indices = @transform_3, window_bounds = array<i64: 2, 128>}, {pipeline_mode = #tpu.pipeline_mode<synchronous>, transform_indices = @transform_4, window_bounds = array<i64: 3, 384, 128>}, {pipeline_mode = #tpu.pipeline_mode<synchronous>, transform_indices = @transform_5, window_bounds = array<i64: 3, 384, 128>}, {pipeline_mode = #tpu.pipeline_mode<synchronous>, transform_indices = @transform_6, window_bounds = array<i64: 128, 128>}, {pipeline_mode = #tpu.pipeline_mode<synchronous>, transform_indices = @transform_7, window_bounds = array<i64: 3, 128>}, {transform_indices = @transform_8, window_bounds = array<i64: 1, 256, 128>}]} {
    %cst = arith.constant 0.000000e+00 : f32
    %0 = vector.broadcast %cst : f32 to vector<16x128xf32>
    %c0 = arith.constant 0 : index
    %c0_0 = arith.constant 0 : index
    %1 = vector.load %arg10[%c0, %c0_0] : memref<288x128xf32, #tpu.memory_space<vmem>>, vector<16x128xf32>
    tpu.vector_store %arg10[%c0, %c0_0], %0 {strides = array<i32>} : memref<288x128xf32, #tpu.memory_space<vmem>>, vector<16x128xf32>,
    %cst_1 = arith.constant 0.000000e+00 : f32
    %2 = vector.broadcast %cst_1 : f32 to vector<16x128xf32>
    %c272 = arith.constant 272 : index
    %c0_2 = arith.constant 0 : index
    %3 = vector.load %arg10[%c272, %c0_2] : memref<288x128xf32, #tpu.memory_space<vmem>>, vector<16x128xf32>
    tpu.vector_store %arg10[%c272, %c0_2], %2 {strides = array<i32>} : memref<288x128xf32, #tpu.memory_space<vmem>>, vector<16x128xf32>,
    %cst_3 = arith.constant 0.000000e+00 : f32
    %4 = vector.broadcast %cst_3 : f32 to vector<16x128xf32>
    %c0_4 = arith.constant 0 : index
    %c0_5 = arith.constant 0 : index
    %5 = vector.load %arg11[%c0_4, %c0_5] : memref<288x128xf32, #tpu.memory_space<vmem>>, vector<16x128xf32>
    tpu.vector_store %arg11[%c0_4, %c0_5], %4 {strides = array<i32>} : memref<288x128xf32, #tpu.memory_space<vmem>>, vector<16x128xf32>,
    %cst_6 = arith.constant 0.000000e+00 : f32
    %6 = vector.broadcast %cst_6 : f32 to vector<16x128xf32>
    %c272_7 = arith.constant 272 : index
    %c0_8 = arith.constant 0 : index
    %7 = vector.load %arg11[%c272_7, %c0_8] : memref<288x128xf32, #tpu.memory_space<vmem>>, vector<16x128xf32>
    tpu.vector_store %arg11[%c272_7, %c0_8], %6 {strides = array<i32>} : memref<288x128xf32, #tpu.memory_space<vmem>>, vector<16x128xf32>,
    %cst_9 = arith.constant 0.000000e+00 : f32
    %8 = vector.broadcast %cst_9 : f32 to vector<256x116xf32>
    %c16 = arith.constant 16 : index
    %c12 = arith.constant 12 : index
    %9 = vector.load %arg10[%c16, %c12] : memref<288x128xf32, #tpu.memory_space<vmem>>, vector<256x116xf32>
    tpu.vector_store %arg10[%c16, %c12], %8 {strides = array<i32>} : memref<288x128xf32, #tpu.memory_space<vmem>>, vector<256x116xf32>,
    %c0_10 = arith.constant 0 : index
    %c0_11 = arith.constant 0 : index
    %10 = vector.load %arg3[%c0_10, %c0_11] : memref<16x8xf32, #tpu.memory_space<vmem>>, vector<16x8xf32>
    %c0_12 = arith.constant 0 : index
    %c0_13 = arith.constant 0 : index
    %c0_14 = arith.constant 0 : index
    %11 = vector.load %arg1[%c0_12, %c0_13, %c0_14] : memref<1x8x64xbf16, #tpu.memory_space<vmem>>, vector<1x8x64xbf16>
    %12 = vector.shape_cast %11 : vector<1x8x64xbf16> to vector<8x64xbf16>
    %13 = arith.extf %12 : vector<8x64xbf16> to vector<8x64xf32>
    %cst_15 = arith.constant dense<0.000000e+00> : vector<16x64xf32>
    %14 = tpu.matmul %10, %13, %cst_15 {dimension_numbers = #tpu.dot_dimension_numbers<[1], [0], [0], [1], [0, 0, 1, 1], [], []>} : vector<16x8xf32>, vector<8x64xf32>, vector<16x64xf32> -> vector<16x64xf32>
    %15 = vector.extract_strided_slice %14 {offsets = [0, 0], sizes = [16, 8], strides = [1, 1]} : vector<16x64xf32> to vector<16x8xf32>
    %cst_16 = arith.constant 1.000000e+00 : f32
    %16 = vector.broadcast %cst_16 : f32 to vector<16x8xf32>
    %17 = arith.mulf %16, %15 : vector<16x8xf32>
    %18 = vector.extract_strided_slice %14 {offsets = [0, 8], sizes = [16, 8], strides = [1, 1]} : vector<16x64xf32> to vector<16x8xf32>
    %cst_17 = arith.constant 0.000000e+00 : f32
    %19 = vector.broadcast %cst_17 : f32 to vector<16x8xf32>
    %20 = arith.mulf %19, %18 : vector<16x8xf32>
    %21 = arith.addf %17, %20 : vector<16x8xf32>
    %c16_18 = arith.constant 16 : index
    %c0_19 = arith.constant 0 : index
    %22 = vector.load %arg10[%c16_18, %c0_19] : memref<288x128xf32, #tpu.memory_space<vmem>>, vector<16x8xf32>
    tpu.vector_store %arg10[%c16_18, %c0_19], %21 {strides = array<i32>} : memref<288x128xf32, #tpu.memory_space<vmem>>, vector<16x8xf32>,
    %23 = vector.extract_strided_slice %14 {offsets = [0, 0], sizes = [16, 8], strides = [1, 1]} : vector<16x64xf32> to vector<16x8xf32>
    %cst_20 = arith.constant 0.533333361 : f32
    %24 = vector.broadcast %cst_20 : f32 to vector<16x8xf32>
    %25 = arith.mulf %24, %23 : vector<16x8xf32>
    %26 = vector.extract_strided_slice %14 {offsets = [0, 8], sizes = [16, 8], strides = [1, 1]} : vector<16x64xf32> to vector<16x8xf32>
    %cst_21 = arith.constant 0.466666669 : f32
    %27 = vector.broadcast %cst_21 : f32 to vector<16x8xf32>
    %28 = arith.mulf %27, %26 : vector<16x8xf32>
    %29 = arith.addf %25, %28 : vector<16x8xf32>
    %c32 = arith.constant 32 : index
    %c0_22 = arith.constant 0 : index
    %30 = vector.load %arg10[%c32, %c0_22] : memref<288x128xf32, #tpu.memory_space<vmem>>, vector<16x8xf32>
    tpu.vector_store %arg10[%c32, %c0_22], %29 {strides = array<i32>} : memref<288x128xf32, #tpu.memory_space<vmem>>, vector<16x8xf32>,
    %31 = vector.extract_strided_slice %14 {offsets = [0, 0], sizes = [16, 8], strides = [1, 1]} : vector<16x64xf32> to vector<16x8xf32>
    %cst_23 = arith.constant 0.0666666701 : f32
    %32 = vector.broadcast %cst_23 : f32 to vector<16x8xf32>
    %33 = arith.mulf %32, %31 : vector<16x8xf32>
    %34 = vector.extract_strided_slice %14 {offsets = [0, 8], sizes = [16, 8], strides = [1, 1]} : vector<16x64xf32> to vector<16x8xf32>
    %cst_24 = arith.constant 0.933333337 : f32
    %35 = vector.broadcast %cst_24 : f32 to vector<16x8xf32>
    %36 = arith.mulf %35, %34 : vector<16x8xf32>
    %37 = arith.addf %33, %36 : vector<16x8xf32>
    %c48 = arith.constant 48 : index
    %c0_25 = arith.constant 0 : index
    %38 = vector.load %arg10[%c48, %c0_25] : memref<288x128xf32, #tpu.memory_space<vmem>>, vector<16x8xf32>
    tpu.vector_store %arg10[%c48, %c0_25], %37 {strides = array<i32>} : memref<288x128xf32, #tpu.memory_space<vmem>>, vector<16x8xf32>,
    %39 = vector.extract_strided_slice %14 {offsets = [0, 8], sizes = [16, 8], strides = [1, 1]} : vector<16x64xf32> to vector<16x8xf32>
    %cst_26 = arith.constant 6.000000e-01 : f32
    %40 = vector.broadcast %cst_26 : f32 to vector<16x8xf32>
    %41 = arith.mulf %40, %39 : vector<16x8xf32>
    %42 = vector.extract_strided_slice %14 {offsets = [0, 16], sizes = [16, 8], strides = [1, 1]} : vector<16x64xf32> to vector<16x8xf32>
    %cst_27 = arith.constant 4.000000e-01 : f32
    %43 = vector.broadcast %cst_27 : f32 to vector<16x8xf32>
    %44 = arith.mulf %43, %42 : vector<16x8xf32>
    %45 = arith.addf %41, %44 : vector<16x8xf32>
    %c64 = arith.constant 64 : index
    %c0_28 = arith.constant 0 : index
    %46 = vector.load %arg10[%c64, %c0_28] : memref<288x128xf32, #tpu.memory_space<vmem>>, vector<16x8xf32>
    tpu.vector_store %arg10[%c64, %c0_28], %45 {strides = array<i32>} : memref<288x128xf32, #tpu.memory_space<vmem>>, vector<16x8xf32>,
    %47 = vector.extract_strided_slice %14 {offsets = [0, 8], sizes = [16, 8], strides = [1, 1]} : vector<16x64xf32> to vector<16x8xf32>
    %cst_29 = arith.constant 0.13333334 : f32
    %48 = vector.broadcast %cst_29 : f32 to vector<16x8xf32>
    %49 = arith.mulf %48, %47 : vector<16x8xf32>
    %50 = vector.extract_strided_slice %14 {offsets = [0, 16], sizes = [16, 8], strides = [1, 1]} : vector<16x64xf32> to vector<16x8xf32>
    %cst_30 = arith.constant 0.866666674 : f32
    %51 = vector.broadcast %cst_30 : f32 to vector<16x8xf32>
    %52 = arith.mulf %51, %50 : vector<16x8xf32>
    %53 = arith.addf %49, %52 : vector<16x8xf32>
    %c80 = arith.constant 80 : index
    %c0_31 = arith.constant 0 : index
    %54 = vector.load %arg10[%c80, %c0_31] : memref<288x128xf32, #tpu.memory_space<vmem>>, vector<16x8xf32>
    tpu.vector_store %arg10[%c80, %c0_31], %53 {strides = array<i32>} : memref<288x128xf32, #tpu.memory_space<vmem>>, vector<16x8xf32>,
    %55 = vector.extract_strided_slice %14 {offsets = [0, 16], sizes = [16, 8], strides = [1, 1]} : vector<16x64xf32> to vector<16x8xf32>
    %cst_32 = arith.constant 0.666666686 : f32
    %56 = vector.broadcast %cst_32 : f32 to vector<16x8xf32>
    %57 = arith.mulf %56, %55 : vector<16x8xf32>
    %58 = vector.extract_strided_slice %14 {offsets = [0, 24], sizes = [16, 8], strides = [1, 1]} : vector<16x64xf32> to vector<16x8xf32>
    %cst_33 = arith.constant 0.333333343 : f32
    %59 = vector.broadcast %cst_33 : f32 to vector<16x8xf32>
    %60 = arith.mulf %59, %58 : vector<16x8xf32>
    %61 = arith.addf %57, %60 : vector<16x8xf32>
    %c96 = arith.constant 96 : index
    %c0_34 = arith.constant 0 : index
    %62 = vector.load %arg10[%c96, %c0_34] : memref<288x128xf32, #tpu.memory_space<vmem>>, vector<16x8xf32>
    tpu.vector_store %arg10[%c96, %c0_34], %61 {strides = array<i32>} : memref<288x128xf32, #tpu.memory_space<vmem>>, vector<16x8xf32>,
    %63 = vector.extract_strided_slice %14 {offsets = [0, 16], sizes = [16, 8], strides = [1, 1]} : vector<16x64xf32> to vector<16x8xf32>
    %cst_35 = arith.constant 2.000000e-01 : f32
    %64 = vector.broadcast %cst_35 : f32 to vector<16x8xf32>
    %65 = arith.mulf %64, %63 : vector<16x8xf32>
    %66 = vector.extract_strided_slice %14 {offsets = [0, 24], sizes = [16, 8], strides = [1, 1]} : vector<16x64xf32> to vector<16x8xf32>
    %cst_36 = arith.constant 8.000000e-01 : f32
    %67 = vector.broadcast %cst_36 : f32 to vector<16x8xf32>
    %68 = arith.mulf %67, %66 : vector<16x8xf32>
    %69 = arith.addf %65, %68 : vector<16x8xf32>
    %c112 = arith.constant 112 : index
    %c0_37 = arith.constant 0 : index
    %70 = vector.load %arg10[%c112, %c0_37] : memref<288x128xf32, #tpu.memory_space<vmem>>, vector<16x8xf32>
    tpu.vector_store %arg10[%c112, %c0_37], %69 {strides = array<i32>} : memref<288x128xf32, #tpu.memory_space<vmem>>, vector<16x8xf32>,
    %71 = vector.extract_strided_slice %14 {offsets = [0, 24], sizes = [16, 8], strides = [1, 1]} : vector<16x64xf32> to vector<16x8xf32>
    %cst_38 = arith.constant 0.733333349 : f32
    %72 = vector.broadcast %cst_38 : f32 to vector<16x8xf32>
    %73 = arith.mulf %72, %71 : vector<16x8xf32>
    %74 = vector.extract_strided_slice %14 {offsets = [0, 32], sizes = [16, 8], strides = [1, 1]} : vector<16x64xf32> to vector<16x8xf32>
    %cst_39 = arith.constant 0.266666681 : f32
    %75 = vector.broadcast %cst_39 : f32 to vector<16x8xf32>
    %76 = arith.mulf %75, %74 : vector<16x8xf32>
    %77 = arith.addf %73, %76 : vector<16x8xf32>
    %c128 = arith.constant 128 : index
    %c0_40 = arith.constant 0 : index
    %78 = vector.load %arg10[%c128, %c0_40] : memref<288x128xf32, #tpu.memory_space<vmem>>, vector<16x8xf32>
    tpu.vector_store %arg10[%c128, %c0_40], %77 {strides = array<i32>} : memref<288x128xf32, #tpu.memory_space<vmem>>, vector<16x8xf32>,
    %79 = vector.extract_strided_slice %14 {offsets = [0, 24], sizes = [16, 8], strides = [1, 1]} : vector<16x64xf32> to vector<16x8xf32>
    %cst_41 = arith.constant 0.266666681 : f32
    %80 = vector.broadcast %cst_41 : f32 to vector<16x8xf32>
    %81 = arith.mulf %80, %79 : vector<16x8xf32>
    %82 = vector.extract_strided_slice %14 {offsets = [0, 32], sizes = [16, 8], strides = [1, 1]} : vector<16x64xf32> to vector<16x8xf32>
    %cst_42 = arith.constant 0.733333349 : f32
    %83 = vector.broadcast %cst_42 : f32 to vector<16x8xf32>
    %84 = arith.mulf %83, %82 : vector<16x8xf32>
    %85 = arith.addf %81, %84 : vector<16x8xf32>
    %c144 = arith.constant 144 : index
    %c0_43 = arith.constant 0 : index
    %86 = vector.load %arg10[%c144, %c0_43] : memref<288x128xf32, #tpu.memory_space<vmem>>, vector<16x8xf32>
    tpu.vector_store %arg10[%c144, %c0_43], %85 {strides = array<i32>} : memref<288x128xf32, #tpu.memory_space<vmem>>, vector<16x8xf32>,
    %87 = vector.extract_strided_slice %14 {offsets = [0, 32], sizes = [16, 8], strides = [1, 1]} : vector<16x64xf32> to vector<16x8xf32>
    %cst_44 = arith.constant 8.000000e-01 : f32
    %88 = vector.broadcast %cst_44 : f32 to vector<16x8xf32>
    %89 = arith.mulf %88, %87 : vector<16x8xf32>
    %90 = vector.extract_strided_slice %14 {offsets = [0, 40], sizes = [16, 8], strides = [1, 1]} : vector<16x64xf32> to vector<16x8xf32>
    %cst_45 = arith.constant 2.000000e-01 : f32
    %91 = vector.broadcast %cst_45 : f32 to vector<16x8xf32>
    %92 = arith.mulf %91, %90 : vector<16x8xf32>
    %93 = arith.addf %89, %92 : vector<16x8xf32>
    %c160 = arith.constant 160 : index
    %c0_46 = arith.constant 0 : index
    %94 = vector.load %arg10[%c160, %c0_46] : memref<288x128xf32, #tpu.memory_space<vmem>>, vector<16x8xf32>
    tpu.vector_store %arg10[%c160, %c0_46], %93 {strides = array<i32>} : memref<288x128xf32, #tpu.memory_space<vmem>>, vector<16x8xf32>,
    %95 = vector.extract_strided_slice %14 {offsets = [0, 32], sizes = [16, 8], strides = [1, 1]} : vector<16x64xf32> to vector<16x8xf32>
    %cst_47 = arith.constant 0.333333343 : f32
    %96 = vector.broadcast %cst_47 : f32 to vector<16x8xf32>
    %97 = arith.mulf %96, %95 : vector<16x8xf32>
    %98 = vector.extract_strided_slice %14 {offsets = [0, 40], sizes = [16, 8], strides = [1, 1]} : vector<16x64xf32> to vector<16x8xf32>
    %cst_48 = arith.constant 0.666666686 : f32
    %99 = vector.broadcast %cst_48 : f32 to vector<16x8xf32>
    %100 = arith.mulf %99, %98 : vector<16x8xf32>
    %101 = arith.addf %97, %100 : vector<16x8xf32>
    %c176 = arith.constant 176 : index
    %c0_49 = arith.constant 0 : index
    %102 = vector.load %arg10[%c176, %c0_49] : memref<288x128xf32, #tpu.memory_space<vmem>>, vector<16x8xf32>
    tpu.vector_store %arg10[%c176, %c0_49], %101 {strides = array<i32>} : memref<288x128xf32, #tpu.memory_space<vmem>>, vector<16x8xf32>,
    %103 = vector.extract_strided_slice %14 {offsets = [0, 40], sizes = [16, 8], strides = [1, 1]} : vector<16x64xf32> to vector<16x8xf32>
    %cst_50 = arith.constant 0.866666674 : f32
    %104 = vector.broadcast %cst_50 : f32 to vector<16x8xf32>
    %105 = arith.mulf %104, %103 : vector<16x8xf32>
    %106 = vector.extract_strided_slice %14 {offsets = [0, 48], sizes = [16, 8], strides = [1, 1]} : vector<16x64xf32> to vector<16x8xf32>
    %cst_51 = arith.constant 0.13333334 : f32
    %107 = vector.broadcast %cst_51 : f32 to vector<16x8xf32>
    %108 = arith.mulf %107, %106 : vector<16x8xf32>
    %109 = arith.addf %105, %108 : vector<16x8xf32>
    %c192 = arith.constant 192 : index
    %c0_52 = arith.constant 0 : index
    %110 = vector.load %arg10[%c192, %c0_52] : memref<288x128xf32, #tpu.memory_space<vmem>>, vector<16x8xf32>
    tpu.vector_store %arg10[%c192, %c0_52], %109 {strides = array<i32>} : memref<288x128xf32, #tpu.memory_space<vmem>>, vector<16x8xf32>,
    %111 = vector.extract_strided_slice %14 {offsets = [0, 40], sizes = [16, 8], strides = [1, 1]} : vector<16x64xf32> to vector<16x8xf32>
    %cst_53 = arith.constant 4.000000e-01 : f32
    %112 = vector.broadcast %cst_53 : f32 to vector<16x8xf32>
    %113 = arith.mulf %112, %111 : vector<16x8xf32>
    %114 = vector.extract_strided_slice %14 {offsets = [0, 48], sizes = [16, 8], strides = [1, 1]} : vector<16x64xf32> to vector<16x8xf32>
    %cst_54 = arith.constant 6.000000e-01 : f32
    %115 = vector.broadcast %cst_54 : f32 to vector<16x8xf32>
    %116 = arith.mulf %115, %114 : vector<16x8xf32>
    %117 = arith.addf %113, %116 : vector<16x8xf32>
    %c208 = arith.constant 208 : index
    %c0_55 = arith.constant 0 : index
    %118 = vector.load %arg10[%c208, %c0_55] : memref<288x128xf32, #tpu.memory_space<vmem>>, vector<16x8xf32>
    tpu.vector_store %arg10[%c208, %c0_55], %117 {strides = array<i32>} : memref<288x128xf32, #tpu.memory_space<vmem>>, vector<16x8xf32>,
    %119 = vector.extract_strided_slice %14 {offsets = [0, 48], sizes = [16, 8], strides = [1, 1]} : vector<16x64xf32> to vector<16x8xf32>
    %cst_56 = arith.constant 0.933333337 : f32
    %120 = vector.broadcast %cst_56 : f32 to vector<16x8xf32>
    %121 = arith.mulf %120, %119 : vector<16x8xf32>
    %122 = vector.extract_strided_slice %14 {offsets = [0, 56], sizes = [16, 8], strides = [1, 1]} : vector<16x64xf32> to vector<16x8xf32>
    %cst_57 = arith.constant 0.0666666701 : f32
    %123 = vector.broadcast %cst_57 : f32 to vector<16x8xf32>
    %124 = arith.mulf %123, %122 : vector<16x8xf32>
    %125 = arith.addf %121, %124 : vector<16x8xf32>
    %c224 = arith.constant 224 : index
    %c0_58 = arith.constant 0 : index
    %126 = vector.load %arg10[%c224, %c0_58] : memref<288x128xf32, #tpu.memory_space<vmem>>, vector<16x8xf32>
    tpu.vector_store %arg10[%c224, %c0_58], %125 {strides = array<i32>} : memref<288x128xf32, #tpu.memory_space<vmem>>, vector<16x8xf32>,
    %127 = vector.extract_strided_slice %14 {offsets = [0, 48], sizes = [16, 8], strides = [1, 1]} : vector<16x64xf32> to vector<16x8xf32>
    %cst_59 = arith.constant 0.466666669 : f32
    %128 = vector.broadcast %cst_59 : f32 to vector<16x8xf32>
    %129 = arith.mulf %128, %127 : vector<16x8xf32>
    %130 = vector.extract_strided_slice %14 {offsets = [0, 56], sizes = [16, 8], strides = [1, 1]} : vector<16x64xf32> to vector<16x8xf32>
    %cst_60 = arith.constant 0.533333361 : f32
    %131 = vector.broadcast %cst_60 : f32 to vector<16x8xf32>
    %132 = arith.mulf %131, %130 : vector<16x8xf32>
    %133 = arith.addf %129, %132 : vector<16x8xf32>
    %c240 = arith.constant 240 : index
    %c0_61 = arith.constant 0 : index
    %134 = vector.load %arg10[%c240, %c0_61] : memref<288x128xf32, #tpu.memory_space<vmem>>, vector<16x8xf32>
    tpu.vector_store %arg10[%c240, %c0_61], %133 {strides = array<i32>} : memref<288x128xf32, #tpu.memory_space<vmem>>, vector<16x8xf32>,
    %135 = vector.extract_strided_slice %14 {offsets = [0, 56], sizes = [16, 8], strides = [1, 1]} : vector<16x64xf32> to vector<16x8xf32>
    %cst_62 = arith.constant 1.000000e+00 : f32
    %136 = vector.broadcast %cst_62 : f32 to vector<16x8xf32>
    %137 = arith.mulf %136, %135 : vector<16x8xf32>
    %138 = vector.extract_strided_slice %14 {offsets = [0, 56], sizes = [16, 8], strides = [1, 1]} : vector<16x64xf32> to vector<16x8xf32>
    %cst_63 = arith.constant 0.000000e+00 : f32
    %139 = vector.broadcast %cst_63 : f32 to vector<16x8xf32>
    %140 = arith.mulf %139, %138 : vector<16x8xf32>
    %141 = arith.addf %137, %140 : vector<16x8xf32>
    %c256 = arith.constant 256 : index
    %c0_64 = arith.constant 0 : index
    %142 = vector.load %arg10[%c256, %c0_64] : memref<288x128xf32, #tpu.memory_space<vmem>>, vector<16x8xf32>
    tpu.vector_store %arg10[%c256, %c0_64], %141 {strides = array<i32>} : memref<288x128xf32, #tpu.memory_space<vmem>>, vector<16x8xf32>,
    %c0_65 = arith.constant 0 : index
    %c0_66 = arith.constant 0 : index
    %c0_67 = arith.constant 0 : index
    %143 = vector.load %arg2[%c0_65, %c0_66, %c0_67] : memref<1x256x4xbf16, #tpu.memory_space<vmem>>, vector<1x256x4xbf16>
    %144 = vector.shape_cast %143 : vector<1x256x4xbf16> to vector<256x4xbf16>
    %145 = arith.extf %144 : vector<256x4xbf16> to vector<256x4xf32>
    %c16_68 = arith.constant 16 : index
    %c8 = arith.constant 8 : index
    %146 = vector.load %arg10[%c16_68, %c8] : memref<288x128xf32, #tpu.memory_space<vmem>>, vector<256x4xf32>
    tpu.vector_store %arg10[%c16_68, %c8], %145 {strides = array<i32>} : memref<288x128xf32, #tpu.memory_space<vmem>>, vector<256x4xf32>,
    %c16_69 = arith.constant 16 : index
    %c0_70 = arith.constant 0 : index
    %147 = vector.load %arg10[%c16_69, %c0_70] : memref<288x128xf32, #tpu.memory_space<vmem>>, vector<256x128xf32>
    %c0_71 = arith.constant 0 : index
    %c0_72 = arith.constant 0 : index
    %148 = vector.load %arg7[%c0_71, %c0_72] : memref<128x128xf32, #tpu.memory_space<vmem>>, vector<128x128xf32>
    %cst_73 = arith.constant dense<0.000000e+00> : vector<256x128xf32>
    %149 = tpu.matmul %147, %148, %cst_73 {dimension_numbers = #tpu.dot_dimension_numbers<[1], [0], [0], [1], [0, 0, 1, 1], [], []>} : vector<256x128xf32>, vector<128x128xf32>, vector<256x128xf32> -> vector<256x128xf32>
    %c0_74 = arith.constant 0 : index
    %c0_75 = arith.constant 0 : index
    %c0_76 = arith.constant 0 : index
    %150 = vector.load %arg9[%c0_74, %c0_75, %c0_76] : memref<1x256x128xf32, #tpu.memory_space<vmem>>, vector<1x256x128xf32>
    %151 = vector.shape_cast %150 : vector<1x256x128xf32> to vector<256x128xf32>
    %152 = vector.shape_cast %149 : vector<256x128xf32> to vector<1x256x128xf32>
    tpu.vector_store %arg9[%c0_74, %c0_75, %c0_76], %152 {strides = array<i32>} : memref<1x256x128xf32, #tpu.memory_space<vmem>>, vector<1x256x128xf32>,
    %c16_77 = arith.constant 16 : index
    %c0_78 = arith.constant 0 : index
    %153 = vector.load %arg10[%c16_77, %c0_78] : memref<288x128xf32, #tpu.memory_space<vmem>>, vector<256x128xf32>
    %c0_79 = arith.constant 0 : index
    %c0_80 = arith.constant 0 : index
    %154 = vector.load %arg4[%c0_79, %c0_80] : memref<2x128xf32, #tpu.memory_space<vmem>>, vector<1x128xf32>
    %155 = vector.broadcast %154 : vector<1x128xf32> to vector<256x128xf32>
    %156 = arith.mulf %153, %155 : vector<256x128xf32>
    %c1 = arith.constant 1 : index
    %c0_81 = arith.constant 0 : index
    %157 = vector.load %arg4[%c1, %c0_81] : memref<2x128xf32, #tpu.memory_space<vmem>>, vector<1x128xf32>
    %158 = vector.broadcast %157 : vector<1x128xf32> to vector<256x128xf32>
    %159 = arith.addf %156, %158 : vector<256x128xf32>
    %cst_82 = arith.constant 0.000000e+00 : f32
    %160 = vector.broadcast %cst_82 : f32 to vector<256x128xf32>
    %161 = arith.maximumf %159, %160 : vector<256x128xf32>
    %c16_83 = arith.constant 16 : index
    %c0_84 = arith.constant 0 : index
    %162 = vector.load %arg10[%c16_83, %c0_84] : memref<288x128xf32, #tpu.memory_space<vmem>>, vector<256x128xf32>
    tpu.vector_store %arg10[%c16_83, %c0_84], %161 {strides = array<i32>} : memref<288x128xf32, #tpu.memory_space<vmem>>, vector<256x128xf32>,
    %163 = tpu.iota {dimensions = array<i32: 0>} : vector<128x128xi32>
    %c16_i32 = arith.constant 16 : i32
    %c0_i32 = arith.constant 0 : i32
    %164 = arith.cmpi eq, %c16_i32, %c0_i32 : i32
    %c1_i32 = arith.constant 1 : i32
    %165 = arith.select %164, %c1_i32, %c16_i32 : i32
    %166 = vector.broadcast %165 : i32 to vector<128x128xi32>
    %167 = arith.remsi %163, %166 : vector<128x128xi32>
    %c0_i32_85 = arith.constant 0 : i32
    %168 = vector.broadcast %c0_i32_85 : i32 to vector<128x128xi32>
    %169 = arith.cmpi ne, %167, %168 : vector<128x128xi32>
    %c0_i32_86 = arith.constant 0 : i32
    %170 = vector.broadcast %c0_i32_86 : i32 to vector<128x128xi32>
    %171 = arith.cmpi slt, %167, %170 : vector<128x128xi32>
    %c0_i32_87 = arith.constant 0 : i32
    %172 = arith.cmpi slt, %165, %c0_i32_87 : i32
    %173 = vector.broadcast %172 : i1 to vector<128x128xi1>
    %174 = vector.broadcast %173 : vector<128x128xi1> to vector<128x128xi1>
    %175 = arith.xori %171, %174 : vector<128x128xi1>
    %176 = arith.andi %175, %169 : vector<128x128xi1>
    %177 = vector.broadcast %165 : i32 to vector<128x128xi32>
    %178 = arith.addi %167, %177 : vector<128x128xi32>
    %179 = arith.select %176, %178, %167 : vector<128x128xi1>, vector<128x128xi32>
    %c0_i32_88 = arith.constant 0 : i32
    %180 = vector.broadcast %c0_i32_88 : i32 to vector<128x128xi32>
    %181 = arith.cmpi ne, %179, %180 : vector<128x128xi32>
    %182 = arith.extui %181 : vector<128x128xi1> to vector<128x128xi32>
    %183 = arith.sitofp %182 : vector<128x128xi32> to vector<128x128xf32>
    %c15_i32 = arith.constant 15 : i32
    %184 = vector.broadcast %c15_i32 : i32 to vector<128x128xi32>
    %185 = arith.cmpi ne, %179, %184 : vector<128x128xi32>
    %186 = arith.extui %185 : vector<128x128xi1> to vector<128x128xi32>
    %187 = arith.sitofp %186 : vector<128x128xi32> to vector<128x128xf32>
    %c0_89 = arith.constant 0 : index
    %c0_90 = arith.constant 0 : index
    %188 = vector.load %arg10[%c0_89, %c0_90] : memref<288x128xf32, #tpu.memory_space<vmem>>, vector<128x128xf32>
    %c1_i32_91 = arith.constant 1 : i32
    %189 = tpu.dynamic_rotate %188 by %c1_i32_91 dim 0 : vector<128x128xf32>, i32 -> vector<128x128xf32>
    %190 = arith.mulf %189, %183 : vector<128x128xf32>
    %c127_i32 = arith.constant 127 : i32
    %191 = tpu.dynamic_rotate %188 by %c127_i32 dim 0 : vector<128x128xf32>, i32 -> vector<128x128xf32>
    %192 = arith.mulf %191, %187 : vector<128x128xf32>
    %193 = tpu.concatenate %190, %188, %192 in 1 : vector<128x128xf32>, vector<128x128xf32>, vector<128x128xf32> -> vector<128x384xf32>
    %c0_92 = arith.constant 0 : index
    %c0_93 = arith.constant 0 : index
    %c0_94 = arith.constant 0 : index
    %194 = vector.load %arg5[%c0_92, %c0_93, %c0_94] : memref<3x384x128xf32, #tpu.memory_space<vmem>>, vector<1x384x128xf32>
    %195 = vector.shape_cast %194 : vector<1x384x128xf32> to vector<384x128xf32>
    %cst_95 = arith.constant dense<0.000000e+00> : vector<128x128xf32>
    %196 = tpu.matmul %193, %195, %cst_95 {dimension_numbers = #tpu.dot_dimension_numbers<[1], [0], [0], [1], [0, 0, 1, 1], [], []>} : vector<128x384xf32>, vector<384x128xf32>, vector<128x128xf32> -> vector<128x128xf32>
    %c16_96 = arith.constant 16 : index
    %c0_97 = arith.constant 0 : index
    %197 = vector.load %arg10[%c16_96, %c0_97] : memref<288x128xf32, #tpu.memory_space<vmem>>, vector<128x128xf32>
    %c1_i32_98 = arith.constant 1 : i32
    %198 = tpu.dynamic_rotate %197 by %c1_i32_98 dim 0 : vector<128x128xf32>, i32 -> vector<128x128xf32>
    %199 = arith.mulf %198, %183 : vector<128x128xf32>
    %c127_i32_99 = arith.constant 127 : i32
    %200 = tpu.dynamic_rotate %197 by %c127_i32_99 dim 0 : vector<128x128xf32>, i32 -> vector<128x128xf32>
    %201 = arith.mulf %200, %187 : vector<128x128xf32>
    %202 = tpu.concatenate %199, %197, %201 in 1 : vector<128x128xf32>, vector<128x128xf32>, vector<128x128xf32> -> vector<128x384xf32>
    %c1_100 = arith.constant 1 : index
    %c0_101 = arith.constant 0 : index
    %c0_102 = arith.constant 0 : index
    %203 = vector.load %arg5[%c1_100, %c0_101, %c0_102] : memref<3x384x128xf32, #tpu.memory_space<vmem>>, vector<1x384x128xf32>
    %204 = vector.shape_cast %203 : vector<1x384x128xf32> to vector<384x128xf32>
    %cst_103 = arith.constant dense<0.000000e+00> : vector<128x128xf32>
    %205 = tpu.matmul %202, %204, %cst_103 {dimension_numbers = #tpu.dot_dimension_numbers<[1], [0], [0], [1], [0, 0, 1, 1], [], []>} : vector<128x384xf32>, vector<384x128xf32>, vector<128x128xf32> -> vector<128x128xf32>
    %206 = arith.addf %196, %205 : vector<128x128xf32>
    %c32_104 = arith.constant 32 : index
    %c0_105 = arith.constant 0 : index
    %207 = vector.load %arg10[%c32_104, %c0_105] : memref<288x128xf32, #tpu.memory_space<vmem>>, vector<128x128xf32>
    %c1_i32_106 = arith.constant 1 : i32
    %208 = tpu.dynamic_rotate %207 by %c1_i32_106 dim 0 : vector<128x128xf32>, i32 -> vector<128x128xf32>
    %209 = arith.mulf %208, %183 : vector<128x128xf32>
    %c127_i32_107 = arith.constant 127 : i32
    %210 = tpu.dynamic_rotate %207 by %c127_i32_107 dim 0 : vector<128x128xf32>, i32 -> vector<128x128xf32>
    %211 = arith.mulf %210, %187 : vector<128x128xf32>
    %212 = tpu.concatenate %209, %207, %211 in 1 : vector<128x128xf32>, vector<128x128xf32>, vector<128x128xf32> -> vector<128x384xf32>
    %c2 = arith.constant 2 : index
    %c0_108 = arith.constant 0 : index
    %c0_109 = arith.constant 0 : index
    %213 = vector.load %arg5[%c2, %c0_108, %c0_109] : memref<3x384x128xf32, #tpu.memory_space<vmem>>, vector<1x384x128xf32>
    %214 = vector.shape_cast %213 : vector<1x384x128xf32> to vector<384x128xf32>
    %cst_110 = arith.constant dense<0.000000e+00> : vector<128x128xf32>
    %215 = tpu.matmul %212, %214, %cst_110 {dimension_numbers = #tpu.dot_dimension_numbers<[1], [0], [0], [1], [0, 0, 1, 1], [], []>} : vector<128x384xf32>, vector<384x128xf32>, vector<128x128xf32> -> vector<128x128xf32>
    %216 = arith.addf %206, %215 : vector<128x128xf32>
    %c0_111 = arith.constant 0 : index
    %c0_112 = arith.constant 0 : index
    %217 = vector.load %arg8[%c0_111, %c0_112] : memref<3x128xf32, #tpu.memory_space<vmem>>, vector<1x128xf32>
    %218 = vector.broadcast %217 : vector<1x128xf32> to vector<128x128xf32>
    %219 = arith.mulf %216, %218 : vector<128x128xf32>
    %c1_113 = arith.constant 1 : index
    %c0_114 = arith.constant 0 : index
    %220 = vector.load %arg8[%c1_113, %c0_114] : memref<3x128xf32, #tpu.memory_space<vmem>>, vector<1x128xf32>
    %221 = vector.broadcast %220 : vector<1x128xf32> to vector<128x128xf32>
    %222 = arith.addf %219, %221 : vector<128x128xf32>
    %cst_115 = arith.constant 0.000000e+00 : f32
    %223 = vector.broadcast %cst_115 : f32 to vector<128x128xf32>
    %224 = arith.maximumf %222, %223 : vector<128x128xf32>
    %c16_116 = arith.constant 16 : index
    %c0_117 = arith.constant 0 : index
    %225 = vector.load %arg11[%c16_116, %c0_117] : memref<288x128xf32, #tpu.memory_space<vmem>>, vector<128x128xf32>
    tpu.vector_store %arg11[%c16_116, %c0_117], %224 {strides = array<i32>} : memref<288x128xf32, #tpu.memory_space<vmem>>, vector<128x128xf32>,
    %226 = tpu.iota {dimensions = array<i32: 0>} : vector<128x128xi32>
    %c16_i32_118 = arith.constant 16 : i32
    %c0_i32_119 = arith.constant 0 : i32
    %227 = arith.cmpi eq, %c16_i32_118, %c0_i32_119 : i32
    %c1_i32_120 = arith.constant 1 : i32
    %228 = arith.select %227, %c1_i32_120, %c16_i32_118 : i32
    %229 = vector.broadcast %228 : i32 to vector<128x128xi32>
    %230 = arith.remsi %226, %229 : vector<128x128xi32>
    %c0_i32_121 = arith.constant 0 : i32
    %231 = vector.broadcast %c0_i32_121 : i32 to vector<128x128xi32>
    %232 = arith.cmpi ne, %230, %231 : vector<128x128xi32>
    %c0_i32_122 = arith.constant 0 : i32
    %233 = vector.broadcast %c0_i32_122 : i32 to vector<128x128xi32>
    %234 = arith.cmpi slt, %230, %233 : vector<128x128xi32>
    %c0_i32_123 = arith.constant 0 : i32
    %235 = arith.cmpi slt, %228, %c0_i32_123 : i32
    %236 = vector.broadcast %235 : i1 to vector<128x128xi1>
    %237 = vector.broadcast %236 : vector<128x128xi1> to vector<128x128xi1>
    %238 = arith.xori %234, %237 : vector<128x128xi1>
    %239 = arith.andi %238, %232 : vector<128x128xi1>
    %240 = vector.broadcast %228 : i32 to vector<128x128xi32>
    %241 = arith.addi %230, %240 : vector<128x128xi32>
    %242 = arith.select %239, %241, %230 : vector<128x128xi1>, vector<128x128xi32>
    %c0_i32_124 = arith.constant 0 : i32
    %243 = vector.broadcast %c0_i32_124 : i32 to vector<128x128xi32>
    %244 = arith.cmpi ne, %242, %243 : vector<128x128xi32>
    %245 = arith.extui %244 : vector<128x128xi1> to vector<128x128xi32>
    %246 = arith.sitofp %245 : vector<128x128xi32> to vector<128x128xf32>
    %c15_i32_125 = arith.constant 15 : i32
    %247 = vector.broadcast %c15_i32_125 : i32 to vector<128x128xi32>
    %248 = arith.cmpi ne, %242, %247 : vector<128x128xi32>
    %249 = arith.extui %248 : vector<128x128xi1> to vector<128x128xi32>
    %250 = arith.sitofp %249 : vector<128x128xi32> to vector<128x128xf32>
    %c128_126 = arith.constant 128 : index
    %c0_127 = arith.constant 0 : index
    %251 = vector.load %arg10[%c128_126, %c0_127] : memref<288x128xf32, #tpu.memory_space<vmem>>, vector<128x128xf32>
    %c1_i32_128 = arith.constant 1 : i32
    %252 = tpu.dynamic_rotate %251 by %c1_i32_128 dim 0 : vector<128x128xf32>, i32 -> vector<128x128xf32>
    %253 = arith.mulf %252, %246 : vector<128x128xf32>
    %c127_i32_129 = arith.constant 127 : i32
    %254 = tpu.dynamic_rotate %251 by %c127_i32_129 dim 0 : vector<128x128xf32>, i32 -> vector<128x128xf32>
    %255 = arith.mulf %254, %250 : vector<128x128xf32>
    %256 = tpu.concatenate %253, %251, %255 in 1 : vector<128x128xf32>, vector<128x128xf32>, vector<128x128xf32> -> vector<128x384xf32>
    %c0_130 = arith.constant 0 : index
    %c0_131 = arith.constant 0 : index
    %c0_132 = arith.constant 0 : index
    %257 = vector.load %arg5[%c0_130, %c0_131, %c0_132] : memref<3x384x128xf32, #tpu.memory_space<vmem>>, vector<1x384x128xf32>
    %258 = vector.shape_cast %257 : vector<1x384x128xf32> to vector<384x128xf32>
    %cst_133 = arith.constant dense<0.000000e+00> : vector<128x128xf32>
    %259 = tpu.matmul %256, %258, %cst_133 {dimension_numbers = #tpu.dot_dimension_numbers<[1], [0], [0], [1], [0, 0, 1, 1], [], []>} : vector<128x384xf32>, vector<384x128xf32>, vector<128x128xf32> -> vector<128x128xf32>
    %c144_134 = arith.constant 144 : index
    %c0_135 = arith.constant 0 : index
    %260 = vector.load %arg10[%c144_134, %c0_135] : memref<288x128xf32, #tpu.memory_space<vmem>>, vector<128x128xf32>
    %c1_i32_136 = arith.constant 1 : i32
    %261 = tpu.dynamic_rotate %260 by %c1_i32_136 dim 0 : vector<128x128xf32>, i32 -> vector<128x128xf32>
    %262 = arith.mulf %261, %246 : vector<128x128xf32>
    %c127_i32_137 = arith.constant 127 : i32
    %263 = tpu.dynamic_rotate %260 by %c127_i32_137 dim 0 : vector<128x128xf32>, i32 -> vector<128x128xf32>
    %264 = arith.mulf %263, %250 : vector<128x128xf32>
    %265 = tpu.concatenate %262, %260, %264 in 1 : vector<128x128xf32>, vector<128x128xf32>, vector<128x128xf32> -> vector<128x384xf32>
    %c1_138 = arith.constant 1 : index
    %c0_139 = arith.constant 0 : index
    %c0_140 = arith.constant 0 : index
    %266 = vector.load %arg5[%c1_138, %c0_139, %c0_140] : memref<3x384x128xf32, #tpu.memory_space<vmem>>, vector<1x384x128xf32>
    %267 = vector.shape_cast %266 : vector<1x384x128xf32> to vector<384x128xf32>
    %cst_141 = arith.constant dense<0.000000e+00> : vector<128x128xf32>
    %268 = tpu.matmul %265, %267, %cst_141 {dimension_numbers = #tpu.dot_dimension_numbers<[1], [0], [0], [1], [0, 0, 1, 1], [], []>} : vector<128x384xf32>, vector<384x128xf32>, vector<128x128xf32> -> vector<128x128xf32>
    %269 = arith.addf %259, %268 : vector<128x128xf32>
    %c160_142 = arith.constant 160 : index
    %c0_143 = arith.constant 0 : index
    %270 = vector.load %arg10[%c160_142, %c0_143] : memref<288x128xf32, #tpu.memory_space<vmem>>, vector<128x128xf32>
    %c1_i32_144 = arith.constant 1 : i32
    %271 = tpu.dynamic_rotate %270 by %c1_i32_144 dim 0 : vector<128x128xf32>, i32 -> vector<128x128xf32>
    %272 = arith.mulf %271, %246 : vector<128x128xf32>
    %c127_i32_145 = arith.constant 127 : i32
    %273 = tpu.dynamic_rotate %270 by %c127_i32_145 dim 0 : vector<128x128xf32>, i32 -> vector<128x128xf32>
    %274 = arith.mulf %273, %250 : vector<128x128xf32>
    %275 = tpu.concatenate %272, %270, %274 in 1 : vector<128x128xf32>, vector<128x128xf32>, vector<128x128xf32> -> vector<128x384xf32>
    %c2_146 = arith.constant 2 : index
    %c0_147 = arith.constant 0 : index
    %c0_148 = arith.constant 0 : index
    %276 = vector.load %arg5[%c2_146, %c0_147, %c0_148] : memref<3x384x128xf32, #tpu.memory_space<vmem>>, vector<1x384x128xf32>
    %277 = vector.shape_cast %276 : vector<1x384x128xf32> to vector<384x128xf32>
    %cst_149 = arith.constant dense<0.000000e+00> : vector<128x128xf32>
    %278 = tpu.matmul %275, %277, %cst_149 {dimension_numbers = #tpu.dot_dimension_numbers<[1], [0], [0], [1], [0, 0, 1, 1], [], []>} : vector<128x384xf32>, vector<384x128xf32>, vector<128x128xf32> -> vector<128x128xf32>
    %279 = arith.addf %269, %278 : vector<128x128xf32>
    %c0_150 = arith.constant 0 : index
    %c0_151 = arith.constant 0 : index
    %280 = vector.load %arg8[%c0_150, %c0_151] : memref<3x128xf32, #tpu.memory_space<vmem>>, vector<1x128xf32>
    %281 = vector.broadcast %280 : vector<1x128xf32> to vector<128x128xf32>
    %282 = arith.mulf %279, %281 : vector<128x128xf32>
    %c1_152 = arith.constant 1 : index
    %c0_153 = arith.constant 0 : index
    %283 = vector.load %arg8[%c1_152, %c0_153] : memref<3x128xf32, #tpu.memory_space<vmem>>, vector<1x128xf32>
    %284 = vector.broadcast %283 : vector<1x128xf32> to vector<128x128xf32>
    %285 = arith.addf %282, %284 : vector<128x128xf32>
    %cst_154 = arith.constant 0.000000e+00 : f32
    %286 = vector.broadcast %cst_154 : f32 to vector<128x128xf32>
    %287 = arith.maximumf %285, %286 : vector<128x128xf32>
    %c144_155 = arith.constant 144 : index
    %c0_156 = arith.constant 0 : index
    %288 = vector.load %arg11[%c144_155, %c0_156] : memref<288x128xf32, #tpu.memory_space<vmem>>, vector<128x128xf32>
    tpu.vector_store %arg11[%c144_155, %c0_156], %287 {strides = array<i32>} : memref<288x128xf32, #tpu.memory_space<vmem>>, vector<128x128xf32>,
    %289 = tpu.iota {dimensions = array<i32: 0>} : vector<128x128xi32>
    %c16_i32_157 = arith.constant 16 : i32
    %c0_i32_158 = arith.constant 0 : i32
    %290 = arith.cmpi eq, %c16_i32_157, %c0_i32_158 : i32
    %c1_i32_159 = arith.constant 1 : i32
    %291 = arith.select %290, %c1_i32_159, %c16_i32_157 : i32
    %292 = vector.broadcast %291 : i32 to vector<128x128xi32>
    %293 = arith.remsi %289, %292 : vector<128x128xi32>
    %c0_i32_160 = arith.constant 0 : i32
    %294 = vector.broadcast %c0_i32_160 : i32 to vector<128x128xi32>
    %295 = arith.cmpi ne, %293, %294 : vector<128x128xi32>
    %c0_i32_161 = arith.constant 0 : i32
    %296 = vector.broadcast %c0_i32_161 : i32 to vector<128x128xi32>
    %297 = arith.cmpi slt, %293, %296 : vector<128x128xi32>
    %c0_i32_162 = arith.constant 0 : i32
    %298 = arith.cmpi slt, %291, %c0_i32_162 : i32
    %299 = vector.broadcast %298 : i1 to vector<128x128xi1>
    %300 = vector.broadcast %299 : vector<128x128xi1> to vector<128x128xi1>
    %301 = arith.xori %297, %300 : vector<128x128xi1>
    %302 = arith.andi %301, %295 : vector<128x128xi1>
    %303 = vector.broadcast %291 : i32 to vector<128x128xi32>
    %304 = arith.addi %293, %303 : vector<128x128xi32>
    %305 = arith.select %302, %304, %293 : vector<128x128xi1>, vector<128x128xi32>
    %c0_i32_163 = arith.constant 0 : i32
    %306 = vector.broadcast %c0_i32_163 : i32 to vector<128x128xi32>
    %307 = arith.cmpi ne, %305, %306 : vector<128x128xi32>
    %308 = arith.extui %307 : vector<128x128xi1> to vector<128x128xi32>
    %309 = arith.sitofp %308 : vector<128x128xi32> to vector<128x128xf32>
    %c15_i32_164 = arith.constant 15 : i32
    %310 = vector.broadcast %c15_i32_164 : i32 to vector<128x128xi32>
    %311 = arith.cmpi ne, %305, %310 : vector<128x128xi32>
    %312 = arith.extui %311 : vector<128x128xi1> to vector<128x128xi32>
    %313 = arith.sitofp %312 : vector<128x128xi32> to vector<128x128xf32>
    %c0_165 = arith.constant 0 : index
    %c0_166 = arith.constant 0 : index
    %314 = vector.load %arg11[%c0_165, %c0_166] : memref<288x128xf32, #tpu.memory_space<vmem>>, vector<128x128xf32>
    %c1_i32_167 = arith.constant 1 : i32
    %315 = tpu.dynamic_rotate %314 by %c1_i32_167 dim 0 : vector<128x128xf32>, i32 -> vector<128x128xf32>
    %316 = arith.mulf %315, %309 : vector<128x128xf32>
    %c127_i32_168 = arith.constant 127 : i32
    %317 = tpu.dynamic_rotate %314 by %c127_i32_168 dim 0 : vector<128x128xf32>, i32 -> vector<128x128xf32>
    %318 = arith.mulf %317, %313 : vector<128x128xf32>
    %319 = tpu.concatenate %316, %314, %318 in 1 : vector<128x128xf32>, vector<128x128xf32>, vector<128x128xf32> -> vector<128x384xf32>
    %c0_169 = arith.constant 0 : index
    %c0_170 = arith.constant 0 : index
    %c0_171 = arith.constant 0 : index
    %320 = vector.load %arg6[%c0_169, %c0_170, %c0_171] : memref<3x384x128xf32, #tpu.memory_space<vmem>>, vector<1x384x128xf32>
    %321 = vector.shape_cast %320 : vector<1x384x128xf32> to vector<384x128xf32>
    %cst_172 = arith.constant dense<0.000000e+00> : vector<128x128xf32>
    %322 = tpu.matmul %319, %321, %cst_172 {dimension_numbers = #tpu.dot_dimension_numbers<[1], [0], [0], [1], [0, 0, 1, 1], [], []>} : vector<128x384xf32>, vector<384x128xf32>, vector<128x128xf32> -> vector<128x128xf32>
    %c16_173 = arith.constant 16 : index
    %c0_174 = arith.constant 0 : index
    %323 = vector.load %arg11[%c16_173, %c0_174] : memref<288x128xf32, #tpu.memory_space<vmem>>, vector<128x128xf32>
    %c1_i32_175 = arith.constant 1 : i32
    %324 = tpu.dynamic_rotate %323 by %c1_i32_175 dim 0 : vector<128x128xf32>, i32 -> vector<128x128xf32>
    %325 = arith.mulf %324, %309 : vector<128x128xf32>
    %c127_i32_176 = arith.constant 127 : i32
    %326 = tpu.dynamic_rotate %323 by %c127_i32_176 dim 0 : vector<128x128xf32>, i32 -> vector<128x128xf32>
    %327 = arith.mulf %326, %313 : vector<128x128xf32>
    %328 = tpu.concatenate %325, %323, %327 in 1 : vector<128x128xf32>, vector<128x128xf32>, vector<128x128xf32> -> vector<128x384xf32>
    %c1_177 = arith.constant 1 : index
    %c0_178 = arith.constant 0 : index
    %c0_179 = arith.constant 0 : index
    %329 = vector.load %arg6[%c1_177, %c0_178, %c0_179] : memref<3x384x128xf32, #tpu.memory_space<vmem>>, vector<1x384x128xf32>
    %330 = vector.shape_cast %329 : vector<1x384x128xf32> to vector<384x128xf32>
    %cst_180 = arith.constant dense<0.000000e+00> : vector<128x128xf32>
    %331 = tpu.matmul %328, %330, %cst_180 {dimension_numbers = #tpu.dot_dimension_numbers<[1], [0], [0], [1], [0, 0, 1, 1], [], []>} : vector<128x384xf32>, vector<384x128xf32>, vector<128x128xf32> -> vector<128x128xf32>
    %332 = arith.addf %322, %331 : vector<128x128xf32>
    %c32_181 = arith.constant 32 : index
    %c0_182 = arith.constant 0 : index
    %333 = vector.load %arg11[%c32_181, %c0_182] : memref<288x128xf32, #tpu.memory_space<vmem>>, vector<128x128xf32>
    %c1_i32_183 = arith.constant 1 : i32
    %334 = tpu.dynamic_rotate %333 by %c1_i32_183 dim 0 : vector<128x128xf32>, i32 -> vector<128x128xf32>
    %335 = arith.mulf %334, %309 : vector<128x128xf32>
    %c127_i32_184 = arith.constant 127 : i32
    %336 = tpu.dynamic_rotate %333 by %c127_i32_184 dim 0 : vector<128x128xf32>, i32 -> vector<128x128xf32>
    %337 = arith.mulf %336, %313 : vector<128x128xf32>
    %338 = tpu.concatenate %335, %333, %337 in 1 : vector<128x128xf32>, vector<128x128xf32>, vector<128x128xf32> -> vector<128x384xf32>
    %c2_185 = arith.constant 2 : index
    %c0_186 = arith.constant 0 : index
    %c0_187 = arith.constant 0 : index
    %339 = vector.load %arg6[%c2_185, %c0_186, %c0_187] : memref<3x384x128xf32, #tpu.memory_space<vmem>>, vector<1x384x128xf32>
    %340 = vector.shape_cast %339 : vector<1x384x128xf32> to vector<384x128xf32>
    %cst_188 = arith.constant dense<0.000000e+00> : vector<128x128xf32>
    %341 = tpu.matmul %338, %340, %cst_188 {dimension_numbers = #tpu.dot_dimension_numbers<[1], [0], [0], [1], [0, 0, 1, 1], [], []>} : vector<128x384xf32>, vector<384x128xf32>, vector<128x128xf32> -> vector<128x128xf32>
    %342 = arith.addf %332, %341 : vector<128x128xf32>
    %c0_189 = arith.constant 0 : index
    %c0_190 = arith.constant 0 : index
    %c0_191 = arith.constant 0 : index
    %343 = vector.load %arg9[%c0_189, %c0_190, %c0_191] : memref<1x256x128xf32, #tpu.memory_space<vmem>>, vector<1x128x128xf32>
    %344 = vector.shape_cast %343 : vector<1x128x128xf32> to vector<128x128xf32>
    %345 = arith.addf %344, %342 : vector<128x128xf32>
    %c2_192 = arith.constant 2 : index
    %c0_193 = arith.constant 0 : index
    %346 = vector.load %arg8[%c2_192, %c0_193] : memref<3x128xf32, #tpu.memory_space<vmem>>, vector<1x128xf32>
    %347 = vector.broadcast %346 : vector<1x128xf32> to vector<128x128xf32>
    %348 = arith.addf %345, %347 : vector<128x128xf32>
    %c0_194 = arith.constant 0 : index
    %c0_195 = arith.constant 0 : index
    %c0_196 = arith.constant 0 : index
    %349 = vector.load %arg9[%c0_194, %c0_195, %c0_196] : memref<1x256x128xf32, #tpu.memory_space<vmem>>, vector<1x128x128xf32>
    %350 = vector.shape_cast %349 : vector<1x128x128xf32> to vector<128x128xf32>
    %351 = vector.shape_cast %348 : vector<128x128xf32> to vector<1x128x128xf32>
    tpu.vector_store %arg9[%c0_194, %c0_195, %c0_196], %351 {strides = array<i32>} : memref<1x256x128xf32, #tpu.memory_space<vmem>>, vector<1x128x128xf32>,
    %352 = tpu.iota {dimensions = array<i32: 0>} : vector<128x128xi32>
    %c16_i32_197 = arith.constant 16 : i32
    %c0_i32_198 = arith.constant 0 : i32
    %353 = arith.cmpi eq, %c16_i32_197, %c0_i32_198 : i32
    %c1_i32_199 = arith.constant 1 : i32
    %354 = arith.select %353, %c1_i32_199, %c16_i32_197 : i32
    %355 = vector.broadcast %354 : i32 to vector<128x128xi32>
    %356 = arith.remsi %352, %355 : vector<128x128xi32>
    %c0_i32_200 = arith.constant 0 : i32
    %357 = vector.broadcast %c0_i32_200 : i32 to vector<128x128xi32>
    %358 = arith.cmpi ne, %356, %357 : vector<128x128xi32>
    %c0_i32_201 = arith.constant 0 : i32
    %359 = vector.broadcast %c0_i32_201 : i32 to vector<128x128xi32>
    %360 = arith.cmpi slt, %356, %359 : vector<128x128xi32>
    %c0_i32_202 = arith.constant 0 : i32
    %361 = arith.cmpi slt, %354, %c0_i32_202 : i32
    %362 = vector.broadcast %361 : i1 to vector<128x128xi1>
    %363 = vector.broadcast %362 : vector<128x128xi1> to vector<128x128xi1>
    %364 = arith.xori %360, %363 : vector<128x128xi1>
    %365 = arith.andi %364, %358 : vector<128x128xi1>
    %366 = vector.broadcast %354 : i32 to vector<128x128xi32>
    %367 = arith.addi %356, %366 : vector<128x128xi32>
    %368 = arith.select %365, %367, %356 : vector<128x128xi1>, vector<128x128xi32>
    %c0_i32_203 = arith.constant 0 : i32
    %369 = vector.broadcast %c0_i32_203 : i32 to vector<128x128xi32>
    %370 = arith.cmpi ne, %368, %369 : vector<128x128xi32>
    %371 = arith.extui %370 : vector<128x128xi1> to vector<128x128xi32>
    %372 = arith.sitofp %371 : vector<128x128xi32> to vector<128x128xf32>
    %c15_i32_204 = arith.constant 15 : i32
    %373 = vector.broadcast %c15_i32_204 : i32 to vector<128x128xi32>
    %374 = arith.cmpi ne, %368, %373 : vector<128x128xi32>
    %375 = arith.extui %374 : vector<128x128xi1> to vector<128x128xi32>
    %376 = arith.sitofp %375 : vector<128x128xi32> to vector<128x128xf32>
    %c128_205 = arith.constant 128 : index
    %c0_206 = arith.constant 0 : index
    %377 = vector.load %arg11[%c128_205, %c0_206] : memref<288x128xf32, #tpu.memory_space<vmem>>, vector<128x128xf32>
    %c1_i32_207 = arith.constant 1 : i32
    %378 = tpu.dynamic_rotate %377 by %c1_i32_207 dim 0 : vector<128x128xf32>, i32 -> vector<128x128xf32>
    %379 = arith.mulf %378, %372 : vector<128x128xf32>
    %c127_i32_208 = arith.constant 127 : i32
    %380 = tpu.dynamic_rotate %377 by %c127_i32_208 dim 0 : vector<128x128xf32>, i32 -> vector<128x128xf32>
    %381 = arith.mulf %380, %376 : vector<128x128xf32>
    %382 = tpu.concatenate %379, %377, %381 in 1 : vector<128x128xf32>, vector<128x128xf32>, vector<128x128xf32> -> vector<128x384xf32>
    %c0_209 = arith.constant 0 : index
    %c0_210 = arith.constant 0 : index
    %c0_211 = arith.constant 0 : index
    %383 = vector.load %arg6[%c0_209, %c0_210, %c0_211] : memref<3x384x128xf32, #tpu.memory_space<vmem>>, vector<1x384x128xf32>
    %384 = vector.shape_cast %383 : vector<1x384x128xf32> to vector<384x128xf32>
    %cst_212 = arith.constant dense<0.000000e+00> : vector<128x128xf32>
    %385 = tpu.matmul %382, %384, %cst_212 {dimension_numbers = #tpu.dot_dimension_numbers<[1], [0], [0], [1], [0, 0, 1, 1], [], []>} : vector<128x384xf32>, vector<384x128xf32>, vector<128x128xf32> -> vector<128x128xf32>
    %c144_213 = arith.constant 144 : index
    %c0_214 = arith.constant 0 : index
    %386 = vector.load %arg11[%c144_213, %c0_214] : memref<288x128xf32, #tpu.memory_space<vmem>>, vector<128x128xf32>
    %c1_i32_215 = arith.constant 1 : i32
    %387 = tpu.dynamic_rotate %386 by %c1_i32_215 dim 0 : vector<128x128xf32>, i32 -> vector<128x128xf32>
    %388 = arith.mulf %387, %372 : vector<128x128xf32>
    %c127_i32_216 = arith.constant 127 : i32
    %389 = tpu.dynamic_rotate %386 by %c127_i32_216 dim 0 : vector<128x128xf32>, i32 -> vector<128x128xf32>
    %390 = arith.mulf %389, %376 : vector<128x128xf32>
    %391 = tpu.concatenate %388, %386, %390 in 1 : vector<128x128xf32>, vector<128x128xf32>, vector<128x128xf32> -> vector<128x384xf32>
    %c1_217 = arith.constant 1 : index
    %c0_218 = arith.constant 0 : index
    %c0_219 = arith.constant 0 : index
    %392 = vector.load %arg6[%c1_217, %c0_218, %c0_219] : memref<3x384x128xf32, #tpu.memory_space<vmem>>, vector<1x384x128xf32>
    %393 = vector.shape_cast %392 : vector<1x384x128xf32> to vector<384x128xf32>
    %cst_220 = arith.constant dense<0.000000e+00> : vector<128x128xf32>
    %394 = tpu.matmul %391, %393, %cst_220 {dimension_numbers = #tpu.dot_dimension_numbers<[1], [0], [0], [1], [0, 0, 1, 1], [], []>} : vector<128x384xf32>, vector<384x128xf32>, vector<128x128xf32> -> vector<128x128xf32>
    %395 = arith.addf %385, %394 : vector<128x128xf32>
    %c160_221 = arith.constant 160 : index
    %c0_222 = arith.constant 0 : index
    %396 = vector.load %arg11[%c160_221, %c0_222] : memref<288x128xf32, #tpu.memory_space<vmem>>, vector<128x128xf32>
    %c1_i32_223 = arith.constant 1 : i32
    %397 = tpu.dynamic_rotate %396 by %c1_i32_223 dim 0 : vector<128x128xf32>, i32 -> vector<128x128xf32>
    %398 = arith.mulf %397, %372 : vector<128x128xf32>
    %c127_i32_224 = arith.constant 127 : i32
    %399 = tpu.dynamic_rotate %396 by %c127_i32_224 dim 0 : vector<128x128xf32>, i32 -> vector<128x128xf32>
    %400 = arith.mulf %399, %376 : vector<128x128xf32>
    %401 = tpu.concatenate %398, %396, %400 in 1 : vector<128x128xf32>, vector<128x128xf32>, vector<128x128xf32> -> vector<128x384xf32>
    %c2_225 = arith.constant 2 : index
    %c0_226 = arith.constant 0 : index
    %c0_227 = arith.constant 0 : index
    %402 = vector.load %arg6[%c2_225, %c0_226, %c0_227] : memref<3x384x128xf32, #tpu.memory_space<vmem>>, vector<1x384x128xf32>
    %403 = vector.shape_cast %402 : vector<1x384x128xf32> to vector<384x128xf32>
    %cst_228 = arith.constant dense<0.000000e+00> : vector<128x128xf32>
    %404 = tpu.matmul %401, %403, %cst_228 {dimension_numbers = #tpu.dot_dimension_numbers<[1], [0], [0], [1], [0, 0, 1, 1], [], []>} : vector<128x384xf32>, vector<384x128xf32>, vector<128x128xf32> -> vector<128x128xf32>
    %405 = arith.addf %395, %404 : vector<128x128xf32>
    %c0_229 = arith.constant 0 : index
    %c128_230 = arith.constant 128 : index
    %c0_231 = arith.constant 0 : index
    %406 = vector.load %arg9[%c0_229, %c128_230, %c0_231] : memref<1x256x128xf32, #tpu.memory_space<vmem>>, vector<1x128x128xf32>
    %407 = vector.shape_cast %406 : vector<1x128x128xf32> to vector<128x128xf32>
    %408 = arith.addf %407, %405 : vector<128x128xf32>
    %c2_232 = arith.constant 2 : index
    %c0_233 = arith.constant 0 : index
    %409 = vector.load %arg8[%c2_232, %c0_233] : memref<3x128xf32, #tpu.memory_space<vmem>>, vector<1x128xf32>
    %410 = vector.broadcast %409 : vector<1x128xf32> to vector<128x128xf32>
    %411 = arith.addf %408, %410 : vector<128x128xf32>
    %c0_234 = arith.constant 0 : index
    %c128_235 = arith.constant 128 : index
    %c0_236 = arith.constant 0 : index
    %412 = vector.load %arg9[%c0_234, %c128_235, %c0_236] : memref<1x256x128xf32, #tpu.memory_space<vmem>>, vector<1x128x128xf32>
    %413 = vector.shape_cast %412 : vector<1x128x128xf32> to vector<128x128xf32>
    %414 = vector.shape_cast %411 : vector<128x128xf32> to vector<1x128x128xf32>
    tpu.vector_store %arg9[%c0_234, %c128_235, %c0_236], %414 {strides = array<i32>} : memref<1x256x128xf32, #tpu.memory_space<vmem>>, vector<1x128x128xf32>,
    return
  }
  func.func @transform_0(%arg0: i32) -> (i32, i32, i32) {
    %c0_i32 = arith.constant 0 : i32
    %c0_i32_0 = arith.constant 0 : i32
    %c0_i32_1 = arith.constant 0 : i32
    return %arg0, %c0_i32, %c0_i32_0 : i32, i32, i32
  }
  func.func @transform_1(%arg0: i32) -> (i32, i32, i32) {
    %c0_i32 = arith.constant 0 : i32
    %c0_i32_0 = arith.constant 0 : i32
    %c0_i32_1 = arith.constant 0 : i32
    return %arg0, %c0_i32, %c0_i32_0 : i32, i32, i32
  }
  func.func @transform_2(%arg0: i32) -> (i32, i32) {
    %c0_i32 = arith.constant 0 : i32
    %c0_i32_0 = arith.constant 0 : i32
    %c0_i32_1 = arith.constant 0 : i32
    return %c0_i32, %c0_i32_0 : i32, i32
  }
  func.func @transform_3(%arg0: i32) -> (i32, i32) {
    %c0_i32 = arith.constant 0 : i32
    %c0_i32_0 = arith.constant 0 : i32
    %c0_i32_1 = arith.constant 0 : i32
    return %c0_i32, %c0_i32_0 : i32, i32
  }
  func.func @transform_4(%arg0: i32) -> (i32, i32, i32) {
    %c0_i32 = arith.constant 0 : i32
    %c0_i32_0 = arith.constant 0 : i32
    %c0_i32_1 = arith.constant 0 : i32
    %c0_i32_2 = arith.constant 0 : i32
    return %c0_i32, %c0_i32_0, %c0_i32_1 : i32, i32, i32
  }
  func.func @transform_5(%arg0: i32) -> (i32, i32, i32) {
    %c0_i32 = arith.constant 0 : i32
    %c0_i32_0 = arith.constant 0 : i32
    %c0_i32_1 = arith.constant 0 : i32
    %c0_i32_2 = arith.constant 0 : i32
    return %c0_i32, %c0_i32_0, %c0_i32_1 : i32, i32, i32
  }
  func.func @transform_6(%arg0: i32) -> (i32, i32) {
    %c0_i32 = arith.constant 0 : i32
    %c0_i32_0 = arith.constant 0 : i32
    %c0_i32_1 = arith.constant 0 : i32
    return %c0_i32, %c0_i32_0 : i32, i32
  }
  func.func @transform_7(%arg0: i32) -> (i32, i32) {
    %c0_i32 = arith.constant 0 : i32
    %c0_i32_0 = arith.constant 0 : i32
    %c0_i32_1 = arith.constant 0 : i32
    return %c0_i32, %c0_i32_0 : i32, i32
  }
  func.func @transform_8(%arg0: i32) -> (i32, i32, i32) {
    %c0_i32 = arith.constant 0 : i32
    %c0_i32_0 = arith.constant 0 : i32
    %c0_i32_1 = arith.constant 0 : i32
    return %arg0, %c0_i32, %c0_i32_0 : i32, i32, i32
  }
}

</mosaic_0001>

<bundles_post_ra>
// kernel: tpu_custom_call.1
= control target key start
LH: loop header
LB: loop body
LE: loop exit
PB: predicated region body
PF: predicated region fallthrough
CT: control target
= control target key end

     0   :  { %13 = vsyncpa [#allocation5], 0  ;;  %s14548_s0 = inlined_call_operand.vmem [shape: bf16[2,8,64], index: 0, kind: input, shape index: {}]   ;;  %s14549_s1 = inlined_call_operand.vmem [shape: bf16[2,256,4], index: 1, kind: input, shape index: {}]   ;;  %s14550_s2 = inlined_call_operand.vmem [shape: f32[16,8], index: 2, kind: input, shape index: {}]   ;;  %s14551_s3 = inlined_call_operand.vmem [shape: f32[2,128], index: 3, kind: input, shape index: {}]   ;;  %s14552_s4 = inlined_call_operand.hbm [shape: f32[3,384,128], index: 4, kind: input, shape index: {}]   ;;  %s14553_s5 = inlined_call_operand.hbm [shape: f32[3,384,128], index: 5, kind: input, shape index: {}]   ;;  %s14554_s6 = inlined_call_operand.vmem [shape: f32[128,128], index: 6, kind: input, shape index: {}]   ;;  %s14555_s7 = inlined_call_operand.vmem [shape: f32[3,128], index: 7, kind: input, shape index: {}]   ;;  %s14556_s8 = inlined_call_operand.hbm [shape: f32[2,256,128], index: 8, kind: output, shape index: {}]  }
   0x1   :  { %14 = vsyncpa [#allocation8], 0 }
   0x2   :  { %15 = vsyncpa [#allocation6], 0 }
   0x3   :  { %17 = vsyncpa [#allocation6 + $0x1], 0  ;;  %s10038_s27 = smov 0   ;;  %s10040_s28 = smov 0  }
   0x4   :  { %s10042_s29 = smov 0   ;;  %s10044_s30 = smov 0  }
   0x5 LB: > { %s10059_s9 = sadd.s32 4294967295, %s9976_s30   ;;  %s7395_s10 = sadd.s32 4294967294, %s9976_s30   ;;  %s9976_s30 = sphi %s10044_s30, %s15442_s30   ;;  %s9972_s29 = sphi %s10042_s29, %s15441_s29   ;;  %s9968_s28 = sphi %s10040_s28, %s15440_s28   ;;  %s9964_s27 = sphi %s10038_s27, %s15439_s27  }
   0x6   : > { %s10063_s11 = sadd.s32 1, %s9976_s30   ;;  %s208_s12 = sadd.s32 1, %s9972_s29 }
   0x7   : > { %s205_s13 = ssub.s32 %s9976_s30, %s10063_s11  ;;  %p218_p0 = scmp.ne.s32.totalorder %s9972_s29, %s9968_s28 }
   0x8   : > { %p206_p1 = scmp.eq.s32.totalorder %s205_s13, 0  ;;  %p219_p2 = scmp.eq.s32.totalorder %s10059_s9, 1 }
   0x9   : > { %p224_p3 = scmp.ne.s32.totalorder %s9968_s28, %s9964_s27  ;;  %p225_p4 = scmp.eq.s32.totalorder %s7395_s10, 1 }
   0xa   : > { %s10074_s14 = scalar_select %p206_p1, %s9972_s29, %s208_s12  }
   0xb   : > { %p10076_p5 = por %p219_p2, %p218_p0  ;;  %p10080_p6 = por %p225_p4, %p224_p3 }
   0xc   : > { %p7396_p7 = scmp.ge.s32.totalorder %s9976_s30, 1  ;;  %p232_p8 = scmp.lt.s32.totalorder %s9976_s30, 3 }
   0xd   : > { %s14804_s16 = scalar_select %p10080_p6, 1, 0 }
   0xe   : > { %p14557_p9 = scmp.eq.s32.totalorder %s10059_s9, 0  ;;  %p10087_p10 = pnand %p7396_p7, %p232_p8 }
   0xf   : > { %s9978_s18 = smov [#allocation4]   ;;  %s9979_s21 = smov [#allocation7]  }
  0x10   : > { %s250_s19 = sshll.u32 %s9978_s18, 4  ;;  %p9681_p11 = pneg %p10087_p10  ;;  %s251_s19 = int_to_ptr.vmem [resolvable:$true] %s250_s19 }
  0x11   : > { %s263_s22 = sshll.u32 %s9979_s21, 4  ;;  %s9867_s23 = scalar_lea.vmem %s251_s19, 18432  ;;  %s264_s22 = int_to_ptr.vmem [resolvable:$true] %s263_s22 }
  0x12   : > { %p10095_p12 = pnand %p14557_p9, %p9681_p11  ;;  %p9868_p0 = scmp.ne.s32.totalorder %s251_s19, %s9867_s23 }
  0x13   : > { %p9875_p3 = scmp.lt.s32.totalorder %s251_s19, %s251_s19  ;;  %p9876_p4 = scmp.lt.s32.totalorder %s9867_s23, %s9867_s23 }
  0x14   : > { %p9858_p13 = pneg %p10095_p12 }
  0x15   : > { %p9877_p7 = por %p9876_p4, %p9875_p3 }
  0x16   : > { %p9870_p1 = pnand %p9868_p0, %p9858_p13 }
  0x18   : > { %p9871_p2 = pneg %p9870_p1 }
  0x1a   : > { %p9878_p8 = pnand %p9877_p7, %p9871_p2 }
  0x1c   : > { %9881 = shalt.err (!%p9878_p8)
}
  0x1d   : > { %s9980_s24 = smov 128   ;;  %s9981_s25 = smov 8  }
  0x1e   : > { %9684 = dma.hbm_to_vmem [thread:$0]  (!%p10095_p12), %s14552_s4, 18432, %s251_s19, [#allocation5], %s9980_s24, %s9980_s24, %s9981_s25  }
  0x1f   : > { %s9893_s12 = scalar_lea.vmem %s264_s22, 18432  ;;  %p9901_p9 = scmp.lt.s32.totalorder %s264_s22, %s264_s22 }
  0x20   : > { %p9894_p11 = scmp.ne.s32.totalorder %s264_s22, %s9893_s12  ;;  %p9902_p6 = scmp.lt.s32.totalorder %s9893_s12, %s9893_s12 }
  0x22   : > { %p9896_p0 = pnand %p9894_p11, %p9858_p13  ;;  %p9903_p3 = por %p9902_p6, %p9901_p9 }
  0x24   : > { %p9897_p1 = pneg %p9896_p0 }
  0x26   : > { %p9904_p2 = pnand %p9903_p3, %p9897_p1 }
  0x28   : > { %9907 = shalt.err (!%p9904_p2)
}
  0x29   : > { %9687 = dma.hbm_to_vmem [thread:$0]  (!%p10095_p12), %s14553_s5, 18432, %s264_s22, [#allocation8], %s9980_s24, %s9980_s24, %s9981_s25  }
  0x2a   : > { %300 = sbr.rel (%p10087_p10) target bundleno = 1519 (0x5ef), region = 52 }
  0x2f   : > { %p14807_p4 = scmp.eq.s32.totalorder %s10059_s9, 0 }
  0x31   : > { %9951 = dma.done.wait (%p14807_p4), [#allocation5], 18432   ;;  %p14808_p13 = pmov %p14807_p4 }
  0x32   : > { %p14809_p7 = pmov %p14807_p4 }
  0x33   : > { %9953 = vsyncadd (%p14808_p13), [#allocation5], 4294948864 }
  0x34   : > { %9955 = dma.done.wait (%p14809_p7), [#allocation8], 18432   ;;  %p14810_p6 = pmov %p14807_p4 }
  0x35   : > { %p342_p9 = scmp.lt.s32.totalorder %s10059_s9, 1  ;;  %vm396_vm0 = vcmask 64512   ;;  %v392_v1 = vld [vmem:[%s14550_s2] sm:$0xff]  ;;  %v393_v5 = vld [vmem:[%s14550_s2 + $0x8] sm:$0xff]  ;;  %vm359_vm1 = vcmask 1047648   ;;  %v9984_v19 = vmov 0.0  }
  0x36   : > { %9957 = vsyncadd (%p14810_p6), [#allocation8], 4294948864  ;;  %8916 = vmatprep.mubr.msk.f32.mxu0 %vm396_vm0, %v392_v1  ;;  %351 = vst [vmem:[#allocation2] sm:$0xff] %v9984_v19  ;;  %v1068_v22 = vld [vmem:[%s14554_s6 + $0x78] sm:$0xff]  ;;  %v1067_v25 = vld [vmem:[%s14554_s6 + $0x70] sm:$0xff]  ;;  %s9985_s22 = smov 104  }
  0x37   : > { %s343_s19 = scalar_select %p342_p9, %s10059_s9, 1  ;;  %361 = vst.msk [vmem:[#allocation2 + $0x18] sm:$0xff] %vm359_vm1, %v9984_v19  ;;  %360 = vst.msk [vmem:[#allocation2 + $0x10] sm:$0xff] %vm359_vm1, %v9984_v19  ;;  %8919 = vmatprep.subr.mxu1 %v1068_v22  ;;  %v1066_v27 = vld [vmem:[%s14554_s6 + $0x68] sm:$0xff]  ;;  %v1065_v30 = vld [vmem:[%s14554_s6 + $0x60] sm:$0xff]  ;;  %vm988_vm2 = vcmask 97344  }
  0x38   : > { %362 = vst.msk [vmem:[#allocation2 + $0x20] sm:$0xff] %vm359_vm1, %v9984_v19  ;;  %363 = vst.msk [vmem:[#allocation2 + $0x28] sm:$0xff] %vm359_vm1, %v9984_v19  ;;  %8920 = vmatpush3.msra.mxu1 %v1068_v22  ;;  %v1064_v34 = vld [vmem:[%s14554_s6 + $0x58] sm:$0xff]  ;;  %v1063_v37 = vld [vmem:[%s14554_s6 + $0x50] sm:$0xff]  ;;  %s9988_s13 = smov 88   ;;  %s9989_s18 = smov 80  }
  0x39   : > { %s7404_s20 = sshll.u32 %s343_s19, 2  ;;  %s7438_s21 = sshll.u32 %s343_s19, 7  ;;  %364 = vst.msk [vmem:[#allocation2 + $0x30] sm:$0xff] %vm359_vm1, %v9984_v19  ;;  %365 = vst.msk [vmem:[#allocation2 + $0x38] sm:$0xff] %vm359_vm1, %v9984_v19  ;;  %8921 = vmatprep.subr.mxu1 %v1067_v25  ;;  %v1062_v40 = vld [vmem:[%s14554_s6 + $0x48] sm:$0xff]  ;;  %v1061_v43 = vld [vmem:[%s14554_s6 + $0x40] sm:$0xff] }
  0x3a   : > { %s345_s23 = scalar_lea.vmem %s14548_s0, %s7404_s20  ;;  %s10135_s26 = scalar_lea.vmem %s14549_s1, %s7438_s21  ;;  %366 = vst.msk [vmem:[#allocation2 + $0x40] sm:$0xff] %vm359_vm1, %v9984_v19  ;;  %367 = vst.msk [vmem:[#allocation2 + $0x48] sm:$0xff] %vm359_vm1, %v9984_v19  ;;  %8922 = vmatpush3.msra.mxu1 %v1067_v25  ;;  %v1060_v44 = vld [vmem:[%s14554_s6 + $0x38] sm:$0xff]  ;;  %v1059_v47 = vld [vmem:[%s14554_s6 + $0x30] sm:$0xff] }
  0x3b   : > { %v394_v0 = vld [vmem:[%s345_s23] sm:$0xf]  ;;  %v10143_v4 = vld [vmem:[%s10135_s26 + $0x8] sm:$0xff]   ;;  %s9982_s19 = smov 8   ;;  %v10152_v9 = vld [vmem:[%s10135_s26 + $0x38] sm:$0xff]   ;;  %s9983_s20 = smov 120   ;;  %8923 = vmatprep.subr.mxu1 %v1066_v27 }
  0x3c   : > { %v395_v2 = vunpack.c.l.bf16 %v394_v0  ;;  %v7441_v3 = vld [vmem:[%s10135_s26] sm:$0xff]   ;;  %v7446_v7 = vunpack.c.l.bf16 %v10143_v4  ;;  %v7471_v11 = vunpack.c.h.bf16 %v10152_v9  ;;  %368 = vst.msk [vmem:[#allocation2 + $0x50] sm:$0xff] %vm359_vm1, %v9984_v19  ;;  %369 = vst.msk [vmem:[#allocation2 + $0x58] sm:$0xff] %vm359_vm1, %v9984_v19  ;;  %v10293_v31 = vld [vmem:[%s10135_s26 + $0x10] sm:$0xff]   ;;  %8924 = vmatpush3.msra.mxu1 %v1066_v27  ;;  %v7447_v35 = vunpack.c.h.bf16 %v10143_v4  ;;  %s9986_s23 = smov 112   ;;  %s9990_s21 = smov 72  }
  0x3d   : > { %v7443_v6 = vunpack.c.h.bf16 %v7441_v3  ;;  %v7442_v10 = vunpack.c.l.bf16 %v7441_v3  ;;  %370 = vst.msk [vmem:[#allocation2 + $0x60] sm:$0xff] %vm359_vm1, %v9984_v19  ;;  %371 = vst.msk [vmem:[#allocation2 + $0x68] sm:$0xff] %vm359_vm1, %v9984_v19  ;;  %8925 = vmatprep.subr.mxu1 %v1065_v30  ;;  %v7450_v36 = vunpack.c.l.bf16 %v10293_v31  ;;  %v1058_v50 = vld [vmem:[%s14554_s6 + $0x28] sm:$0xff]  ;;  %v1057_v51 = vld [vmem:[%s14554_s6 + $0x20] sm:$0xff]  ;;  %v7451_v0 = vunpack.c.h.bf16 %v10293_v31  ;;  %s339_s24 = sand.u32 1, %s9968_s28  }
  0x3e   : > { %8914 = vmatprep.subr.mxu0 %v395_v2  ;;  %372 = vst.msk [vmem:[#allocation2 + $0x70] sm:$0xff] %vm359_vm1, %v9984_v19  ;;  %373 = vst.msk [vmem:[#allocation2 + $0x78] sm:$0xff] %vm359_vm1, %v9984_v19  ;;  %8926 = vmatpush3.msra.mxu1 %v1065_v30  ;;  %v1056_v54 = vld [vmem:[%s14554_s6 + $0x18] sm:$0xff]  ;;  %v1055_v57 = vld [vmem:[%s14554_s6 + $0x10] sm:$0xff]  ;;  %s7403_s25 = sshll.u32 %s339_s24, 8 }
  0x3f   : > { %8915 = vmatpush3.msra.mxu0 %v395_v2  ;;  %v9748_v8 = vpack.i.bf16 %v7446_v7, %v7443_v6  ;;  %v9743_v15 = vpack.i.bf16 %v7471_v11, %v7442_v10  ;;  %374 = vst.msk [vmem:[#allocation2 + $0x80] sm:$0xff] %vm359_vm1, %v9984_v19  ;;  %375 = vst.msk [vmem:[#allocation2 + $0x88] sm:$0xff] %vm359_vm1, %v9984_v19  ;;  %8927 = vmatprep.subr.mxu1 %v1064_v34  ;;  %v1054_v58 = vld [vmem:[%s14554_s6 + $0x8] sm:$0xff]  ;;  %v1053_v60 = vld [vmem:[%s14554_s6] sm:$0xff]  ;;  %s11103_s10 = scalar_lea.vmem [#allocation9], %s7403_s25 }
  0x40   : > { %8917 = vmatmul.mubr.msk.f32.vlgmr.msra.gmra.mxu0 %vm396_vm0, %v393_v5  ;;  %376 = vst.msk [vmem:[#allocation2 + $0x90] sm:$0xff] %vm359_vm1, %v9984_v19  ;;  %377 = vst.msk [vmem:[#allocation2 + $0x98] sm:$0xff] %vm359_vm1, %v9984_v19  ;;  %8928 = vmatpush3.msra.mxu1 %v1064_v34  ;;  %v9753_v41 = vpack.i.bf16 %v7450_v36, %v7447_v35  ;;  %v10410_v62 = vld [vmem:[%s10135_s26 + $0x18] sm:$0xff]   ;;  %v10420_v2 = vld [vmem:[%s10135_s26 + $0x20] sm:$0xff]  }
  0x41   : > { %9749 = vrot.lane.b32.xlu1 %v9748_v8, %s9982_s19  ;;  %378 = vst.msk [vmem:[#allocation2 + $0xa0] sm:$0xff] %vm359_vm1, %v9984_v19  ;;  %379 = vst.msk [vmem:[#allocation2 + $0xa8] sm:$0xff] %vm359_vm1, %v9984_v19  ;;  %8929 = vmatprep.subr.mxu1 %v1063_v37  ;;  %v7454_v1 = vunpack.c.l.bf16 %v10410_v62  ;;  %v10423_v3 = vld [vmem:[%s10135_s26 + $0x28] sm:$0xff]   ;;  %v7459_v6 = vunpack.c.h.bf16 %v10420_v2  ;;  %v2039_v10 = vld [vmem:[#allocation4 + $0x278] sm:$0xff] }
  0x42   : > { %380 = vst.msk [vmem:[#allocation2 + $0xb0] sm:$0xff] %vm359_vm1, %v9984_v19  ;;  %381 = vst.msk [vmem:[#allocation2 + $0xb8] sm:$0xff] %vm359_vm1, %v9984_v19  ;;  %8930 = vmatpush3.msra.mxu1 %v1063_v37  ;;  %v7462_v7 = vunpack.c.l.bf16 %v10423_v3  ;;  %v2023_v11 = vld [vmem:[#allocation4 + $0x1f8] sm:$0xff]  ;;  %7570 = vmatprep.subr.mxu0 %v2039_v10  ;;  %v2022_v22 = vld [vmem:[#allocation4 + $0x1f0] sm:$0xff] }
  0x43   : > { %382 = vst.msk [vmem:[#allocation2 + $0xc0] sm:$0xff] %vm359_vm1, %v9984_v19  ;;  %383 = vst.msk [vmem:[#allocation2 + $0xc8] sm:$0xff] %vm359_vm1, %v9984_v19  ;;  %8931 = vmatprep.subr.mxu1 %v1062_v40  ;;  %v9758_v5 = vpack.i.bf16 %v7454_v1, %v7451_v0  ;;  %7571 = vmatpush3.msra.mxu0 %v2023_v11  ;;  %v2037_v25 = vld [vmem:[#allocation4 + $0x268] sm:$0xff]  ;;  %v2036_v30 = vld [vmem:[#allocation4 + $0x260] sm:$0xff] }
  0x44   : > { %384 = vst.msk [vmem:[#allocation2 + $0xd0] sm:$0xff] %vm359_vm1, %v9984_v19  ;;  %385 = vst.msk [vmem:[#allocation2 + $0xd8] sm:$0xff] %vm359_vm1, %v9984_v19  ;;  %8932 = vmatpush3.msra.mxu1 %v1062_v40  ;;  %v9768_v8 = vpack.i.bf16 %v7462_v7, %v7459_v6  ;;  %v2021_v27 = vld [vmem:[#allocation4 + $0x1e8] sm:$0xff]  ;;  %v2020_v31 = vld [vmem:[#allocation4 + $0x1e0] sm:$0xff]  ;;  %v7455_v6 = vunpack.c.h.bf16 %v10410_v62  ;;  %v7458_v7 = vunpack.c.l.bf16 %v10420_v2 }
  0x45   : > { %386 = vst.msk [vmem:[#allocation2 + $0xe0] sm:$0xff] %vm359_vm1, %v9984_v19  ;;  %387 = vst.msk [vmem:[#allocation2 + $0xe8] sm:$0xff] %vm359_vm1, %v9984_v19  ;;  %8933 = vmatprep.subr.mxu1 %v1061_v43  ;;  %v2035_v35 = vld [vmem:[#allocation4 + $0x258] sm:$0xff]  ;;  %v2034_v37 = vld [vmem:[#allocation4 + $0x250] sm:$0xff] }
  0x46   : > { %388 = vst.msk [vmem:[#allocation2 + $0xf0] sm:$0xff] %vm359_vm1, %v9984_v19  ;;  %389 = vst.msk [vmem:[#allocation2 + $0xf8] sm:$0xff] %vm359_vm1, %v9984_v19  ;;  %8934 = vmatpush3.msra.mxu1 %v1061_v43  ;;  %v2019_v36 = vld [vmem:[#allocation4 + $0x1d8] sm:$0xff]  ;;  %v2018_v40 = vld [vmem:[#allocation4 + $0x1d0] sm:$0xff]  ;;  %v9763_v62 = vpack.i.bf16 %v7458_v7, %v7455_v6 }
  0x47   : > { %390 = vst.msk [vmem:[#allocation2 + $0x100] sm:$0xff] %vm359_vm1, %v9984_v19  ;;  %391 = vst.msk [vmem:[#allocation2 + $0x108] sm:$0xff] %vm359_vm1, %v9984_v19  ;;  %8935 = vmatprep.subr.mxu1 %v1060_v44  ;;  %v2017_v43 = vld [vmem:[#allocation4 + $0x1c8] sm:$0xff]  ;;  %v2027_v2 = vld [vmem:[#allocation4 + $0x218] sm:$0xff] }
  0x48   : > { %8936 = vmatpush3.msra.mxu1 %v1060_v44  ;;  %v2013_v10 = vld [vmem:[#allocation4 + $0x1a8] sm:$0xff] }
  0x49   : > { %8937 = vmatprep.subr.mxu1 %v1059_v47 }
  0x4a   : > { %8938 = vmatpush3.msra.mxu1 %v1059_v47 }
  0x4b   : > { %8939 = vmatprep.subr.mxu1 %v1058_v50 }
  0x4c   : > { %8940 = vmatpush3.msra.mxu1 %v1058_v50  ;;  %v2032_v50 = vld [vmem:[#allocation4 + $0x240] sm:$0xff] }
  0x4d   : > { %8941 = vmatprep.subr.mxu1 %v1057_v51 }
  0x4e   : > { %8942 = vmatpush3.msra.mxu1 %v1057_v51 }
  0x4f   : > { %8943 = vmatprep.subr.mxu1 %v1056_v54 }
  0x50   : > { %8944 = vmatpush3.msra.mxu1 %v1056_v54 }
  0x51   : > { %8945 = vmatprep.subr.mxu1 %v1055_v57 }
  0x52   : > { %8946 = vmatpush3.msra.mxu1 %v1055_v57  ;;  %v2016_v57 = vld [vmem:[#allocation4 + $0x1c0] sm:$0xff] }
  0x53   : > { %8947 = vmatprep.subr.mxu1 %v1054_v58 }
  0x54   : > { %8948 = vmatpush3.msra.mxu1 %v1054_v58  ;;  %v2031_v58 = vld [vmem:[#allocation4 + $0x238] sm:$0xff] }
  0x55   : > { %8949 = vmatprep.subr.mxu1 %v1053_v60 }
  0x56   : > { %8950 = vmatpush3.msra.mxu1 %v1053_v60  ;;  %v2015_v60 = vld [vmem:[#allocation4 + $0x1b8] sm:$0xff] }
  0xb3   : > { %v10434_v34 = vpop.permute.xlu1 %9749 }
 0x100   : > { %v10155_v12 = vpop.f32.mrf.mxu0 }
 0x101   : > { %v10158_v13 = vmul.f32 0.26666668, %v10155_v12  ;;  %v10161_v14 = vmul.f32 0.4, %v10155_v12  ;;  %v10168_v16 = vmul.f32 0.73333335, %v10155_v12 }
 0x102   : > { %v10174_v17 = vmul.f32 0.8666667, %v10155_v12  ;;  %v10177_v18 = vmul.f32 0.2, %v10155_v12  ;;  %v10249_v20 = vmul.f32 0.33333334, %v10155_v12  ;;  %v10270_v26 = vpop.f32.mrf.mxu0 }
 0x103   : > { %628 = vrot.lane.b32.xlu0 %v10158_v13, %s9983_s20  ;;  %532 = vrot.lane.b32.xlu1 %v10161_v14, %s9983_s20  ;;  %v10252_v21 = vmul.f32 0.6666667, %v10155_v12  ;;  %v10262_v23 = vmul.f32 0.8, %v10155_v12  ;;  %v10265_v24 = vmul.f32 0.0, %v10155_v12  ;;  %v10371_v53 = vmul.f32 0.0, %v10270_v26 }
 0x104   : > { %v10280_v28 = vmul.f32 0.13333334, %v10155_v12  ;;  %v10283_v29 = vmul.f32 0.4, %v10270_v26  ;;  %v10296_v32 = vmul.f32 0.8666667, %v10270_v26 }
 0x105   : > { %v10299_v33 = vmul.f32 0.46666667, %v10155_v12  ;;  %v10314_v38 = vmul.f32 0.6, %v10155_v12  ;;  %v10317_v39 = vmul.f32 0.06666667, %v10155_v12 }
 0x106   : > { %v10327_v42 = vmul.f32 0.33333334, %v10270_v26  ;;  %v10339_v45 = vmul.f32 0.8, %v10270_v26  ;;  %v10342_v46 = vmul.f32 0.73333335, %v10270_v26 }
 0x107   : > { %9744 = vrot.lane.b32.xlu0 %v9743_v15, %s9982_s19  ;;  %648 = vrot.lane.b32.xlu1 %v10168_v16, %s9983_s20  ;;  %v10352_v48 = vmul.f32 0.26666668, %v10270_v26  ;;  %v10355_v49 = vmul.f32 0.2, %v10270_v26  ;;  %v10368_v52 = vmul.f32 0.06666667, %v10270_v26 }
 0x108   : > { %v10381_v55 = vmul.f32 0.93333334, %v10270_v26  ;;  %v10384_v56 = vmul.f32 0.6666667, %v10270_v26  ;;  %v10397_v59 = vmul.f32 0.13333334, %v10270_v26 }
 0x109   : > { %v10405_v61 = vmul.f32 0.46666667, %v10270_v26  ;;  %v10413_v63 = vmul.f32 0.6, %v10270_v26  ;;  %v10426_v4 = vmul.f32 0.53333336, %v10155_v12 }
 0x10a   : > { %v2038_v15 = vld [vmem:[#allocation4 + $0x270] sm:$0xff] }
 0x10b   : > { %556 = vrot.lane.b32.xlu0 %v10174_v17, %s9983_s20  ;;  %668 = vrot.lane.b32.xlu1 %v10177_v18, %s9983_s20 }
 0x10c   : > { %7572 = vmatprep.subr.mxu0 %v2038_v15 }
 0x10d   : > { %7573 = vmatpush3.msra.mxu0 %v2022_v22  ;;  %v7509_v22 = vld [vmem:[%s10135_s26 + $0x30] sm:$0xff]  }
 0x10e   : > { %7574 = vmatprep.subr.mxu0 %v2037_v25  ;;  %v2028_v25 = vld [vmem:[#allocation4 + $0x220] sm:$0xff] }
 0x10f   : > { %580 = vrot.lane.b32.xlu0 %v10249_v20, %s9983_s20  ;;  %688 = vrot.lane.b32.xlu1 %v10252_v21, %s9983_s20 }
 0x110   : > { %7575 = vmatpush3.msra.mxu0 %v2021_v27  ;;  %v2012_v27 = vld [vmem:[#allocation4 + $0x1a0] sm:$0xff] }
 0x111   : > { %7576 = vmatprep.subr.mxu0 %v2036_v30  ;;  %v10455_v30 = vmul.f32 0.93333334, %v10155_v12 }
 0x112   : > { %7577 = vmatpush3.msra.mxu0 %v2020_v31  ;;  %v7463_v31 = vunpack.c.h.bf16 %v10423_v3 }
 0x113   : > { %604 = vrot.lane.b32.xlu0 %v10262_v23, %s9983_s20  ;;  %484 = vrot.lane.b32.xlu1 %v10265_v24, %s9983_s20 }
 0x114   : > { %7578 = vmatprep.subr.mxu0 %v2035_v35  ;;  %v7466_v35 = vunpack.c.l.bf16 %v7509_v22 }
 0x115   : > { %7579 = vmatpush3.msra.mxu0 %v2019_v36  ;;  %v7467_v36 = vunpack.c.h.bf16 %v7509_v22 }
 0x116   : > { %7580 = vmatprep.subr.mxu0 %v2034_v37  ;;  %v7470_v37 = vunpack.c.l.bf16 %v10152_v9  ;;  %v9773_v3 = vpack.i.bf16 %v7466_v35, %v7463_v31 }
 0x117   : > { %708 = vrot.lane.b32.xlu1 %v10280_v28, %s9983_s20  ;;  %530 = vrot.lane.b32.xlu0 %v10283_v29, %s9983_s20 }
 0x118   : > { %7581 = vmatpush3.msra.mxu0 %v2018_v40  ;;  %v2011_v40 = vld [vmem:[#allocation4 + $0x198] sm:$0xff]  ;;  %v9778_v9 = vpack.i.bf16 %v7470_v37, %v7467_v36  ;;  %v10483_v36 = vld [vmem:[%s14551_s3] ss:$0 sm:$0xff]  ;;  %v7512_v37 = vld [vmem:[%s10135_s26 + $0x48] sm:$0xff]  }
 0x11b   : > { %554 = vrot.lane.b32.xlu1 %v10296_v32, %s9983_s20  ;;  %500 = vrot.lane.b32.xlu0 %v10299_v33, %s9983_s20 }
 0x11f   : > { %728 = vrot.lane.b32.xlu1 %v10314_v38, %s9983_s20  ;;  %748 = vrot.lane.b32.xlu0 %v10317_v39, %s9983_s20 }
 0x123   : > { %578 = vrot.lane.b32.xlu1 %v10327_v42, %s9983_s20  ;;  %9754 = vrot.lane.b32.xlu0 %v9753_v41, %s9982_s19  ;;  %v2033_v41 = vld [vmem:[#allocation4 + $0x248] sm:$0xff] }
 0x124   : > { %7582 = vmatprep.subr.mxu0 %v2033_v41  ;;  %v2026_v41 = vld [vmem:[#allocation4 + $0x210] sm:$0xff] }
 0x125   : > { %7583 = vmatpush3.msra.mxu0 %v2017_v43 }
 0x126   : > { %7584 = vmatprep.subr.mxu0 %v2032_v50  ;;  %v2010_v50 = vld [vmem:[#allocation4 + $0x190] sm:$0xff] }
 0x127   : > { %602 = vrot.lane.b32.xlu1 %v10339_v45, %s9983_s20  ;;  %646 = vrot.lane.b32.xlu0 %v10342_v46, %s9983_s20 }
 0x128   : > { %7585 = vmatpush3.msra.mxu0 %v2016_v57  ;;  %v9751_v57 = vunpack.i.l.bf16 %v10434_v34 }
 0x129   : > { %7586 = vmatprep.subr.mxu0 %v2031_v58 }
 0x12a   : > { %7587 = vmatpush3.msra.mxu0 %v2015_v60 }
 0x12b   : > { %626 = vrot.lane.b32.xlu1 %v10352_v48, %s9983_s20  ;;  %666 = vrot.lane.b32.xlu0 %v10355_v49, %s9983_s20 }
 0x12f   : > { %746 = vrot.lane.b32.xlu1 %v10368_v52, %s9983_s20  ;;  %482 = vrot.lane.b32.xlu0 %v10371_v53, %s9983_s20 }
 0x133   : > { %514 = vrot.lane.b32.xlu1 %v10381_v55, %s9983_s20  ;;  %686 = vrot.lane.b32.xlu0 %v10384_v56, %s9983_s20 }
 0x137   : > { %706 = vrot.lane.b32.xlu0 %v10397_v59, %s9983_s20 }
 0x13b   : > { %498 = vrot.lane.b32.xlu0 %v10405_v61, %s9983_s20 }
 0x13f   : > { %726 = vrot.lane.b32.xlu0 %v10413_v63, %s9983_s20 }
 0x143   : > { %768 = vrot.lane.b32.xlu0 %v10426_v4, %s9983_s20 }
 0x147   : > { %9759 = vrot.lane.b32.xlu0 %v9758_v5, %s9982_s19  ;;  %v2030_v5 = vld [vmem:[#allocation4 + $0x230] sm:$0xff] }
 0x148   : > { %7588 = vmatprep.subr.mxu0 %v2030_v5  ;;  %v2024_v5 = vld [vmem:[#allocation4 + $0x200] sm:$0xff] }
 0x14b   : > { %9769 = vrot.lane.b32.xlu0 %v9768_v8, %s9982_s19  ;;  %v2029_v8 = vld [vmem:[#allocation4 + $0x228] sm:$0xff] }
 0x175   : > { %v629_v44 = vpop.permute.xlu0 %628  ;;  %v533_v47 = vpop.permute.xlu1 %532 }
 0x176   : > { %v633_v51 = vadd.f32 %v629_v44, %v10168_v16  ;;  %v537_v54 = vadd.f32 %v533_v47, %v10314_v38  ;;  %v10445_v16 = vmul.f32 0.53333336, %v10270_v26  ;;  %v2014_v38 = vld [vmem:[#allocation4 + $0x1b0] sm:$0xff] }
 0x177   : > { %7589 = vmatpush3.msra.mxu0 %v2014_v38  ;;  %v2008_v38 = vld [vmem:[#allocation4 + $0x180] sm:$0xff] }
 0x178   : > { %638 = vrot.lane.b32.xlu1 %v633_v51, %s9985_s22  ;;  %542 = vrot.lane.b32.xlu0 %v537_v54, %s9983_s20  ;;  %v2025_v51 = vld [vmem:[#allocation4 + $0x208] sm:$0xff] }
 0x179   : > { %v10440_v0 = vpop.permute.xlu0 %9744  ;;  %v10442_v1 = vpop.permute.xlu1 %648  ;;  %7590 = vmatprep.subr.mxu0 %v2029_v8  ;;  %v2009_v54 = vld [vmem:[#allocation4 + $0x188] sm:$0xff]  ;;  %v7511_v8 = vld [vmem:[%s10135_s26 + $0x40] sm:$0xff]  }
 0x17a   : > { %7591 = vmatpush3.msra.mxu0 %v2013_v10  ;;  %v7474_v22 = vunpack.c.l.bf16 %v7511_v8 }
 0x17b   : > { %7592 = vmatprep.subr.mxu0 %v2028_v25  ;;  %v7475_v25 = vunpack.c.h.bf16 %v7511_v8 }
 0x17c   : > { %766 = vrot.lane.b32.xlu1 %v10445_v16, %s9983_s20  ;;  %7593 = vmatpush3.msra.mxu0 %v2012_v27 }
 0x17d   : > { %v557_v11 = vpop.permute.xlu0 %556  ;;  %v10451_v15 = vpop.permute.xlu1 %668  ;;  %7594 = vmatprep.subr.mxu0 %v2027_v2 }
 0x17e   : > { %7595 = vmatpush3.msra.mxu0 %v2011_v40  ;;  %v561_v10 = vadd.f32 %v557_v11, %v10280_v28  ;;  %v9783_v28 = vpack.i.bf16 %v7475_v25, %v7474_v22 }
 0x17f   : > { %7596 = vmatprep.subr.mxu0 %v2026_v41 }
 0x180   : > { %516 = vrot.lane.b32.xlu1 %v10455_v30, %s9983_s20  ;;  %7597 = vmatpush3.msra.mxu0 %v2010_v50  ;;  %v7479_v50 = vunpack.c.h.bf16 %v7512_v37 }
 0x181   : > { %v581_v43 = vpop.permute.xlu0 %580  ;;  %v10461_v44 = vpop.permute.xlu1 %688  ;;  %7598 = vmatprep.subr.mxu0 %v2025_v51 }
 0x182   : > { %v585_v47 = vadd.f32 %v581_v43, %v10252_v21  ;;  %7599 = vmatpush3.msra.mxu0 %v2009_v54 }
 0x183   : > { %7600 = vmatprep.subr.mxu0 %v2024_v5 }
 0x184   : > { %9764 = vrot.lane.b32.xlu1 %v9763_v62, %s9982_s19  ;;  %590 = vrot.lane.b32.xlu0 %v585_v47, %s9986_s23  ;;  %v7478_v47 = vunpack.c.l.bf16 %v7512_v37 }
 0x185   : > { %v605_v58 = vpop.permute.xlu0 %604  ;;  %v485_v60 = vpop.permute.xlu1 %484  ;;  %7601 = vmatpush3.msra.mxu0 %v2008_v38 }
 0x186   : > { %v489_v21 = vadd.f32 %v10155_v12, %v485_v60  ;;  %v609_v41 = vadd.f32 %v605_v58, %v10177_v18  ;;  %v673_v60 = vadd.f32 %v10451_v15, %v10262_v23  ;;  %v9788_v58 = vpack.i.bf16 %v7479_v50, %v7478_v47 }
 0x188   : > { %491 = vst.msk [vmem:[#allocation2 + $0x18] sm:$0xff] %vm396_vm0, %v489_v21  ;;  %9774 = vrot.lane.b32.xlu1 %v9773_v3, %s9982_s19  ;;  %9779 = vrot.lane.b32.xlu0 %v9778_v9, %s9982_s19  ;;  %v7513_v9 = vld [vmem:[%s10135_s26 + $0x50] sm:$0xff]  }
 0x189   : > { %990 = vst.msk [vmem:[#allocation2 + $0x18] sm:$0xff] %vm988_vm2, %v9751_v57  ;;  %v10472_v6 = vpop.permute.xlu1 %708  ;;  %v531_v7 = vpop.permute.xlu0 %530  ;;  %v653_v57 = vadd.f32 %v10442_v1, %v10158_v13  ;;  %v7482_v21 = vunpack.c.l.bf16 %v7513_v9  ;;  %v7483_v5 = vunpack.c.h.bf16 %v7513_v9 }
 0x18a   : > { %v536_v2 = vadd.f32 %v531_v7, %v10413_v63  ;;  %v10491_v63 = vld [vmem:[%s14551_s3 + $0x1] ss:$0 sm:$0xff] }
 0x18b   : > { %v9793_v23 = vpack.i.bf16 %v7483_v5, %v7482_v21  ;;  %v9752_v5 = vunpack.i.h.bf16 %v10434_v34 }
 0x18c   : > { %566 = vrot.lane.b32.xlu1 %v561_v10, %s9983_s20 }
 0x18d   : > { %v555_v27 = vpop.permute.xlu1 %554  ;;  %v501_v62 = vpop.permute.xlu0 %500 }
 0x18e   : > { %v560_v31 = vadd.f32 %v555_v27, %v10397_v59  ;;  %v505_v35 = vadd.f32 %v501_v62, %v10426_v4  ;;  %v7514_v62 = vld [vmem:[%s10135_s26 + $0x58] sm:$0xff]  }
 0x18f   : > { %v7487_v37 = vunpack.c.h.bf16 %v7514_v62 }
 0x190   : > { %507 = vst.msk [vmem:[#allocation2 + $0x28] sm:$0xff] %vm396_vm0, %v505_v35  ;;  %540 = vrot.lane.b32.xlu1 %v536_v2, %s9983_s20  ;;  %564 = vrot.lane.b32.xlu0 %v560_v31, %s9983_s20  ;;  %v10493_v59 = vld [vmem:[#allocation2 + $0x18] sm:$0xff]  ;;  %s9987_s20 = smov 96   ;;  %v693_v2 = vadd.f32 %v10461_v44, %v10249_v20 }
 0x191   : > { %v10495_v4 = vpop.permute.xlu1 %728  ;;  %v10497_v11 = vpop.permute.xlu0 %748  ;;  %v1364_v40 = vmul.f32 %v10483_v36, %v10493_v59 }
 0x192   : > { %v733_v34 = vadd.f32 %v10495_v4, %v10161_v14 }
 0x193   : > { %v1401_v43 = vadd.f32 %v10491_v63, %v1364_v40 }
 0x194   : > { %614 = vrot.lane.b32.xlu1 %v609_v41, %s9986_s23  ;;  %9784 = vrot.lane.b32.xlu0 %v9783_v28, %s9982_s19  ;;  %v7486_v28 = vunpack.c.l.bf16 %v7514_v62  ;;  %v2053_v62 = vld [vmem:[#allocation4 + $0x2e8] sm:$0xff] }
 0x195   : > { %v579_v51 = vpop.permute.xlu1 %578  ;;  %v9755_v3 = vpop.permute.xlu0 %9754  ;;  %v10507_v54 = vmax.f32 %v1401_v43, 0.0  ;;  %v713_v43 = vadd.f32 %v10472_v6, %v10174_v17 }
 0x196   : > { %v9756_v18 = vunpack.i.l.bf16 %v9755_v3  ;;  %v584_v8 = vadd.f32 %v579_v51, %v10384_v56  ;;  %v9757_v41 = vunpack.i.h.bf16 %v9755_v3  ;;  %v1946_v51 = vld [vmem:[#allocation4 + $0xf8] sm:$0xff]  ;;  %v9798_v3 = vpack.i.bf16 %v7487_v37, %v7486_v28 }
 0x197   : > { %1465 = vst [vmem:[#allocation2 + $0x18] sm:$0xff] %v10507_v54  ;;  %7682 = vmatprep.subr.mxu0 %v1946_v51  ;;  %v9747_v51 = vunpack.i.h.bf16 %v10440_v0 }
 0x198   : > { %992 = vst.msk [vmem:[#allocation2 + $0x28] sm:$0xff] %vm988_vm2, %v9756_v18  ;;  %658 = vrot.lane.b32.xlu1 %v653_v57, %s9985_s22  ;;  %678 = vrot.lane.b32.xlu0 %v673_v60, %s9987_s20 }
 0x199   : > { %v603_v38 = vpop.permute.xlu1 %602  ;;  %v647_v7 = vpop.permute.xlu0 %646 }
 0x19a   : > { %v608_v13 = vadd.f32 %v603_v38, %v10355_v49  ;;  %v9746_v49 = vunpack.i.l.bf16 %v10440_v0  ;;  %v652_v56 = vadd.f32 %v647_v7, %v10352_v48  ;;  %v7515_v48 = vld [vmem:[%s10135_s26 + $0x60] sm:$0xff]  }
 0x19b   : > { %v7490_v9 = vunpack.c.l.bf16 %v7515_v48  ;;  %v7491_v57 = vunpack.c.h.bf16 %v7515_v48  ;;  %v2047_v48 = vld [vmem:[#allocation4 + $0x2b8] sm:$0xff] }
 0x19c   : > { %9789 = vrot.lane.b32.xlu1 %v9788_v58, %s9982_s19  ;;  %612 = vrot.lane.b32.xlu0 %v608_v13, %s9986_s23  ;;  %v7516_v13 = vld [vmem:[%s10135_s26 + $0x68] sm:$0xff]  }
 0x19d   : > { %v627_v1 = vpop.permute.xlu1 %626  ;;  %v667_v15 = vpop.permute.xlu0 %666  ;;  %v9803_v6 = vpack.i.bf16 %v7491_v57, %v7490_v9  ;;  %v7517_v57 = vld [vmem:[%s10135_s26 + $0x70] sm:$0xff]  }
 0x19e   : > { %v632_v47 = vadd.f32 %v627_v1, %v10342_v46  ;;  %v672_v58 = vadd.f32 %v667_v15, %v10339_v45  ;;  %v7494_v1 = vunpack.c.l.bf16 %v7516_v13  ;;  %v7495_v15 = vunpack.c.h.bf16 %v7516_v13 }
 0x19f   : > { %v10521_v10 = vld [vmem:[#allocation2 + $0x28] sm:$0xff] }
 0x1a0   : > { %588 = vrot.lane.b32.xlu1 %v584_v8, %s9986_s23  ;;  %9794 = vrot.lane.b32.xlu0 %v9793_v23, %s9982_s19  ;;  %v1366_v22 = vmul.f32 %v10483_v36, %v10521_v10  ;;  %v9808_v4 = vpack.i.bf16 %v7495_v15, %v7494_v1  ;;  %v2041_v15 = vld [vmem:[#allocation4 + $0x288] sm:$0xff]  ;;  %s9991_s23 = smov [#allocation9]  }
 0x1a1   : > { %v10528_v25 = vpop.permute.xlu1 %746  ;;  %v483_v27 = vpop.permute.xlu0 %482  ;;  %s9912_s25 = sshll.u32 %s9991_s23, 4  ;;  %s9913_s25 = int_to_ptr.vmem [resolvable:$false] %s9912_s25 }
 0x1a2   : > { %v488_v31 = vadd.f32 %v483_v27, %v10270_v26  ;;  %v1403_v35 = vadd.f32 %v10491_v63, %v1366_v22  ;;  %v753_v22 = vadd.f32 %v10497_v11, %v10455_v30  ;;  %s9914_s12 = scalar_lea.vmem %s9913_s25, 8192 }
 0x1a4   : > { %490 = vst.msk [vmem:[#allocation2 + $0x10] sm:$0xff] %vm396_vm0, %v488_v31  ;;  %698 = vrot.lane.b32.xlu1 %v693_v2, %s9987_s20  ;;  %656 = vrot.lane.b32.xlu0 %v652_v56, %s9985_s22  ;;  %v10539_v40 = vmax.f32 %v1403_v35, 0.0  ;;  %v752_v2 = vadd.f32 %v10528_v25, %v10381_v55  ;;  %v2051_v31 = vld [vmem:[#allocation4 + $0x2d8] sm:$0xff]  ;;  %v2050_v25 = vld [vmem:[#allocation4 + $0x2d0] sm:$0xff] }
 0x1a5   : > { %989 = vst.msk [vmem:[#allocation2 + $0x10] sm:$0xff] %vm988_vm2, %v9746_v49  ;;  %v515_v20 = vpop.permute.xlu1 %514  ;;  %v687_v44 = vpop.permute.xlu0 %686  ;;  %v2055_v49 = vld [vmem:[#allocation4 + $0x2f8] sm:$0xff] }
 0x1a6   : > { %v520_v50 = vadd.f32 %v515_v20, %v10368_v52  ;;  %1467 = vst [vmem:[#allocation2 + $0x28] sm:$0xff] %v10539_v40  ;;  %v692_v46 = vadd.f32 %v687_v44, %v10327_v42  ;;  %8999 = vmatprep.subr.mxu1 %v2055_v49  ;;  %v7518_v35 = vld [vmem:[%s10135_s26 + $0x78] sm:$0xff]   ;;  %v2049_v44 = vld [vmem:[#allocation4 + $0x2c8] sm:$0xff] }
 0x1a7   : > { %v7502_v37 = vunpack.c.l.bf16 %v7518_v35  ;;  %v7503_v55 = vunpack.c.h.bf16 %v7518_v35 }
 0x1a8   : > { %522 = vst.msk [vmem:[#allocation2 + $0x30] sm:$0xff] %vm396_vm0, %v520_v50  ;;  %636 = vrot.lane.b32.xlu1 %v632_v47, %s9985_s22  ;;  %718 = vrot.lane.b32.xlu0 %v713_v43, %s9988_s13  ;;  %v2046_v43 = vld [vmem:[#allocation4 + $0x2b0] sm:$0xff]  ;;  %v2044_v50 = vld [vmem:[#allocation4 + $0x2a0] sm:$0xff] }
 0x1a9   : > { %993 = vst.msk [vmem:[#allocation2 + $0x30] sm:$0xff] %vm988_vm2, %v9757_v41  ;;  %v707_v17 = vpop.permute.xlu0 %706  ;;  %v784_v41 = vadd.f32 %v10371_v53, %v10270_v26  ;;  %v9818_v20 = vpack.i.bf16 %v7503_v55, %v7502_v37  ;;  %v2045_v26 = vld [vmem:[#allocation4 + $0x2a8] sm:$0xff]  ;;  %v1945_v37 = vld [vmem:[#allocation4 + $0xf0] sm:$0xff] }
 0x1aa   : > { %v712_v14 = vadd.f32 %v707_v17, %v10296_v32  ;;  %v2054_v32 = vld [vmem:[#allocation4 + $0x2f0] sm:$0xff]  ;;  %v2043_v17 = vld [vmem:[#allocation4 + $0x298] sm:$0xff] }
 0x1ab   : > { %v1929_v55 = vld [vmem:[#allocation4 + $0x70] sm:$0xff] }
 0x1ac   : > { %9799 = vrot.lane.b32.xlu1 %v9798_v3, %s9982_s19  ;;  %696 = vrot.lane.b32.xlu0 %v692_v46, %s9987_s20  ;;  %v1021_v52 = vld [vmem:[#allocation2 + $0x10] sm:$0xff]  ;;  %v7498_v46 = vunpack.c.l.bf16 %v7517_v57 }
 0x1ad   : > { %v499_v60 = vpop.permute.xlu0 %498  ;;  %8951 = vmatprep.mubr.f32.mxu1 %v1021_v52  ;;  %v1363_v18 = vmul.f32 %v10483_v36, %v1021_v52  ;;  %v7499_v52 = vunpack.c.h.bf16 %v7517_v57  ;;  %v1943_v57 = vld [vmem:[#allocation4 + $0xe0] sm:$0xff] }
 0x1ae   : > { %v504_v21 = vadd.f32 %v499_v60, %v10445_v16  ;;  %8952 = vmatmul.mubr.f32.vlgmr.msra.gmra.mxu1 %v10493_v59  ;;  %v2042_v60 = vld [vmem:[#allocation4 + $0x290] sm:$0xff] }
 0x1af   : > { %v1400_v42 = vadd.f32 %v10491_v63, %v1363_v18  ;;  %9000 = vmatpush3.msra.mxu1 %v2055_v49 }
 0x1b0   : > { %506 = vst.msk [vmem:[#allocation2 + $0x20] sm:$0xff] %vm396_vm0, %v504_v21  ;;  %676 = vrot.lane.b32.xlu1 %v672_v58, %s9987_s20  ;;  %9804 = vrot.lane.b32.xlu0 %v9803_v6, %s9982_s19  ;;  %v1025_v38 = vld [vmem:[#allocation2 + $0x30] sm:$0xff]  ;;  %v1496_v6 = vlaneseq  ;;  %v9813_v58 = vpack.i.bf16 %v7499_v52, %v7498_v46  ;;  %v1927_v46 = vld [vmem:[#allocation4 + $0x60] sm:$0xff] }
 0x1b1   : > { %991 = vst.msk [vmem:[#allocation2 + $0x20] sm:$0xff] %vm988_vm2, %v9752_v5  ;;  %v10565_v7 = vmax.f32 %v1400_v42, 0.0  ;;  %v727_v45 = vpop.permute.xlu0 %726  ;;  %v1367_v16 = vmul.f32 %v10483_v36, %v1025_v38  ;;  %9001 = vmatprep.subr.mxu1 %v2054_v32 }
 0x1b2   : > { %v732_v59 = vadd.f32 %v727_v45, %v10283_v29  ;;  %9002 = vmatpush3.msra.mxu1 %v2054_v32  ;;  %v10613_v21 = vshrl.u32 %v1496_v6, 7  ;;  %v10698_v6 = vld [vmem:[#allocation2] sm:$0xff] }
 0x1b3   : > { %1464 = vst [vmem:[#allocation2 + $0x10] sm:$0xff] %v10565_v7  ;;  %2120 = vmatprep.mubr.f32.mxu0 %v10565_v7  ;;  %v1404_v23 = vadd.f32 %v10491_v63, %v1367_v16  ;;  %9003 = vmatprep.subr.mxu1 %v2053_v62 }
 0x1b4   : > { %738 = vrot.lane.b32.xlu1 %v733_v34, %s9988_s13  ;;  %736 = vrot.lane.b32.xlu0 %v732_v59, %s9988_s13  ;;  %v1517_v13 = vand.u32 15, %v10613_v21  ;;  %vm1833_vm4 = vcmp.lt.s32.totalorder %v10613_v21, 1  ;;  %vm1882_vm11 = vcmp.lt.s32.totalorder %v10613_v21, 7 }
 0x1b5   : > { %v10577_v8 = vmax.f32 %v1404_v23, 0.0  ;;  %v769_v56 = vpop.permute.xlu0 %768  ;;  %9004 = vmatpush3.msra.mxu1 %v2053_v62 }
 0x1b6   : > { %v773_v28 = vadd.f32 %v769_v56, %v10299_v33  ;;  %v2048_v33 = vld [vmem:[#allocation4 + $0x2c0] sm:$0xff]  ;;  %vm1705_vm3 = vcmp.ne.s32.totalorder %v1517_v13, 0  ;;  %v1930_v56 = vld [vmem:[#allocation4 + $0x78] sm:$0xff] }
 0x1b7   : > { %1468 = vst [vmem:[#allocation2 + $0x30] sm:$0xff] %v10577_v8  ;;  %v1926_v13 = vld [vmem:[#allocation4 + $0x58] sm:$0xff] }
 0x1b8   : > { %716 = vrot.lane.b32.xlu1 %v712_v14, %s9988_s13  ;;  %758 = vrot.lane.b32.xlu0 %v753_v22, %s9989_s18  ;;  %v1023_v29 = vld [vmem:[#allocation2 + $0x20] sm:$0xff]  ;;  %v1499_v14 = vadd.s32 16, %v10613_v21  ;;  %s7439_s13 = sshll.u32 %s10059_s9, 12  ;;  %s14507_s9 = scalar_lea.sflag [#allocation6], %s339_s24 }
 0x1b9   : > { %8954 = vmatprep.mubr.f32.mxu1 %v1023_v29  ;;  %v1365_v27 = vmul.f32 %v10483_v36, %v1023_v29  ;;  %v10602_v53 = vpop.permute.xlu0 %9759  ;;  %v2040_v22 = vld [vmem:[#allocation4 + $0x280] sm:$0xff]  ;;  %v10638_v29 = vrot.slane %v10565_v7, 7  ;;  %s14499_s17 = scalar_lea.hbm %s14556_s8, %s7439_s13 }
 0x1ba   : > { %8955 = vmatmul.mubr.f32.gmra.mxu1 %v10521_v10  ;;  %v2052_v10 = vld [vmem:[#allocation4 + $0x2e0] sm:$0xff]  ;;  %v9761_v5 = vunpack.i.l.bf16 %v10602_v53  ;;  %v1531_v62 = vand.u32 15, %v1499_v14  ;;  %v1925_v14 = vld [vmem:[#allocation4 + $0x50] sm:$0xff] }
 0x1bb   : > { %v1402_v30 = vadd.f32 %v10491_v63, %v1365_v27  ;;  %8957 = vmatprep.mubr.f32.mxu1 %v1025_v38  ;;  %9005 = vmatprep.subr.mxu1 %v2052_v10  ;;  %v1962_v27 = vld [vmem:[#allocation4 + $0x178] sm:$0xff] }
 0x1bc   : > { %9809 = vrot.lane.b32.xlu1 %v9808_v4, %s9982_s19  ;;  %9006 = vmatpush3.msra.mxu1 %v2052_v10  ;;  %vm10671_vm5 = vcmp.ne.s32.totalorder %v1531_v62, 0 }
 0x1bd   : > { %v10589_v11 = vmax.f32 %v1402_v30, 0.0  ;;  %9007 = vmatprep.subr.mxu1 %v2051_v31  ;;  %v10604_v47 = vpop.permute.xlu0 %9769 }
 0x1be   : > { %9008 = vmatpush3.msra.mxu1 %v2051_v31  ;;  %v9771_v30 = vunpack.i.l.bf16 %v10604_v47  ;;  %v1820_v31 = vrot.slane %v10507_v54, 7 }
 0x1bf   : > { %1466 = vst [vmem:[#allocation2 + $0x20] sm:$0xff] %v10589_v11  ;;  %9009 = vmatprep.subr.mxu1 %v2050_v25  ;;  %v1821_v35 = vrot.slane %v10589_v11, 7 }
 0x1c0   : > { %756 = vrot.lane.b32.xlu1 %v752_v2, %s9989_s18  ;;  %9010 = vmatpush3.msra.mxu1 %v2050_v25  ;;  %v9762_v25 = vunpack.i.h.bf16 %v10602_v53  ;;  %v1928_v53 = vld [vmem:[#allocation4 + $0x68] sm:$0xff] }
 0x1c1   : > { %9011 = vmatprep.subr.mxu1 %v2049_v44 }
 0x1c2   : > { %9012 = vmatpush3.msra.mxu1 %v2049_v44 }
 0x1c3   : > { %9013 = vmatprep.subr.mxu1 %v2048_v33 }
 0x1c4   : > { %778 = vrot.lane.b32.xlu1 %v773_v28, %s9989_s18  ;;  %9014 = vmatpush3.msra.mxu1 %v2048_v33  ;;  %v1501_v33 = vadd.s32 32, %v10613_v21 }
 0x1c5   : > { %9015 = vmatprep.subr.mxu1 %v2047_v48 }
 0x1c6   : > { %9016 = vmatpush3.msra.mxu1 %v2047_v48  ;;  %v1944_v48 = vld [vmem:[#allocation4 + $0xe8] sm:$0xff] }
 0x1c7   : > { %9017 = vmatprep.subr.mxu1 %v2046_v43 }
 0x1c8   : > { %788 = vrot.lane.b32.xlu1 %v784_v41, %s9990_s21  ;;  %9018 = vmatpush3.msra.mxu1 %v2046_v43 }
 0x1c9   : > { %9019 = vmatprep.subr.mxu1 %v2045_v26 }
 0x1ca   : > { %9020 = vmatpush3.msra.mxu1 %v2045_v26 }
 0x1cb   : > { %9021 = vmatprep.subr.mxu1 %v2044_v50 }
 0x1cc   : > { %9819 = vrot.lane.b32.xlu1 %v9818_v20, %s9982_s19  ;;  %9022 = vmatpush3.msra.mxu1 %v2044_v50 }
 0x1cd   : > { %9023 = vmatprep.subr.mxu1 %v2043_v17 }
 0x1ce   : > { %9024 = vmatpush3.msra.mxu1 %v2043_v17 }
 0x1cf   : > { %9025 = vmatprep.subr.mxu1 %v2042_v60 }
 0x1d0   : > { %9026 = vmatpush3.msra.mxu1 %v2042_v60  ;;  %v10703_v60 = vsel %vm10671_vm5, 1.0, %v10698_v6 }
 0x1d1   : > { %9027 = vmatprep.subr.mxu1 %v2041_v15  ;;  %14814 = vst [vmem:[#allocation14_spill] sm:$0xff] %v10703_v60 }
 0x1d2   : > { %9028 = vmatpush3.msra.mxu1 %v2041_v15 }
 0x1d3   : > { %9029 = vmatprep.subr.mxu1 %v2040_v22 }
 0x1d4   : > { %9030 = vmatpush3.msra.mxu1 %v2040_v22  ;;  %v1503_v22 = vadd.s32 48, %v10613_v21 }
 0x1d5   : > { %9055 = vmatprep.subr.mxu1 %v1962_v27 }
 0x1ea   : > { %v639_v3 = vpop.permute.xlu1 %638  ;;  %v543_v9 = vpop.permute.xlu0 %542 }
 0x1eb   : > { %643 = vst.msk [vmem:[#allocation2 + $0x88] sm:$0xff] %vm396_vm0, %v639_v3  ;;  %547 = vst.msk [vmem:[#allocation2 + $0x48] sm:$0xff] %vm396_vm0, %v543_v9  ;;  %v10686_v3 = vsel %vm1833_vm4, %v1820_v31, %v1821_v35 }
 0x1ec   : > { %1004 = vst.msk [vmem:[#allocation2 + $0x88] sm:$0xff] %vm988_vm2, %v9747_v51 }
 0x1ee   : > { %v767_v18 = vpop.permute.xlu1 %766 }
 0x1ef   : > { %v772_v0 = vadd.f32 %v767_v18, %v10405_v61  ;;  %v1545_v18 = vand.u32 15, %v1501_v33 }
 0x1f1   : > { %776 = vrot.lane.b32.xlu0 %v772_v0, %s9989_s18  ;;  %vm10727_vm6 = vcmp.ne.s32.totalorder %v1545_v18, 0  ;;  %s7299_s18 = sshll.u32 %s11103_s10, 4  ;;  %s14502_s18 = int_to_ptr.vmem [resolvable:$true] %s7299_s18 }
 0x1f2   : > { %v517_v42 = vpop.permute.xlu1 %516  ;;  %s9908_s22 = scalar_lea.vmem %s14502_s18, 4096  ;;  %p9915_p11 = scmp.lt.s32.totalorder %s14502_s18, %s9913_s25 }
 0x1f3   : > { %v10616_v38 = vld [vmem:[#allocation2 + $0x88] sm:$0xff]  ;;  %v521_v45 = vadd.f32 %v517_v42, %v10317_v39  ;;  %v785_v39 = vadd.f32 %v10155_v12, %v10265_v24  ;;  %v10644_v12 = vsel %vm1705_vm3, 1.0, %v9984_v19  ;;  %p9909_p10 = scmp.ne.s32.totalorder %s14502_s18, %s9908_s22  ;;  %p9916_p0 = scmp.lt.s32.totalorder %s9914_s12, %s9908_s22 }
 0x1f4   : > { %v1378_v16 = vmul.f32 %v10483_v36, %v10616_v38  ;;  %14811 = vst [vmem:[#allocation13_spill] sm:$0xff] %v10644_v12 }
 0x1f5   : > { %523 = vst.msk [vmem:[#allocation2 + $0x38] sm:$0xff] %vm396_vm0, %v521_v45  ;;  %9814 = vrot.lane.b32.xlu0 %v9813_v58, %s9982_s19  ;;  %v1942_v58 = vld [vmem:[#allocation4 + $0xd8] sm:$0xff]  ;;  %p9910_p12 = pnand %p9909_p10, %p10076_p5  ;;  %p9917_p1 = por %p9916_p0, %p9915_p11 }
 0x1f6   : > { %v1415_v61 = vadd.f32 %v10491_v63, %v1378_v16  ;;  %994 = vst.msk [vmem:[#allocation2 + $0x38] sm:$0xff] %vm988_vm2, %v9761_v5  ;;  %v10626_v34 = vpop.permute.xlu1 %9764  ;;  %v591_v59 = vpop.permute.xlu0 %590  ;;  %v1972_v5 = vmul.f32 %v10703_v60, %v10686_v3 }
 0x1f7   : > { %v9766_v23 = vunpack.i.l.bf16 %v10626_v34  ;;  %595 = vst.msk [vmem:[#allocation2 + $0x68] sm:$0xff] %vm396_vm0, %v591_v59  ;;  %v9767_v41 = vunpack.i.h.bf16 %v10626_v34  ;;  %v1822_v34 = vrot.slane %v10539_v40, 7  ;;  %v1823_v59 = vrot.slane %v10577_v8, 7  ;;  %p9911_p8 = pneg %p9910_p12 }
 0x1f8   : > { %v10632_v1 = vmax.f32 %v1415_v61, 0.0 }
 0x1f9   : > { %996 = vst.msk [vmem:[#allocation2 + $0x48] sm:$0xff] %vm988_vm2, %v9766_v23  ;;  %790 = vrot.lane.b32.xlu0 %v785_v39, %s9990_s21  ;;  %v1941_v23 = vld [vmem:[#allocation4 + $0xd0] sm:$0xff]  ;;  %p9918_p3 = pnand %p9917_p1, %p9911_p8 }
 0x1fa   : > { %1479 = vst [vmem:[#allocation2 + $0x88] sm:$0xff] %v10632_v1  ;;  %v10641_v4 = vpop.permute.xlu1 %9774  ;;  %v1966_v24 = vrot.slane %v10632_v1, 7  ;;  %v10650_v7 = vpop.permute.xlu0 %9779 }
 0x1fb   : > { %v9776_v49 = vunpack.i.l.bf16 %v10641_v4  ;;  %v9781_v52 = vunpack.i.l.bf16 %v10650_v7 }
 0x1fc   : > { %v1969_v19 = vsel %vm1833_vm4, %v1966_v24, %v10638_v29 }
 0x1fd   : > { %1000 = vst.msk [vmem:[#allocation2 + $0x68] sm:$0xff] %vm988_vm2, %v9776_v49  ;;  %v1970_v32 = vmul.f32 %v10644_v12, %v1969_v19  ;;  %v1026_v2 = vld [vmem:[#allocation2 + $0x38] sm:$0xff]  ;;  %v1940_v19 = vld [vmem:[#allocation4 + $0xc8] sm:$0xff] }
 0x1fe   : > { %v567_v10 = vpop.permute.xlu1 %566  ;;  %8958 = vmatmul.mubr.f32.gmra.mxu1 %v1026_v2  ;;  %v1368_v28 = vmul.f32 %v10483_v36, %v1026_v2 }
 0x1ff   : > { %571 = vst.msk [vmem:[#allocation2 + $0x58] sm:$0xff] %vm396_vm0, %v567_v10  ;;  %2121 = vmatmul.mubr.f32.vlgmr.msra.gmra.mxu0 %v1970_v32 }
 0x200   : > { %998 = vst.msk [vmem:[#allocation2 + $0x58] sm:$0xff] %vm988_vm2, %v9771_v30  ;;  %2125 = vmatprep.mubr.f32.mxu0 %v10507_v54  ;;  %v1405_v20 = vadd.f32 %v10491_v63, %v1368_v28  ;;  %v10668_v44 = vld [vmem:[#allocation2 + $0x48] sm:$0xff]  ;;  %7683 = vmatpush3.msra.mxu0 %v1930_v56  ;;  %v10680_v54 = vsel %vm1833_vm4, %v10638_v29, %v1820_v31 }
 0x201   : > { %v1370_v26 = vmul.f32 %v10483_v36, %v10668_v44  ;;  %7684 = vmatprep.subr.mxu0 %v1945_v37  ;;  %v10739_v56 = vsel %vm1833_vm4, %v1821_v35, %v1822_v34  ;;  %v1924_v31 = vld [vmem:[#allocation4 + $0x48] sm:$0xff]  ;;  %v10754_v35 = vsel %vm10727_vm6, 1.0, %v10698_v6  ;;  %v1559_v37 = vand.u32 15, %v1503_v22 }
 0x202   : > { %v541_v50 = vpop.permute.xlu1 %540  ;;  %v565_v51 = vpop.permute.xlu0 %564  ;;  %v10688_v9 = vmax.f32 %v1405_v20, 0.0  ;;  %7685 = vmatpush3.msra.mxu0 %v1929_v55  ;;  %14817 = vst [vmem:[#allocation15_spill] sm:$0xff] %v10754_v35  ;;  %v1505_v55 = vadd.s32 64, %v10613_v21 }
 0x203   : > { %546 = vst.msk [vmem:[#allocation2 + $0x40] sm:$0xff] %vm396_vm0, %v541_v50  ;;  %570 = vst.msk [vmem:[#allocation2 + $0x50] sm:$0xff] %vm396_vm0, %v565_v51  ;;  %2126 = vmatmul.mubr.f32.gmra.mxu0 %v10680_v54  ;;  %v1407_v17 = vadd.f32 %v10491_v63, %v1370_v26  ;;  %7686 = vmatprep.subr.mxu0 %v1944_v48  ;;  %v1923_v26 = vld [vmem:[#allocation4 + $0x40] sm:$0xff]  ;;  %vm10776_vm7 = vcmp.ne.s32.totalorder %v1559_v37, 0 }
 0x204   : > { %995 = vst.msk [vmem:[#allocation2 + $0x40] sm:$0xff] %vm988_vm2, %v9762_v25  ;;  %997 = vst.msk [vmem:[#allocation2 + $0x50] sm:$0xff] %vm988_vm2, %v9767_v41  ;;  %2130 = vmatprep.mubr.f32.mxu0 %v10589_v11  ;;  %v10706_v0 = vld [vmem:[#allocation2 + $0x68] sm:$0xff]  ;;  %7687 = vmatpush3.msra.mxu0 %v1928_v53  ;;  %v1939_v25 = vld [vmem:[#allocation4 + $0xc0] sm:$0xff]  ;;  %v9777_v41 = vunpack.i.h.bf16 %v10641_v4  ;;  %v1573_v18 = vand.u32 15, %v1505_v55 }
 0x205   : > { %1469 = vst [vmem:[#allocation2 + $0x38] sm:$0xff] %v10688_v9  ;;  %v10710_v42 = vmax.f32 %v1407_v17, 0.0  ;;  %v1374_v45 = vmul.f32 %v10483_v36, %v10706_v0  ;;  %7688 = vmatprep.subr.mxu0 %v1943_v57  ;;  %v1824_v57 = vrot.slane %v10688_v9, 7  ;;  %v1938_v17 = vld [vmem:[#allocation4 + $0xb8] sm:$0xff]  ;;  %v1919_v37 = vld [vmem:[#allocation4 + $0x20] sm:$0xff] }
 0x206   : > { %v615_v16 = vpop.permute.xlu1 %614  ;;  %v10714_v61 = vpop.permute.xlu0 %9784  ;;  %7689 = vmatpush3.msra.mxu0 %v1927_v46  ;;  %vm10814_vm8 = vcmp.ne.s32.totalorder %v1573_v18, 0 }
 0x207   : > { %619 = vst.msk [vmem:[#allocation2 + $0x78] sm:$0xff] %vm396_vm0, %v615_v16  ;;  %2131 = vmatmul.mubr.f32.gmra.mxu0 %v1972_v5  ;;  %1471 = vst [vmem:[#allocation2 + $0x48] sm:$0xff] %v10710_v42  ;;  %v10720_v39 = vld [vmem:[#allocation2 + $0x58] sm:$0xff]  ;;  %v1411_v15 = vadd.f32 %v10491_v63, %v1374_v45  ;;  %7690 = vmatprep.subr.mxu0 %v1942_v58  ;;  %v9787_v49 = vunpack.i.h.bf16 %v10714_v61  ;;  %v9772_v5 = vunpack.i.h.bf16 %v10604_v47  ;;  %v9786_v27 = vunpack.i.l.bf16 %v10714_v61 }
 0x208   : > { %1002 = vst.msk [vmem:[#allocation2 + $0x78] sm:$0xff] %vm988_vm2, %v9781_v52  ;;  %2135 = vmatprep.mubr.f32.mxu0 %v10539_v40  ;;  %v1372_v30 = vmul.f32 %v10483_v36, %v10720_v39  ;;  %7691 = vmatpush3.msra.mxu0 %v1926_v13  ;;  %v10745_v40 = vsel %vm1833_vm4, %v1822_v34, %v1823_v59  ;;  %v1922_v58 = vld [vmem:[#allocation4 + $0x38] sm:$0xff]  ;;  %v1937_v34 = vld [vmem:[#allocation4 + $0xb0] sm:$0xff] }
 0x209   : > { %v10733_v32 = vmax.f32 %v1411_v15, 0.0  ;;  %7692 = vmatprep.subr.mxu0 %v1941_v23  ;;  %v1974_v43 = vmul.f32 %v10754_v35, %v10745_v40  ;;  %v1921_v23 = vld [vmem:[#allocation4 + $0x30] sm:$0xff]  ;;  %v10801_v22 = vsel %vm1833_vm4, %v1823_v59, %v1824_v57  ;;  %v1826_v59 = vrot.slane %v10710_v42, 7 }
 0x20a   : > { %v659_v62 = vpop.permute.xlu1 %658  ;;  %v679_v2 = vpop.permute.xlu0 %678  ;;  %v1409_v10 = vadd.f32 %v10491_v63, %v1372_v30  ;;  %7693 = vmatpush3.msra.mxu0 %v1925_v14 }
 0x20b   : > { %663 = vst.msk [vmem:[#allocation2 + $0x98] sm:$0xff] %vm396_vm0, %v659_v62  ;;  %683 = vst.msk [vmem:[#allocation2 + $0xa8] sm:$0xff] %vm396_vm0, %v679_v2  ;;  %2136 = vmatmul.mubr.f32.gmra.mxu0 %v10739_v56  ;;  %v1027_v11 = vld [vmem:[#allocation2 + $0x40] sm:$0xff]  ;;  %v1029_v28 = vld [vmem:[#allocation2 + $0x50] sm:$0xff]  ;;  %7694 = vmatprep.subr.mxu0 %v1940_v19 }
 0x20c   : > { %1475 = vst [vmem:[#allocation2 + $0x68] sm:$0xff] %v10733_v32  ;;  %1006 = vst.msk [vmem:[#allocation2 + $0x98] sm:$0xff] %vm988_vm2, %v9787_v49  ;;  %8960 = vmatprep.mubr.f32.mxu1 %v1027_v11  ;;  %v1369_v20 = vmul.f32 %v10483_v36, %v1027_v11  ;;  %2140 = vmatprep.mubr.f32.mxu0 %v10577_v8  ;;  %v1371_v33 = vmul.f32 %v10483_v36, %v1029_v28  ;;  %v10763_v48 = vmax.f32 %v1409_v10, 0.0  ;;  %v1920_v19 = vld [vmem:[#allocation4 + $0x28] sm:$0xff]  ;;  %v1935_v11 = vld [vmem:[#allocation4 + $0xa0] sm:$0xff] }
 0x20d   : > { %8961 = vmatmul.mubr.f32.gmra.mxu1 %v10668_v44  ;;  %7695 = vmatpush3.msra.mxu0 %v1924_v31  ;;  %v10811_v8 = vsel %vm10776_vm7, 1.0, %v10698_v6 }
 0x20e   : > { %v10768_v53 = vpop.permute.xlu1 %9789  ;;  %v613_v4 = vpop.permute.xlu0 %612  ;;  %v1406_v50 = vadd.f32 %v10491_v63, %v1369_v20  ;;  %8963 = vmatprep.mubr.f32.mxu1 %v1029_v28  ;;  %v1408_v51 = vadd.f32 %v10491_v63, %v1371_v33  ;;  %1473 = vst [vmem:[#allocation2 + $0x58] sm:$0xff] %v10763_v48  ;;  %7696 = vmatprep.subr.mxu0 %v1939_v25  ;;  %14820 = vst [vmem:[#allocation16_spill] sm:$0xff] %v10811_v8  ;;  %v1934_v20 = vld [vmem:[#allocation4 + $0x98] sm:$0xff] }
 0x20f   : > { %v9792_v44 = vunpack.i.h.bf16 %v10768_v53  ;;  %618 = vst.msk [vmem:[#allocation2 + $0x70] sm:$0xff] %vm396_vm0, %v613_v4  ;;  %2141 = vmatmul.mubr.f32.gmra.mxu0 %v1974_v43  ;;  %v10780_v52 = vld [vmem:[#allocation2 + $0x78] sm:$0xff]  ;;  %v10840_v43 = vsel %vm10814_vm8, 1.0, %v10698_v6 }
 0x210   : > { %1001 = vst.msk [vmem:[#allocation2 + $0x70] sm:$0xff] %vm988_vm2, %v9777_v41  ;;  %v10784_v45 = vmax.f32 %v1406_v50, 0.0  ;;  %v10786_v13 = vmax.f32 %v1408_v51, 0.0  ;;  %2145 = vmatprep.mubr.f32.mxu0 %v10688_v9  ;;  %v1376_v16 = vmul.f32 %v10483_v36, %v10780_v52  ;;  %7697 = vmatpush3.msra.mxu0 %v1923_v26  ;;  %14823 = vst [vmem:[#allocation17_spill] sm:$0xff] %v10840_v43  ;;  %v1507_v26 = vadd.s32 80, %v10613_v21  ;;  %v1918_v50 = vld [vmem:[#allocation4 + $0x18] sm:$0xff] }
 0x211   : > { %1008 = vst.msk [vmem:[#allocation2 + $0xa8] sm:$0xff] %vm988_vm2, %v9792_v44  ;;  %8964 = vmatmul.mubr.f32.gmra.mxu1 %v10720_v39  ;;  %7698 = vmatprep.subr.mxu0 %v1938_v17  ;;  %v1936_v39 = vld [vmem:[#allocation4 + $0xa8] sm:$0xff]  ;;  %v9782_v51 = vunpack.i.h.bf16 %v10650_v7  ;;  %v1933_v7 = vld [vmem:[#allocation4 + $0x90] sm:$0xff] }
 0x212   : > { %v589_v47 = vpop.permute.xlu1 %588  ;;  %v10793_v15 = vpop.permute.xlu0 %9794  ;;  %1470 = vst [vmem:[#allocation2 + $0x40] sm:$0xff] %v10784_v45  ;;  %1472 = vst [vmem:[#allocation2 + $0x50] sm:$0xff] %v10786_v13  ;;  %v1825_v14 = vrot.slane %v10784_v45, 7  ;;  %v1413_v49 = vadd.f32 %v10491_v63, %v1376_v16  ;;  %7699 = vmatpush3.msra.mxu0 %v1922_v58  ;;  %v1827_v31 = vrot.slane %v10786_v13, 7 }
 0x213   : > { %594 = vst.msk [vmem:[#allocation2 + $0x60] sm:$0xff] %vm396_vm0, %v589_v47  ;;  %2146 = vmatmul.mubr.f32.gmra.mxu0 %v10801_v22  ;;  %7700 = vmatprep.subr.mxu0 %v1937_v34  ;;  %v10818_v62 = vld [vmem:[#allocation2 + $0x98] sm:$0xff]  ;;  %v9797_v61 = vunpack.i.h.bf16 %v10793_v15  ;;  %v1917_v47 = vld [vmem:[#allocation4 + $0x10] sm:$0xff]  ;;  %v9796_v30 = vunpack.i.l.bf16 %v10793_v15 }
 0x214   : > { %999 = vst.msk [vmem:[#allocation2 + $0x60] sm:$0xff] %vm988_vm2, %v9772_v5  ;;  %2150 = vmatprep.mubr.f32.mxu0 %v10784_v45  ;;  %v10825_v2 = vsel %vm1833_vm4, %v1824_v57, %v1825_v14  ;;  %v10827_v10 = vmax.f32 %v1413_v49, 0.0  ;;  %7701 = vmatpush3.msra.mxu0 %v1921_v23  ;;  %v1380_v55 = vmul.f32 %v10483_v36, %v10818_v62  ;;  %v1509_v23 = vadd.s32 96, %v10613_v21 }
 0x215   : > { %v1976_v28 = vmul.f32 %v10811_v8, %v10825_v2  ;;  %7702 = vmatprep.subr.mxu0 %v1936_v39  ;;  %v10851_v17 = vsel %vm1833_vm4, %v1825_v14, %v1826_v59  ;;  %v10857_v44 = vsel %vm1833_vm4, %v1826_v59, %v1827_v31  ;;  %v1587_v39 = vand.u32 15, %v1507_v26 }
 0x216   : > { %v699_v25 = vpop.permute.xlu1 %698  ;;  %v657_v41 = vpop.permute.xlu0 %656  ;;  %1477 = vst [vmem:[#allocation2 + $0x78] sm:$0xff] %v10827_v10  ;;  %7703 = vmatpush3.msra.mxu0 %v1920_v19  ;;  %v1417_v4 = vadd.f32 %v10491_v63, %v1380_v55  ;;  %v1978_v49 = vmul.f32 %v10840_v43, %v10857_v44 }
 0x217   : > { %703 = vst.msk [vmem:[#allocation2 + $0xb8] sm:$0xff] %vm396_vm0, %v699_v25  ;;  %662 = vst.msk [vmem:[#allocation2 + $0x90] sm:$0xff] %vm396_vm0, %v657_v41  ;;  %2151 = vmatmul.mubr.f32.gmra.mxu0 %v1976_v28  ;;  %v1033_v33 = vld [vmem:[#allocation2 + $0x70] sm:$0xff]  ;;  %7704 = vmatprep.subr.mxu0 %v1935_v11  ;;  %v1828_v11 = vrot.slane %v10763_v48, 7  ;;  %v1601_v41 = vand.u32 15, %v1509_v23  ;;  %vm10885_vm9 = vcmp.ne.s32.totalorder %v1587_v39, 0 }
 0x218   : > { %1010 = vst.msk [vmem:[#allocation2 + $0xb8] sm:$0xff] %vm988_vm2, %v9797_v61  ;;  %1005 = vst.msk [vmem:[#allocation2 + $0x90] sm:$0xff] %vm988_vm2, %v9786_v27  ;;  %v1375_v57 = vmul.f32 %v10483_v36, %v1033_v33  ;;  %2155 = vmatprep.mubr.f32.mxu0 %v10710_v42  ;;  %7705 = vmatpush3.msra.mxu0 %v1919_v37  ;;  %v10859_v46 = vld [vmem:[#allocation2 + $0xa8] sm:$0xff]  ;;  %v1449_v18 = vmax.f32 %v1417_v4, 0.0 }
 0x219   : > { %7706 = vmatprep.subr.mxu0 %v1934_v20  ;;  %v1382_v58 = vmul.f32 %v10483_v36, %v10859_v46  ;;  %v1932_v27 = vld [vmem:[#allocation4 + $0x88] sm:$0xff]  ;;  %v1931_v20 = vld [vmem:[#allocation4 + $0x80] sm:$0xff]  ;;  %vm10916_vm10 = vcmp.ne.s32.totalorder %v1601_v41, 0 }
 0x21a   : > { %v637_v5 = vpop.permute.xlu1 %636  ;;  %v719_v16 = vpop.permute.xlu0 %718  ;;  %v1412_v34 = vadd.f32 %v10491_v63, %v1375_v57  ;;  %7707 = vmatpush3.msra.mxu0 %v1918_v50  ;;  %1481 = vst [vmem:[#allocation2 + $0x98] sm:$0xff] %v1449_v18  ;;  %v1916_v37 = vld [vmem:[#allocation4 + $0x8] sm:$0xff]  ;;  %v1915_v50 = vld [vmem:[#allocation4] sm:$0xff]  ;;  %v10898_v57 = vsel %vm1833_vm4, %v1827_v31, %v1828_v11 }
 0x21b   : > { %642 = vst.msk [vmem:[#allocation2 + $0x80] sm:$0xff] %vm396_vm0, %v637_v5  ;;  %723 = vst.msk [vmem:[#allocation2 + $0xc8] sm:$0xff] %vm396_vm0, %v719_v16  ;;  %v1031_v14 = vld [vmem:[#allocation2 + $0x60] sm:$0xff]  ;;  %2156 = vmatmul.mubr.f32.gmra.mxu0 %v10851_v17  ;;  %7708 = vmatprep.subr.mxu0 %v1933_v7  ;;  %v1419_v59 = vadd.f32 %v10491_v63, %v1382_v58  ;;  %v10903_v58 = vld [vmem:[#allocation4 + $0x478] sm:$0xff] }
 0x21c   : > { %1003 = vst.msk [vmem:[#allocation2 + $0x80] sm:$0xff] %vm988_vm2, %v9782_v51  ;;  %8966 = vmatprep.mubr.f32.mxu1 %v1031_v14  ;;  %v1373_v19 = vmul.f32 %v10483_v36, %v1031_v14  ;;  %v10874_v61 = vmax.f32 %v1412_v34, 0.0  ;;  %2160 = vmatprep.mubr.f32.mxu0 %v10786_v13  ;;  %v9791_v51 = vunpack.i.l.bf16 %v10768_v53  ;;  %v10914_v34 = vsel %vm10885_vm9, 1.0, %v10698_v6 }
 0x21d   : > { %8967 = vmatmul.mubr.f32.gmra.mxu1 %v10706_v0  ;;  %7709 = vmatpush3.msra.mxu0 %v1917_v47  ;;  %v1451_v28 = vmax.f32 %v1419_v59, 0.0  ;;  %14826 = vst [vmem:[#allocation18_spill] sm:$0xff] %v10914_v34 }
 0x21e   : > { %v1410_v55 = vadd.f32 %v10491_v63, %v1373_v19  ;;  %v10880_v25 = vpop.permute.xlu1 %9799  ;;  %v697_v15 = vpop.permute.xlu0 %696  ;;  %8969 = vmatprep.mubr.f32.mxu1 %v1033_v33  ;;  %1476 = vst [vmem:[#allocation2 + $0x70] sm:$0xff] %v10874_v61  ;;  %7710 = vmatprep.subr.mxu0 %v1932_v27  ;;  %v1831_v39 = vrot.slane %v10874_v61, 7 }
 0x21f   : > { %v9802_v26 = vunpack.i.h.bf16 %v10880_v25  ;;  %702 = vst.msk [vmem:[#allocation2 + $0xb0] sm:$0xff] %vm396_vm0, %v697_v15  ;;  %2161 = vmatmul.mubr.f32.gmra.mxu0 %v1978_v49  ;;  %v1037_v4 = vld [vmem:[#allocation2 + $0x90] sm:$0xff]  ;;  %1483 = vst [vmem:[#allocation2 + $0xa8] sm:$0xff] %v1451_v28  ;;  %v10901_v18 = vld [vmem:[#allocation2 + $0xb8] sm:$0xff]  ;;  %v1830_v49 = vrot.slane %v10733_v32, 7 }
 0x220   : > { %v10890_v33 = vmax.f32 %v1410_v55, 0.0  ;;  %1009 = vst.msk [vmem:[#allocation2 + $0xb0] sm:$0xff] %vm988_vm2, %v9796_v30  ;;  %2165 = vmatprep.mubr.f32.mxu0 %v10763_v48  ;;  %v1379_v7 = vmul.f32 %v10483_v36, %v1037_v4  ;;  %7711 = vmatpush3.msra.mxu0 %v1916_v37  ;;  %v1384_v53 = vmul.f32 %v10483_v36, %v10901_v18 }
 0x221   : > { %1012 = vst.msk [vmem:[#allocation2 + $0xc8] sm:$0xff] %vm988_vm2, %v9802_v26  ;;  %8970 = vmatmul.mubr.f32.gmra.mxu1 %v10780_v52  ;;  %7712 = vmatprep.subr.mxu0 %v1931_v20  ;;  %v10960_v0 = vsel %vm1833_vm4, %v1830_v49, %v1831_v39 }
 0x222   : > { %1474 = vst [vmem:[#allocation2 + $0x60] sm:$0xff] %v10890_v33  ;;  %v677_v5 = vpop.permute.xlu1 %676  ;;  %v9805_v31 = vpop.permute.xlu0 %9804  ;;  %v1829_v16 = vrot.slane %v10890_v33, 7  ;;  %v1416_v52 = vadd.f32 %v10491_v63, %v1379_v7  ;;  %7713 = vmatpush3.msra.mxu0 %v1915_v50  ;;  %v1421_v27 = vadd.f32 %v10491_v63, %v1384_v53 }
 0x223   : > { %682 = vst.msk [vmem:[#allocation2 + $0xa0] sm:$0xff] %vm396_vm0, %v677_v5  ;;  %v9807_v47 = vunpack.i.h.bf16 %v9805_v31  ;;  %v1035_v14 = vld [vmem:[#allocation2 + $0x80] sm:$0xff]  ;;  %2166 = vmatmul.mubr.f32.gmra.mxu0 %v10898_v57  ;;  %9111 = vmatprep.subr.mxu0 %v10903_v58  ;;  %v9806_v59 = vunpack.i.l.bf16 %v9805_v31 }
 0x224   : > { %1007 = vst.msk [vmem:[#allocation2 + $0xa0] sm:$0xff] %vm988_vm2, %v9791_v51  ;;  %8972 = vmatprep.mubr.f32.mxu1 %v1035_v14  ;;  %v1377_v30 = vmul.f32 %v10483_v36, %v1035_v14  ;;  %2170 = vmatprep.mubr.f32.mxu0 %v10890_v33  ;;  %v10932_v19 = vsel %vm1833_vm4, %v1828_v11, %v1829_v16  ;;  %v1448_v28 = vmax.f32 %v1416_v52, 0.0  ;;  %v1453_v55 = vmax.f32 %v1421_v27, 0.0 }
 0x225   : > { %8973 = vmatmul.mubr.f32.gmra.mxu1 %v10616_v38  ;;  %v1980_v37 = vmul.f32 %v10914_v34, %v10932_v19  ;;  %v9801_v36 = vunpack.i.l.bf16 %v10880_v25  ;;  %v10944_v38 = vsel %vm10916_vm10, 1.0, %v10698_v6  ;;  %v1511_v11 = vadd.s32 112, %v10613_v21 }
 0x226   : > { %v1414_v15 = vadd.f32 %v10491_v63, %v1377_v30  ;;  %v739_v41 = vpop.permute.xlu1 %738  ;;  %v737_v20 = vpop.permute.xlu0 %736  ;;  %8975 = vmatprep.mubr.f32.mxu1 %v1037_v4  ;;  %1480 = vst [vmem:[#allocation2 + $0x90] sm:$0xff] %v1448_v28  ;;  %14829 = vst [vmem:[#allocation19_spill] sm:$0xff] %v10944_v38  ;;  %v10954_v25 = vsel %vm1833_vm4, %v1829_v16, %v1830_v49  ;;  %v10965_v4 = vld [vmem:[%s14551_s3] ss:$0 sm:$0xff]  ;;  %v10975_v16 = vld [vmem:[%s14551_s3 + $0x1] ss:$0 sm:$0xff] }
 0x227   : > { %743 = vst.msk [vmem:[#allocation2 + $0xd8] sm:$0xff] %vm396_vm0, %v739_v41  ;;  %742 = vst.msk [vmem:[#allocation2 + $0xd0] sm:$0xff] %vm396_vm0, %v737_v20  ;;  %2171 = vmatmul.mubr.f32.gmra.mxu0 %v1980_v37  ;;  %v1041_v26 = vld [vmem:[#allocation2 + $0xb0] sm:$0xff]  ;;  %v1832_v52 = vrot.slane %v10827_v10, 7  ;;  %v14560_v30 = vrot.slane %v10632_v1, 1 }
 0x228   : > { %1485 = vst [vmem:[#allocation2 + $0xb8] sm:$0xff] %v1453_v55  ;;  %v10947_v63 = vmax.f32 %v1414_v15, 0.0  ;;  %1014 = vst.msk [vmem:[#allocation2 + $0xd8] sm:$0xff] %vm988_vm2, %v9807_v47  ;;  %2175 = vmatprep.mubr.f32.mxu0 %v10733_v32  ;;  %v1383_v50 = vmul.f32 %v10965_v4, %v1041_v26  ;;  %v1044_v51 = vld [vmem:[#allocation2 + $0xc8] sm:$0xff]  ;;  %v1615_v47 = vand.u32 15, %v1511_v11 }
 0x229   : > { %1013 = vst.msk [vmem:[#allocation2 + $0xd0] sm:$0xff] %vm988_vm2, %v9806_v59  ;;  %8976 = vmatmul.mubr.f32.gmra.mxu1 %v10818_v62  ;;  %v1386_v7 = vmul.f32 %v10965_v4, %v1044_v51  ;;  %v1982_v62 = vmul.f32 %v10944_v38, %v10960_v0 }
 0x22a   : > { %1478 = vst [vmem:[#allocation2 + $0x80] sm:$0xff] %v10947_v63  ;;  %v717_v53 = vpop.permute.xlu1 %716  ;;  %v759_v5 = vpop.permute.xlu0 %758  ;;  %v14561_v31 = vrot.slane %v10947_v63, 1  ;;  %v1420_v23 = vadd.f32 %v10975_v16, %v1383_v50  ;;  %v1965_v28 = vrot.slane %v10947_v63, 7  ;;  %vm1719_vm12 = vcmp.ne.s32.totalorder %v1615_v47, 0 }
 0x22b   : > { %722 = vst.msk [vmem:[#allocation2 + $0xc0] sm:$0xff] %vm396_vm0, %v717_v53  ;;  %763 = vst.msk [vmem:[#allocation2 + $0xe8] sm:$0xff] %vm396_vm0, %v759_v5  ;;  %2176 = vmatmul.mubr.f32.gmra.mxu0 %v10954_v25  ;;  %v1039_v14 = vld [vmem:[#allocation2 + $0xa0] sm:$0xff]  ;;  %v1423_v49 = vadd.f32 %v10975_v16, %v1386_v7 }
 0x22c   : > { %1011 = vst.msk [vmem:[#allocation2 + $0xc0] sm:$0xff] %vm988_vm2, %v9801_v36  ;;  %2180 = vmatprep.mubr.f32.mxu0 %v10874_v61  ;;  %8978 = vmatprep.mubr.f32.mxu1 %v1039_v14  ;;  %v1381_v27 = vmul.f32 %v10965_v4, %v1039_v14  ;;  %v1452_v59 = vmax.f32 %v1420_v23, 0.0  ;;  %v10999_v41 = vsel %vm1882_vm11, %v14561_v31, %v14560_v30  ;;  %v11015_v23 = vsel %vm1719_vm12, 1.0, %v10698_v6  ;;  %v11332_v31 = vld [vmem:[#allocation2 + $0x58] sm:$0xff] }
 0x22d   : > { %8979 = vmatmul.mubr.f32.gmra.mxu1 %v10859_v46  ;;  %v1455_v37 = vmax.f32 %v1423_v49, 0.0  ;;  %v11005_v46 = vsel %vm1833_vm4, %v1831_v39, %v1832_v52  ;;  %v1968_v36 = vsel %vm1833_vm4, %v1832_v52, %v1965_v28  ;;  %14830 = vst [vmem:[#allocation20_spill] sm:$0xff] %v11015_v23  ;;  %14850 = vst [vmem:[#allocation32_spill] sm:$0xff] %v11332_v31 }
 0x22e   : > { %v9810_v55 = vpop.permute.xlu1 %9809  ;;  %v1418_v15 = vadd.f32 %v10975_v16, %v1381_v27  ;;  %8981 = vmatprep.mubr.f32.mxu1 %v1041_v26  ;;  %1484 = vst [vmem:[#allocation2 + $0xb0] sm:$0xff] %v1452_v59  ;;  %v1984_v14 = vmul.f32 %v11015_v23, %v1968_v36 }
 0x22f   : > { %v9812_v20 = vunpack.i.h.bf16 %v9810_v55  ;;  %2181 = vmatmul.mubr.f32.gmra.mxu0 %v1982_v62  ;;  %1487 = vst [vmem:[#allocation2 + $0xc8] sm:$0xff] %v1455_v37  ;;  %v1046_v26 = vld [vmem:[#allocation2 + $0xd8] sm:$0xff]  ;;  %v9811_v50 = vunpack.i.l.bf16 %v9810_v55  ;;  %v1817_v55 = vrot.slane %v10698_v6, 7 }
 0x230   : > { %v1045_v11 = vld [vmem:[#allocation2 + $0xd0] sm:$0xff]  ;;  %2185 = vmatprep.mubr.f32.mxu0 %v10827_v10  ;;  %v1450_v7 = vmax.f32 %v1418_v15, 0.0  ;;  %v1388_v5 = vmul.f32 %v10965_v4, %v1046_v26 }
 0x231   : > { %v1387_v53 = vmul.f32 %v10965_v4, %v1045_v11  ;;  %1016 = vst.msk [vmem:[#allocation2 + $0xe8] sm:$0xff] %vm988_vm2, %v9812_v20  ;;  %8982 = vmatmul.mubr.f32.gmra.mxu1 %v10901_v18  ;;  %v1849_v20 = vsel %vm1833_vm4, %v1832_v52, %v1817_v55 }
 0x232   : > { %v757_v39 = vpop.permute.xlu1 %756  ;;  %1482 = vst [vmem:[#allocation2 + $0xa0] sm:$0xff] %v1450_v7  ;;  %v1425_v47 = vadd.f32 %v10975_v16, %v1388_v5 }
 0x233   : > { %v1424_v62 = vadd.f32 %v10975_v16, %v1387_v53  ;;  %762 = vst.msk [vmem:[#allocation2 + $0xe0] sm:$0xff] %vm396_vm0, %v757_v39  ;;  %2186 = vmatmul.mubr.f32.gmra.mxu0 %v11005_v46  ;;  %v1043_v49 = vld [vmem:[#allocation2 + $0xc0] sm:$0xff]  ;;  %v1850_v53 = vmul.f32 %v10644_v12, %v1849_v20  ;;  %v11055_v20 = vld [vmem:[#allocation2 + $0x18] sm:$0xff] }
 0x234   : > { %1015 = vst.msk [vmem:[#allocation2 + $0xe0] sm:$0xff] %vm988_vm2, %v9811_v50  ;;  %2190 = vmatprep.mubr.f32.mxu0 %v10947_v63  ;;  %8984 = vmatprep.mubr.f32.mxu1 %v1043_v49  ;;  %v1385_v18 = vmul.f32 %v10965_v4, %v1043_v49  ;;  %v1457_v59 = vmax.f32 %v1425_v47, 0.0  ;;  %v2794_v49 = vld [vmem:[#allocation4 + $0x468] sm:$0xff] }
 0x235   : > { %v1456_v27 = vmax.f32 %v1424_v62, 0.0  ;;  %8985 = vmatmul.mubr.f32.gmra.mxu1 %v1044_v51 }
 0x236   : > { %v779_v37 = vpop.permute.xlu1 %778  ;;  %v1422_v15 = vadd.f32 %v10975_v16, %v1385_v18  ;;  %8987 = vmatprep.mubr.f32.mxu1 %v1045_v11  ;;  %1489 = vst [vmem:[#allocation2 + $0xd8] sm:$0xff] %v1457_v59  ;;  %v1967_v11 = vsel %vm1833_vm4, %v1965_v28, %v1966_v24  ;;  %v2795_v24 = vld [vmem:[#allocation4 + $0x470] sm:$0xff]  ;;  %v1847_v18 = vsel %vm1833_vm4, %v1817_v55, %v10638_v29  ;;  %v2790_v29 = vld [vmem:[#allocation4 + $0x448] sm:$0xff] }
 0x237   : > { %1488 = vst [vmem:[#allocation2 + $0xd0] sm:$0xff] %v1456_v27  ;;  %783 = vst.msk [vmem:[#allocation2 + $0xf8] sm:$0xff] %vm396_vm0, %v779_v37  ;;  %2191 = vmatmul.mubr.f32.gmra.mxu0 %v1984_v14  ;;  %v2793_v27 = vld [vmem:[#allocation4 + $0x460] sm:$0xff]  ;;  %v11051_v59 = vld [vmem:[#allocation2 + $0x10] sm:$0xff] }
 0x238   : > { %2195 = vmatprep.mubr.f32.mxu0 %v10632_v1  ;;  %v1454_v36 = vmax.f32 %v1422_v15, 0.0  ;;  %v1048_v50 = vld [vmem:[#allocation2 + $0xe8] sm:$0xff]  ;;  %v2792_v37 = vld [vmem:[#allocation4 + $0x458] sm:$0xff]  ;;  %v2791_v15 = vld [vmem:[#allocation4 + $0x450] sm:$0xff] }
 0x239   : > { %8988 = vmatmul.mubr.f32.gmra.mxu1 %v1046_v26  ;;  %v1390_v51 = vmul.f32 %v10965_v4, %v1048_v50 }
 0x23a   : > { %v789_v7 = vpop.permute.xlu1 %788  ;;  %1486 = vst [vmem:[#allocation2 + $0xc0] sm:$0xff] %v1454_v36 }
 0x23b   : > { %794 = vst.msk [vmem:[#allocation2 + $0x100] sm:$0xff] %vm396_vm0, %v789_v7  ;;  %2196 = vmatmul.mubr.f32.gmra.mxu0 %v1967_v11  ;;  %v1047_v5 = vld [vmem:[#allocation2 + $0xe0] sm:$0xff]  ;;  %v1427_v52 = vadd.f32 %v10975_v16, %v1390_v51  ;;  %v2788_v11 = vld [vmem:[#allocation4 + $0x438] sm:$0xff] }
 0x23c   : > { %2410 = vmatprep.mubr.f32.mxu0 %v10698_v6  ;;  %8990 = vmatprep.mubr.f32.mxu1 %v1047_v5  ;;  %v1389_v26 = vmul.f32 %v10965_v4, %v1047_v5  ;;  %v11064_v7 = vld [vmem:[#allocation2 + $0x20] sm:$0xff] }
 0x23d   : > { %8991 = vmatmul.mubr.f32.gmra.mxu1 %v1048_v50  ;;  %v1459_v39 = vmax.f32 %v1427_v52, 0.0  ;;  %v2789_v50 = vld [vmem:[#allocation4 + $0x440] sm:$0xff]  ;;  %v2787_v52 = vld [vmem:[#allocation4 + $0x430] sm:$0xff] }
 0x23e   : > { %v1426_v62 = vadd.f32 %v10975_v16, %v1389_v26  ;;  %v11042_v47 = vpop.permute.xlu1 %9819  ;;  %v2786_v26 = vld [vmem:[#allocation4 + $0x428] sm:$0xff] }
 0x23f   : > { %2411 = vmatmul.mubr.f32.vlgmr.msra.gmra.mxu0 %v1850_v53  ;;  %1491 = vst [vmem:[#allocation2 + $0xe8] sm:$0xff] %v1459_v39  ;;  %v9821_v28 = vunpack.i.l.bf16 %v11042_v47  ;;  %v1854_v53 = vmul.f32 %v10754_v35, %v10686_v3  ;;  %v2785_v39 = vld [vmem:[#allocation4 + $0x420] sm:$0xff]  ;;  %v11073_v3 = vld [vmem:[#allocation2 + $0x30] sm:$0xff] }
 0x240   : > { %2415 = vmatprep.mubr.f32.mxu0 %v10698_v6  ;;  %v1458_v14 = vmax.f32 %v1426_v62, 0.0  ;;  %9112 = vmatpush3.msra.mxu0 %v10903_v58  ;;  %v1852_v58 = vmul.f32 %v10703_v60, %v1847_v18  ;;  %v2784_v62 = vld [vmem:[#allocation4 + $0x418] sm:$0xff] }
 0x241   : > { %1019 = vst.msk [vmem:[#allocation2 + $0x100] sm:$0xff] %vm988_vm2, %v9821_v28  ;;  %9113 = vmatprep.subr.mxu0 %v2795_v24  ;;  %v2783_v28 = vld [vmem:[#allocation4 + $0x410] sm:$0xff] }
 0x242   : > { %1490 = vst [vmem:[#allocation2 + $0xe0] sm:$0xff] %v1458_v14  ;;  %9114 = vmatpush3.msra.mxu0 %v2795_v24  ;;  %v1856_v24 = vmul.f32 %v10811_v8, %v10745_v40  ;;  %v2782_v14 = vld [vmem:[#allocation4 + $0x408] sm:$0xff]  ;;  %v3412_v40 = vld [vmem:[#allocation4 + $0x278] sm:$0xff] }
 0x243   : > { %2416 = vmatmul.mubr.f32.gmra.mxu0 %v1817_v55  ;;  %9115 = vmatprep.subr.mxu0 %v2794_v49 }
 0x244   : > { %2420 = vmatprep.mubr.f32.mxu0 %v11051_v59  ;;  %9116 = vmatpush3.msra.mxu0 %v2794_v49  ;;  %v1858_v49 = vmul.f32 %v10840_v43, %v10825_v2 }
 0x245   : > { %9117 = vmatprep.subr.mxu0 %v2793_v27 }
 0x246   : > { %9118 = vmatpush3.msra.mxu0 %v2793_v27 }
 0x247   : > { %2421 = vmatmul.mubr.f32.gmra.mxu0 %v1852_v58  ;;  %9119 = vmatprep.subr.mxu0 %v2792_v37  ;;  %v9822_v58 = vunpack.i.h.bf16 %v11042_v47  ;;  %v1862_v47 = vmul.f32 %v10944_v38, %v10932_v19  ;;  %v11344_v38 = vrot.slane %v10827_v10, 1 }
 0x248   : > { %2425 = vmatprep.mubr.f32.mxu0 %v11055_v20  ;;  %9120 = vmatpush3.msra.mxu0 %v2792_v37  ;;  %v11058_v55 = vld [vmem:[#allocation2 + $0x100] sm:$0xff] }
 0x249   : > { %9121 = vmatprep.subr.mxu0 %v2791_v15  ;;  %v1393_v36 = vmul.f32 %v10965_v4, %v11058_v55 }
 0x24a   : > { %9122 = vmatpush3.msra.mxu0 %v2791_v15 }
 0x24b   : > { %2426 = vmatmul.mubr.f32.gmra.mxu0 %v10680_v54  ;;  %9123 = vmatprep.subr.mxu0 %v2790_v29  ;;  %v1430_v51 = vadd.f32 %v10975_v16, %v1393_v36  ;;  %v11069_v54 = vld [vmem:[#allocation2 + $0x28] sm:$0xff] }
 0x24c   : > { %2430 = vmatprep.mubr.f32.mxu0 %v11064_v7  ;;  %9124 = vmatpush3.msra.mxu0 %v2790_v29 }
 0x24d   : > { %9125 = vmatprep.subr.mxu0 %v2789_v50  ;;  %v1462_v5 = vmax.f32 %v1430_v51, 0.0  ;;  %v1500_v51 = vadd.s32 24, %v10613_v21 }
 0x24e   : > { %9126 = vmatpush3.msra.mxu0 %v2789_v50 }
 0x24f   : > { %2431 = vmatmul.mubr.f32.gmra.mxu0 %v1854_v53  ;;  %1494 = vst [vmem:[#allocation2 + $0x100] sm:$0xff] %v1462_v5  ;;  %9127 = vmatprep.subr.mxu0 %v2788_v11  ;;  %v11113_v5 = vrot.slane %v11051_v59, 1 }
 0x250   : > { %2435 = vmatprep.mubr.f32.mxu0 %v11069_v54  ;;  %9128 = vmatpush3.msra.mxu0 %v2788_v11  ;;  %v1870_v11 = vrot.slane %v11064_v7, 1 }
 0x251   : > { %9129 = vmatprep.subr.mxu0 %v2787_v52 }
 0x252   : > { %9130 = vmatpush3.msra.mxu0 %v2787_v52  ;;  %v1869_v52 = vrot.slane %v11055_v20, 1  ;;  %v1864_v20 = vmul.f32 %v11015_v23, %v10960_v0  ;;  %v3393_v23 = vld [vmem:[#allocation4 + $0x1e0] sm:$0xff] }
 0x253   : > { %2436 = vmatmul.mubr.f32.gmra.mxu0 %v10739_v56  ;;  %9131 = vmatprep.subr.mxu0 %v2786_v26  ;;  %v2781_v56 = vld [vmem:[#allocation4 + $0x400] sm:$0xff] }
 0x254   : > { %2440 = vmatprep.mubr.f32.mxu0 %v11073_v3  ;;  %9132 = vmatpush3.msra.mxu0 %v2786_v26  ;;  %v11146_v0 = vsel %vm1882_vm11, %v11113_v5, %v1869_v52 }
 0x255   : > { %9133 = vmatprep.subr.mxu0 %v2785_v39 }
 0x256   : > { %9134 = vmatpush3.msra.mxu0 %v2785_v39  ;;  %v1876_v39 = vrot.slane %v10786_v13, 1 }
 0x257   : > { %2441 = vmatmul.mubr.f32.gmra.mxu0 %v1856_v24  ;;  %9135 = vmatprep.subr.mxu0 %v2784_v62  ;;  %v11129_v24 = vld [vmem:[#allocation2 + $0x20] sm:$0xff] }
 0x258   : > { %2445 = vmatprep.mubr.f32.mxu0 %v10688_v9  ;;  %9136 = vmatpush3.msra.mxu0 %v2784_v62  ;;  %v1538_v62 = vand.u32 15, %v1500_v51  ;;  %v11189_v51 = vld [vmem:[#allocation4 + $0x168] sm:$0xff] }
 0x259   : > { %9137 = vmatprep.subr.mxu0 %v2783_v28 }
 0x25a   : > { %9138 = vmatpush3.msra.mxu0 %v2783_v28  ;;  %v11131_v28 = vld [vmem:[#allocation2 + $0x28] sm:$0xff]  ;;  %vm11163_vm14 = vcmp.ne.s32.totalorder %v1538_v62, 15 }
 0x25b   : > { %2446 = vmatmul.mubr.f32.gmra.mxu0 %v10801_v22  ;;  %9139 = vmatprep.subr.mxu0 %v2782_v14  ;;  %v1860_v22 = vmul.f32 %v10914_v34, %v10857_v44  ;;  %v1498_v44 = vadd.s32 8, %v10613_v21 }
 0x25c   : > { %2450 = vmatprep.mubr.f32.mxu0 %v10784_v45  ;;  %9140 = vmatpush3.msra.mxu0 %v2782_v14  ;;  %v1872_v14 = vrot.slane %v11073_v3, 1  ;;  %v1504_v3 = vadd.s32 56, %v10613_v21 }
 0x25d   : > { %9141 = vmatprep.subr.mxu0 %v2781_v56 }
 0x25e   : > { %9142 = vmatpush3.msra.mxu0 %v2781_v56 }
 0x25f   : > { %2451 = vmatmul.mubr.f32.gmra.mxu0 %v1858_v49  ;;  %7906 = vmatprep.subr.mxu0 %v3412_v40  ;;  %v11138_v49 = vsel %vm1882_vm11, %v1869_v52, %v1870_v11 }
 0x260   : > { %2455 = vmatprep.mubr.f32.mxu0 %v10710_v42 }
 0x263   : > { %v777_v18 = vpop.permute.xlu0 %776  ;;  %2456 = vmatmul.mubr.f32.gmra.mxu0 %v10851_v17 }
 0x264   : > { %782 = vst.msk [vmem:[#allocation2 + $0xf0] sm:$0xff] %vm396_vm0, %v777_v18  ;;  %2460 = vmatprep.mubr.f32.mxu0 %v10786_v13  ;;  %v1871_v18 = vrot.slane %v11069_v54, 1 }
 0x267   : > { %v9815_v27 = vpop.permute.xlu0 %9814  ;;  %2461 = vmatmul.mubr.f32.gmra.mxu0 %v1860_v22 }
 0x268   : > { %v9817_v2 = vunpack.i.h.bf16 %v9815_v27  ;;  %v9816_v37 = vunpack.i.l.bf16 %v9815_v27  ;;  %2465 = vmatprep.mubr.f32.mxu0 %v10763_v48  ;;  %v2701_v27 = vrot.slane %v11131_v28, 1 }
 0x26a   : > { %1017 = vst.msk [vmem:[#allocation2 + $0xf0] sm:$0xff] %vm988_vm2, %v9816_v37  ;;  %1018 = vst.msk [vmem:[#allocation2 + $0xf8] sm:$0xff] %vm988_vm2, %v9817_v2 }
 0x26b   : > { %v791_v17 = vpop.permute.xlu0 %790  ;;  %2466 = vmatmul.mubr.f32.gmra.mxu0 %v10898_v57  ;;  %v1524_v57 = vand.u32 15, %v1498_v44  ;;  %v11168_v44 = vld [vmem:[#allocation4 + $0x170] sm:$0xff] }
 0x26c   : > { %795 = vst.msk [vmem:[#allocation2 + $0x108] sm:$0xff] %vm396_vm0, %v791_v17  ;;  %2470 = vmatprep.mubr.f32.mxu0 %v10890_v33  ;;  %v1874_v17 = vrot.slane %v10784_v45, 1  ;;  %v1566_v45 = vand.u32 15, %v1504_v3 }
 0x26d   : > { %1020 = vst.msk [vmem:[#allocation2 + $0x108] sm:$0xff] %vm988_vm2, %v9822_v58  ;;  %vm11120_vm13 = vcmp.ne.s32.totalorder %v1524_v57, 15  ;;  %v11180_v57 = vsel %vm1882_vm11, %v1870_v11, %v1871_v18  ;;  %v1878_v58 = vrot.slane %v10890_v33, 1  ;;  %v1877_v33 = vrot.slane %v10763_v48, 1 }
 0x26e   : > { %v8953_v15 = vpop.f32.mrf.mxu1  ;;  %v11153_v22 = vsel %vm11120_vm13, 1.0, %v10698_v6  ;;  %vm1760_vm0 = vcmp.ne.s32.totalorder %v1566_v45, 15  ;;  %v3396_v45 = vld [vmem:[#allocation4 + $0x1f8] sm:$0xff] }
 0x26f   : > { %1295 = vst [vmem:[%s11103_s10 + $0x8] sm:$0xff] %v8953_v15  ;;  %2471 = vmatmul.mubr.f32.gmra.mxu0 %v1862_v47  ;;  %14833 = vst [vmem:[#allocation21_spill] sm:$0xff] %v11153_v22  ;;  %v1992_v37 = vmul.f32 %v11153_v22, %v11138_v49  ;;  %v11172_v47 = vsel %vm1882_vm11, %v1871_v18, %v1872_v14  ;;  %v11174_v15 = vld [vmem:[#allocation2 + $0x38] sm:$0xff] }
 0x270   : > { %v1135_v29 = vpop.f32.mrf.mxu1  ;;  %2475 = vmatprep.mubr.f32.mxu0 %v10733_v32 }
 0x271   : > { %1294 = vst [vmem:[%s11103_s10] sm:$0xff] %v1135_v29  ;;  %v1049_v36 = vld [vmem:[#allocation2 + $0xf0] sm:$0xff]  ;;  %v1050_v50 = vld [vmem:[#allocation2 + $0xf8] sm:$0xff] }
 0x272   : > { %8993 = vmatprep.mubr.f32.mxu1 %v1049_v36  ;;  %v1391_v19 = vmul.f32 %v10965_v4, %v1049_v36  ;;  %v1392_v53 = vmul.f32 %v10965_v4, %v1050_v50  ;;  %v1873_v36 = vrot.slane %v10688_v9, 1 }
 0x273   : > { %8994 = vmatmul.mubr.f32.gmra.mxu1 %v1050_v50  ;;  %2476 = vmatmul.mubr.f32.gmra.mxu0 %v10954_v25  ;;  %v1502_v25 = vadd.s32 40, %v10613_v21  ;;  %v11185_v50 = vld [vmem:[#allocation4 + $0x178] sm:$0xff] }
 0x274   : > { %v1428_v32 = vadd.f32 %v10975_v16, %v1391_v19  ;;  %v1429_v26 = vadd.f32 %v10975_v16, %v1392_v53  ;;  %8996 = vmatprep.mubr.f32.mxu1 %v11058_v55  ;;  %v1052_v7 = vld [vmem:[#allocation2 + $0x108] sm:$0xff]  ;;  %2480 = vmatprep.mubr.f32.mxu0 %v10874_v61  ;;  %v11133_v55 = vld [vmem:[#allocation2 + $0x30] sm:$0xff]  ;;  %v11191_v19 = vld [vmem:[#allocation2] sm:$0xff]  ;;  %v1506_v53 = vadd.s32 72, %v10613_v21  ;;  %v11220_v62 = vsel %vm1882_vm11, %v1873_v36, %v1874_v17 }
 0x275   : > { %v1394_v59 = vmul.f32 %v10965_v4, %v1052_v7  ;;  %v2702_v54 = vrot.slane %v11133_v55, 1  ;;  %v1552_v6 = vand.u32 15, %v1502_v25  ;;  %v11196_v11 = vsel %vm11163_vm14, 1.0, %v11191_v19  ;;  %v11223_v25 = vld [vmem:[#allocation2 + $0x40] sm:$0xff] }
 0x276   : > { %v1460_v56 = vmax.f32 %v1428_v32, 0.0  ;;  %v1461_v40 = vmax.f32 %v1429_v26, 0.0  ;;  %14836 = vst [vmem:[#allocation22_spill] sm:$0xff] %v11196_v11  ;;  %v1994_v32 = vmul.f32 %v11196_v11, %v11172_v47  ;;  %v1580_v18 = vand.u32 15, %v1506_v53  ;;  %v11281_v26 = vld [vmem:[#allocation2 + $0x50] sm:$0xff] }
 0x277   : > { %8997 = vmatmul.mubr.f32.gmra.mxu1 %v1052_v7  ;;  %v11141_v4 = vadd.f32 %v10975_v16, %v1394_v59  ;;  %2481 = vmatmul.mubr.f32.gmra.mxu0 %v1864_v20  ;;  %v14559_v16 = vrot.slane %v11129_v24, 1  ;;  %v2729_v9 = vsel %vm1882_vm11, %v2701_v27, %v2702_v54  ;;  %vm11208_vm15 = vcmp.ne.s32.totalorder %v1552_v6, 15  ;;  %v11216_v59 = vld [vmem:[#allocation4 + $0x160] sm:$0xff]  ;;  %v11249_v6 = vld [vmem:[#allocation4 + $0x150] sm:$0xff] }
 0x278   : > { %1492 = vst [vmem:[#allocation2 + $0xf0] sm:$0xff] %v1460_v56  ;;  %1493 = vst [vmem:[#allocation2 + $0xf8] sm:$0xff] %v1461_v40  ;;  %9031 = vmatprep.mubr.f32.mxu1 %v11146_v0  ;;  %2485 = vmatprep.mubr.f32.mxu0 %v10827_v10  ;;  %v2703_v7 = vrot.slane %v11174_v15, 1  ;;  %v1875_v20 = vrot.slane %v10710_v42, 1  ;;  %v11228_v56 = vsel %vm1882_vm11, %v1872_v14, %v1873_v36  ;;  %v11233_v40 = vld [vmem:[#allocation4 + $0x158] sm:$0xff]  ;;  %v11238_v42 = vsel %vm11208_vm15, 1.0, %v11191_v19 }
 0x279   : > { %v14558_v2 = vmax.f32 %v11141_v4, 0.0  ;;  %v2733_v13 = vmul.f32 %v11153_v22, %v2729_v9  ;;  %14839 = vst [vmem:[#allocation23_spill] sm:$0xff] %v11238_v42  ;;  %v1996_v14 = vmul.f32 %v11238_v42, %v11220_v62  ;;  %v3411_v9 = vld [vmem:[#allocation4 + $0x270] sm:$0xff]  ;;  %vm11268_vm1 = vcmp.ne.s32.totalorder %v1580_v18, 15  ;;  %v3392_v10 = vld [vmem:[#allocation4 + $0x1d8] sm:$0xff] }
 0x27a   : > { %v8956_v29 = vpop.f32.mrf.mxu1  ;;  %v2728_v3 = vsel %vm1882_vm11, %v2702_v54, %v2703_v7  ;;  %v11256_v36 = vsel %vm1882_vm11, %v1875_v20, %v1876_v39  ;;  %v11261_v54 = vsel %vm1882_vm11, %v1874_v17, %v1875_v20  ;;  %v11279_v17 = vld [vmem:[#allocation2 + $0x48] sm:$0xff]  ;;  %v11284_v20 = vld [vmem:[#allocation4 + $0x140] sm:$0xff]  ;;  %v11288_v18 = vsel %vm1882_vm11, %v1877_v33, %v1878_v58 }
 0x27b   : > { %1495 = vst [vmem:[#allocation2 + $0x108] sm:$0xff] %v14558_v2  ;;  %9032 = vmatmul.mubr.f32.vlgmr.msra.gmra.mxu1 %v1992_v37  ;;  %2486 = vmatmul.mubr.f32.gmra.mxu0 %v11005_v46  ;;  %1297 = vst [vmem:[%s11103_s10 + $0x18] sm:$0xff] %v8956_v29  ;;  %v2730_v46 = vsel %vm1882_vm11, %v14559_v16, %v2701_v27  ;;  %v2704_v27 = vrot.slane %v11223_v25, 1  ;;  %v1508_v37 = vadd.s32 88, %v10613_v21  ;;  %v11252_v29 = vsel %vm1760_vm0, 1.0, %v11191_v19  ;;  %v11313_v2 = vld [vmem:[#allocation4 + $0x130] sm:$0xff] }
 0x27c   : > { %9056 = vmatpush3.msra.mxu1 %v11185_v50  ;;  %9034 = vmatprep.mubr.f32.mxu1 %v11180_v57  ;;  %v1145_v52 = vpop.f32.mrf.mxu1  ;;  %14840 = vst [vmem:[#allocation24_spill] sm:$0xff] %v11252_v29  ;;  %14844 = vst [vmem:[#allocation26_spill] sm:$0xff] %v11284_v20  ;;  %v11316_v16 = vld [vmem:[#allocation2 + $0x60] sm:$0xff] }
 0x27d   : > { %9057 = vmatprep.subr.mxu1 %v11168_v44  ;;  %9143 = vmatprep.mubr.f32.mxu0 %v2730_v46  ;;  %1296 = vst [vmem:[%s11103_s10 + $0x10] sm:$0xff] %v1145_v52  ;;  %v11266_v46 = vld [vmem:[#allocation4 + $0x148] sm:$0xff]  ;;  %v1998_v52 = vmul.f32 %v11252_v29, %v11256_v36  ;;  %v2727_v48 = vsel %vm1882_vm11, %v2703_v7, %v2704_v27  ;;  %14847 = vst [vmem:[#allocation29_spill] sm:$0xff] %v11313_v2 }
 0x27e   : > { %9058 = vmatpush3.msra.mxu1 %v11168_v44  ;;  %14841 = vst [vmem:[#allocation25_spill] sm:$0xff] %v11266_v46  ;;  %v11293_v7 = vsel %vm1882_vm11, %v1876_v39, %v1877_v33  ;;  %v2705_v39 = vrot.slane %v11279_v17, 1  ;;  %v2706_v33 = vrot.slane %v11281_v26, 1  ;;  %14848 = vst [vmem:[#allocation30_spill] sm:$0xff] %v11316_v16 }
 0x27f   : > { %9059 = vmatprep.subr.mxu1 %v11189_v51  ;;  %9035 = vmatmul.mubr.f32.gmra.mxu1 %v1994_v32  ;;  %v1594_v32 = vand.u32 15, %v1508_v37 }
 0x280   : > { %9060 = vmatpush3.msra.mxu1 %v11189_v51  ;;  %9037 = vmatprep.mubr.f32.mxu1 %v11228_v56 }
 0x281   : > { %9061 = vmatprep.subr.mxu1 %v11216_v59  ;;  %9144 = vmatmul.mubr.f32.vlgmr.msra.gmra.mxu0 %v2733_v13  ;;  %v3395_v13 = vld [vmem:[#allocation4 + $0x1f0] sm:$0xff]  ;;  %vm1764_vm2 = vcmp.ne.s32.totalorder %v1594_v32, 15  ;;  %v3409_v32 = vld [vmem:[#allocation4 + $0x260] sm:$0xff] }
 0x282   : > { %9062 = vmatpush3.msra.mxu1 %v11216_v59  ;;  %9146 = vmatprep.mubr.f32.mxu0 %v2728_v3  ;;  %v9833_v3 = vld [vmem:[#allocation2 + $0x68] sm:$0xff]  ;;  %v11324_v30 = vsel %vm1764_vm2, 1.0, %v11191_v19 }
 0x283   : > { %9063 = vmatprep.subr.mxu1 %v11233_v40  ;;  %9038 = vmatmul.mubr.f32.gmra.mxu1 %v1996_v14  ;;  %v11298_v14 = vsel %vm11268_vm1, 1.0, %v11191_v19  ;;  %v1879_v37 = vrot.slane %v9833_v3, 1  ;;  %v3410_v3 = vld [vmem:[#allocation4 + $0x268] sm:$0xff]  ;;  %14849 = vst [vmem:[#allocation31_spill] sm:$0xff] %v11324_v30 }
 0x284   : > { %9064 = vmatpush3.msra.mxu1 %v11233_v40  ;;  %9040 = vmatprep.mubr.f32.mxu1 %v11261_v54  ;;  %14845 = vst [vmem:[#allocation27_spill] sm:$0xff] %v11298_v14  ;;  %v2000_v53 = vmul.f32 %v11298_v14, %v11288_v18 }
 0x285   : > { %9065 = vmatprep.subr.mxu1 %v11249_v6  ;;  %7907 = vmatpush3.msra.mxu0 %v3396_v45  ;;  %v1880_v45 = vrot.slane %v10874_v61, 1  ;;  %v1510_v61 = vadd.s32 104, %v10613_v21 }
 0x286   : > { %9066 = vmatpush3.msra.mxu1 %v11249_v6  ;;  %7908 = vmatprep.subr.mxu0 %v3411_v9  ;;  %v11303_v9 = vld [vmem:[#allocation4 + $0x138] sm:$0xff] }
 0x287   : > { %9067 = vmatprep.subr.mxu1 %v11266_v46  ;;  %9041 = vmatmul.mubr.f32.gmra.mxu1 %v1998_v52  ;;  %14846 = vst [vmem:[#allocation28_spill] sm:$0xff] %v11303_v9  ;;  %v2735_v52 = vmul.f32 %v11196_v11, %v2727_v48  ;;  %v3394_v48 = vld [vmem:[#allocation4 + $0x1e8] sm:$0xff] }
 0x288   : > { %9068 = vmatpush3.msra.mxu1 %v11266_v46  ;;  %9043 = vmatprep.mubr.f32.mxu1 %v11293_v7 }
 0x289   : > { %9069 = vmatprep.subr.mxu1 %v11284_v20  ;;  %7909 = vmatpush3.msra.mxu0 %v3395_v13  ;;  %v11321_v13 = vsel %vm1882_vm11, %v1878_v58, %v1879_v37  ;;  %v2726_v58 = vsel %vm1882_vm11, %v2704_v27, %v2705_v39 }
 0x28a   : > { %9070 = vmatpush3.msra.mxu1 %v11284_v20  ;;  %9147 = vmatmul.mubr.f32.gmra.mxu0 %v2735_v52  ;;  %v11328_v52 = vsel %vm1882_vm11, %v1879_v37, %v1880_v45  ;;  %v1512_v37 = vadd.s32 120, %v10613_v21  ;;  %v2708_v20 = vrot.slane %v11316_v16, 1  ;;  %v11361_v16 = vld [vmem:[#allocation2 + $0x70] sm:$0xff] }
 0x28b   : > { %9071 = vmatprep.subr.mxu1 %v11303_v9  ;;  %9044 = vmatmul.mubr.f32.gmra.mxu1 %v2000_v53  ;;  %v2725_v53 = vsel %vm1882_vm11, %v2705_v39, %v2706_v33  ;;  %v2002_v46 = vmul.f32 %v11324_v30, %v11328_v52  ;;  %v3408_v39 = vld [vmem:[#allocation4 + $0x258] sm:$0xff] }
 0x28c   : > { %9072 = vmatpush3.msra.mxu1 %v11303_v9  ;;  %7910 = vmatprep.subr.mxu0 %v3410_v3  ;;  %v11340_v3 = vld [vmem:[#allocation4 + $0x128] sm:$0xff]  ;;  %v1608_v9 = vand.u32 15, %v1510_v61  ;;  %v2737_v27 = vmul.f32 %v11238_v42, %v2725_v53  ;;  %v2707_v61 = vrot.slane %v11332_v31, 1  ;;  %v14855_v53 = vrot.slane %v10947_v63, 1 }
 0x28d   : > { %9046 = vmatprep.mubr.f32.mxu1 %v11321_v13  ;;  %9073 = vmatprep.subr.mxu1 %v11313_v2  ;;  %14851 = vst [vmem:[#allocation33_spill] sm:$0xff] %v11340_v3 }
 0x28e   : > { %9149 = vmatprep.mubr.f32.mxu0 %v2726_v58  ;;  %7911 = vmatpush3.msra.mxu0 %v3394_v48  ;;  %v11353_v48 = vld [vmem:[#allocation4 + $0x120] sm:$0xff]  ;;  %vm11355_vm3 = vcmp.ne.s32.totalorder %v1608_v9, 15  ;;  %v1989_v9 = vsel %vm1882_vm11, %v11344_v38, %v14855_v53  ;;  %v3390_v58 = vld [vmem:[#allocation4 + $0x1c8] sm:$0xff] }
 0x28f   : > { %9074 = vmatpush3.msra.mxu1 %v11313_v2  ;;  %7912 = vmatprep.subr.mxu0 %v3409_v32  ;;  %14852 = vst [vmem:[#allocation34_spill] sm:$0xff] %v11353_v48  ;;  %v11359_v32 = vld [vmem:[#allocation2 + $0x68] sm:$0xff]  ;;  %v1622_v2 = vand.u32 15, %v1512_v37  ;;  %v2723_v37 = vsel %vm1882_vm11, %v2707_v61, %v2708_v20  ;;  %v11385_v63 = vsel %vm11355_vm3, 1.0, %v11191_v19 }
 0x290   : > { %9075 = vmatprep.subr.mxu1 %v11340_v3  ;;  %7913 = vmatpush3.msra.mxu0 %v3393_v23  ;;  %v11367_v23 = vsel %vm1882_vm11, %v1880_v45, %v11344_v38  ;;  %v3391_v45 = vld [vmem:[#allocation4 + $0x1d0] sm:$0xff]  ;;  %14857 = vst [vmem:[#allocation36_spill] sm:$0xff] %v11385_v63  ;;  %v2709_v53 = vrot.slane %v11359_v32, 1  ;;  %v2004_v31 = vmul.f32 %v11385_v63, %v1989_v9 }
 0x291   : > { %9047 = vmatmul.mubr.f32.gmra.mxu1 %v2002_v46  ;;  %9150 = vmatmul.mubr.f32.gmra.mxu0 %v2737_v27  ;;  %v3407_v46 = vld [vmem:[#allocation4 + $0x250] sm:$0xff]  ;;  %v2724_v27 = vsel %vm1882_vm11, %v2706_v33, %v2707_v61  ;;  %v2739_v33 = vmul.f32 %v11252_v29, %v2723_v37  ;;  %v3406_v61 = vld [vmem:[#allocation4 + $0x248] sm:$0xff]  ;;  %vm1768_vm5 = vcmp.ne.s32.totalorder %v1622_v2, 15  ;;  %v14860_v2 = vrot.slane %v10632_v1, 1  ;;  %v11417_v1 = vld [vmem:[#allocation2 + $0x80] sm:$0xff] }
 0x292   : > { %9076 = vmatpush3.msra.mxu1 %v11340_v3  ;;  %7914 = vmatprep.subr.mxu0 %v3408_v39  ;;  %v11380_v39 = vld [vmem:[#allocation4 + $0x118] sm:$0xff]  ;;  %v2710_v3 = vrot.slane %v11361_v16, 1  ;;  %v11399_v9 = vsel %vm1768_vm5, 1.0, %v11191_v19  ;;  %14862 = vst [vmem:[#allocation40_spill] sm:$0xff] %v11417_v1 }
 0x293   : > { %9049 = vmatprep.mubr.f32.mxu1 %v11367_v23  ;;  %9077 = vmatprep.subr.mxu1 %v11353_v48  ;;  %14856 = vst [vmem:[#allocation35_spill] sm:$0xff] %v11380_v39  ;;  %14859 = vst [vmem:[#allocation38_spill] sm:$0xff] %v11399_v9  ;;  %v1990_v37 = vsel %vm1882_vm11, %v14860_v2, %v11113_v5 }
 0x294   : > { %9152 = vmatprep.mubr.f32.mxu0 %v2724_v27  ;;  %7915 = vmatpush3.msra.mxu0 %v3392_v10  ;;  %v11393_v10 = vld [vmem:[#allocation4 + $0x110] sm:$0xff]  ;;  %v11395_v27 = vld [vmem:[#allocation2 + $0x78] sm:$0xff] }
 0x295   : > { %9078 = vmatpush3.msra.mxu1 %v11353_v48  ;;  %7916 = vmatprep.subr.mxu0 %v3407_v46  ;;  %14858 = vst [vmem:[#allocation37_spill] sm:$0xff] %v11395_v27  ;;  %v3405_v46 = vld [vmem:[#allocation4 + $0x240] sm:$0xff]  ;;  %v2711_v2 = vrot.slane %v11395_v27, 1  ;;  %v3404_v48 = vld [vmem:[#allocation4 + $0x238] sm:$0xff] }
 0x296   : > { %9079 = vmatprep.subr.mxu1 %v11380_v39  ;;  %7917 = vmatpush3.msra.mxu0 %v3391_v45  ;;  %v11409_v45 = vrot.slane %v11191_v19, 1  ;;  %v2006_v19 = vmul.f32 %v11399_v9, %v1990_v37  ;;  %v11433_v37 = vld [vmem:[#allocation2 + $0x90] sm:$0xff]  ;;  %v11459_v27 = vld [vmem:[#allocation2 + $0x98] sm:$0xff] }
 0x297   : > { %9050 = vmatmul.mubr.f32.gmra.mxu1 %v2004_v31  ;;  %9153 = vmatmul.mubr.f32.gmra.mxu0 %v2739_v33  ;;  %v2721_v31 = vsel %vm1882_vm11, %v2709_v53, %v2710_v3  ;;  %v2722_v33 = vsel %vm1882_vm11, %v2708_v20, %v2709_v53  ;;  %v11424_v20 = vld [vmem:[#allocation4 + $0x100] sm:$0xff]  ;;  %v11427_v53 = vrot.slane %v11417_v1, 1  ;;  %v3402_v1 = vld [vmem:[#allocation4 + $0x228] sm:$0xff] }
 0x298   : > { %9080 = vmatpush3.msra.mxu1 %v11380_v39  ;;  %7918 = vmatprep.subr.mxu0 %v3406_v61  ;;  %v11415_v61 = vld [vmem:[#allocation4 + $0x108] sm:$0xff]  ;;  %v3389_v39 = vld [vmem:[#allocation4 + $0x1c0] sm:$0xff]  ;;  %14863 = vst [vmem:[#allocation41_spill] sm:$0xff] %v11424_v20 }
 0x299   : > { %9052 = vmatprep.mubr.f32.mxu1 %v10999_v41  ;;  %9081 = vmatprep.subr.mxu1 %v11393_v10  ;;  %14861 = vst [vmem:[#allocation39_spill] sm:$0xff] %v11415_v61  ;;  %v2741_v41 = vmul.f32 %v11298_v14, %v2721_v31  ;;  %14864 = vst [vmem:[#allocation42_spill] sm:$0xff] %v11427_v53  ;;  %v3403_v31 = vld [vmem:[#allocation4 + $0x230] sm:$0xff] }
 0x29a   : > { %9155 = vmatprep.mubr.f32.mxu0 %v2722_v33  ;;  %7919 = vmatpush3.msra.mxu0 %v3390_v58  ;;  %v1896_v58 = vsel %vm1882_vm11, %v11409_v45, %v11113_v5  ;;  %v2719_v33 = vsel %vm1882_vm11, %v2711_v2, %v11427_v53  ;;  %v11442_v5 = vld [vmem:[#allocation4 + $0x3f8] sm:$0xff] }
 0x29b   : > { %9082 = vmatpush3.msra.mxu1 %v11393_v10  ;;  %7920 = vmatprep.subr.mxu0 %v3405_v46  ;;  %v3388_v46 = vld [vmem:[#allocation4 + $0x1b8] sm:$0xff] }
 0x29c   : > { %9083 = vmatprep.subr.mxu1 %v11415_v61  ;;  %7921 = vmatpush3.msra.mxu0 %v3389_v39  ;;  %v2720_v39 = vsel %vm1882_vm11, %v2710_v3, %v2711_v2  ;;  %v1900_v3 = vmul.f32 %v11153_v22, %v1896_v58  ;;  %v11452_v2 = vld [vmem:[#allocation4 + $0x378] sm:$0xff]  ;;  %v11462_v58 = vld [vmem:[#allocation4 + $0x370] sm:$0xff] }
 0x29d   : > { %9053 = vmatmul.mubr.f32.gmra.mxu1 %v2006_v19  ;;  %9156 = vmatmul.mubr.f32.gmra.mxu0 %v2741_v41  ;;  %v3387_v19 = vld [vmem:[#allocation4 + $0x1b0] sm:$0xff]  ;;  %v11444_v41 = vld [vmem:[#allocation2 + $0x88] sm:$0xff]  ;;  %14868 = vst [vmem:[#allocation46_spill] sm:$0xff] %v11462_v58 }
 0x29e   : > { %9084 = vmatpush3.msra.mxu1 %v11415_v61  ;;  %7922 = vmatprep.subr.mxu0 %v3404_v48  ;;  %14865 = vst [vmem:[#allocation43_spill] sm:$0xff] %v11444_v41  ;;  %v11448_v48 = vrot.slane %v11433_v37, 1  ;;  %v11456_v61 = vld [vmem:[#allocation4 + $0x3f0] sm:$0xff] }
 0x29f   : > { %9085 = vmatprep.subr.mxu1 %v11424_v20  ;;  %9158 = vmatprep.mubr.f32.mxu0 %v2720_v39  ;;  %v2743_v39 = vmul.f32 %v11324_v30, %v2719_v33  ;;  %14867 = vst [vmem:[#allocation45_spill] sm:$0xff] %v11456_v61 }
 0x2a0   : > { %7923 = vmatpush3.msra.mxu0 %v3388_v46  ;;  %9086 = vmatpush3.msra.mxu1 %v11424_v20  ;;  %14866 = vst [vmem:[#allocation44_spill] sm:$0xff] %v11448_v48  ;;  %v2713_v46 = vrot.slane %v11444_v41, 1  ;;  %v3386_v20 = vld [vmem:[#allocation4 + $0x1a8] sm:$0xff] }
 0x2a1   : > { %7924 = vmatprep.subr.mxu0 %v3403_v31  ;;  %9087 = vmatprep.mubr.f32.mxu1 %v11409_v45  ;;  %v3401_v31 = vld [vmem:[#allocation4 + $0x220] sm:$0xff]  ;;  %v11485_v41 = vld [vmem:[#allocation4 + $0x368] sm:$0xff] }
 0x2a2   : > { %7794 = vmatprep.subr.mxu1 %v11442_v5  ;;  %7925 = vmatpush3.msra.mxu0 %v3387_v19  ;;  %v11467_v33 = vsel %vm1882_vm11, %v2713_v46, %v11448_v48  ;;  %v11474_v19 = vsel %vm1882_vm11, %v11427_v53, %v2713_v46  ;;  %14870 = vst [vmem:[#allocation48_spill] sm:$0xff] %v11485_v41  ;;  %v3400_v53 = vld [vmem:[#allocation4 + $0x218] sm:$0xff] }
 0x2a3   : > { %9088 = vmatmul.mubr.f32.vlgmr.msra.gmra.mxu1 %v1900_v3  ;;  %9159 = vmatmul.mubr.f32.gmra.mxu0 %v2743_v39  ;;  %v11476_v3 = vld [vmem:[#allocation4 + $0x3e8] sm:$0xff]  ;;  %v11480_v39 = vrot.slane %v11459_v27, 1  ;;  %v2745_v46 = vmul.f32 %v11385_v63, %v11467_v33 }
 0x2a4   : > { %7795 = vmatpush3.msra.mxu1 %v11452_v2  ;;  %7926 = vmatprep.subr.mxu0 %v3402_v1  ;;  %14869 = vst [vmem:[#allocation47_spill] sm:$0xff] %v11476_v3  ;;  %v3385_v1 = vld [vmem:[#allocation4 + $0x1a0] sm:$0xff] }
 0x2a5   : > { %9090 = vmatprep.mubr.f32.mxu1 %v11146_v0  ;;  %7796 = vmatprep.subr.mxu1 %v11456_v61  ;;  %v1902_v0 = vmul.f32 %v11196_v11, %v11138_v49  ;;  %v11490_v61 = vld [vmem:[#allocation4 + $0x3e0] sm:$0xff]  ;;  %v3399_v49 = vld [vmem:[#allocation4 + $0x210] sm:$0xff] }
 0x2a6   : > { %9161 = vmatprep.mubr.f32.mxu0 %v11474_v19  ;;  %7927 = vmatpush3.msra.mxu0 %v3386_v20  ;;  %14871 = vst [vmem:[#allocation49_spill] sm:$0xff] %v11490_v61  ;;  %v3384_v20 = vld [vmem:[#allocation4 + $0x198] sm:$0xff] }
 0x2a7   : > { %7797 = vmatpush3.msra.mxu1 %v11462_v58  ;;  %7928 = vmatprep.subr.mxu0 %v3401_v31  ;;  %v11493_v31 = vld [vmem:[#allocation4 + $0x360] sm:$0xff]  ;;  %v14872_v58 = vrot.slane %v11129_v24, 1 }
 0x2a8   : > { %7798 = vmatprep.subr.mxu1 %v11476_v3  ;;  %7929 = vmatpush3.msra.mxu0 %v3385_v1  ;;  %v11506_v1 = vsel %vm1882_vm11, %v11448_v48, %v11480_v39  ;;  %v11522_v3 = vld [vmem:[#allocation4 + $0x3d0] sm:$0xff] }
 0x2a9   : > { %9091 = vmatmul.mubr.f32.gmra.mxu1 %v1902_v0  ;;  %9162 = vmatmul.mubr.f32.gmra.mxu0 %v2745_v46  ;;  %v2731_v11 = vsel %vm1882_vm11, %v11480_v39, %v14872_v58  ;;  %v3383_v0 = vld [vmem:[#allocation4 + $0x190] sm:$0xff]  ;;  %v14873_v46 = vmax.f32 %v11141_v4, 0.0  ;;  %v11518_v58 = vld [vmem:[#allocation4 + $0x358] sm:$0xff]  ;;  %14875 = vst [vmem:[#allocation51_spill] sm:$0xff] %v11522_v3  ;;  %v11525_v4 = vrot.slane %v11433_v37, 7 }
 0x2aa   : > { %7799 = vmatpush3.msra.mxu1 %v11485_v41  ;;  %7930 = vmatprep.subr.mxu0 %v3400_v53  ;;  %v11508_v53 = vld [vmem:[#allocation4 + $0x3d8] sm:$0xff]  ;;  %14874 = vst [vmem:[#allocation50_spill] sm:$0xff] %v11518_v58  ;;  %v2747_v48 = vmul.f32 %v11399_v9, %v2731_v11  ;;  %v11532_v11 = vld [vmem:[#allocation4 + $0x350] sm:$0xff] }
 0x2ab   : > { %9093 = vmatprep.mubr.f32.mxu1 %v11180_v57  ;;  %7800 = vmatprep.subr.mxu1 %v11490_v61  ;;  %v11513_v41 = vrot.slane %v14873_v46, 7  ;;  %v1904_v57 = vmul.f32 %v11238_v42, %v11172_v47  ;;  %v3398_v61 = vld [vmem:[#allocation4 + $0x208] sm:$0xff]  ;;  %v3381_v46 = vld [vmem:[#allocation4 + $0x180] sm:$0xff] }
 0x2ac   : > { %9164 = vmatprep.mubr.f32.mxu0 %v11506_v1  ;;  %7931 = vmatpush3.msra.mxu0 %v3384_v20  ;;  %v3382_v20 = vld [vmem:[#allocation4 + $0x188] sm:$0xff] }
 0x2ad   : > { %7801 = vmatpush3.msra.mxu1 %v11493_v31  ;;  %7932 = vmatprep.subr.mxu0 %v3399_v49  ;;  %v3343_v47 = vsel %vm1833_vm4, %v11513_v41, %v11525_v4  ;;  %v3397_v49 = vld [vmem:[#allocation4 + $0x200] sm:$0xff] }
 0x2ae   : > { %7802 = vmatprep.subr.mxu1 %v11508_v53  ;;  %7933 = vmatpush3.msra.mxu0 %v3383_v0  ;;  %v11536_v0 = vld [vmem:[#allocation4 + $0x3c8] sm:$0xff] }
 0x2af   : > { %9094 = vmatmul.mubr.f32.gmra.mxu1 %v1904_v57  ;;  %9165 = vmatmul.mubr.f32.gmra.mxu0 %v2747_v48  ;;  %v11539_v48 = vld [vmem:[#allocation2 + $0xa0] sm:$0xff]  ;;  %v11544_v57 = vld [vmem:[#allocation4 + $0x348] sm:$0xff] }
 0x2b0   : > { %7803 = vmatpush3.msra.mxu1 %v11518_v58  ;;  %7934 = vmatprep.subr.mxu0 %v3398_v61  ;;  %v1906_v61 = vmul.f32 %v11252_v29, %v11220_v62  ;;  %v11553_v58 = vrot.slane %v11539_v48, 7  ;;  %v11557_v62 = vld [vmem:[#allocation4 + $0x3b8] sm:$0xff] }
 0x2b1   : > { %9096 = vmatprep.mubr.f32.mxu1 %v11228_v56  ;;  %7804 = vmatprep.subr.mxu1 %v11522_v3  ;;  %v3344_v56 = vmul.f32 %v10644_v12, %v3343_v47  ;;  %v11548_v3 = vld [vmem:[#allocation4 + $0x3c0] sm:$0xff]  ;;  %14879 = vst [vmem:[#allocation55_spill] sm:$0xff] %v11557_v62  ;;  %v11560_v47 = vrot.slane %v11459_v27, 7 }
 0x2b2   : > { %7935 = vmatpush3.msra.mxu0 %v3382_v20  ;;  %3493 = vmatprep.mubr.f32.mxu0 %v11433_v37  ;;  %14876 = vst [vmem:[#allocation52_spill] sm:$0xff] %v11548_v3  ;;  %v11550_v20 = vld [vmem:[#allocation4 + $0x340] sm:$0xff]  ;;  %14878 = vst [vmem:[#allocation54_spill] sm:$0xff] %v11553_v58 }
 0x2b3   : > { %7805 = vmatpush3.msra.mxu1 %v11532_v11  ;;  %7936 = vmatprep.subr.mxu0 %v3397_v49  ;;  %14877 = vst [vmem:[#allocation53_spill] sm:$0xff] %v11550_v20  ;;  %v1908_v49 = vmul.f32 %v11298_v14, %v11256_v36  ;;  %v11585_v36 = vsel %vm1833_vm4, %v11560_v47, %v11553_v58 }
 0x2b4   : > { %7806 = vmatprep.subr.mxu1 %v11536_v0  ;;  %7937 = vmatpush3.msra.mxu0 %v3381_v46  ;;  %v11566_v46 = vld [vmem:[#allocation4 + $0x338] sm:$0xff]  ;;  %14884 = vst [vmem:[#allocation60_spill] sm:$0xff] %v11585_v36  ;;  %v1910_v14 = vmul.f32 %v11324_v30, %v11288_v18 }
 0x2b5   : > { %9097 = vmatmul.mubr.f32.gmra.mxu1 %v1906_v61  ;;  %3494 = vmatmul.mubr.f32.vlgmr.msra.gmra.mxu0 %v3344_v56  ;;  %14880 = vst [vmem:[#allocation56_spill] sm:$0xff] %v11566_v46  ;;  %v11569_v61 = vld [vmem:[#allocation4 + $0x3b0] sm:$0xff]  ;;  %v11613_v30 = vld [vmem:[#allocation4 + $0x398] sm:$0xff] }
 0x2b6   : > { %7807 = vmatpush3.msra.mxu1 %v11544_v57  ;;  %9099 = vmatprep.mubr.f32.mxu1 %v11261_v54  ;;  %14881 = vst [vmem:[#allocation57_spill] sm:$0xff] %v11569_v61  ;;  %v11577_v54 = vsel %vm1833_vm4, %v11525_v4, %v11560_v47  ;;  %v11579_v56 = vld [vmem:[#allocation4 + $0x330] sm:$0xff]  ;;  %14889 = vst [vmem:[#allocation65_spill] sm:$0xff] %v11613_v30 }
 0x2b7   : > { %7808 = vmatprep.subr.mxu1 %v11548_v3  ;;  %3498 = vmatprep.mubr.f32.mxu0 %v11459_v27  ;;  %14882 = vst [vmem:[#allocation58_spill] sm:$0xff] %v11577_v54  ;;  %14883 = vst [vmem:[#allocation59_spill] sm:$0xff] %v11579_v56  ;;  %v11599_v3 = vld [vmem:[#allocation4 + $0x328] sm:$0xff] }
 0x2b8   : > { %7809 = vmatpush3.msra.mxu1 %v11550_v20  ;;  %9223 = vmatprep.subr.mxu0 %v11185_v50  ;;  %v11593_v20 = vld [vmem:[#allocation2 + $0xb0] sm:$0xff]  ;;  %14886 = vst [vmem:[#allocation62_spill] sm:$0xff] %v11599_v3 }
 0x2b9   : > { %7810 = vmatprep.subr.mxu1 %v11557_v62  ;;  %9100 = vmatmul.mubr.f32.gmra.mxu1 %v1908_v49  ;;  %v11589_v62 = vld [vmem:[#allocation4 + $0x3a8] sm:$0xff]  ;;  %v3199_v18 = vrot.slane %v11593_v20, 7 }
 0x2ba   : > { %7811 = vmatpush3.msra.mxu1 %v11566_v46  ;;  %3499 = vmatmul.mubr.f32.gmra.mxu0 %v11577_v54  ;;  %14885 = vst [vmem:[#allocation61_spill] sm:$0xff] %v11589_v62  ;;  %v11591_v49 = vld [vmem:[#allocation2 + $0xa8] sm:$0xff]  ;;  %v3346_v46 = vmul.f32 %v10703_v60, %v11585_v36  ;;  %v11605_v54 = vld [vmem:[#allocation4 + $0x3a0] sm:$0xff]  ;;  %v11619_v36 = vld [vmem:[#allocation4 + $0x318] sm:$0xff] }
 0x2bb   : > { %9102 = vmatprep.mubr.f32.mxu1 %v11293_v7  ;;  %7812 = vmatprep.subr.mxu1 %v11569_v61  ;;  %14887 = vst [vmem:[#allocation63_spill] sm:$0xff] %v11605_v54  ;;  %v11608_v7 = vld [vmem:[#allocation4 + $0x320] sm:$0xff]  ;;  %v3198_v61 = vrot.slane %v11591_v49, 7  ;;  %14890 = vst [vmem:[#allocation66_spill] sm:$0xff] %v11619_v36 }
 0x2bc   : > { %3503 = vmatprep.mubr.f32.mxu0 %v11539_v48  ;;  %7813 = vmatpush3.msra.mxu1 %v11579_v56  ;;  %14888 = vst [vmem:[#allocation64_spill] sm:$0xff] %v11608_v7 }
 0x2bd   : > { %7814 = vmatprep.subr.mxu1 %v11589_v62  ;;  %9103 = vmatmul.mubr.f32.gmra.mxu1 %v1910_v14  ;;  %v1912_v14 = vmul.f32 %v11385_v63, %v11328_v52  ;;  %v11634_v52 = vsel %vm1833_vm4, %v11553_v58, %v3198_v61 }
 0x2be   : > { %7815 = vmatpush3.msra.mxu1 %v11599_v3  ;;  %3504 = vmatmul.mubr.f32.gmra.mxu0 %v3346_v46  ;;  %v8959_v56 = vpop.f32.mrf.mxu1  ;;  %v11624_v46 = vld [vmem:[#allocation4 + $0x390] sm:$0xff]  ;;  %14891 = vst [vmem:[#allocation67_spill] sm:$0xff] %v11634_v52  ;;  %v2652_v3 = vrot.slane %v11129_v24, 7 }
 0x2bf   : > { %9105 = vmatprep.mubr.f32.mxu1 %v11321_v13  ;;  %7816 = vmatprep.subr.mxu1 %v11605_v54  ;;  %v7602_v62 = vpop.f32.mrf.mxu0  ;;  %1299 = vst [vmem:[%s11103_s10 + $0x28] sm:$0xff] %v8959_v56  ;;  %v1898_v13 = vsel %vm1882_vm11, %v11344_v38, %v11409_v45  ;;  %v11636_v56 = vld [vmem:[#allocation4 + $0x310] sm:$0xff]  ;;  %v11646_v38 = vld [vmem:[#allocation4 + $0x388] sm:$0xff]  ;;  %v11648_v45 = vld [vmem:[#allocation2 + $0xb8] sm:$0xff] }
 0x2c0   : > { %3508 = vmatprep.mubr.f32.mxu0 %v11591_v49  ;;  %7817 = vmatpush3.msra.mxu1 %v11608_v7  ;;  %v1155_v54 = vpop.f32.mrf.mxu1  ;;  %14892 = vst [vmem:[#allocation68_spill] sm:$0xff] %v11636_v56  ;;  %v11640_v7 = vsel %vm1833_vm4, %v3198_v61, %v3199_v18  ;;  %14894 = vst [vmem:[#allocation70_spill] sm:$0xff] %v11646_v38  ;;  %v1914_v61 = vmul.f32 %v11399_v9, %v1898_v13  ;;  %v2654_v9 = vrot.slane %v11133_v55, 7 }
 0x2c1   : > { %7818 = vmatprep.subr.mxu1 %v11613_v30  ;;  %9106 = vmatmul.mubr.f32.gmra.mxu1 %v1912_v14  ;;  %14893 = vst [vmem:[#allocation69_spill] sm:$0xff] %v11640_v7  ;;  %v7603_v63 = vpop.f32.mrf.mxu0  ;;  %1298 = vst [vmem:[%s11103_s10 + $0x20] sm:$0xff] %v1155_v54  ;;  %v11650_v14 = vld [vmem:[#allocation2 + $0xc0] sm:$0xff]  ;;  %v11657_v54 = vld [vmem:[#allocation4 + $0x308] sm:$0xff] }
 0x2c2   : > { %7819 = vmatpush3.msra.mxu1 %v11619_v36  ;;  %3509 = vmatmul.mubr.f32.gmra.mxu0 %v11634_v52  ;;  %v11652_v58 = vadd.f32 %v7603_v63, %v7602_v62  ;;  %v3348_v52 = vmul.f32 %v10754_v35, %v11640_v7  ;;  %v11663_v36 = vld [vmem:[#allocation4 + $0x380] sm:$0xff]  ;;  %v3200_v62 = vrot.slane %v11648_v45, 7  ;;  %v3201_v13 = vrot.slane %v11650_v14, 7  ;;  %v3428_v7 = vld [vmem:[#allocation4 + $0x2f8] sm:$0xff] }
 0x2c3   : > { %9108 = vmatprep.mubr.f32.mxu1 %v11367_v23  ;;  %7820 = vmatprep.subr.mxu1 %v11624_v46  ;;  %v7605_v30 = vpop.f32.mrf.mxu0  ;;  %v2683_v23 = vsel %vm1833_vm4, %v11560_v47, %v2652_v3  ;;  %v11669_v63 = vld [vmem:[#allocation4 + $0x300] sm:$0xff] }
 0x2c4   : > { %14895 = vst [vmem:[#allocation71_spill] sm:$0xff] %v11652_v58  ;;  %3513 = vmatprep.mubr.f32.mxu0 %v11593_v20  ;;  %7821 = vmatpush3.msra.mxu1 %v11636_v56  ;;  %14896 = vst [vmem:[#allocation72_spill] sm:$0xff] %v11669_v63  ;;  %v2684_v47 = vmul.f32 %v10644_v12, %v2683_v23  ;;  %v11692_v23 = vld [vmem:[#allocation2 + $0xc8] sm:$0xff] }
 0x2c5   : > { %7822 = vmatprep.subr.mxu1 %v11646_v38  ;;  %9109 = vmatmul.mubr.f32.gmra.mxu1 %v1914_v61  ;;  %v7606_v58 = vpop.f32.mrf.mxu0  ;;  %v2653_v38 = vrot.slane %v11131_v28, 7 }
 0x2c6   : > { %7823 = vmatpush3.msra.mxu1 %v11657_v54  ;;  %3514 = vmatmul.mubr.f32.gmra.mxu0 %v3348_v52  ;;  %v11674_v56 = vadd.f32 %v7606_v58, %v7605_v30  ;;  %v11685_v30 = vsel %vm1833_vm4, %v3199_v18, %v3200_v62  ;;  %v3427_v58 = vld [vmem:[#allocation4 + $0x2f0] sm:$0xff] }
 0x2c7   : > { %7824 = vmatprep.subr.mxu1 %v11663_v36  ;;  %2861 = vmatprep.mubr.f32.mxu1 %v11129_v24  ;;  %v7608_v61 = vpop.f32.mrf.mxu0  ;;  %14898 = vst [vmem:[#allocation74_spill] sm:$0xff] %v11685_v30  ;;  %v11689_v24 = vsel %vm1833_vm4, %v3200_v62, %v3201_v13  ;;  %v2682_v62 = vsel %vm1833_vm4, %v2652_v3, %v2653_v38 }
 0x2c8   : > { %14897 = vst [vmem:[#allocation73_spill] sm:$0xff] %v11674_v56  ;;  %3518 = vmatprep.mubr.f32.mxu0 %v11648_v45  ;;  %7825 = vmatpush3.msra.mxu1 %v11669_v63  ;;  %14899 = vst [vmem:[#allocation75_spill] sm:$0xff] %v11689_v24  ;;  %v11694_v56 = vld [vmem:[#allocation2 + $0xd0] sm:$0xff] }
 0x2c9   : > { %9167 = vmatprep.subr.mxu1 %v3428_v7  ;;  %2862 = vmatmul.mubr.f32.vlgmr.msra.gmra.mxu1 %v2684_v47  ;;  %v7609_v52 = vpop.f32.mrf.mxu0  ;;  %v3350_v47 = vmul.f32 %v10811_v8, %v11689_v24  ;;  %v2655_v24 = vrot.slane %v11174_v15, 7 }
 0x2ca   : > { %3519 = vmatmul.mubr.f32.gmra.mxu0 %v11685_v30  ;;  %9168 = vmatpush3.msra.mxu1 %v3428_v7  ;;  %v11696_v63 = vadd.f32 %v7609_v52, %v7608_v61  ;;  %v2681_v7 = vsel %vm1833_vm4, %v2653_v38, %v2654_v9  ;;  %v3426_v61 = vld [vmem:[#allocation4 + $0x2e8] sm:$0xff]  ;;  %v3203_v52 = vrot.slane %v11694_v56, 7 }
 0x2cb   : > { %2866 = vmatprep.mubr.f32.mxu1 %v11131_v28  ;;  %3523 = vmatprep.mubr.f32.mxu0 %v11650_v14  ;;  %v7611_v18 = vpop.f32.mrf.mxu0  ;;  %v3202_v28 = vrot.slane %v11692_v23, 7 }
 0x2cc   : > { %14900 = vst [vmem:[#allocation76_spill] sm:$0xff] %v11696_v63  ;;  %9169 = vmatprep.subr.mxu1 %v3427_v58  ;;  %9224 = vmatpush3.msra.mxu0 %v11185_v50  ;;  %v2686_v50 = vmul.f32 %v10703_v60, %v2681_v7  ;;  %v11732_v7 = vld [vmem:[#allocation2 + $0xe0] sm:$0xff] }
 0x2cd   : > { %2867 = vmatmul.mubr.f32.gmra.mxu1 %v2682_v62  ;;  %9225 = vmatprep.subr.mxu0 %v11168_v44  ;;  %v8962_v30 = vpop.f32.mrf.mxu1  ;;  %v7612_v63 = vpop.f32.mrf.mxu0 }
 0x2ce   : > { %3524 = vmatmul.mubr.f32.gmra.mxu0 %v3350_v47  ;;  %9170 = vmatpush3.msra.mxu1 %v3427_v58  ;;  %1301 = vst [vmem:[%s11103_s10 + $0x38] sm:$0xff] %v8962_v30  ;;  %v11711_v3 = vadd.f32 %v7612_v63, %v7611_v18  ;;  %v2656_v47 = vrot.slane %v11223_v25, 7  ;;  %v11722_v63 = vsel %vm1833_vm4, %v3201_v13, %v3202_v28 }
 0x2cf   : > { %2871 = vmatprep.mubr.f32.mxu1 %v11133_v55  ;;  %3528 = vmatprep.mubr.f32.mxu0 %v11692_v23  ;;  %v1165_v38 = vpop.f32.mrf.mxu1  ;;  %v7614_v62 = vpop.f32.mrf.mxu0  ;;  %14901 = vst [vmem:[#allocation77_spill] sm:$0xff] %v11722_v63  ;;  %v3425_v55 = vld [vmem:[#allocation4 + $0x2e0] sm:$0xff]  ;;  %v11726_v30 = vsel %vm1833_vm4, %v3202_v28, %v3203_v52 }
 0x2d0   : > { %9171 = vmatprep.subr.mxu1 %v3426_v61  ;;  %9226 = vmatpush3.msra.mxu0 %v11168_v44  ;;  %1300 = vst [vmem:[%s11103_s10 + $0x30] sm:$0xff] %v1165_v38  ;;  %14902 = vst [vmem:[#allocation78_spill] sm:$0xff] %v11726_v30  ;;  %v11730_v44 = vld [vmem:[#allocation2 + $0xd8] sm:$0xff]  ;;  %v2680_v38 = vsel %vm1833_vm4, %v2654_v9, %v2655_v24 }
 0x2d1   : > { %2872 = vmatmul.mubr.f32.gmra.mxu1 %v2686_v50  ;;  %9227 = vmatprep.subr.mxu0 %v11189_v51  ;;  %v8965_v58 = vpop.f32.mrf.mxu1  ;;  %v7615_v18 = vpop.f32.mrf.mxu0 }
 0x2d2   : > { %3529 = vmatmul.mubr.f32.gmra.mxu0 %v11722_v63  ;;  %9172 = vmatpush3.msra.mxu1 %v3426_v61  ;;  %1303 = vst [vmem:[%s11103_s10 + $0x48] sm:$0xff] %v8965_v58  ;;  %v11735_v13 = vadd.f32 %v7615_v18, %v7614_v62  ;;  %v3352_v61 = vmul.f32 %v10840_v43, %v11726_v30  ;;  %v3424_v62 = vld [vmem:[#allocation4 + $0x2d8] sm:$0xff]  ;;  %v3205_v58 = vrot.slane %v11732_v7, 7 }
 0x2d3   : > { %2876 = vmatprep.mubr.f32.mxu1 %v11174_v15  ;;  %3533 = vmatprep.mubr.f32.mxu0 %v11694_v56  ;;  %v1175_v28 = vpop.f32.mrf.mxu1  ;;  %v7617_v50 = vpop.f32.mrf.mxu0  ;;  %v2679_v63 = vsel %vm1833_vm4, %v2655_v24, %v2656_v47  ;;  %v3204_v15 = vrot.slane %v11730_v44, 7 }
 0x2d4   : > { %14903 = vst [vmem:[#allocation79_spill] sm:$0xff] %v11735_v13  ;;  %9173 = vmatprep.subr.mxu1 %v3425_v55  ;;  %9228 = vmatpush3.msra.mxu0 %v11189_v51  ;;  %1302 = vst [vmem:[%s11103_s10 + $0x40] sm:$0xff] %v1175_v28  ;;  %v2688_v51 = vmul.f32 %v10754_v35, %v2679_v63  ;;  %v2657_v28 = vrot.slane %v11279_v17, 7 }
 0x2d5   : > { %2877 = vmatmul.mubr.f32.gmra.mxu1 %v2680_v38  ;;  %9229 = vmatprep.subr.mxu0 %v11216_v59  ;;  %v7618_v18 = vpop.f32.mrf.mxu0  ;;  %v2658_v38 = vrot.slane %v11281_v26, 7 }
 0x2d6   : > { %3534 = vmatmul.mubr.f32.gmra.mxu0 %v3352_v61  ;;  %9174 = vmatpush3.msra.mxu1 %v3425_v55  ;;  %v11750_v9 = vadd.f32 %v7618_v18, %v7617_v50  ;;  %v11760_v55 = vsel %vm1833_vm4, %v3203_v52, %v3204_v15  ;;  %v3423_v50 = vld [vmem:[#allocation4 + $0x2d0] sm:$0xff] }
 0x2d7   : > { %2881 = vmatprep.mubr.f32.mxu1 %v11223_v25  ;;  %3538 = vmatprep.mubr.f32.mxu0 %v11730_v44  ;;  %v7620_v24 = vpop.f32.mrf.mxu0  ;;  %14904 = vst [vmem:[#allocation80_spill] sm:$0xff] %v11760_v55  ;;  %v11764_v25 = vsel %vm1833_vm4, %v3204_v15, %v3205_v58  ;;  %v11774_v52 = vld [vmem:[#allocation2 + $0xf0] sm:$0xff]  ;;  %v2678_v15 = vsel %vm1833_vm4, %v2656_v47, %v2657_v28 }
 0x2d8   : > { %9175 = vmatprep.subr.mxu1 %v3424_v62  ;;  %9230 = vmatpush3.msra.mxu0 %v11216_v59  ;;  %14905 = vst [vmem:[#allocation81_spill] sm:$0xff] %v11764_v25  ;;  %v11768_v59 = vld [vmem:[#allocation2 + $0xe8] sm:$0xff]  ;;  %v3207_v47 = vrot.slane %v11774_v52, 7 }
 0x2d9   : > { %2882 = vmatmul.mubr.f32.gmra.mxu1 %v2688_v51  ;;  %9231 = vmatprep.subr.mxu0 %v11233_v40  ;;  %v7621_v63 = vpop.f32.mrf.mxu0  ;;  %v2677_v51 = vsel %vm1833_vm4, %v2657_v28, %v2658_v38 }
 0x2da   : > { %3539 = vmatmul.mubr.f32.gmra.mxu0 %v11760_v55  ;;  %9176 = vmatpush3.msra.mxu1 %v3424_v62  ;;  %v11770_v61 = vadd.f32 %v7621_v63, %v7620_v24  ;;  %v3354_v62 = vmul.f32 %v10914_v34, %v11764_v25  ;;  %v3206_v24 = vrot.slane %v11768_v59, 7  ;;  %v14908_v25 = vld [vmem:[#allocation32_spill] sm:$0xff] }
 0x2db   : > { %2886 = vmatprep.mubr.f32.mxu1 %v11279_v17  ;;  %3543 = vmatprep.mubr.f32.mxu0 %v11732_v7  ;;  %v11776_v18 = vpop.f32.mrf.mxu0  ;;  %v3422_v17 = vld [vmem:[#allocation4 + $0x2c8] sm:$0xff]  ;;  %v2659_v30 = vrot.slane %v14908_v25, 7 }
 0x2dc   : > { %14906 = vst [vmem:[#allocation82_spill] sm:$0xff] %v11770_v61  ;;  %9177 = vmatprep.subr.mxu1 %v3423_v50  ;;  %9232 = vmatpush3.msra.mxu0 %v11233_v40  ;;  %v2690_v40 = vmul.f32 %v10811_v8, %v2677_v51 }
 0x2dd   : > { %2887 = vmatmul.mubr.f32.gmra.mxu1 %v2678_v15  ;;  %9233 = vmatprep.subr.mxu0 %v11249_v6  ;;  %v8968_v63 = vpop.f32.mrf.mxu1  ;;  %v11787_v55 = vpop.f32.mrf.mxu0 }
 0x2de   : > { %3544 = vmatmul.mubr.f32.gmra.mxu0 %v3354_v62  ;;  %9178 = vmatpush3.msra.mxu1 %v3423_v50  ;;  %1305 = vst [vmem:[%s11103_s10 + $0x58] sm:$0xff] %v8968_v63  ;;  %v11801_v50 = vsel %vm1833_vm4, %v3205_v58, %v3206_v24  ;;  %v3421_v62 = vld [vmem:[#allocation4 + $0x2c0] sm:$0xff]  ;;  %v14911_v63 = vld [vmem:[#allocation30_spill] sm:$0xff] }
 0x2df   : > { %2891 = vmatprep.mubr.f32.mxu1 %v11281_v26  ;;  %3548 = vmatprep.mubr.f32.mxu0 %v11768_v59  ;;  %v1185_v28 = vpop.f32.mrf.mxu1  ;;  %v11794_v15 = vpop.f32.mrf.mxu0  ;;  %14909 = vst [vmem:[#allocation32_spill] sm:$0xff] %v11801_v50  ;;  %v14910_v26 = vld [vmem:[#allocation25_spill] sm:$0xff]  ;;  %v14643_v51 = vrot.slane %v14911_v63, 7 }
 0x2e0   : > { %14907 = vst [vmem:[#allocation83_spill] sm:$0xff] %v11794_v15  ;;  %9179 = vmatprep.subr.mxu1 %v3422_v17  ;;  %9234 = vmatpush3.msra.mxu0 %v11249_v6  ;;  %1304 = vst [vmem:[%s11103_s10 + $0x50] sm:$0xff] %v1185_v28  ;;  %v11810_v6 = vsel %vm1833_vm4, %v3206_v24, %v3207_v47  ;;  %v2676_v28 = vsel %vm1833_vm4, %v2658_v38, %v2659_v30  ;;  %v14915_v24 = vld [vmem:[#allocation26_spill] sm:$0xff]  ;;  %v3420_v38 = vld [vmem:[#allocation4 + $0x2b8] sm:$0xff] }
 0x2e1   : > { %2892 = vmatmul.mubr.f32.gmra.mxu1 %v2690_v40  ;;  %9235 = vmatprep.subr.mxu0 %v14910_v26  ;;  %v8971_v61 = vpop.f32.mrf.mxu1  ;;  %v11805_v13 = vpop.f32.mrf.mxu0  ;;  %14913 = vst [vmem:[#allocation30_spill] sm:$0xff] %v11810_v6 }
 0x2e2   : > { %14912 = vst [vmem:[#allocation25_spill] sm:$0xff] %v11805_v13  ;;  %3549 = vmatmul.mubr.f32.gmra.mxu0 %v11801_v50  ;;  %9180 = vmatpush3.msra.mxu1 %v3422_v17  ;;  %1307 = vst [vmem:[%s11103_s10 + $0x68] sm:$0xff] %v8971_v61  ;;  %v11820_v17 = vld [vmem:[#allocation2 + $0xf8] sm:$0xff]  ;;  %v2675_v50 = vsel %vm1833_vm4, %v2659_v30, %v14643_v51 }
 0x2e3   : > { %2896 = vmatprep.mubr.f32.mxu1 %v14908_v25  ;;  %3553 = vmatprep.mubr.f32.mxu0 %v11774_v52  ;;  %v1195_v58 = vpop.f32.mrf.mxu1  ;;  %v11815_v40 = vpop.f32.mrf.mxu0  ;;  %v14916_v25 = vld [vmem:[#allocation19_spill] sm:$0xff] }
 0x2e4   : > { %14914 = vst [vmem:[#allocation84_spill] sm:$0xff] %v11815_v40  ;;  %9236 = vmatpush3.msra.mxu0 %v14910_v26  ;;  %9181 = vmatprep.subr.mxu1 %v3421_v62  ;;  %1306 = vst [vmem:[%s11103_s10 + $0x60] sm:$0xff] %v1195_v58  ;;  %v3356_v61 = vmul.f32 %v14916_v25, %v11810_v6  ;;  %v14918_v58 = vld [vmem:[#allocation28_spill] sm:$0xff]  ;;  %v11838_v6 = vld [vmem:[#allocation2 + $0x100] sm:$0xff] }
 0x2e5   : > { %9237 = vmatprep.subr.mxu0 %v14915_v24  ;;  %2897 = vmatmul.mubr.f32.gmra.mxu1 %v2676_v28  ;;  %v8974_v26 = vpop.f32.mrf.mxu1  ;;  %v11830_v13 = vpop.f32.mrf.mxu0  ;;  %v11836_v28 = vrot.slane %v11820_v17, 7  ;;  %v11851_v51 = vrot.slane %v11838_v6, 7 }
 0x2e6   : > { %14917 = vst [vmem:[#allocation26_spill] sm:$0xff] %v11830_v13  ;;  %9238 = vmatpush3.msra.mxu0 %v14915_v24  ;;  %9182 = vmatpush3.msra.mxu1 %v3421_v62  ;;  %1309 = vst [vmem:[%s11103_s10 + $0x78] sm:$0xff] %v8974_v26  ;;  %v2692_v62 = vmul.f32 %v10840_v43, %v2675_v50  ;;  %v14921_v26 = vld [vmem:[#allocation29_spill] sm:$0xff]  ;;  %v3419_v50 = vld [vmem:[#allocation4 + $0x2b0] sm:$0xff] }
 0x2e7   : > { %3554 = vmatmul.mubr.f32.gmra.mxu0 %v3356_v61  ;;  %9239 = vmatprep.subr.mxu0 %v14918_v58  ;;  %v1205_v15 = vpop.f32.mrf.mxu1  ;;  %v11840_v30 = vpop.f32.mrf.mxu0  ;;  %14922 = vst [vmem:[#allocation29_spill] sm:$0xff] %v11851_v51  ;;  %v14925_v13 = vld [vmem:[#allocation33_spill] sm:$0xff] }
 0x2e8   : > { %14919 = vst [vmem:[#allocation28_spill] sm:$0xff] %v11840_v30  ;;  %2901 = vmatprep.mubr.f32.mxu1 %v14911_v63  ;;  %3558 = vmatprep.mubr.f32.mxu0 %v11820_v17  ;;  %1308 = vst [vmem:[%s11103_s10 + $0x70] sm:$0xff] %v1205_v15  ;;  %v2661_v30 = vrot.slane %v11359_v32, 7  ;;  %v11859_v15 = vsel %vm1833_vm4, %v3207_v47, %v11836_v28 }
 0x2e9   : > { %9240 = vmatpush3.msra.mxu0 %v14918_v58  ;;  %9183 = vmatprep.subr.mxu1 %v3420_v38  ;;  %v11847_v24 = vpop.f32.mrf.mxu0  ;;  %v8977_v61 = vpop.f32.mrf.mxu1  ;;  %14923 = vst [vmem:[#allocation86_spill] sm:$0xff] %v11859_v15 }
 0x2ea   : > { %14920 = vst [vmem:[#allocation85_spill] sm:$0xff] %v11847_v24  ;;  %9241 = vmatprep.subr.mxu0 %v14921_v26  ;;  %2902 = vmatmul.mubr.f32.gmra.mxu1 %v2692_v62  ;;  %1311 = vst [vmem:[%s11103_s10 + $0x88] sm:$0xff] %v8977_v61  ;;  %v3342_v61 = vsel %vm1833_vm4, %v11836_v28, %v11851_v51 }
 0x2eb   : > { %9242 = vmatpush3.msra.mxu0 %v14921_v26  ;;  %9184 = vmatpush3.msra.mxu1 %v3420_v38  ;;  %v11862_v24 = vpop.f32.mrf.mxu0  ;;  %v1215_v62 = vpop.f32.mrf.mxu1  ;;  %v14927_v26 = vrot.slane %v14911_v63, 7  ;;  %v3418_v63 = vld [vmem:[#allocation4 + $0x2a8] sm:$0xff] }
 0x2ec   : > { %14924 = vst [vmem:[#allocation87_spill] sm:$0xff] %v11862_v24  ;;  %3559 = vmatmul.mubr.f32.gmra.mxu0 %v11859_v15  ;;  %9243 = vmatprep.subr.mxu0 %v14925_v13  ;;  %1310 = vst [vmem:[%s11103_s10 + $0x80] sm:$0xff] %v1215_v62  ;;  %v14928_v15 = vld [vmem:[#allocation34_spill] sm:$0xff]  ;;  %v14929_v62 = vld [vmem:[#allocation20_spill] sm:$0xff]  ;;  %v14930_v24 = vrot.slane %v11361_v16, 7 }
 0x2ed   : > { %2906 = vmatprep.mubr.f32.mxu1 %v11359_v32  ;;  %3563 = vmatprep.mubr.f32.mxu0 %v11838_v6  ;;  %v11873_v47 = vpop.f32.mrf.mxu0  ;;  %v8980_v38 = vpop.f32.mrf.mxu1  ;;  %v2674_v58 = vsel %vm1833_vm4, %v14927_v26, %v2661_v30  ;;  %v3358_v32 = vmul.f32 %v14929_v62, %v3342_v61  ;;  %v11895_v26 = vld [vmem:[#allocation2 + $0x108] sm:$0xff] }
 0x2ee   : > { %14926 = vst [vmem:[#allocation33_spill] sm:$0xff] %v11873_v47  ;;  %9244 = vmatpush3.msra.mxu0 %v14925_v13  ;;  %9185 = vmatprep.subr.mxu1 %v3419_v50  ;;  %1313 = vst [vmem:[%s11103_s10 + $0x98] sm:$0xff] %v8980_v38  ;;  %v2673_v47 = vsel %vm1833_vm4, %v2661_v30, %v14930_v24  ;;  %v14932_v38 = vld [vmem:[#allocation35_spill] sm:$0xff] }
 0x2ef   : > { %9245 = vmatprep.subr.mxu0 %v14928_v15  ;;  %2907 = vmatmul.mubr.f32.gmra.mxu1 %v2674_v58  ;;  %v11887_v40 = vpop.f32.mrf.mxu0  ;;  %v1225_v13 = vpop.f32.mrf.mxu1  ;;  %v2694_v30 = vmul.f32 %v10914_v34, %v2673_v47  ;;  %v14935_v47 = vld [vmem:[#allocation37_spill] sm:$0xff] }
 0x2f0   : > { %14931 = vst [vmem:[#allocation34_spill] sm:$0xff] %v11887_v40  ;;  %9246 = vmatpush3.msra.mxu0 %v14928_v15  ;;  %9186 = vmatpush3.msra.mxu1 %v3419_v50  ;;  %1312 = vst [vmem:[%s11103_s10 + $0x90] sm:$0xff] %v1225_v13  ;;  %v3341_v50 = vsel %vm1833_vm4, %v11851_v51, %v11513_v41  ;;  %v14940_v40 = vld [vmem:[#allocation41_spill] sm:$0xff] }
 0x2f1   : > { %3564 = vmatmul.mubr.f32.gmra.mxu0 %v3358_v32  ;;  %9247 = vmatprep.subr.mxu0 %v14932_v38  ;;  %v11892_v58 = vpop.f32.mrf.mxu0  ;;  %v8983_v61 = vpop.f32.mrf.mxu1  ;;  %v2663_v32 = vrot.slane %v14935_v47, 7 }
 0x2f2   : > { %14933 = vst [vmem:[#allocation35_spill] sm:$0xff] %v11892_v58  ;;  %2911 = vmatprep.mubr.f32.mxu1 %v11361_v16  ;;  %3568 = vmatprep.mubr.f32.mxu0 %v11895_v26  ;;  %1315 = vst [vmem:[%s11103_s10 + $0xa8] sm:$0xff] %v8983_v61  ;;  %v14937_v61 = vld [vmem:[#allocation39_spill] sm:$0xff]  ;;  %v3417_v58 = vld [vmem:[#allocation4 + $0x2a0] sm:$0xff] }
 0x2f3   : > { %9248 = vmatpush3.msra.mxu0 %v14932_v38  ;;  %9187 = vmatprep.subr.mxu1 %v3418_v63  ;;  %v11901_v24 = vpop.f32.mrf.mxu0  ;;  %v1235_v15 = vpop.f32.mrf.mxu1 }
 0x2f4   : > { %14934 = vst [vmem:[#allocation88_spill] sm:$0xff] %v11901_v24  ;;  %9249 = vmatprep.subr.mxu0 %v11393_v10  ;;  %2912 = vmatmul.mubr.f32.gmra.mxu1 %v2694_v30  ;;  %1314 = vst [vmem:[%s11103_s10 + $0xa0] sm:$0xff] %v1235_v15  ;;  %v3245_v30 = vrot.slane %v11539_v48, 1  ;;  %v3317_v24 = vld [vmem:[#allocation4 + $0xe0] sm:$0xff] }
 0x2f5   : > { %9250 = vmatpush3.msra.mxu0 %v11393_v10  ;;  %9188 = vmatpush3.msra.mxu1 %v3418_v63  ;;  %v11911_v13 = vpop.f32.mrf.mxu0  ;;  %v8986_v38 = vpop.f32.mrf.mxu1  ;;  %v14938_v10 = vld [vmem:[#allocation40_spill] sm:$0xff] }
 0x2f6   : > { %14936 = vst [vmem:[#allocation37_spill] sm:$0xff] %v11911_v13  ;;  %3569 = vmatmul.mubr.f32.gmra.mxu0 %v3341_v50  ;;  %9251 = vmatprep.subr.mxu0 %v14937_v61  ;;  %1317 = vst [vmem:[%s11103_s10 + $0xb8] sm:$0xff] %v8986_v38  ;;  %v11919_v41 = vrot.slane %v14938_v10, 7  ;;  %v3274_v50 = vmul.f32 %v11153_v22, %v11467_v33  ;;  %v14967_v13 = vld [vmem:[#allocation64_spill] sm:$0xff] }
 0x2f7   : > { %2916 = vmatprep.mubr.f32.mxu1 %v14935_v47  ;;  %9252 = vmatpush3.msra.mxu0 %v14937_v61  ;;  %v11921_v63 = vpop.f32.mrf.mxu0  ;;  %v1245_v15 = vpop.f32.mrf.mxu1  ;;  %v14941_v47 = vrot.slane %v11361_v16, 7  ;;  %v11943_v16 = vsel %vm1882_vm11, %v11480_v39, %v3245_v30 }
 0x2f8   : > { %14939 = vst [vmem:[#allocation39_spill] sm:$0xff] %v11921_v63  ;;  %9255 = vmatprep.mubr.f32.mxu0 %v11474_v19  ;;  %9253 = vmatprep.subr.mxu0 %v14940_v40  ;;  %1316 = vst [vmem:[%s11103_s10 + $0xb0] sm:$0xff] %v1245_v15  ;;  %v2671_v61 = vsel %vm1833_vm4, %v2663_v32, %v11919_v41  ;;  %v3416_v19 = vld [vmem:[#allocation4 + $0x298] sm:$0xff]  ;;  %v3247_v15 = vrot.slane %v11593_v20, 1  ;;  %v14946_v20 = vld [vmem:[#allocation22_spill] sm:$0xff] }
 0x2f9   : > { %9189 = vmatprep.subr.mxu1 %v3417_v58  ;;  %9254 = vmatpush3.msra.mxu0 %v14940_v40  ;;  %v2672_v38 = vsel %vm1833_vm4, %v14941_v47, %v2663_v32  ;;  %v11936_v63 = vpop.f32.mrf.mxu0  ;;  %v8989_v33 = vpop.f32.mrf.mxu1  ;;  %v14945_v47 = vld [vmem:[#allocation45_spill] sm:$0xff] }
 0x2fa   : > { %14942 = vst [vmem:[#allocation40_spill] sm:$0xff] %v11936_v63  ;;  %2917 = vmatmul.mubr.f32.gmra.mxu1 %v2672_v38  ;;  %9256 = vmatmul.mubr.f32.vlgmr.msra.gmra.mxu0 %v3274_v50  ;;  %1319 = vst [vmem:[%s11103_s10 + $0xc8] sm:$0xff] %v8989_v33  ;;  %v2696_v50 = vmul.f32 %v14916_v25, %v2671_v61  ;;  %v14947_v38 = vld [vmem:[#allocation46_spill] sm:$0xff]  ;;  %v3415_v61 = vld [vmem:[#allocation4 + $0x290] sm:$0xff] }
 0x2fb   : > { %9190 = vmatpush3.msra.mxu1 %v3417_v58  ;;  %8130 = vmatprep.subr.mxu0 %v11442_v5  ;;  %v11945_v40 = vpop.f32.mrf.mxu0  ;;  %v1255_v32 = vpop.f32.mrf.mxu1  ;;  %v3246_v58 = vrot.slane %v11591_v49, 1  ;;  %v14972_v25 = vld [vmem:[#allocation68_spill] sm:$0xff] }
 0x2fc   : > { %14943 = vst [vmem:[#allocation41_spill] sm:$0xff] %v11945_v40  ;;  %2921 = vmatprep.mubr.f32.mxu1 %v14938_v10  ;;  %9258 = vmatprep.mubr.f32.mxu0 %v11506_v1  ;;  %1318 = vst [vmem:[%s11103_s10 + $0xc0] sm:$0xff] %v1255_v32  ;;  %v3276_v10 = vmul.f32 %v14946_v20, %v11943_v16  ;;  %v3319_v40 = vld [vmem:[#allocation4 + $0xf0] sm:$0xff] }
 0x2fd   : > { %8131 = vmatpush3.msra.mxu0 %v11452_v2  ;;  %9191 = vmatprep.subr.mxu1 %v3416_v19  ;;  %v11954_v5 = vpop.f32.mrf.mxu0  ;;  %v8992_v39 = vpop.f32.mrf.mxu1  ;;  %v14948_v2 = vld [vmem:[#allocation47_spill] sm:$0xff]  ;;  %v11966_v32 = vsel %vm1882_vm11, %v3245_v30, %v3246_v58  ;;  %v11971_v63 = vsel %vm1882_vm11, %v3246_v58, %v3247_v15  ;;  %v14951_v58 = vld [vmem:[#allocation49_spill] sm:$0xff] }
 0x2fe   : > { %14944 = vst [vmem:[#allocation89_spill] sm:$0xff] %v11954_v5  ;;  %8132 = vmatprep.subr.mxu0 %v14945_v47  ;;  %2922 = vmatmul.mubr.f32.gmra.mxu1 %v2696_v50  ;;  %1321 = vst [vmem:[%s11103_s10 + $0xd8] sm:$0xff] %v8992_v39  ;;  %v14949_v47 = vld [vmem:[#allocation43_spill] sm:$0xff]  ;;  %v3248_v39 = vrot.slane %v11648_v45, 1 }
 0x2ff   : > { %8133 = vmatpush3.msra.mxu0 %v14947_v38  ;;  %9192 = vmatpush3.msra.mxu1 %v3416_v19  ;;  %v11961_v49 = vpop.f32.mrf.mxu0  ;;  %v1265_v33 = vpop.f32.mrf.mxu1  ;;  %v2665_v50 = vrot.slane %v14949_v47, 7  ;;  %v3249_v19 = vrot.slane %v11650_v14, 1  ;;  %v14950_v38 = vld [vmem:[#allocation48_spill] sm:$0xff]  ;;  %v3278_v14 = vmul.f32 %v11238_v42, %v11971_v63 }
 0x300   : > { %9259 = vmatmul.mubr.f32.gmra.mxu0 %v3276_v10  ;;  %8134 = vmatprep.subr.mxu0 %v14948_v2  ;;  %1320 = vst [vmem:[%s11103_s10 + $0xd0] sm:$0xff] %v1265_v33  ;;  %v3414_v2 = vld [vmem:[#allocation4 + $0x288] sm:$0xff] }
 0x301   : > { %2926 = vmatprep.mubr.f32.mxu1 %v14949_v47  ;;  %9261 = vmatprep.mubr.f32.mxu0 %v11966_v32  ;;  %v11978_v10 = vpop.f32.mrf.mxu0  ;;  %v11984_v30 = vsel %vm1833_vm4, %v11919_v41, %v2665_v50  ;;  %v11993_v45 = vsel %vm1833_vm4, %v2665_v50, %v11525_v4  ;;  %v12001_v47 = vsel %vm1882_vm11, %v3247_v15, %v3248_v39  ;;  %v3251_v4 = vrot.slane %v11694_v56, 1  ;;  %v14953_v50 = vld [vmem:[#allocation51_spill] sm:$0xff] }
 0x302   : > { %8135 = vmatpush3.msra.mxu0 %v14950_v38  ;;  %9193 = vmatprep.subr.mxu1 %v3415_v61  ;;  %v12005_v38 = vsel %vm1882_vm11, %v3248_v39, %v3249_v19 }
 0x303   : > { %8136 = vmatprep.subr.mxu0 %v14951_v58  ;;  %2927 = vmatmul.mubr.f32.gmra.mxu1 %v11984_v30  ;;  %v11995_v33 = vpop.f32.mrf.mxu0  ;;  %v3280_v56 = vmul.f32 %v11252_v29, %v12005_v38 }
 0x304   : > { %8137 = vmatpush3.msra.mxu0 %v11493_v31  ;;  %9194 = vmatpush3.msra.mxu1 %v3415_v61  ;;  %v2698_v31 = vmul.f32 %v14929_v62, %v11993_v45  ;;  %v14952_v61 = vld [vmem:[#allocation50_spill] sm:$0xff]  ;;  %v3255_v62 = vrot.slane %v11774_v52, 1  ;;  %v14961_v52 = vld [vmem:[#allocation31_spill] sm:$0xff] }
 0x305   : > { %9262 = vmatmul.mubr.f32.gmra.mxu0 %v3278_v14  ;;  %8138 = vmatprep.subr.mxu0 %v11508_v53  ;;  %v12007_v58 = vpop.f32.mrf.mxu0  ;;  %v3250_v53 = vrot.slane %v11692_v23, 1 }
 0x306   : > { %2931 = vmatprep.mubr.f32.mxu1 %v11433_v37  ;;  %9264 = vmatprep.mubr.f32.mxu0 %v12001_v47  ;;  %v3413_v37 = vld [vmem:[#allocation4 + $0x280] sm:$0xff] }
 0x307   : > { %8139 = vmatpush3.msra.mxu0 %v14952_v61  ;;  %9195 = vmatprep.subr.mxu1 %v3414_v2  ;;  %v12016_v15 = vpop.f32.mrf.mxu0  ;;  %v12027_v23 = vsel %vm1882_vm11, %v3249_v19, %v3250_v53  ;;  %v12031_v14 = vsel %vm1882_vm11, %v3250_v53, %v3251_v4  ;;  %v14955_v19 = vld [vmem:[#allocation58_spill] sm:$0xff]  ;;  %v14956_v53 = vld [vmem:[#allocation27_spill] sm:$0xff] }
 0x308   : > { %8140 = vmatprep.subr.mxu0 %v14953_v50  ;;  %2932 = vmatmul.mubr.f32.gmra.mxu1 %v2698_v31  ;;  %v3253_v31 = vrot.slane %v11732_v7, 1  ;;  %v3282_v61 = vmul.f32 %v14956_v53, %v12031_v14  ;;  %v14957_v7 = vld [vmem:[#allocation53_spill] sm:$0xff] }
 0x309   : > { %8141 = vmatpush3.msra.mxu0 %v11532_v11  ;;  %9196 = vmatpush3.msra.mxu1 %v3414_v2  ;;  %v12022_v39 = vpop.f32.mrf.mxu0  ;;  %v3252_v11 = vrot.slane %v11730_v44, 1  ;;  %v14958_v44 = vld [vmem:[#allocation55_spill] sm:$0xff] }
 0x30a   : > { %9265 = vmatmul.mubr.f32.gmra.mxu0 %v3280_v56  ;;  %8142 = vmatprep.subr.mxu0 %v11536_v0  ;;  %v14954_v0 = vld [vmem:[#allocation52_spill] sm:$0xff] }
 0x30b   : > { %2936 = vmatprep.mubr.f32.mxu1 %v11459_v27  ;;  %9267 = vmatprep.mubr.f32.mxu0 %v12027_v23  ;;  %v12037_v2 = vpop.f32.mrf.mxu0  ;;  %v3320_v27 = vld [vmem:[#allocation4 + $0xf8] sm:$0xff]  ;;  %v12054_v56 = vsel %vm1882_vm11, %v3252_v11, %v3253_v31 }
 0x30c   : > { %8143 = vmatpush3.msra.mxu0 %v11544_v57  ;;  %9197 = vmatprep.subr.mxu1 %v3413_v37  ;;  %v12050_v57 = vsel %vm1882_vm11, %v3251_v4, %v3252_v11  ;;  %v3254_v4 = vrot.slane %v11768_v59, 1  ;;  %v14960_v11 = vld [vmem:[#allocation57_spill] sm:$0xff]  ;;  %v3284_v5 = vmul.f32 %v14961_v52, %v12054_v56 }
 0x30d   : > { %8144 = vmatprep.subr.mxu0 %v14954_v0  ;;  %2937 = vmatmul.mubr.f32.gmra.mxu1 %v14955_v19  ;;  %v12044_v50 = vpop.f32.mrf.mxu0 }
 0x30e   : > { %8145 = vmatpush3.msra.mxu0 %v14957_v7  ;;  %9198 = vmatpush3.msra.mxu1 %v3413_v37  ;;  %v3366_v7 = vmul.f32 %v11153_v22, %v11943_v16  ;;  %v3304_v37 = vld [vmem:[#allocation4 + $0x78] sm:$0xff]  ;;  %v14962_v16 = vld [vmem:[#allocation59_spill] sm:$0xff]  ;;  %v14963_v22 = vld [vmem:[#allocation61_spill] sm:$0xff]  ;;  %v12076_v59 = vsel %vm1882_vm11, %v3254_v4, %v3255_v62 }
 0x30f   : > { %9268 = vmatmul.mubr.f32.gmra.mxu0 %v3282_v61  ;;  %8146 = vmatprep.subr.mxu0 %v14958_v44  ;;  %v12056_v0 = vpop.f32.mrf.mxu0  ;;  %v14959_v61 = vld [vmem:[#allocation56_spill] sm:$0xff] }
 0x310   : > { %9199 = vmatprep.mubr.f32.mxu1 %v11506_v1  ;;  %9270 = vmatprep.mubr.f32.mxu0 %v12050_v57 }
 0x311   : > { %8147 = vmatpush3.msra.mxu0 %v14959_v61  ;;  %8018 = vmatprep.subr.mxu1 %v3320_v27  ;;  %v12065_v44 = vpop.f32.mrf.mxu0  ;;  %v3303_v27 = vld [vmem:[#allocation4 + $0x70] sm:$0xff]  ;;  %v3318_v61 = vld [vmem:[#allocation4 + $0xe8] sm:$0xff] }
 0x312   : > { %8148 = vmatprep.subr.mxu0 %v14960_v11  ;;  %9200 = vmatmul.mubr.f32.vlgmr.msra.gmra.mxu1 %v3366_v7  ;;  %v12081_v7 = vsel %vm1882_vm11, %v3253_v31, %v3254_v4  ;;  %v14966_v31 = vld [vmem:[#allocation36_spill] sm:$0xff] }
 0x313   : > { %8149 = vmatpush3.msra.mxu0 %v14962_v16  ;;  %8019 = vmatpush3.msra.mxu1 %v3304_v37  ;;  %v12071_v1 = vpop.f32.mrf.mxu0  ;;  %v14965_v37 = vld [vmem:[#allocation63_spill] sm:$0xff]  ;;  %v3286_v4 = vmul.f32 %v14966_v31, %v12076_v59 }
 0x314   : > { %9271 = vmatmul.mubr.f32.gmra.mxu0 %v3284_v5  ;;  %8150 = vmatprep.subr.mxu0 %v14963_v22  ;;  %v14964_v5 = vld [vmem:[#allocation62_spill] sm:$0xff]  ;;  %v12088_v22 = vrot.slane %v11820_v17, 1 }
 0x315   : > { %9202 = vmatprep.mubr.f32.mxu1 %v11966_v32  ;;  %8020 = vmatprep.subr.mxu1 %v3319_v40  ;;  %v12083_v11 = vpop.f32.mrf.mxu0  ;;  %v3368_v40 = vmul.f32 %v14946_v20, %v11971_v63  ;;  %v3302_v32 = vld [vmem:[#allocation4 + $0x68] sm:$0xff] }
 0x316   : > { %9273 = vmatprep.mubr.f32.mxu0 %v12081_v7  ;;  %8151 = vmatpush3.msra.mxu0 %v14964_v5  ;;  %v3301_v5 = vld [vmem:[#allocation4 + $0x60] sm:$0xff] }
 0x317   : > { %8021 = vmatpush3.msra.mxu1 %v3303_v27  ;;  %8152 = vmatprep.subr.mxu0 %v14965_v37  ;;  %v12095_v16 = vpop.f32.mrf.mxu0  ;;  %v14968_v27 = vld [vmem:[#allocation65_spill] sm:$0xff]  ;;  %v14969_v37 = vld [vmem:[#allocation42_spill] sm:$0xff] }
 0x318   : > { %8022 = vmatprep.subr.mxu1 %v3318_v61  ;;  %8153 = vmatpush3.msra.mxu0 %v14967_v13  ;;  %v3272_v63 = vsel %vm1882_vm11, %v12088_v22, %v14969_v37  ;;  %v12109_v13 = vsel %vm1882_vm11, %v3255_v62, %v12088_v22  ;;  %v3316_v61 = vld [vmem:[#allocation4 + $0xd8] sm:$0xff] }
 0x319   : > { %9203 = vmatmul.mubr.f32.gmra.mxu1 %v3368_v40  ;;  %9274 = vmatmul.mubr.f32.gmra.mxu0 %v3286_v4  ;;  %v12098_v17 = vpop.f32.mrf.mxu0  ;;  %v12115_v4 = vld [vmem:[#allocation2] sm:$0xff]  ;;  %v3300_v62 = vld [vmem:[#allocation4 + $0x58] sm:$0xff] }
 0x31a   : > { %8023 = vmatpush3.msra.mxu1 %v3302_v32  ;;  %8154 = vmatprep.subr.mxu0 %v14968_v27  ;;  %v14970_v32 = vld [vmem:[#allocation66_spill] sm:$0xff]  ;;  %v12118_v27 = vrot.slane %v12115_v4, 7 }
 0x31b   : > { %9205 = vmatprep.mubr.f32.mxu1 %v12001_v47  ;;  %8024 = vmatprep.subr.mxu1 %v3317_v24  ;;  %v12111_v40 = vpop.f32.mrf.mxu0  ;;  %v3370_v24 = vmul.f32 %v11238_v42, %v12005_v38  ;;  %v14971_v47 = vld [vmem:[#allocation38_spill] sm:$0xff]  ;;  %v3299_v42 = vld [vmem:[#allocation4 + $0x50] sm:$0xff] }
 0x31c   : > { %9276 = vmatprep.mubr.f32.mxu0 %v12109_v13  ;;  %8155 = vmatpush3.msra.mxu0 %v14970_v32  ;;  %v3288_v37 = vmul.f32 %v14971_v47, %v3272_v63  ;;  %v3315_v32 = vld [vmem:[#allocation4 + $0xd0] sm:$0xff]  ;;  %v3314_v63 = vld [vmem:[#allocation4 + $0xc8] sm:$0xff] }
 0x31d   : > { %8025 = vmatpush3.msra.mxu1 %v3301_v5  ;;  %8156 = vmatprep.subr.mxu0 %v11624_v46  ;;  %v12124_v20 = vpop.f32.mrf.mxu0  ;;  %v14974_v5 = vld [vmem:[#allocation70_spill] sm:$0xff] }
 0x31e   : > { %8026 = vmatprep.subr.mxu1 %v3316_v61  ;;  %8157 = vmatpush3.msra.mxu0 %v14972_v25  ;;  %v14975_v46 = vld [vmem:[#allocation54_spill] sm:$0xff] }
 0x31f   : > { %9206 = vmatmul.mubr.f32.gmra.mxu1 %v3370_v24  ;;  %9277 = vmatmul.mubr.f32.gmra.mxu0 %v3288_v37  ;;  %v12127_v51 = vpop.f32.mrf.mxu0  ;;  %v4056_v38 = vsel %vm1833_vm4, %v12118_v27, %v14975_v46  ;;  %v12139_v25 = vld [vmem:[#allocation2 + $0xa8] sm:$0xff]  ;;  %v12141_v24 = vld [vmem:[#allocation2 + $0xb0] sm:$0xff] }
 0x320   : > { %14973 = vst [vmem:[#allocation45_spill] sm:$0xff] %v12127_v51  ;;  %8027 = vmatpush3.msra.mxu1 %v3300_v62  ;;  %8158 = vmatprep.subr.mxu0 %v14974_v5  ;;  %14977 = vst [vmem:[#allocation47_spill] sm:$0xff] %v12141_v24  ;;  %v4057_v62 = vmul.f32 %v10644_v12, %v4056_v38  ;;  %v3298_v37 = vld [vmem:[#allocation4 + $0x48] sm:$0xff]  ;;  %v14978_v5 = vld [vmem:[#allocation72_spill] sm:$0xff]  ;;  %v4027_v38 = vrot.slane %v12141_v24, 7 }
 0x321   : > { %9208 = vmatprep.mubr.f32.mxu1 %v12027_v23  ;;  %8028 = vmatprep.subr.mxu1 %v3315_v32  ;;  %v12135_v61 = vpop.f32.mrf.mxu0  ;;  %v3372_v23 = vmul.f32 %v11252_v29, %v12031_v14  ;;  %v3312_v14 = vld [vmem:[#allocation4 + $0xb8] sm:$0xff] }
 0x322   : > { %14976 = vst [vmem:[#allocation46_spill] sm:$0xff] %v12135_v61  ;;  %8159 = vmatpush3.msra.mxu0 %v11657_v54  ;;  %4233 = vmatprep.mubr.f32.mxu0 %v11539_v48  ;;  %v3313_v54 = vld [vmem:[#allocation4 + $0xc0] sm:$0xff]  ;;  %v4026_v48 = vrot.slane %v12139_v25, 7 }
 0x323   : > { %8029 = vmatpush3.msra.mxu1 %v3299_v42  ;;  %8160 = vmatprep.subr.mxu0 %v11663_v36  ;;  %v12147_v32 = vpop.f32.mrf.mxu0  ;;  %v3297_v61 = vld [vmem:[#allocation4 + $0x40] sm:$0xff]  ;;  %v12154_v36 = vld [vmem:[#allocation7 + $0x2f8] sm:$0xff] }
 0x324   : > { %8030 = vmatprep.subr.mxu1 %v3314_v63  ;;  %8161 = vmatpush3.msra.mxu0 %v14978_v5  ;;  %v3374_v63 = vmul.f32 %v14956_v53, %v12054_v56  ;;  %v3311_v5 = vld [vmem:[#allocation4 + $0xb0] sm:$0xff]  ;;  %v12171_v56 = vrot.slane %v11838_v6, 1  ;;  %v12173_v53 = vld [vmem:[#allocation2 + $0xb8] sm:$0xff] }
 0x325   : > { %9209 = vmatmul.mubr.f32.gmra.mxu1 %v3372_v23  ;;  %4234 = vmatmul.mubr.f32.vlgmr.msra.gmra.mxu0 %v4057_v62  ;;  %v12152_v42 = vpop.f32.mrf.mxu0  ;;  %v3296_v62 = vld [vmem:[#allocation4 + $0x38] sm:$0xff] }
 0x326   : > { %8031 = vmatpush3.msra.mxu1 %v3298_v37  ;;  %9211 = vmatprep.mubr.f32.mxu1 %v12050_v57  ;;  %v4055_v57 = vsel %vm1833_vm4, %v14975_v46, %v4026_v48  ;;  %v3295_v37 = vld [vmem:[#allocation4 + $0x30] sm:$0xff]  ;;  %14979 = vst [vmem:[#allocation43_spill] sm:$0xff] %v12171_v56  ;;  %v3376_v46 = vmul.f32 %v14961_v52, %v12076_v59  ;;  %v4028_v59 = vrot.slane %v12173_v53, 7 }
 0x327   : > { %8032 = vmatprep.subr.mxu1 %v3313_v54  ;;  %4238 = vmatprep.mubr.f32.mxu0 %v12139_v25  ;;  %v12160_v23 = vpop.f32.mrf.mxu0  ;;  %v4054_v54 = vsel %vm1833_vm4, %v4026_v48, %v4027_v38 }
 0x328   : > { %8033 = vmatpush3.msra.mxu1 %v3297_v61  ;;  %9335 = vmatprep.subr.mxu0 %v12154_v36  ;;  %v3310_v61 = vld [vmem:[#allocation4 + $0xa8] sm:$0xff]  ;;  %v4059_v6 = vmul.f32 %v10703_v60, %v4054_v54 }
 0x329   : > { %8034 = vmatprep.subr.mxu1 %v3312_v14  ;;  %9212 = vmatmul.mubr.f32.gmra.mxu1 %v3374_v63  ;;  %v12168_v51 = vpop.f32.mrf.mxu0  ;;  %v12175_v14 = vld [vmem:[#allocation2 + $0xc0] sm:$0xff]  ;;  %v3294_v63 = vld [vmem:[#allocation4 + $0x28] sm:$0xff] }
 0x32a   : > { %8035 = vmatpush3.msra.mxu1 %v3296_v62  ;;  %4239 = vmatmul.mubr.f32.gmra.mxu0 %v4055_v57  ;;  %14980 = vst [vmem:[#allocation48_spill] sm:$0xff] %v12175_v14  ;;  %v3309_v62 = vld [vmem:[#allocation4 + $0xa0] sm:$0xff]  ;;  %v3363_v57 = vsel %vm1882_vm11, %v12088_v22, %v12171_v56  ;;  %v14659_v52 = vrot.slane %v12175_v14, 7  ;;  %v3292_v22 = vld [vmem:[#allocation4 + $0x18] sm:$0xff] }
 0x32b   : > { %9214 = vmatprep.mubr.f32.mxu1 %v12081_v7  ;;  %8036 = vmatprep.subr.mxu1 %v3311_v5  ;;  %v12180_v48 = vpop.f32.mrf.mxu0  ;;  %v3361_v7 = vrot.slane %v11895_v26, 1  ;;  %v3293_v5 = vld [vmem:[#allocation4 + $0x20] sm:$0xff]  ;;  %v3378_v54 = vmul.f32 %v14966_v31, %v3363_v57  ;;  %v3307_v26 = vld [vmem:[#allocation4 + $0x90] sm:$0xff] }
 0x32c   : > { %4243 = vmatprep.mubr.f32.mxu0 %v12141_v24  ;;  %8037 = vmatpush3.msra.mxu1 %v3295_v37  ;;  %v3308_v37 = vld [vmem:[#allocation4 + $0x98] sm:$0xff] }
 0x32d   : > { %8038 = vmatprep.subr.mxu1 %v3310_v61  ;;  %9215 = vmatmul.mubr.f32.gmra.mxu1 %v3376_v46  ;;  %v12191_v29 = vpop.f32.mrf.mxu0  ;;  %v14981_v61 = vld [vmem:[#allocation44_spill] sm:$0xff]  ;;  %v3362_v57 = vsel %vm1882_vm11, %v12171_v56, %v3361_v7 }
 0x32e   : > { %8039 = vmatpush3.msra.mxu1 %v3294_v63  ;;  %4244 = vmatmul.mubr.f32.gmra.mxu0 %v4059_v6  ;;  %v3364_v46 = vsel %vm1882_vm11, %v3361_v7, %v14981_v61  ;;  %v4053_v63 = vsel %vm1833_vm4, %v4027_v38, %v4028_v59  ;;  %v4052_v6 = vsel %vm1833_vm4, %v4028_v59, %v14659_v52  ;;  %v3290_v61 = vld [vmem:[#allocation4 + $0x8] sm:$0xff] }
 0x32f   : > { %9217 = vmatprep.mubr.f32.mxu1 %v12109_v13  ;;  %8040 = vmatprep.subr.mxu1 %v3309_v62  ;;  %v12195_v24 = vpop.f32.mrf.mxu0  ;;  %v3291_v13 = vld [vmem:[#allocation4 + $0x10] sm:$0xff]  ;;  %v3380_v38 = vmul.f32 %v14971_v47, %v3364_v46  ;;  %v4061_v7 = vmul.f32 %v10754_v35, %v4052_v6  ;;  %v3289_v46 = vld [vmem:[#allocation4] sm:$0xff] }
 0x330   : > { %4248 = vmatprep.mubr.f32.mxu0 %v12173_v53  ;;  %8041 = vmatpush3.msra.mxu1 %v3293_v5  ;;  %v3306_v5 = vld [vmem:[#allocation4 + $0x88] sm:$0xff] }
 0x331   : > { %8042 = vmatprep.subr.mxu1 %v3308_v37  ;;  %9218 = vmatmul.mubr.f32.gmra.mxu1 %v3378_v54  ;;  %v12207_v62 = vpop.f32.mrf.mxu0  ;;  %v12212_v37 = vld [vmem:[#allocation2 + $0xc8] sm:$0xff]  ;;  %v12214_v54 = vld [vmem:[#allocation2 + $0xd0] sm:$0xff] }
 0x332   : > { %8043 = vmatpush3.msra.mxu1 %v3292_v22  ;;  %4249 = vmatmul.mubr.f32.gmra.mxu0 %v4053_v63  ;;  %14982 = vst [vmem:[#allocation49_spill] sm:$0xff] %v12212_v37  ;;  %v3224_v22 = vsel %vm1833_vm4, %v11836_v28, %v11919_v41  ;;  %v3305_v63 = vld [vmem:[#allocation4 + $0x80] sm:$0xff]  ;;  %v4168_v28 = vld [vmem:[#allocation4 + $0x478] sm:$0xff] }
 0x333   : > { %9220 = vmatprep.mubr.f32.mxu1 %v3362_v57  ;;  %8044 = vmatprep.subr.mxu1 %v3307_v26  ;;  %v8995_v59 = vpop.f32.mrf.mxu1  ;;  %v12217_v52 = vpop.f32.mrf.mxu0  ;;  %v4030_v26 = vrot.slane %v12212_v37, 7  ;;  %v14666_v57 = vrot.slane %v12214_v54, 7  ;;  %v3225_v41 = vmul.f32 %v10644_v12, %v3224_v22  ;;  %v4167_v22 = vld [vmem:[#allocation4 + $0x470] sm:$0xff] }
 0x334   : > { %4253 = vmatprep.mubr.f32.mxu0 %v12175_v14  ;;  %8045 = vmatpush3.msra.mxu1 %v3291_v13  ;;  %1323 = vst [vmem:[%s11103_s10 + $0xe8] sm:$0xff] %v8995_v59  ;;  %v9836_v13 = vld [vmem:[#allocation2 + $0x80] sm:$0xff] }
 0x335   : > { %8046 = vmatprep.subr.mxu1 %v3306_v5  ;;  %9221 = vmatmul.mubr.f32.gmra.mxu1 %v3380_v38  ;;  %v1275_v47 = vpop.f32.mrf.mxu1  ;;  %v12228_v31 = vpop.f32.mrf.mxu0  ;;  %v12235_v38 = vld [vmem:[#allocation2 + $0xd8] sm:$0xff]  ;;  %v12237_v59 = vld [vmem:[#allocation2 + $0xe0] sm:$0xff] }
 0x336   : > { %8047 = vmatpush3.msra.mxu1 %v3290_v61  ;;  %4254 = vmatmul.mubr.f32.gmra.mxu0 %v4061_v7  ;;  %1322 = vst [vmem:[%s11103_s10 + $0xe0] sm:$0xff] %v1275_v47  ;;  %v14983_v47 = vrot.slane %v12175_v14, 7  ;;  %v4050_v7 = vsel %vm1833_vm4, %v4030_v26, %v14666_v57 }
 0x337   : > { %8048 = vmatprep.subr.mxu1 %v3305_v63  ;;  %3783 = vmatprep.mubr.f32.mxu1 %v9836_v13  ;;  %v8998_v6 = vpop.f32.mrf.mxu1  ;;  %v12232_v5 = vpop.f32.mrf.mxu0  ;;  %v7719_v13 = vadd.f32 %v12007_v58, %v11995_v33  ;;  %v4063_v57 = vmul.f32 %v10811_v8, %v4050_v7  ;;  %v4166_v58 = vld [vmem:[#allocation4 + $0x468] sm:$0xff] }
 0x338   : > { %4258 = vmatprep.mubr.f32.mxu0 %v12212_v37  ;;  %8049 = vmatpush3.msra.mxu1 %v3289_v46  ;;  %1325 = vst [vmem:[%s11103_s10 + $0xf8] sm:$0xff] %v8998_v6  ;;  %v4051_v61 = vsel %vm1833_vm4, %v14983_v47, %v4030_v26  ;;  %v9837_v6 = vld [vmem:[#allocation2 + $0x88] sm:$0xff]  ;;  %v4032_v47 = vrot.slane %v12235_v38, 7  ;;  %v14984_v37 = vld [vmem:[#allocation73_spill] sm:$0xff] }
 0x339   : > { %9279 = vmatprep.subr.mxu1 %v4168_v28  ;;  %3784 = vmatmul.mubr.f32.vlgmr.msra.gmra.mxu1 %v3225_v41  ;;  %v1285_v63 = vpop.f32.mrf.mxu1  ;;  %v12248_v46 = vpop.f32.mrf.mxu0  ;;  %v4800_v41 = vld [vmem:[#allocation7 + $0x2f0] sm:$0xff]  ;;  %v4799_v7 = vld [vmem:[#allocation7 + $0x2e8] sm:$0xff] }
 0x33a   : > { %4259 = vmatmul.mubr.f32.gmra.mxu0 %v4051_v61  ;;  %9280 = vmatpush3.msra.mxu1 %v4168_v28  ;;  %1324 = vst [vmem:[%s11103_s10 + $0xf0] sm:$0xff] %v1285_v63  ;;  %v7716_v61 = vadd.f32 %v11978_v10, %v11961_v49  ;;  %v14985_v63 = vld [vmem:[#allocation71_spill] sm:$0xff] }
 0x33b   : > { %3788 = vmatprep.mubr.f32.mxu1 %v9837_v6  ;;  %4263 = vmatprep.mubr.f32.mxu0 %v12214_v54  ;;  %v9033_v56 = vpop.f32.mrf.mxu1  ;;  %v12256_v26 = vpop.f32.mrf.mxu0 }
 0x33c   : > { %9281 = vmatprep.subr.mxu1 %v4167_v22  ;;  %v2273_v33 = vadd.f32 %v9033_v56, %v14984_v37  ;;  %9336 = vmatpush3.msra.mxu0 %v12154_v36  ;;  %v9838_v56 = vld [vmem:[#allocation2 + $0x90] sm:$0xff]  ;;  %v14986_v36 = vrot.slane %v12237_v59, 7  ;;  %v7725_v37 = vadd.f32 %v12044_v50, %v12037_v2  ;;  %v7722_v2 = vadd.f32 %v12022_v39, %v12016_v15  ;;  %v12289_v50 = vld [vmem:[#allocation2 + $0xe8] sm:$0xff] }
 0x33d   : > { %3789 = vmatmul.mubr.f32.gmra.mxu1 %v11984_v30  ;;  %v2267_v28 = vpop.f32.mrf.mxu1  ;;  %9337 = vmatprep.subr.mxu0 %v4800_v41  ;;  %v12265_v12 = vpop.f32.mrf.mxu0  ;;  %v3227_v30 = vmul.f32 %v10703_v60, %v11993_v45  ;;  %v14987_v45 = vrot.slane %v12214_v54, 7  ;;  %v7731_v39 = vadd.f32 %v12083_v11, %v12071_v1  ;;  %v14989_v1 = vld [vmem:[#allocation79_spill] sm:$0xff] }
 0x33e   : > { %4264 = vmatmul.mubr.f32.gmra.mxu0 %v4063_v57  ;;  %9282 = vmatpush3.msra.mxu1 %v4167_v22  ;;  %v2268_v6 = vadd.f32 %v14985_v63, %v2267_v28  ;;  %v12267_v14 = vadd.f32 %v7719_v13, %v2273_v33  ;;  %v4048_v49 = vsel %vm1833_vm4, %v4032_v47, %v14986_v36  ;;  %v12278_v57 = vld [vmem:[#allocation2 + $0xf0] sm:$0xff]  ;;  %v4165_v28 = vld [vmem:[#allocation4 + $0x460] sm:$0xff] }
 0x33f   : > { %3793 = vmatprep.mubr.f32.mxu1 %v9838_v56  ;;  %4268 = vmatprep.mubr.f32.mxu0 %v12235_v38  ;;  %v9036_v10 = vpop.f32.mrf.mxu1  ;;  %v4049_v33 = vsel %vm1833_vm4, %v14987_v45, %v4032_v47  ;;  %v4798_v56 = vld [vmem:[#allocation7 + $0x2e0] sm:$0xff]  ;;  %v4065_v47 = vmul.f32 %v10840_v43, %v4048_v49  ;;  %v4035_v36 = vrot.slane %v12278_v57, 7  ;;  %v4164_v49 = vld [vmem:[#allocation4 + $0x458] sm:$0xff] }
 0x340   : > { %9283 = vmatprep.subr.mxu1 %v4166_v58  ;;  %v2283_v22 = vadd.f32 %v9036_v10, %v11711_v3  ;;  %v12281_v13 = vadd.f32 %v7716_v61, %v2268_v6  ;;  %9338 = vmatpush3.msra.mxu0 %v4800_v41  ;;  %v14988_v3 = vld [vmem:[#allocation76_spill] sm:$0xff] }
 0x341   : > { %3794 = vmatmul.mubr.f32.gmra.mxu1 %v3227_v30  ;;  %v2277_v63 = vpop.f32.mrf.mxu1  ;;  %9339 = vmatprep.subr.mxu0 %v4799_v7  ;;  %v12292_v6 = vpop.f32.mrf.mxu0  ;;  %v9839_v30 = vld [vmem:[#allocation2 + $0x98] sm:$0xff] }
 0x342   : > { %4269 = vmatmul.mubr.f32.gmra.mxu0 %v4049_v33  ;;  %9284 = vmatpush3.msra.mxu1 %v4166_v58  ;;  %v2278_v61 = vadd.f32 %v14988_v3, %v2277_v63  ;;  %v12294_v41 = vadd.f32 %v7725_v37, %v2283_v22  ;;  %v7625_v37 = vadd.f32 %v11787_v55, %v11776_v18  ;;  %v4034_v22 = vrot.slane %v12289_v50, 7  ;;  %v4797_v63 = vld [vmem:[#allocation7 + $0x2d8] sm:$0xff] }
 0x343   : > { %3798 = vmatprep.mubr.f32.mxu1 %v9839_v30  ;;  %4273 = vmatprep.mubr.f32.mxu0 %v12237_v59  ;;  %v9039_v15 = vpop.f32.mrf.mxu1  ;;  %v7728_v33 = vadd.f32 %v12065_v44, %v12056_v0  ;;  %v12311_v11 = vpop.f32.mrf.mxu0  ;;  %v14990_v55 = vld [vmem:[#allocation60_spill] sm:$0xff]  ;;  %v14992_v30 = vld [vmem:[#allocation26_spill] sm:$0xff] }
 0x344   : > { %9285 = vmatprep.subr.mxu1 %v4165_v28  ;;  %v2293_v58 = vadd.f32 %v9039_v15, %v11750_v9  ;;  %v12302_v10 = vadd.f32 %v7722_v2, %v2278_v61  ;;  %9340 = vmatpush3.msra.mxu0 %v4799_v7  ;;  %v3229_v18 = vmul.f32 %v10754_v35, %v14990_v55  ;;  %v14991_v61 = vld [vmem:[#allocation84_spill] sm:$0xff]  ;;  %v14993_v15 = vrot.slane %v12237_v59, 7  ;;  %v14995_v55 = vld [vmem:[#allocation83_spill] sm:$0xff] }
 0x345   : > { %3799 = vmatmul.mubr.f32.gmra.mxu1 %v14955_v19  ;;  %v2287_v45 = vpop.f32.mrf.mxu1  ;;  %9341 = vmatprep.subr.mxu0 %v4798_v56  ;;  %v12317_v19 = vld [vmem:[#allocation2 + $0xa0] sm:$0xff]  ;;  %v4046_v0 = vsel %vm1833_vm4, %v4034_v22, %v4035_v36 }
 0x346   : > { %4274 = vmatmul.mubr.f32.gmra.mxu0 %v4065_v47  ;;  %9286 = vmatpush3.msra.mxu1 %v4165_v28  ;;  %v2288_v9 = vadd.f32 %v14989_v1, %v2287_v45  ;;  %v12313_v7 = vadd.f32 %v7731_v39, %v2293_v58  ;;  %v7737_v28 = vadd.f32 %v12124_v20, %v12111_v40  ;;  %v4163_v58 = vld [vmem:[#allocation4 + $0x450] sm:$0xff]  ;;  %v12335_v45 = vld [vmem:[#allocation2 + $0xf8] sm:$0xff]  ;;  %v14994_v40 = vld [vmem:[#allocation82_spill] sm:$0xff] }
 0x347   : > { %3803 = vmatprep.mubr.f32.mxu1 %v12317_v19  ;;  %4278 = vmatprep.mubr.f32.mxu0 %v12289_v50  ;;  %v9042_v44 = vpop.f32.mrf.mxu1  ;;  %v7631_v47 = vadd.f32 %v14992_v30, %v14991_v61  ;;  %v4047_v39 = vsel %vm1833_vm4, %v14993_v15, %v4034_v22  ;;  %v7734_v20 = vadd.f32 %v12098_v17, %v12095_v16  ;;  %v4036_v17 = vrot.slane %v12335_v45, 7  ;;  %v4162_v15 = vld [vmem:[#allocation4 + $0x448] sm:$0xff] }
 0x348   : > { %9287 = vmatprep.subr.mxu1 %v4164_v49  ;;  %v2303_v2 = vadd.f32 %v9042_v44, %v7625_v37  ;;  %v12327_v3 = vadd.f32 %v7728_v33, %v2288_v9  ;;  %9342 = vmatpush3.msra.mxu0 %v4798_v56  ;;  %v4796_v9 = vld [vmem:[#allocation7 + $0x2d0] sm:$0xff]  ;;  %v9841_v44 = vld [vmem:[#allocation2 + $0xa8] sm:$0xff]  ;;  %v4067_v61 = vmul.f32 %v10914_v34, %v4046_v0 }
 0x349   : > { %3804 = vmatmul.mubr.f32.gmra.mxu1 %v3229_v18  ;;  %v2297_v1 = vpop.f32.mrf.mxu1  ;;  %9343 = vmatprep.subr.mxu0 %v4797_v63  ;;  %v14996_v18 = vld [vmem:[#allocation25_spill] sm:$0xff]  ;;  %v7743_v16 = vadd.f32 %v12152_v42, %v12147_v32  ;;  %v4795_v32 = vld [vmem:[#allocation7 + $0x2c8] sm:$0xff] }
 0x34a   : > { %4279 = vmatmul.mubr.f32.gmra.mxu0 %v4047_v39  ;;  %9288 = vmatpush3.msra.mxu1 %v4164_v49  ;;  %v2298_v56 = vadd.f32 %v14994_v40, %v2297_v1  ;;  %v12340_v37 = vpop.f32.mrf.mxu0  ;;  %v12342_v33 = vadd.f32 %v7737_v28, %v2303_v2  ;;  %v7628_v22 = vadd.f32 %v14996_v18, %v14995_v55  ;;  %v14997_v2 = vld [vmem:[#allocation67_spill] sm:$0xff]  ;;  %v14998_v42 = vld [vmem:[#allocation69_spill] sm:$0xff] }
 0x34b   : > { %3808 = vmatprep.mubr.f32.mxu1 %v9841_v44  ;;  %4283 = vmatprep.mubr.f32.mxu0 %v12278_v57  ;;  %v9045_v30 = vpop.f32.mrf.mxu1  ;;  %v15001_v18 = vld [vmem:[#allocation29_spill] sm:$0xff] }
 0x34c   : > { %9289 = vmatprep.subr.mxu1 %v4163_v58  ;;  %v2313_v49 = vadd.f32 %v9045_v30, %v7631_v47  ;;  %v12351_v28 = vadd.f32 %v7734_v20, %v2298_v56  ;;  %9344 = vmatpush3.msra.mxu0 %v4797_v63  ;;  %v12354_v1 = vpop.f32.mrf.mxu0  ;;  %v3231_v47 = vmul.f32 %v10811_v8, %v14998_v42  ;;  %v9842_v20 = vld [vmem:[#allocation2 + $0xb0] sm:$0xff]  ;;  %v15000_v56 = vld [vmem:[#allocation33_spill] sm:$0xff] }
 0x34d   : > { %3809 = vmatmul.mubr.f32.gmra.mxu1 %v14997_v2  ;;  %v2307_v39 = vpop.f32.mrf.mxu1  ;;  %9345 = vmatprep.subr.mxu0 %v4796_v9  ;;  %v14999_v63 = vld [vmem:[#allocation87_spill] sm:$0xff]  ;;  %v4161_v44 = vld [vmem:[#allocation4 + $0x440] sm:$0xff] }
 0x34e   : > { %4284 = vmatmul.mubr.f32.gmra.mxu0 %v4067_v61  ;;  %9290 = vmatpush3.msra.mxu1 %v4163_v58  ;;  %v12356_v0 = vadd.f32 %v7628_v22, %v2307_v39  ;;  %v12358_v40 = vadd.f32 %v7743_v16, %v2313_v49  ;;  %v7637_v55 = vadd.f32 %v15000_v56, %v14999_v63  ;;  %v15002_v16 = vld [vmem:[#allocation28_spill] sm:$0xff]  ;;  %v15003_v49 = vld [vmem:[#allocation85_spill] sm:$0xff] }
 0x34f   : > { %3813 = vmatprep.mubr.f32.mxu1 %v9842_v20  ;;  %4288 = vmatprep.mubr.f32.mxu0 %v12335_v45  ;;  %v4044_v58 = vsel %vm1833_vm4, %v4036_v17, %v15001_v18  ;;  %v4045_v22 = vsel %vm1833_vm4, %v4035_v36, %v4036_v17  ;;  %v7634_v2 = vadd.f32 %v15003_v49, %v15002_v16  ;;  %v9843_v20 = vld [vmem:[#allocation2 + $0xb8] sm:$0xff]  ;;  %v9844_v36 = vld [vmem:[#allocation2 + $0x100] sm:$0xff]  ;;  %v15004_v17 = vld [vmem:[#allocation19_spill] sm:$0xff] }
 0x350   : > { %9291 = vmatprep.subr.mxu1 %v4162_v15  ;;  %9346 = vmatpush3.msra.mxu0 %v4796_v9  ;;  %v7749_v39 = vadd.f32 %v12191_v29, %v12180_v48  ;;  %v12378_v9 = vld [vmem:[#allocation2 + $0x108] sm:$0xff]  ;;  %v4069_v63 = vmul.f32 %v15004_v17, %v4044_v58  ;;  %v15007_v49 = vld [vmem:[#allocation37_spill] sm:$0xff] }
 0x351   : > { %3814 = vmatmul.mubr.f32.gmra.mxu1 %v3231_v47  ;;  %v9048_v61 = vpop.f32.mrf.mxu1  ;;  %v12372_v30 = vpop.f32.mrf.mxu0  ;;  %9347 = vmatprep.subr.mxu0 %v4795_v32  ;;  %v4794_v47 = vld [vmem:[#allocation7 + $0x2c0] sm:$0xff]  ;;  %v15005_v29 = vld [vmem:[#allocation74_spill] sm:$0xff]  ;;  %v4038_v48 = vrot.slane %v12378_v9, 7 }
 0x352   : > { %4289 = vmatmul.mubr.f32.gmra.mxu0 %v4045_v22  ;;  %9292 = vmatpush3.msra.mxu1 %v4162_v15  ;;  %v2323_v42 = vadd.f32 %v9048_v61, %v7637_v55  ;;  %v7746_v22 = vadd.f32 %v12168_v51, %v12160_v23  ;;  %v4160_v55 = vld [vmem:[#allocation4 + $0x438] sm:$0xff]  ;;  %v15008_v51 = vld [vmem:[#allocation75_spill] sm:$0xff] }
 0x353   : > { %3818 = vmatprep.mubr.f32.mxu1 %v9843_v20  ;;  %4293 = vmatprep.mubr.f32.mxu0 %v9844_v36  ;;  %v2317_v56 = vpop.f32.mrf.mxu1  ;;  %v12381_v8 = vpop.f32.mrf.mxu0  ;;  %v15006_v61 = vld [vmem:[#allocation88_spill] sm:$0xff]  ;;  %v3233_v23 = vmul.f32 %v10840_v43, %v15008_v51 }
 0x354   : > { %9293 = vmatprep.subr.mxu1 %v4161_v44  ;;  %v2318_v15 = vadd.f32 %v7634_v2, %v2317_v56  ;;  %v12385_v16 = vadd.f32 %v7749_v39, %v2323_v42  ;;  %9348 = vmatpush3.msra.mxu0 %v4795_v32  ;;  %v7643_v58 = vadd.f32 %v15007_v49, %v15006_v61  ;;  %v4793_v36 = vld [vmem:[#allocation7 + $0x2b8] sm:$0xff]  ;;  %v9845_v2 = vld [vmem:[#allocation2 + $0xc0] sm:$0xff]  ;;  %v15009_v42 = vld [vmem:[#allocation34_spill] sm:$0xff] }
 0x355   : > { %3819 = vmatmul.mubr.f32.gmra.mxu1 %v15005_v29  ;;  %9349 = vmatprep.subr.mxu0 %v4794_v47  ;;  %v15010_v56 = vld [vmem:[#allocation35_spill] sm:$0xff]  ;;  %v4042_v61 = vsel %vm1833_vm4, %v4038_v48, %v12118_v27 }
 0x356   : > { %4294 = vmatmul.mubr.f32.gmra.mxu0 %v4069_v63  ;;  %9294 = vmatpush3.msra.mxu1 %v4161_v44  ;;  %v12391_v20 = vadd.f32 %v7746_v22, %v2318_v15  ;;  %v7640_v29 = vadd.f32 %v15010_v56, %v15009_v42  ;;  %v7755_v44 = vadd.f32 %v12228_v31, %v12217_v52  ;;  %v4159_v15 = vld [vmem:[#allocation4 + $0x430] sm:$0xff]  ;;  %v4158_v56 = vld [vmem:[#allocation4 + $0x428] sm:$0xff] }
 0x357   : > { %3823 = vmatprep.mubr.f32.mxu1 %v9845_v2  ;;  %4298 = vmatprep.mubr.f32.mxu0 %v12378_v9  ;;  %v9051_v32 = vpop.f32.mrf.mxu1  ;;  %v12396_v39 = vpop.f32.mrf.mxu0  ;;  %v4043_v22 = vsel %vm1833_vm4, %v15001_v18, %v4038_v48  ;;  %v7752_v2 = vadd.f32 %v12207_v62, %v12195_v24  ;;  %v15011_v18 = vld [vmem:[#allocation41_spill] sm:$0xff] }
 0x358   : > { %9295 = vmatprep.subr.mxu1 %v4160_v55  ;;  %v2333_v63 = vadd.f32 %v9051_v32, %v7643_v58  ;;  %9350 = vmatpush3.msra.mxu0 %v4794_v47  ;;  %v4792_v47 = vld [vmem:[#allocation7 + $0x2b0] sm:$0xff]  ;;  %v9846_v58 = vld [vmem:[#allocation2 + $0xc8] sm:$0xff]  ;;  %v15013_v32 = vld [vmem:[#allocation20_spill] sm:$0xff] }
 0x359   : > { %3824 = vmatmul.mubr.f32.gmra.mxu1 %v3233_v23  ;;  %v2327_v49 = vpop.f32.mrf.mxu1  ;;  %v12408_v51 = vpop.f32.mrf.mxu0  ;;  %9351 = vmatprep.subr.mxu0 %v4793_v36  ;;  %v15012_v23 = vld [vmem:[#allocation89_spill] sm:$0xff]  ;;  %v4071_v42 = vmul.f32 %v15013_v32, %v4042_v61 }
 0x35a   : > { %4299 = vmatmul.mubr.f32.gmra.mxu0 %v4043_v22  ;;  %9296 = vmatpush3.msra.mxu1 %v4160_v55  ;;  %v2328_v52 = vadd.f32 %v7640_v29, %v2327_v49  ;;  %v12412_v31 = vadd.f32 %v7755_v44, %v2333_v63  ;;  %v7649_v48 = vadd.f32 %v15012_v23, %v15011_v18  ;;  %v15015_v24 = vld [vmem:[#allocation77_spill] sm:$0xff]  ;;  %v15016_v29 = vld [vmem:[#allocation39_spill] sm:$0xff]  ;;  %v15017_v44 = vld [vmem:[#allocation40_spill] sm:$0xff] }
 0x35b   : > { %3828 = vmatprep.mubr.f32.mxu1 %v9846_v58  ;;  %4303 = vmatprep.mubr.f32.mxu0 %v12115_v4  ;;  %v7646_v63 = vadd.f32 %v15017_v44, %v15016_v29  ;;  %v7761_v22 = vadd.f32 %v12265_v12, %v12256_v26  ;;  %v4157_v49 = vld [vmem:[#allocation4 + $0x420] sm:$0xff]  ;;  %v15018_v58 = vld [vmem:[#allocation78_spill] sm:$0xff]  ;;  %v7758_v23 = vadd.f32 %v12248_v46, %v12232_v5  ;;  %v9848_v26 = vld [vmem:[#allocation2 + $0xd8] sm:$0xff] }
 0x35c   : > { %9297 = vmatprep.subr.mxu1 %v4159_v15  ;;  %v12418_v43 = vadd.f32 %v7752_v2, %v2328_v52  ;;  %9352 = vmatpush3.msra.mxu0 %v4793_v36  ;;  %v3235_v2 = vmul.f32 %v10914_v34, %v15018_v58  ;;  %v9847_v36 = vld [vmem:[#allocation2 + $0xd0] sm:$0xff]  ;;  %v4154_v5 = vld [vmem:[#allocation4 + $0x408] sm:$0xff]  ;;  %v15020_v46 = vld [vmem:[#allocation80_spill] sm:$0xff] }
 0x35d   : > { %3829 = vmatmul.mubr.f32.gmra.mxu1 %v15015_v24  ;;  %v9054_v62 = vpop.f32.mrf.mxu1  ;;  %v12421_v55 = vpop.f32.mrf.mxu0  ;;  %9353 = vmatprep.subr.mxu0 %v4792_v47 }
 0x35e   : > { %15014 = vst [vmem:[#allocation50_spill] sm:$0xff] %v12418_v43  ;;  %4304 = vmatmul.mubr.f32.gmra.mxu0 %v4071_v42  ;;  %9298 = vmatpush3.msra.mxu1 %v4159_v15  ;;  %v2343_v61 = vadd.f32 %v9054_v62, %v7649_v48  ;;  %v4156_v42 = vld [vmem:[#allocation4 + $0x418] sm:$0xff]  ;;  %v4155_v48 = vld [vmem:[#allocation4 + $0x410] sm:$0xff] }
 0x35f   : > { %3833 = vmatprep.mubr.f32.mxu1 %v9847_v36  ;;  %9299 = vmatprep.subr.mxu1 %v4158_v56  ;;  %v2337_v52 = vpop.f32.mrf.mxu1  ;;  %v12429_v18 = vpop.f32.mrf.mxu0  ;;  %v9850_v36 = vld [vmem:[#allocation2 + $0xe8] sm:$0xff] }
 0x360   : > { %9300 = vmatpush3.msra.mxu1 %v4158_v56  ;;  %v2338_v15 = vadd.f32 %v7646_v63, %v2337_v52  ;;  %4308 = vmatprep.mubr.f32.mxu0 %v12115_v4  ;;  %v12434_v12 = vadd.f32 %v7761_v22, %v2343_v61  ;;  %v4791_v4 = vld [vmem:[#allocation7 + $0x2a8] sm:$0xff]  ;;  %v9849_v63 = vld [vmem:[#allocation2 + $0xe0] sm:$0xff]  ;;  %v4789_v52 = vld [vmem:[#allocation7 + $0x298] sm:$0xff] }
 0x361   : > { %3834 = vmatmul.mubr.f32.gmra.mxu1 %v3235_v2  ;;  %9301 = vmatprep.subr.mxu1 %v4157_v49  ;;  %v4153_v22 = vld [vmem:[#allocation4 + $0x400] sm:$0xff] }
 0x362   : > { %3838 = vmatprep.mubr.f32.mxu1 %v9848_v26  ;;  %9302 = vmatpush3.msra.mxu1 %v4157_v49  ;;  %v12436_v24 = vadd.f32 %v7758_v23, %v2338_v15  ;;  %v15021_v49 = vld [vmem:[#allocation81_spill] sm:$0xff]  ;;  %v4788_v15 = vld [vmem:[#allocation7 + $0x290] sm:$0xff]  ;;  %v15024_v26 = vld [vmem:[#allocation32_spill] sm:$0xff] }
 0x363   : > { %9303 = vmatprep.subr.mxu1 %v4156_v42  ;;  %v12438_v62 = vpop.f32.mrf.mxu1  ;;  %v12440_v29 = vpop.f32.mrf.mxu0  ;;  %4309 = vmatmul.mubr.f32.gmra.mxu0 %v12118_v27  ;;  %v3237_v61 = vmul.f32 %v15004_v17, %v15021_v49  ;;  %v4790_v27 = vld [vmem:[#allocation7 + $0x2a0] sm:$0xff]  ;;  %v4074_v49 = vrot.slane %v12139_v25, 1 }
 0x364   : > { %15019 = vst [vmem:[#allocation51_spill] sm:$0xff] %v12436_v24  ;;  %9304 = vmatpush3.msra.mxu1 %v4156_v42  ;;  %9354 = vmatpush3.msra.mxu0 %v4792_v47  ;;  %v4785_v47 = vld [vmem:[#allocation7 + $0x278] sm:$0xff] }
 0x365   : > { %3839 = vmatmul.mubr.f32.gmra.mxu1 %v15020_v46  ;;  %9305 = vmatprep.subr.mxu1 %v4155_v48  ;;  %v12444_v56 = vpop.f32.mrf.mxu1  ;;  %v12446_v44 = vpop.f32.mrf.mxu0 }
 0x366   : > { %3843 = vmatprep.mubr.f32.mxu1 %v9849_v63  ;;  %9306 = vmatpush3.msra.mxu1 %v4155_v48  ;;  %v9851_v48 = vld [vmem:[#allocation2 + $0xf0] sm:$0xff] }
 0x367   : > { %9307 = vmatprep.subr.mxu1 %v4154_v5  ;;  %9355 = vmatprep.subr.mxu0 %v4791_v4 }
 0x368   : > { %9308 = vmatpush3.msra.mxu1 %v4154_v5  ;;  %9356 = vmatpush3.msra.mxu0 %v4791_v4  ;;  %v4787_v5 = vld [vmem:[#allocation7 + $0x288] sm:$0xff] }
 0x369   : > { %3844 = vmatmul.mubr.f32.gmra.mxu1 %v3237_v61  ;;  %9309 = vmatprep.subr.mxu1 %v4153_v22  ;;  %v12450_v58 = vpop.f32.mrf.mxu1  ;;  %v12452_v2 = vpop.f32.mrf.mxu0  ;;  %v15025_v4 = vld [vmem:[#allocation30_spill] sm:$0xff]  ;;  %v15027_v61 = vld [vmem:[#allocation47_spill] sm:$0xff] }
 0x36a   : > { %15022 = vst [vmem:[#allocation52_spill] sm:$0xff] %v12452_v2  ;;  %3848 = vmatprep.mubr.f32.mxu1 %v9850_v36  ;;  %9310 = vmatpush3.msra.mxu1 %v4153_v22  ;;  %v3239_v46 = vmul.f32 %v15013_v32, %v15025_v4  ;;  %v4692_v4 = vld [vmem:[#allocation7 + $0xf8] sm:$0xff]  ;;  %v15030_v36 = vld [vmem:[#allocation86_spill] sm:$0xff]  ;;  %v4080_v2 = vrot.slane %v12235_v38, 1 }
 0x36b   : > { %v12454_v23 = vpop.f32.mrf.mxu1  ;;  %v12456_v42 = vpop.f32.mrf.mxu0  ;;  %9357 = vmatprep.subr.mxu0 %v4790_v27  ;;  %8242 = vmatprep.subr.mxu1 %v4785_v47  ;;  %v4786_v47 = vld [vmem:[#allocation7 + $0x280] sm:$0xff] }
 0x36c   : > { %15023 = vst [vmem:[#allocation58_spill] sm:$0xff] %v12456_v42  ;;  %9358 = vmatpush3.msra.mxu0 %v4790_v27  ;;  %v4075_v27 = vrot.slane %v15027_v61, 1  ;;  %v4076_v61 = vrot.slane %v12173_v53, 1  ;;  %v15040_v42 = vld [vmem:[#allocation23_spill] sm:$0xff] }
 0x36d   : > { %3849 = vmatmul.mubr.f32.gmra.mxu1 %v15024_v26  ;;  %9359 = vmatprep.subr.mxu0 %v4789_v52 }
 0x36e   : > { %3853 = vmatprep.mubr.f32.mxu1 %v9851_v48  ;;  %9360 = vmatpush3.msra.mxu0 %v4789_v52  ;;  %v9852_v48 = vld [vmem:[#allocation2 + $0xf8] sm:$0xff]  ;;  %v4102_v25 = vsel %vm1882_vm11, %v4074_v49, %v4075_v27 }
 0x36f   : > { %v12461_v63 = vpop.f32.mrf.mxu1  ;;  %v12463_v22 = vpop.f32.mrf.mxu0  ;;  %9361 = vmatprep.subr.mxu0 %v4788_v15 }
 0x370   : > { %15026 = vst [vmem:[#allocation53_spill] sm:$0xff] %v12463_v22  ;;  %9362 = vmatpush3.msra.mxu0 %v4788_v15  ;;  %v15029_v15 = vld [vmem:[#allocation48_spill] sm:$0xff]  ;;  %v4079_v22 = vrot.slane %v12214_v54, 1  ;;  %v4767_v54 = vld [vmem:[#allocation7 + $0x1e8] sm:$0xff] }
 0x371   : > { %3854 = vmatmul.mubr.f32.gmra.mxu1 %v3239_v46  ;;  %v12468_v26 = vpop.f32.mrf.mxu1  ;;  %v12470_v52 = vpop.f32.mrf.mxu0  ;;  %9363 = vmatprep.subr.mxu0 %v4787_v5  ;;  %v4077_v32 = vrot.slane %v15029_v15, 1  ;;  %v15031_v46 = vrot.slane %v12317_v19, 1  ;;  %v15035_v15 = vld [vmem:[#allocation49_spill] sm:$0xff] }
 0x372   : > { %15028 = vst [vmem:[#allocation55_spill] sm:$0xff] %v12470_v52  ;;  %3858 = vmatprep.mubr.f32.mxu1 %v9852_v48  ;;  %9364 = vmatpush3.msra.mxu0 %v4787_v5  ;;  %v15033_v48 = vld [vmem:[#allocation21_spill] sm:$0xff]  ;;  %v15037_v52 = vld [vmem:[#allocation22_spill] sm:$0xff] }
 0x373   : > { %9365 = vmatprep.subr.mxu0 %v4786_v47  ;;  %v4103_v17 = vsel %vm1882_vm11, %v15031_v46, %v4074_v49  ;;  %v4106_v35 = vmul.f32 %v15033_v48, %v4102_v25  ;;  %v4100_v49 = vsel %vm1882_vm11, %v4076_v61, %v4077_v32  ;;  %v4784_v46 = vld [vmem:[#allocation7 + $0x270] sm:$0xff] }
 0x374   : > { %9366 = vmatpush3.msra.mxu0 %v4786_v47  ;;  %v4769_v47 = vld [vmem:[#allocation7 + $0x1f8] sm:$0xff]  ;;  %v4768_v25 = vld [vmem:[#allocation7 + $0x1f0] sm:$0xff] }
 0x375   : > { %3859 = vmatmul.mubr.f32.gmra.mxu1 %v15030_v36  ;;  %v12481_v34 = vpop.f32.mrf.mxu1  ;;  %v12483_v5 = vpop.f32.mrf.mxu0  ;;  %8354 = vmatprep.subr.mxu0 %v4692_v4  ;;  %v4078_v36 = vrot.slane %v15035_v15, 1  ;;  %v4101_v4 = vsel %vm1882_vm11, %v4075_v27, %v4076_v61  ;;  %v4108_v15 = vmul.f32 %v15037_v52, %v4100_v49 }
 0x376   : > { %15032 = vst [vmem:[#allocation56_spill] sm:$0xff] %v12483_v5  ;;  %9311 = vmatprep.mubr.f32.mxu1 %v4103_v17 }
 0x377   : > { %v12486_v60 = vpop.f32.mrf.mxu1  ;;  %v12488_v53 = vpop.f32.mrf.mxu0  ;;  %v4098_v27 = vsel %vm1882_vm11, %v4078_v36, %v4079_v22 }
 0x378   : > { %15034 = vst [vmem:[#allocation57_spill] sm:$0xff] %v12488_v53  ;;  %v4783_v53 = vld [vmem:[#allocation7 + $0x268] sm:$0xff]  ;;  %v4110_v43 = vmul.f32 %v15040_v42, %v4098_v27 }
 0x379   : > { %9312 = vmatmul.mubr.f32.vlgmr.msra.gmra.mxu1 %v4106_v35  ;;  %v12496_v17 = vpop.f32.mrf.mxu1  ;;  %v4081_v35 = vrot.slane %v12237_v59, 1  ;;  %v4781_v59 = vld [vmem:[#allocation7 + $0x258] sm:$0xff] }
 0x37a   : > { %9314 = vmatprep.mubr.f32.mxu1 %v4101_v4  ;;  %v12498_v5 = vpop.f32.mrf.mxu0  ;;  %8243 = vmatpush3.msra.mxu1 %v4769_v47  ;;  %v4782_v4 = vld [vmem:[#allocation7 + $0x260] sm:$0xff]  ;;  %v4099_v47 = vsel %vm1882_vm11, %v4077_v32, %v4078_v36  ;;  %v4082_v36 = vrot.slane %v12289_v50, 1  ;;  %v4084_v50 = vrot.slane %v12335_v45, 1  ;;  %v4777_v45 = vld [vmem:[#allocation7 + $0x238] sm:$0xff] }
 0x37b   : > { %15036 = vst [vmem:[#allocation59_spill] sm:$0xff] %v12498_v5  ;;  %v12501_v24 = vpop.f32.mrf.mxu1  ;;  %8244 = vmatprep.subr.mxu1 %v4784_v46  ;;  %v4766_v5 = vld [vmem:[#allocation7 + $0x1e0] sm:$0xff]  ;;  %v4096_v32 = vsel %vm1882_vm11, %v4080_v2, %v4081_v35 }
 0x37c   : > { %v12507_v61 = vpop.f32.mrf.mxu0  ;;  %8245 = vmatpush3.msra.mxu1 %v4768_v25  ;;  %v4765_v25 = vld [vmem:[#allocation7 + $0x1d8] sm:$0xff] }
 0x37d   : > { %15038 = vst [vmem:[#allocation61_spill] sm:$0xff] %v12507_v61  ;;  %9315 = vmatmul.mubr.f32.gmra.mxu1 %v4108_v15  ;;  %v9104_v49 = vpop.f32.mrf.mxu1  ;;  %8246 = vmatprep.subr.mxu1 %v4783_v53  ;;  %v4083_v15 = vrot.slane %v12278_v57, 1 }
 0x37e   : > { %9317 = vmatprep.mubr.f32.mxu1 %v4099_v47  ;;  %v12512_v46 = vadd.f32 %v9104_v49, %v12385_v16  ;;  %v12514_v38 = vpop.f32.mrf.mxu0  ;;  %8247 = vmatpush3.msra.mxu1 %v4767_v54  ;;  %v4780_v16 = vld [vmem:[#allocation7 + $0x250] sm:$0xff]  ;;  %v4097_v54 = vsel %vm1882_vm11, %v4079_v22, %v4080_v2  ;;  %v4779_v49 = vld [vmem:[#allocation7 + $0x248] sm:$0xff] }
 0x37f   : > { %15039 = vst [vmem:[#allocation62_spill] sm:$0xff] %v12514_v38  ;;  %v12517_v61 = vpop.f32.mrf.mxu1  ;;  %8248 = vmatprep.subr.mxu1 %v4782_v4  ;;  %v4764_v47 = vld [vmem:[#allocation7 + $0x1d0] sm:$0xff]  ;;  %v4094_v2 = vsel %vm1882_vm11, %v4082_v36, %v4083_v15 }
 0x380   : > { %v12522_v53 = vpop.f32.mrf.mxu0  ;;  %8249 = vmatpush3.msra.mxu1 %v4766_v5 }
 0x381   : > { %15041 = vst [vmem:[#allocation63_spill] sm:$0xff] %v12522_v53  ;;  %9318 = vmatmul.mubr.f32.gmra.mxu1 %v4110_v43  ;;  %v9107_v27 = vpop.f32.mrf.mxu1  ;;  %8250 = vmatprep.subr.mxu1 %v4781_v59  ;;  %v15043_v53 = vld [vmem:[#allocation24_spill] sm:$0xff]  ;;  %v4763_v43 = vld [vmem:[#allocation7 + $0x1c8] sm:$0xff]  ;;  %v4095_v59 = vsel %vm1882_vm11, %v4081_v35, %v4082_v36  ;;  %v15048_v35 = vld [vmem:[#allocation43_spill] sm:$0xff] }
 0x382   : > { %9320 = vmatprep.mubr.f32.mxu1 %v4097_v54  ;;  %v12528_v4 = vadd.f32 %v9107_v27, %v12412_v31  ;;  %v12530_v57 = vpop.f32.mrf.mxu0  ;;  %8251 = vmatpush3.msra.mxu1 %v4765_v25  ;;  %v4112_v5 = vmul.f32 %v15043_v53, %v4096_v32  ;;  %v4778_v31 = vld [vmem:[#allocation7 + $0x240] sm:$0xff]  ;;  %v15047_v27 = vld [vmem:[#allocation27_spill] sm:$0xff]  ;;  %v4092_v36 = vsel %vm1882_vm11, %v4084_v50, %v15048_v35 }
 0x383   : > { %15042 = vst [vmem:[#allocation64_spill] sm:$0xff] %v12530_v57  ;;  %v12533_v38 = vpop.f32.mrf.mxu1  ;;  %8252 = vmatprep.subr.mxu1 %v4780_v16  ;;  %v4762_v32 = vld [vmem:[#allocation7 + $0x1c0] sm:$0xff]  ;;  %v4114_v57 = vmul.f32 %v15047_v27, %v4094_v2  ;;  %v4760_v2 = vld [vmem:[#allocation7 + $0x1b0] sm:$0xff] }
 0x384   : > { %v12538_v22 = vpop.f32.mrf.mxu0  ;;  %8253 = vmatpush3.msra.mxu1 %v4764_v47  ;;  %v4761_v47 = vld [vmem:[#allocation7 + $0x1b8] sm:$0xff] }
 0x385   : > { %15044 = vst [vmem:[#allocation65_spill] sm:$0xff] %v12538_v22  ;;  %9321 = vmatmul.mubr.f32.gmra.mxu1 %v4112_v5  ;;  %v9110_v25 = vpop.f32.mrf.mxu1  ;;  %8254 = vmatprep.subr.mxu1 %v4779_v49  ;;  %v4086_v5 = vrot.slane %v12378_v9, 1 }
 0x386   : > { %9323 = vmatprep.mubr.f32.mxu1 %v4095_v59  ;;  %v12543_v16 = vadd.f32 %v9110_v25, %v12434_v12  ;;  %v12545_v54 = vpop.f32.mrf.mxu0  ;;  %8255 = vmatpush3.msra.mxu1 %v4763_v43  ;;  %v4776_v12 = vld [vmem:[#allocation7 + $0x230] sm:$0xff]  ;;  %v4093_v43 = vsel %vm1882_vm11, %v4083_v15, %v4084_v50  ;;  %v12558_v25 = vld [vmem:[#allocation2] sm:$0xff] }
 0x387   : > { %15046 = vst [vmem:[#allocation66_spill] sm:$0xff] %v12545_v54  ;;  %v12548_v22 = vpop.f32.mrf.mxu1  ;;  %8256 = vmatprep.subr.mxu1 %v4778_v31  ;;  %15050 = vst [vmem:[#allocation70_spill] sm:$0xff] %v12558_v25  ;;  %v12561_v31 = vrot.slane %v12558_v25, 1  ;;  %v4775_v54 = vld [vmem:[#allocation7 + $0x228] sm:$0xff]  ;;  %v4774_v25 = vld [vmem:[#allocation7 + $0x220] sm:$0xff] }
 0x388   : > { %15045 = vst [vmem:[#allocation42_spill] sm:$0xff] %v12543_v16  ;;  %v12554_v49 = vpop.f32.mrf.mxu0  ;;  %8257 = vmatpush3.msra.mxu1 %v4762_v32 }
 0x389   : > { %15049 = vst [vmem:[#allocation68_spill] sm:$0xff] %v12554_v49  ;;  %9324 = vmatmul.mubr.f32.gmra.mxu1 %v4114_v57  ;;  %v7826_v59 = vpop.f32.mrf.mxu1  ;;  %8258 = vmatprep.subr.mxu1 %v4777_v45  ;;  %15051 = vst [vmem:[#allocation54_spill] sm:$0xff] %v12561_v31  ;;  %v15053_v49 = vld [vmem:[#allocation31_spill] sm:$0xff]  ;;  %v4759_v57 = vld [vmem:[#allocation7 + $0x1a8] sm:$0xff]  ;;  %v4090_v15 = vsel %vm1882_vm11, %v4086_v5, %v12561_v31 }
 0x38a   : > { %9326 = vmatprep.mubr.f32.mxu1 %v4093_v43  ;;  %v12563_v9 = vpop.f32.mrf.mxu0  ;;  %8259 = vmatpush3.msra.mxu1 %v4761_v47  ;;  %v4116_v32 = vmul.f32 %v15053_v49, %v4092_v36  ;;  %v4091_v47 = vsel %vm1882_vm11, %v15048_v35, %v4086_v5  ;;  %v4758_v36 = vld [vmem:[#allocation7 + $0x1a0] sm:$0xff]  ;;  %v15057_v35 = vrot.slane %v12317_v19, 1  ;;  %v2563_v19 = vadd.f32 %v12438_v62, %v12267_v14 }
 0x38b   : > { %15052 = vst [vmem:[#allocation72_spill] sm:$0xff] %v12563_v9  ;;  %v7827_v16 = vpop.f32.mrf.mxu1  ;;  %8260 = vmatprep.subr.mxu1 %v4776_v12  ;;  %v2558_v12 = vadd.f32 %v12444_v56, %v12281_v13  ;;  %v4770_v62 = vld [vmem:[#allocation7 + $0x200] sm:$0xff] }
 0x38c   : > { %v7828_v50 = vadd.f32 %v7827_v16, %v7826_v59  ;;  %v12569_v45 = vpop.f32.mrf.mxu0  ;;  %8261 = vmatpush3.msra.mxu1 %v4760_v2  ;;  %v4773_v16 = vld [vmem:[#allocation7 + $0x218] sm:$0xff]  ;;  %v4104_v13 = vsel %vm1882_vm11, %v12561_v31, %v15057_v35 }
 0x38d   : > { %15054 = vst [vmem:[#allocation44_spill] sm:$0xff] %v12569_v45  ;;  %9327 = vmatmul.mubr.f32.gmra.mxu1 %v4116_v32  ;;  %v7829_v43 = vpop.f32.mrf.mxu1  ;;  %8262 = vmatprep.subr.mxu1 %v4775_v54  ;;  %v15056_v59 = vld [vmem:[#allocation36_spill] sm:$0xff]  ;;  %v12583_v32 = vld [vmem:[%s14555_s7] ss:$0 sm:$0xff] }
 0x38e   : > { %9329 = vmatprep.mubr.f32.mxu1 %v4091_v47  ;;  %v3009_v9 = vadd.f32 %v7828_v50, %v12311_v11  ;;  %v12577_v49 = vpop.f32.mrf.mxu0  ;;  %8263 = vmatpush3.msra.mxu1 %v4759_v57  ;;  %v4118_v2 = vmul.f32 %v15056_v59, %v4090_v15  ;;  %v4757_v54 = vld [vmem:[#allocation7 + $0x198] sm:$0xff]  ;;  %v4772_v15 = vld [vmem:[#allocation7 + $0x210] sm:$0xff]  ;;  %v12595_v50 = vld [vmem:[%s14555_s7 + $0x1] ss:$0 sm:$0xff] }
 0x38f   : > { %15055 = vst [vmem:[#allocation73_spill] sm:$0xff] %v12577_v49  ;;  %v7830_v5 = vpop.f32.mrf.mxu1  ;;  %8264 = vmatprep.subr.mxu1 %v4774_v25  ;;  %v4756_v47 = vld [vmem:[#allocation7 + $0x190] sm:$0xff] }
 0x390   : > { %v3087_v11 = vadd.f32 %v3009_v9, %v2558_v12  ;;  %v7831_v56 = vadd.f32 %v7830_v5, %v7829_v43  ;;  %v12590_v57 = vpop.f32.mrf.mxu0  ;;  %8265 = vmatpush3.msra.mxu1 %v4758_v36  ;;  %v4771_v12 = vld [vmem:[#allocation7 + $0x208] sm:$0xff] }
 0x391   : > { %15058 = vst [vmem:[#allocation71_spill] sm:$0xff] %v12590_v57  ;;  %9330 = vmatmul.mubr.f32.gmra.mxu1 %v4118_v2  ;;  %v7832_v25 = vpop.f32.mrf.mxu1  ;;  %8266 = vmatprep.subr.mxu1 %v4773_v16  ;;  %v15059_v2 = vld [vmem:[#allocation38_spill] sm:$0xff] }
 0x392   : > { %9332 = vmatprep.mubr.f32.mxu1 %v12561_v31  ;;  %v3108_v9 = vmul.f32 %v12583_v32, %v3087_v11  ;;  %v3014_v43 = vadd.f32 %v12292_v6, %v7831_v56  ;;  %v12602_v36 = vpop.f32.mrf.mxu0  ;;  %8267 = vmatpush3.msra.mxu1 %v4757_v54  ;;  %v4120_v5 = vmul.f32 %v15059_v2, %v4104_v13  ;;  %v4755_v57 = vld [vmem:[#allocation7 + $0x188] sm:$0xff]  ;;  %v4754_v6 = vld [vmem:[#allocation7 + $0x180] sm:$0xff] }
 0x393   : > { %v7833_v35 = vpop.f32.mrf.mxu1  ;;  %8268 = vmatprep.subr.mxu1 %v4772_v15  ;;  %v2568_v54 = vadd.f32 %v12454_v23, %v12302_v10 }
 0x394   : > { %v3088_v16 = vadd.f32 %v3014_v43, %v2563_v19  ;;  %v7834_v49 = vadd.f32 %v7833_v35, %v7832_v25  ;;  %v12605_v45 = vpop.f32.mrf.mxu0  ;;  %v3129_v14 = vadd.f32 %v12595_v50, %v3108_v9  ;;  %8269 = vmatpush3.msra.mxu1 %v4756_v47  ;;  %v12616_v19 = vld [vmem:[#allocation7 + $0x178] sm:$0xff] }
 0x395   : > { %9333 = vmatmul.mubr.f32.gmra.mxu1 %v4120_v5  ;;  %v7835_v11 = vpop.f32.mrf.mxu1  ;;  %8270 = vmatprep.subr.mxu1 %v4771_v12 }
 0x396   : > { %v3109_v13 = vmul.f32 %v12583_v32, %v3088_v16  ;;  %v3019_v56 = vadd.f32 %v7834_v49, %v12354_v1  ;;  %v12612_v15 = vpop.f32.mrf.mxu0  ;;  %v12614_v25 = vmax.f32 %v3129_v14, 0.0  ;;  %8271 = vmatpush3.msra.mxu1 %v4755_v57  ;;  %v2573_v1 = vadd.f32 %v12450_v58, %v12294_v41 }
 0x397   : > { %v7836_v47 = vpop.f32.mrf.mxu1  ;;  %8272 = vmatprep.subr.mxu1 %v4770_v62  ;;  %v2578_v58 = vadd.f32 %v12468_v26, %v12327_v3 }
 0x398   : > { %v3130_v9 = vadd.f32 %v12595_v50, %v3109_v13  ;;  %v3089_v43 = vadd.f32 %v3019_v56, %v2568_v54  ;;  %v7837_v12 = vadd.f32 %v7836_v47, %v7835_v11  ;;  %v12619_v5 = vpop.f32.mrf.mxu0  ;;  %4866 = vmatprep.mubr.f32.mxu1 %v12614_v25  ;;  %8273 = vmatpush3.msra.mxu1 %v4754_v6  ;;  %v12632_v14 = vrot.slane %v12614_v25, 1 }
 0x399   : > { %v7838_v10 = vpop.f32.mrf.mxu1  ;;  %9391 = vmatprep.subr.mxu1 %v12616_v19 }
 0x39a   : > { %v12625_v23 = vmax.f32 %v3130_v9, 0.0  ;;  %v3110_v49 = vmul.f32 %v12583_v32, %v3089_v43  ;;  %v3024_v57 = vadd.f32 %v12340_v37, %v7837_v12  ;;  %v12629_v35 = vpop.f32.mrf.mxu0 }
 0x39b   : > { %v7839_v16 = vpop.f32.mrf.mxu1 }
 0x39c   : > { %v3131_v62 = vadd.f32 %v12595_v50, %v3110_v49  ;;  %v3090_v11 = vadd.f32 %v3024_v57, %v2573_v1  ;;  %v7840_v6 = vadd.f32 %v7839_v16, %v7838_v10  ;;  %v12635_v54 = vpop.f32.mrf.mxu0  ;;  %v4616_v41 = vrot.slane %v12625_v23, 1 }
 0x39d   : > { %v7841_v13 = vpop.f32.mrf.mxu1 }
 0x39e   : > { %v12640_v56 = vmax.f32 %v3131_v62, 0.0  ;;  %v3111_v37 = vmul.f32 %v12583_v32, %v3090_v11  ;;  %v3029_v47 = vadd.f32 %v7840_v6, %v12381_v8  ;;  %v12644_v9 = vpop.f32.mrf.mxu0  ;;  %v12649_v43 = vsel %vm1882_vm11, %v12632_v14, %v4616_v41 }
 0x39f   : > { %15061 = vst [vmem:[#allocation79_spill] sm:$0xff] %v12644_v9  ;;  %15062 = vst [vmem:[#allocation60_spill] sm:$0xff] %v12649_v43  ;;  %v7842_v12 = vpop.f32.mrf.mxu1  ;;  %9367 = vmatprep.mubr.f32.mxu0 %v12649_v43  ;;  %v2583_v8 = vadd.f32 %v12461_v63, %v12313_v7  ;;  %v4675_v43 = vld [vmem:[#allocation7 + $0x70] sm:$0xff] }
 0x3a0   : > { %15060 = vst [vmem:[#allocation76_spill] sm:$0xff] %v12640_v56  ;;  %v3132_v10 = vadd.f32 %v12595_v50, %v3111_v37  ;;  %v3091_v3 = vadd.f32 %v3029_v47, %v2578_v58  ;;  %v7843_v26 = vadd.f32 %v7842_v12, %v7841_v13  ;;  %v12653_v1 = vpop.f32.mrf.mxu0  ;;  %v12656_v49 = vrot.slane %v12640_v56, 1  ;;  %v4676_v47 = vld [vmem:[#allocation7 + $0x78] sm:$0xff] }
 0x3a1   : > { %15063 = vst [vmem:[#allocation84_spill] sm:$0xff] %v12653_v1  ;;  %v7844_v57 = vpop.f32.mrf.mxu1 }
 0x3a2   : > { %15064 = vst [vmem:[#allocation26_spill] sm:$0xff] %v12656_v49  ;;  %v12660_v16 = vmax.f32 %v3132_v10, 0.0  ;;  %v3112_v62 = vmul.f32 %v12583_v32, %v3091_v3  ;;  %v3034_v11 = vadd.f32 %v12372_v30, %v7843_v26  ;;  %v12667_v6 = vsel %vm1882_vm11, %v4616_v41, %v12656_v49  ;;  %v12669_v58 = vpop.f32.mrf.mxu0  ;;  %v4691_v3 = vld [vmem:[#allocation7 + $0xf0] sm:$0xff] }
 0x3a3   : > { %15066 = vst [vmem:[#allocation83_spill] sm:$0xff] %v12667_v6  ;;  %v4738_v13 = vmul.f32 %v15033_v48, %v12667_v6  ;;  %v7845_v37 = vpop.f32.mrf.mxu1  ;;  %v2588_v41 = vadd.f32 %v12486_v60, %v12351_v28  ;;  %v4674_v60 = vld [vmem:[#allocation7 + $0x68] sm:$0xff] }
 0x3a4   : > { %15065 = vst [vmem:[#allocation82_spill] sm:$0xff] %v12660_v16  ;;  %v3133_v7 = vadd.f32 %v12595_v50, %v3112_v62  ;;  %v3092_v63 = vadd.f32 %v3034_v11, %v2583_v8  ;;  %v7846_v12 = vadd.f32 %v7845_v37, %v7844_v57  ;;  %v12674_v10 = vpop.f32.mrf.mxu0  ;;  %v4618_v30 = vrot.slane %v12660_v16, 1  ;;  %v4690_v57 = vld [vmem:[#allocation7 + $0xe8] sm:$0xff] }
 0x3a5   : > { %v7847_v26 = vpop.f32.mrf.mxu1  ;;  %9368 = vmatmul.mubr.f32.vlgmr.msra.gmra.mxu0 %v4738_v13 }
 0x3a6   : > { %v12679_v1 = vmax.f32 %v3133_v7, 0.0  ;;  %v3113_v6 = vmul.f32 %v12583_v32, %v3092_v63  ;;  %v3039_v9 = vadd.f32 %v7846_v12, %v12408_v51  ;;  %v12686_v8 = vsel %vm1882_vm11, %v12656_v49, %v4618_v30  ;;  %8355 = vmatpush3.msra.mxu0 %v4676_v47  ;;  %v4689_v7 = vld [vmem:[#allocation7 + $0xe0] sm:$0xff] }
 0x3a7   : > { %v12688_v62 = vpop.f32.mrf.mxu0  ;;  %v7848_v11 = vpop.f32.mrf.mxu1  ;;  %9370 = vmatprep.mubr.f32.mxu0 %v12686_v8  ;;  %8356 = vmatprep.subr.mxu0 %v4691_v3  ;;  %v4673_v47 = vld [vmem:[#allocation7 + $0x60] sm:$0xff]  ;;  %v2593_v12 = vadd.f32 %v12481_v34, %v12342_v33 }
 0x3a8   : > { %15067 = vst [vmem:[#allocation25_spill] sm:$0xff] %v12679_v1  ;;  %15068 = vst [vmem:[#allocation67_spill] sm:$0xff] %v12688_v62  ;;  %v3134_v28 = vadd.f32 %v12595_v50, %v3113_v6  ;;  %v3093_v13 = vadd.f32 %v3039_v9, %v2588_v41  ;;  %v7849_v37 = vadd.f32 %v7848_v11, %v7847_v26  ;;  %v4619_v51 = vrot.slane %v12679_v1, 1  ;;  %v4688_v9 = vld [vmem:[#allocation7 + $0xd8] sm:$0xff]  ;;  %v15071_v41 = vld [vmem:[#allocation45_spill] sm:$0xff] }
 0x3a9   : > { %8357 = vmatpush3.msra.mxu0 %v4675_v43  ;;  %v12693_v63 = vpop.f32.mrf.mxu0  ;;  %v15072_v26 = vld [vmem:[#allocation46_spill] sm:$0xff] }
 0x3aa   : > { %15069 = vst [vmem:[#allocation69_spill] sm:$0xff] %v12693_v63  ;;  %8358 = vmatprep.subr.mxu0 %v4690_v57  ;;  %v12697_v49 = vmax.f32 %v3134_v28, 0.0  ;;  %v3114_v3 = vmul.f32 %v12583_v32, %v3093_v13  ;;  %v3044_v62 = vadd.f32 %v12396_v39, %v7849_v37  ;;  %v7850_v6 = vpop.f32.mrf.mxu1  ;;  %v7740_v43 = vadd.f32 %v15072_v26, %v15071_v41 }
 0x3ab   : > { %8359 = vmatpush3.msra.mxu0 %v4674_v60  ;;  %v12705_v11 = vsel %vm1882_vm11, %v4618_v30, %v4619_v51  ;;  %v4672_v60 = vld [vmem:[#allocation7 + $0x58] sm:$0xff]  ;;  %v4687_v30 = vld [vmem:[#allocation7 + $0xd0] sm:$0xff] }
 0x3ac   : > { %15070 = vst [vmem:[#allocation87_spill] sm:$0xff] %v12697_v49  ;;  %8360 = vmatprep.subr.mxu0 %v4689_v7  ;;  %v3135_v57 = vadd.f32 %v12595_v50, %v3114_v3  ;;  %v3094_v34 = vadd.f32 %v3044_v62, %v2593_v12  ;;  %v12708_v33 = vpop.f32.mrf.mxu0  ;;  %v7851_v28 = vpop.f32.mrf.mxu1  ;;  %v4740_v39 = vmul.f32 %v15037_v52, %v12705_v11  ;;  %v4620_v41 = vrot.slane %v12697_v49, 1  ;;  %v4671_v12 = vld [vmem:[#allocation7 + $0x50] sm:$0xff] }
 0x3ad   : > { %8361 = vmatpush3.msra.mxu0 %v4673_v47  ;;  %v2453_v13 = vadd.f32 %v7740_v43, %v12356_v0  ;;  %v7852_v37 = vadd.f32 %v7851_v28, %v7850_v6  ;;  %v4686_v6 = vld [vmem:[#allocation7 + $0xc8] sm:$0xff] }
 0x3ae   : > { %8362 = vmatprep.subr.mxu0 %v4688_v9  ;;  %v12714_v26 = vmax.f32 %v3135_v57, 0.0  ;;  %v3115_v7 = vmul.f32 %v12583_v32, %v3094_v34  ;;  %v12717_v62 = vpop.f32.mrf.mxu0  ;;  %9371 = vmatmul.mubr.f32.gmra.mxu0 %v4740_v39  ;;  %v12723_v0 = vsel %vm1882_vm11, %v4619_v51, %v4620_v41  ;;  %v4670_v57 = vld [vmem:[#allocation7 + $0x48] sm:$0xff] }
 0x3af   : > { %v2598_v3 = vadd.f32 %v12501_v24, %v2453_v13  ;;  %v3049_v47 = vadd.f32 %v7852_v37, %v12429_v18  ;;  %v7853_v63 = vpop.f32.mrf.mxu1  ;;  %8363 = vmatpush3.msra.mxu0 %v4672_v60  ;;  %9373 = vmatprep.mubr.f32.mxu0 %v12723_v0  ;;  %v4685_v18 = vld [vmem:[#allocation7 + $0xc0] sm:$0xff] }
 0x3b0   : > { %15073 = vst [vmem:[#allocation33_spill] sm:$0xff] %v12714_v26  ;;  %v3136_v9 = vadd.f32 %v12595_v50, %v3115_v7  ;;  %v4621_v43 = vrot.slane %v12714_v26, 1  ;;  %8364 = vmatprep.subr.mxu0 %v4687_v30  ;;  %v4669_v7 = vld [vmem:[#allocation7 + $0x40] sm:$0xff] }
 0x3b1   : > { %v3095_v34 = vadd.f32 %v3049_v47, %v2598_v3  ;;  %v12728_v28 = vpop.f32.mrf.mxu0  ;;  %v7854_v24 = vpop.f32.mrf.mxu1  ;;  %8365 = vmatpush3.msra.mxu0 %v4671_v12  ;;  %v2603_v12 = vadd.f32 %v12496_v17, %v12358_v40  ;;  %v4683_v40 = vld [vmem:[#allocation7 + $0xb0] sm:$0xff] }
 0x3b2   : > { %15074 = vst [vmem:[#allocation29_spill] sm:$0xff] %v12728_v28  ;;  %v12730_v39 = vmax.f32 %v3136_v9, 0.0  ;;  %v7855_v51 = vadd.f32 %v7854_v24, %v7853_v63  ;;  %v12734_v60 = vsel %vm1882_vm11, %v4620_v41, %v4621_v43  ;;  %8366 = vmatprep.subr.mxu0 %v4686_v6  ;;  %v4684_v41 = vld [vmem:[#allocation7 + $0xb8] sm:$0xff] }
 0x3b3   : > { %v3116_v13 = vmul.f32 %v12583_v32, %v3095_v34  ;;  %v12737_v37 = vpop.f32.mrf.mxu0  ;;  %v4742_v30 = vmul.f32 %v15040_v42, %v12734_v60  ;;  %8367 = vmatpush3.msra.mxu0 %v4670_v57  ;;  %v4668_v9 = vld [vmem:[#allocation7 + $0x38] sm:$0xff] }
 0x3b4   : > { %15075 = vst [vmem:[#allocation28_spill] sm:$0xff] %v12730_v39  ;;  %15076 = vst [vmem:[#allocation85_spill] sm:$0xff] %v12737_v37  ;;  %v3054_v3 = vadd.f32 %v12421_v55, %v7855_v51  ;;  %v7856_v63 = vpop.f32.mrf.mxu1  ;;  %v4622_v47 = vrot.slane %v12730_v39, 1  ;;  %8368 = vmatprep.subr.mxu0 %v4685_v18  ;;  %v4667_v18 = vld [vmem:[#allocation7 + $0x30] sm:$0xff] }
 0x3b5   : > { %v3137_v6 = vadd.f32 %v12595_v50, %v3116_v13  ;;  %9374 = vmatmul.mubr.f32.gmra.mxu0 %v4742_v30  ;;  %v4682_v30 = vld [vmem:[#allocation7 + $0xa8] sm:$0xff] }
 0x3b6   : > { %v3096_v34 = vadd.f32 %v3054_v3, %v2603_v12  ;;  %v12746_v24 = vpop.f32.mrf.mxu0  ;;  %v7857_v37 = vpop.f32.mrf.mxu1  ;;  %v12750_v57 = vsel %vm1882_vm11, %v4621_v43, %v4622_v47  ;;  %8369 = vmatpush3.msra.mxu0 %v4669_v7  ;;  %v2608_v12 = vadd.f32 %v12517_v61, %v12391_v20  ;;  %v4666_v3 = vld [vmem:[#allocation7 + $0x28] sm:$0xff] }
 0x3b7   : > { %15077 = vst [vmem:[#allocation74_spill] sm:$0xff] %v12750_v57  ;;  %v12752_v55 = vmax.f32 %v3137_v6, 0.0  ;;  %v7858_v17 = vadd.f32 %v7857_v37, %v7856_v63  ;;  %9376 = vmatprep.mubr.f32.mxu0 %v12750_v57  ;;  %8370 = vmatprep.subr.mxu0 %v4684_v41  ;;  %v4681_v6 = vld [vmem:[#allocation7 + $0xa0] sm:$0xff] }
 0x3b8   : > { %v3117_v51 = vmul.f32 %v12583_v32, %v3096_v34  ;;  %v12756_v13 = vpop.f32.mrf.mxu0  ;;  %8371 = vmatpush3.msra.mxu0 %v4668_v9 }
 0x3b9   : > { %15078 = vst [vmem:[#allocation88_spill] sm:$0xff] %v12752_v55  ;;  %v3059_v43 = vadd.f32 %v7858_v17, %v12446_v44  ;;  %v4623_v7 = vrot.slane %v12752_v55, 1  ;;  %8372 = vmatprep.subr.mxu0 %v4683_v40  ;;  %v4665_v17 = vld [vmem:[#allocation7 + $0x20] sm:$0xff] }
 0x3ba   : > { %v3138_v37 = vadd.f32 %v12595_v50, %v3117_v51  ;;  %v7859_v63 = vpop.f32.mrf.mxu1  ;;  %v12763_v41 = vpop.f32.mrf.mxu0  ;;  %8373 = vmatpush3.msra.mxu0 %v4667_v18 }
 0x3bb   : > { %15079 = vst [vmem:[#allocation37_spill] sm:$0xff] %v12763_v41  ;;  %v3097_v34 = vadd.f32 %v3059_v43, %v2608_v12  ;;  %v12767_v9 = vsel %vm1882_vm11, %v4622_v47, %v4623_v7  ;;  %8374 = vmatprep.subr.mxu0 %v4682_v30  ;;  %v4680_v12 = vld [vmem:[#allocation7 + $0x98] sm:$0xff] }
 0x3bc   : > { %15080 = vst [vmem:[#allocation75_spill] sm:$0xff] %v12767_v9  ;;  %v12769_v20 = vmax.f32 %v3138_v37, 0.0  ;;  %v7860_v44 = vpop.f32.mrf.mxu1  ;;  %v12771_v61 = vpop.f32.mrf.mxu0  ;;  %v4744_v40 = vmul.f32 %v15043_v53, %v12767_v9  ;;  %8375 = vmatpush3.msra.mxu0 %v4666_v3  ;;  %v4664_v30 = vld [vmem:[#allocation7 + $0x18] sm:$0xff] }
 0x3bd   : > { %15082 = vst [vmem:[#allocation35_spill] sm:$0xff] %v12771_v61  ;;  %v3118_v51 = vmul.f32 %v12583_v32, %v3097_v34  ;;  %v7861_v18 = vadd.f32 %v7860_v44, %v7859_v63  ;;  %8376 = vmatprep.subr.mxu0 %v4681_v6  ;;  %v4679_v61 = vld [vmem:[#allocation7 + $0x90] sm:$0xff] }
 0x3be   : > { %15081 = vst [vmem:[#allocation34_spill] sm:$0xff] %v12769_v20  ;;  %v7862_v43 = vpop.f32.mrf.mxu1  ;;  %9377 = vmatmul.mubr.f32.gmra.mxu0 %v4744_v40  ;;  %v4624_v47 = vrot.slane %v12769_v20, 1  ;;  %v4663_v63 = vld [vmem:[#allocation7 + $0x10] sm:$0xff] }
 0x3bf   : > { %v3139_v37 = vadd.f32 %v12595_v50, %v3118_v51  ;;  %v3064_v41 = vadd.f32 %v12440_v29, %v7861_v18  ;;  %8377 = vmatpush3.msra.mxu0 %v4665_v17  ;;  %v4678_v29 = vld [vmem:[#allocation7 + $0x88] sm:$0xff] }
 0x3c0   : > { %v12779_v28 = vpop.f32.mrf.mxu0  ;;  %v7863_v3 = vpop.f32.mrf.mxu1  ;;  %v12783_v34 = vsel %vm1882_vm11, %v4623_v7, %v4624_v47  ;;  %8378 = vmatprep.subr.mxu0 %v4680_v12  ;;  %v4662_v51 = vld [vmem:[#allocation7 + $0x8] sm:$0xff] }
 0x3c1   : > { %15083 = vst [vmem:[#allocation41_spill] sm:$0xff] %v12779_v28  ;;  %15084 = vst [vmem:[#allocation89_spill] sm:$0xff] %v12783_v34  ;;  %v12785_v6 = vmax.f32 %v3139_v37, 0.0  ;;  %v3098_v44 = vadd.f32 %v3064_v41, %v12512_v46  ;;  %v7864_v40 = vadd.f32 %v7863_v3, %v7862_v43  ;;  %9379 = vmatprep.mubr.f32.mxu0 %v12783_v34  ;;  %8379 = vmatpush3.msra.mxu0 %v4664_v30  ;;  %v15086_v18 = vld [vmem:[#allocation50_spill] sm:$0xff]  ;;  %v4677_v46 = vld [vmem:[#allocation7 + $0x80] sm:$0xff] }
 0x3c2   : > { %v12789_v17 = vpop.f32.mrf.mxu0  ;;  %8380 = vmatprep.subr.mxu0 %v4679_v61  ;;  %v2618_v28 = vadd.f32 %v12533_v38, %v15086_v18  ;;  %v15087_v12 = vld [vmem:[#allocation58_spill] sm:$0xff]  ;;  %v4661_v41 = vld [vmem:[#allocation7] sm:$0xff] }
 0x3c3   : > { %15085 = vst [vmem:[#allocation77_spill] sm:$0xff] %v12789_v17  ;;  %v3119_v7 = vmul.f32 %v12583_v32, %v3098_v44  ;;  %v3069_v9 = vadd.f32 %v7864_v40, %v15087_v12  ;;  %v7865_v37 = vpop.f32.mrf.mxu1  ;;  %v4625_v57 = vrot.slane %v12785_v6, 1  ;;  %8381 = vmatpush3.msra.mxu0 %v4663_v63  ;;  %v12803_v44 = vld [vmem:[#allocation7 + $0x478] sm:$0xff] }
 0x3c4   : > { %8382 = vmatprep.subr.mxu0 %v4678_v29 }
 0x3c5   : > { %v3140_v43 = vadd.f32 %v12595_v50, %v3119_v7  ;;  %v3099_v30 = vadd.f32 %v3069_v9, %v2618_v28  ;;  %v12797_v3 = vpop.f32.mrf.mxu0  ;;  %v7866_v61 = vpop.f32.mrf.mxu1  ;;  %v12801_v38 = vsel %vm1882_vm11, %v4624_v47, %v4625_v57  ;;  %8383 = vmatpush3.msra.mxu0 %v4662_v51  ;;  %v15092_v9 = vld [vmem:[#allocation52_spill] sm:$0xff] }
 0x3c6   : > { %15088 = vst [vmem:[#allocation39_spill] sm:$0xff] %v12797_v3  ;;  %15089 = vst [vmem:[#allocation40_spill] sm:$0xff] %v12801_v38  ;;  %v7867_v40 = vadd.f32 %v7866_v61, %v7865_v37  ;;  %v4746_v63 = vmul.f32 %v15047_v27, %v12801_v38  ;;  %8384 = vmatprep.subr.mxu0 %v4677_v46  ;;  %v4568_v38 = vrot.slane %v12625_v23, 7 }
 0x3c7   : > { %v12807_v29 = vmax.f32 %v3140_v43, 0.0  ;;  %v3120_v18 = vmul.f32 %v12583_v32, %v3099_v30  ;;  %v12810_v28 = vpop.f32.mrf.mxu0  ;;  %8385 = vmatpush3.msra.mxu0 %v4661_v41 }
 0x3c8   : > { %15091 = vst [vmem:[#allocation80_spill] sm:$0xff] %v12810_v28  ;;  %v3074_v7 = vadd.f32 %v15092_v9, %v7867_v40  ;;  %v7868_v12 = vpop.f32.mrf.mxu1  ;;  %9380 = vmatmul.mubr.f32.gmra.mxu0 %v4746_v63  ;;  %9447 = vmatprep.subr.mxu0 %v12803_v44 }
 0x3c9   : > { %15090 = vst [vmem:[#allocation78_spill] sm:$0xff] %v12807_v29  ;;  %v3141_v47 = vadd.f32 %v12595_v50, %v3120_v18  ;;  %v4626_v51 = vrot.slane %v12807_v29, 1  ;;  %v15097_v18 = vld [vmem:[#allocation51_spill] sm:$0xff] }
 0x3ca   : > { %v3100_v37 = vadd.f32 %v3074_v7, %v12528_v4  ;;  %v12817_v46 = vpop.f32.mrf.mxu0  ;;  %v7869_v43 = vpop.f32.mrf.mxu1  ;;  %v2628_v9 = vadd.f32 %v12548_v22, %v15097_v18  ;;  %v15098_v4 = vld [vmem:[#allocation55_spill] sm:$0xff] }
 0x3cb   : > { %15093 = vst [vmem:[#allocation81_spill] sm:$0xff] %v12817_v46  ;;  %v12819_v61 = vmax.f32 %v3141_v47, 0.0  ;;  %v7870_v30 = vadd.f32 %v7869_v43, %v7868_v12  ;;  %v12823_v41 = vsel %vm1882_vm11, %v4625_v57, %v4626_v51  ;;  %v15102_v22 = vld [vmem:[#allocation31_spill] sm:$0xff] }
 0x3cc   : > { %15095 = vst [vmem:[#allocation30_spill] sm:$0xff] %v12823_v41  ;;  %v3121_v40 = vmul.f32 %v12583_v32, %v3100_v37  ;;  %v12826_v63 = vpop.f32.mrf.mxu0  ;;  %9382 = vmatprep.mubr.f32.mxu0 %v12823_v41 }
 0x3cd   : > { %15094 = vst [vmem:[#allocation32_spill] sm:$0xff] %v12819_v61  ;;  %15096 = vst [vmem:[#allocation47_spill] sm:$0xff] %v12826_v63  ;;  %v3079_v7 = vadd.f32 %v7870_v30, %v15098_v4  ;;  %v7871_v28 = vpop.f32.mrf.mxu1  ;;  %v4627_v47 = vrot.slane %v12819_v61, 1  ;;  %v15103_v30 = vld [vmem:[#allocation59_spill] sm:$0xff]  ;;  %v15104_v4 = vld [vmem:[#allocation61_spill] sm:$0xff] }
 0x3ce   : > { %v3142_v12 = vadd.f32 %v12595_v50, %v3121_v40  ;;  %v7943_v3 = vadd.f32 %v15104_v4, %v15103_v30  ;;  %v15117_v4 = vld [vmem:[#allocation65_spill] sm:$0xff] }
 0x3cf   : > { %v3101_v43 = vadd.f32 %v3079_v7, %v2628_v9  ;;  %v12834_v17 = vpop.f32.mrf.mxu0  ;;  %v7872_v57 = vpop.f32.mrf.mxu1  ;;  %v12838_v37 = vsel %vm1882_vm11, %v4626_v51, %v4627_v47  ;;  %v15106_v9 = vld [vmem:[#allocation53_spill] sm:$0xff] }
 0x3d0   : > { %15099 = vst [vmem:[#allocation48_spill] sm:$0xff] %v12834_v17  ;;  %15100 = vst [vmem:[#allocation86_spill] sm:$0xff] %v12838_v37  ;;  %v12840_v63 = vmax.f32 %v3142_v12, 0.0  ;;  %v7873_v46 = vadd.f32 %v7872_v57, %v7871_v28  ;;  %v4748_v18 = vmul.f32 %v15102_v22, %v12838_v37  ;;  %v15109_v57 = vld [vmem:[#allocation42_spill] sm:$0xff] }
 0x3d1   : > { %v3122_v41 = vmul.f32 %v12583_v32, %v3101_v43  ;;  %v12847_v40 = vpop.f32.mrf.mxu0 }
 0x3d2   : > { %15101 = vst [vmem:[#allocation49_spill] sm:$0xff] %v12840_v63  ;;  %15105 = vst [vmem:[#allocation43_spill] sm:$0xff] %v12847_v40  ;;  %v3084_v7 = vadd.f32 %v15106_v9, %v7873_v46  ;;  %v9201_v17 = vpop.f32.mrf.mxu1  ;;  %9383 = vmatmul.mubr.f32.gmra.mxu0 %v4748_v18  ;;  %v12851_v51 = vrot.slane %v12840_v63, 1 }
 0x3d3   : > { %v3143_v12 = vadd.f32 %v12595_v50, %v3122_v41  ;;  %v12854_v28 = vadd.f32 %v9201_v17, %v7943_v3  ;;  %v15116_v3 = vld [vmem:[#allocation64_spill] sm:$0xff] }
 0x3d4   : > { %15107 = vst [vmem:[#allocation45_spill] sm:$0xff] %v12851_v51  ;;  %v3102_v37 = vadd.f32 %v3084_v7, %v15109_v57  ;;  %v12857_v22 = vpop.f32.mrf.mxu0  ;;  %v12862_v43 = vsel %vm1882_vm11, %v4627_v47, %v12851_v51  ;;  %v12866_v46 = vpop.f32.mrf.mxu1  ;;  %v7949_v9 = vadd.f32 %v15117_v4, %v15116_v3 }
 0x3d5   : > { %15108 = vst [vmem:[#allocation46_spill] sm:$0xff] %v12854_v28  ;;  %15110 = vst [vmem:[#allocation50_spill] sm:$0xff] %v12857_v22  ;;  %v12864_v30 = vmax.f32 %v3143_v12, 0.0  ;;  %9385 = vmatprep.mubr.f32.mxu0 %v12862_v43  ;;  %v15127_v22 = vld [vmem:[#allocation44_spill] sm:$0xff] }
 0x3d6   : > { %15111 = vst [vmem:[#allocation58_spill] sm:$0xff] %v12862_v43  ;;  %15113 = vst [vmem:[#allocation51_spill] sm:$0xff] %v12866_v46  ;;  %v3123_v18 = vmul.f32 %v12583_v32, %v3102_v37  ;;  %v12870_v41 = vpop.f32.mrf.mxu0  ;;  %v4707_v46 = vld [vmem:[#allocation7 + $0x170] sm:$0xff] }
 0x3d7   : > { %15112 = vst [vmem:[#allocation52_spill] sm:$0xff] %v12864_v30  ;;  %15114 = vst [vmem:[#allocation55_spill] sm:$0xff] %v12870_v41  ;;  %v12873_v17 = vrot.slane %v12864_v30, 1 }
 0x3d8   : > { %v3144_v7 = vadd.f32 %v12595_v50, %v3123_v18  ;;  %v4567_v50 = vrot.slane %v12614_v25, 7  ;;  %v12898_v18 = vrot.slane %v12840_v63, 7 }
 0x3d9   : > { %15115 = vst [vmem:[#allocation59_spill] sm:$0xff] %v12873_v17  ;;  %v9204_v47 = vpop.f32.mrf.mxu1  ;;  %v12878_v57 = vpop.f32.mrf.mxu0  ;;  %v12884_v12 = vsel %vm1882_vm11, %v12851_v51, %v12873_v17 }
 0x3da   : > { %15118 = vst [vmem:[#allocation61_spill] sm:$0xff] %v12878_v57  ;;  %15119 = vst [vmem:[#allocation53_spill] sm:$0xff] %v12884_v12  ;;  %v12886_v32 = vmax.f32 %v3144_v7, 0.0  ;;  %v12888_v37 = vadd.f32 %v9204_v47, %v7949_v9  ;;  %v4750_v40 = vmul.f32 %v15056_v59, %v12884_v12  ;;  %v15124_v9 = vld [vmem:[#allocation70_spill] sm:$0xff]  ;;  %v15126_v57 = vld [vmem:[#allocation72_spill] sm:$0xff] }
 0x3db   : > { %v12892_v41 = vpop.f32.mrf.mxu1  ;;  %v12894_v3 = vpop.f32.mrf.mxu0  ;;  %v12907_v47 = vrot.slane %v15124_v9, 7  ;;  %v7955_v12 = vadd.f32 %v15127_v22, %v15126_v57  ;;  %v15130_v22 = vld [vmem:[#allocation13_spill] sm:$0xff] }
 0x3dc   : > { %15120 = vst [vmem:[#allocation42_spill] sm:$0xff] %v12886_v32  ;;  %15121 = vst [vmem:[#allocation64_spill] sm:$0xff] %v12894_v3  ;;  %v12901_v4 = vrot.slane %v12886_v32, 7  ;;  %9386 = vmatmul.mubr.f32.gmra.mxu0 %v4750_v40  ;;  %v12904_v7 = vrot.slane %v12886_v32, 1 }
 0x3dd   : > { %15125 = vst [vmem:[#allocation70_spill] sm:$0xff] %v12907_v47  ;;  %v4596_v34 = vsel %vm1833_vm4, %v12898_v18, %v12907_v47 }
 0x3de   : > { %15122 = vst [vmem:[#allocation65_spill] sm:$0xff] %v12901_v4  ;;  %15123 = vst [vmem:[#allocation90_spill] sm:$0xff] %v12904_v7  ;;  %v12915_v3 = vsel %vm1882_vm11, %v12873_v17, %v12904_v7  ;;  %v4715_v43 = vsel %vm1833_vm4, %v12901_v4, %v4567_v50  ;;  %v4736_v40 = vsel %vm1882_vm11, %v12904_v7, %v12632_v14  ;;  %v12937_v7 = vrot.slane %v12640_v56, 7 }
 0x3df   : > { %15128 = vst [vmem:[#allocation72_spill] sm:$0xff] %v12915_v3  ;;  %v9207_v51 = vpop.f32.mrf.mxu1  ;;  %v12924_v59 = vpop.f32.mrf.mxu0  ;;  %9388 = vmatprep.mubr.f32.mxu0 %v12915_v3  ;;  %v4716_v57 = vmul.f32 %v15130_v22, %v4715_v43  ;;  %v4752_v28 = vmul.f32 %v15059_v2, %v4736_v40  ;;  %v7961_v43 = vadd.f32 %v12605_v45, %v12602_v36  ;;  %v4706_v40 = vld [vmem:[#allocation7 + $0x168] sm:$0xff] }
 0x3e0   : > { %15129 = vst [vmem:[#allocation44_spill] sm:$0xff] %v12924_v59  ;;  %v12929_v17 = vadd.f32 %v9207_v51, %v7955_v12  ;;  %15131 = vst [vmem:[#allocation91_spill] sm:$0xff] %v12937_v7  ;;  %v4597_v51 = vmul.f32 %v15130_v22, %v4596_v34  ;;  %v12951_v12 = vsel %vm1833_vm4, %v4567_v50, %v4568_v38  ;;  %v5541_v34 = vld [vmem:[#allocation7 + $0x470] sm:$0xff]  ;;  %v4571_v22 = vrot.slane %v12679_v1, 7 }
 0x3e1   : > { %v12939_v59 = vpop.f32.mrf.mxu1  ;;  %v12941_v3 = vpop.f32.mrf.mxu0  ;;  %4867 = vmatmul.mubr.f32.vlgmr.msra.gmra.mxu1 %v4716_v57  ;;  %9389 = vmatmul.mubr.f32.gmra.mxu0 %v4752_v28 }
 0x3e2   : > { %15132 = vst [vmem:[#allocation92_spill] sm:$0xff] %v12941_v3  ;;  %9392 = vmatpush3.msra.mxu1 %v12616_v19  ;;  %4871 = vmatprep.mubr.f32.mxu1 %v12625_v23  ;;  %v12956_v19 = vsel %vm1833_vm4, %v4568_v38, %v12937_v7  ;;  %v15135_v38 = vld [vmem:[#allocation14_spill] sm:$0xff] }
 0x3e3   : > { %5156 = vmatprep.mubr.f32.mxu0 %v15124_v9  ;;  %9393 = vmatprep.subr.mxu1 %v4707_v46 }
 0x3e4   : > { %9394 = vmatpush3.msra.mxu1 %v4707_v46  ;;  %v4718_v46 = vmul.f32 %v15135_v38, %v12956_v19 }
 0x3e5   : > { %v9210_v28 = vpop.f32.mrf.mxu1  ;;  %v12958_v57 = vpop.f32.mrf.mxu0  ;;  %4872 = vmatmul.mubr.f32.gmra.mxu1 %v12951_v12  ;;  %5157 = vmatmul.mubr.f32.vlgmr.msra.gmra.mxu0 %v4597_v51  ;;  %v7967_v51 = vadd.f32 %v12635_v54, %v12629_v35 }
 0x3e6   : > { %15133 = vst [vmem:[#allocation93_spill] sm:$0xff] %v12958_v57  ;;  %v12961_v3 = vadd.f32 %v9210_v28, %v7961_v43  ;;  %4876 = vmatprep.mubr.f32.mxu1 %v12640_v56  ;;  %5161 = vmatprep.mubr.f32.mxu0 %v15124_v9  ;;  %v4705_v43 = vld [vmem:[#allocation7 + $0x160] sm:$0xff]  ;;  %v4570_v28 = vrot.slane %v12660_v16, 7  ;;  %v4594_v9 = vsel %vm1833_vm4, %v12907_v47, %v4567_v50 }
 0x3e7   : > { %v12965_v45 = vpop.f32.mrf.mxu1  ;;  %v12967_v36 = vpop.f32.mrf.mxu0  ;;  %9395 = vmatprep.subr.mxu1 %v4706_v40  ;;  %9448 = vmatpush3.msra.mxu0 %v12803_v44  ;;  %v4599_v54 = vmul.f32 %v15135_v38, %v4594_v9  ;;  %v7973_v50 = vadd.f32 %v12674_v10, %v12669_v58  ;;  %v4573_v38 = vrot.slane %v12714_v26, 7 }
 0x3e8   : > { %15134 = vst [vmem:[#allocation94_spill] sm:$0xff] %v12967_v36  ;;  %9396 = vmatpush3.msra.mxu1 %v4706_v40  ;;  %9449 = vmatprep.subr.mxu0 %v5541_v34  ;;  %v5540_v36 = vld [vmem:[#allocation7 + $0x468] sm:$0xff] }
 0x3e9   : > { %v9213_v2 = vpop.f32.mrf.mxu1  ;;  %4877 = vmatmul.mubr.f32.gmra.mxu1 %v4718_v46  ;;  %5162 = vmatmul.mubr.f32.gmra.mxu0 %v12907_v47  ;;  %v4704_v46 = vld [vmem:[#allocation7 + $0x158] sm:$0xff]  ;;  %v7979_v47 = vadd.f32 %v12717_v62, %v12708_v33 }
 0x3ea   : > { %v12980_v44 = vadd.f32 %v9213_v2, %v7967_v51  ;;  %v12982_v57 = vpop.f32.mrf.mxu0  ;;  %4881 = vmatprep.mubr.f32.mxu1 %v12660_v16  ;;  %5166 = vmatprep.mubr.f32.mxu0 %v12614_v25  ;;  %v12996_v2 = vsel %vm1833_vm4, %v12937_v7, %v4570_v28  ;;  %v13000_v25 = vsel %vm1833_vm4, %v4570_v28, %v4571_v22  ;;  %v15141_v28 = vld [vmem:[#allocation15_spill] sm:$0xff] }
 0x3eb   : > { %15136 = vst [vmem:[#allocation95_spill] sm:$0xff] %v12982_v57  ;;  %v12986_v35 = vpop.f32.mrf.mxu1  ;;  %9397 = vmatprep.subr.mxu1 %v4705_v43  ;;  %9450 = vmatpush3.msra.mxu0 %v5541_v34  ;;  %15138 = vst [vmem:[#allocation97_spill] sm:$0xff] %v12996_v2  ;;  %v5539_v34 = vld [vmem:[#allocation7 + $0x460] sm:$0xff]  ;;  %v4720_v9 = vmul.f32 %v15141_v28, %v13000_v25  ;;  %v4601_v62 = vmul.f32 %v15141_v28, %v12956_v19  ;;  %v5537_v19 = vld [vmem:[#allocation7 + $0x450] sm:$0xff] }
 0x3ec   : > { %v12991_v40 = vpop.f32.mrf.mxu0  ;;  %9398 = vmatpush3.msra.mxu1 %v4705_v43  ;;  %15139 = vst [vmem:[#allocation98_spill] sm:$0xff] %v13000_v25  ;;  %9451 = vmatprep.subr.mxu0 %v5540_v36 }
 0x3ed   : > { %15137 = vst [vmem:[#allocation96_spill] sm:$0xff] %v12991_v40  ;;  %v9216_v51 = vpop.f32.mrf.mxu1  ;;  %4882 = vmatmul.mubr.f32.gmra.mxu1 %v12996_v2  ;;  %5167 = vmatmul.mubr.f32.gmra.mxu0 %v4599_v54  ;;  %v4698_v40 = vld [vmem:[#allocation7 + $0x128] sm:$0xff] }
 0x3ee   : > { %v13003_v58 = vadd.f32 %v9216_v51, %v7973_v50  ;;  %v13005_v10 = vpop.f32.mrf.mxu0  ;;  %4886 = vmatprep.mubr.f32.mxu1 %v12679_v1  ;;  %5171 = vmatprep.mubr.f32.mxu0 %v12625_v23  ;;  %v4703_v50 = vld [vmem:[#allocation7 + $0x150] sm:$0xff]  ;;  %v4572_v51 = vrot.slane %v12697_v49, 7 }
 0x3ef   : > { %15140 = vst [vmem:[#allocation99_spill] sm:$0xff] %v13005_v10  ;;  %v13009_v43 = vpop.f32.mrf.mxu1  ;;  %9399 = vmatprep.subr.mxu1 %v4704_v46  ;;  %9452 = vmatpush3.msra.mxu0 %v5540_v36  ;;  %v5538_v10 = vld [vmem:[#allocation7 + $0x458] sm:$0xff] }
 0x3f0   : > { %v13015_v54 = vpop.f32.mrf.mxu0  ;;  %9400 = vmatpush3.msra.mxu1 %v4704_v46  ;;  %9453 = vmatprep.subr.mxu0 %v5539_v34  ;;  %v7985_v46 = vadd.f32 %v12756_v13, %v12746_v24 }
 0x3f1   : > { %15142 = vst [vmem:[#allocation100_spill] sm:$0xff] %v13015_v54  ;;  %v9219_v23 = vpop.f32.mrf.mxu1  ;;  %4887 = vmatmul.mubr.f32.gmra.mxu1 %v4720_v9  ;;  %5172 = vmatmul.mubr.f32.gmra.mxu0 %v12951_v12  ;;  %v4702_v9 = vld [vmem:[#allocation7 + $0x148] sm:$0xff] }
 0x3f2   : > { %v13020_v7 = vadd.f32 %v9219_v23, %v7979_v47  ;;  %v13022_v36 = vpop.f32.mrf.mxu0  ;;  %4891 = vmatprep.mubr.f32.mxu1 %v12697_v49  ;;  %5176 = vmatprep.mubr.f32.mxu0 %v12640_v56  ;;  %v13036_v47 = vsel %vm1833_vm4, %v4571_v22, %v4572_v51  ;;  %v13040_v23 = vsel %vm1833_vm4, %v4572_v51, %v4573_v38  ;;  %v15149_v22 = vld [vmem:[#allocation16_spill] sm:$0xff]  ;;  %v15156_v56 = vld [vmem:[#allocation62_spill] sm:$0xff] }
 0x3f3   : > { %15143 = vst [vmem:[#allocation101_spill] sm:$0xff] %v13022_v36  ;;  %v13026_v33 = vpop.f32.mrf.mxu1  ;;  %9401 = vmatprep.subr.mxu1 %v4703_v50  ;;  %9454 = vmatpush3.msra.mxu0 %v5539_v34  ;;  %15145 = vst [vmem:[#allocation103_spill] sm:$0xff] %v13036_v47 }
 0x3f4   : > { %v13032_v12 = vpop.f32.mrf.mxu0  ;;  %9402 = vmatpush3.msra.mxu1 %v4703_v50  ;;  %15146 = vst [vmem:[#allocation104_spill] sm:$0xff] %v13040_v23  ;;  %9455 = vmatprep.subr.mxu0 %v5538_v10  ;;  %v4722_v50 = vmul.f32 %v15149_v22, %v13040_v23 }
 0x3f5   : > { %15144 = vst [vmem:[#allocation102_spill] sm:$0xff] %v13032_v12  ;;  %v9222_v54 = vpop.f32.mrf.mxu1  ;;  %4892 = vmatmul.mubr.f32.gmra.mxu1 %v13036_v47  ;;  %5177 = vmatmul.mubr.f32.gmra.mxu0 %v4601_v62  ;;  %v4701_v62 = vld [vmem:[#allocation7 + $0x140] sm:$0xff]  ;;  %v15157_v12 = vld [vmem:[#allocation63_spill] sm:$0xff] }
 0x3f6   : > { %v13043_v34 = vadd.f32 %v9222_v54, %v7985_v46  ;;  %v13045_v24 = vpop.f32.mrf.mxu0  ;;  %4896 = vmatprep.mubr.f32.mxu1 %v12714_v26  ;;  %5181 = vmatprep.mubr.f32.mxu0 %v12660_v16  ;;  %v4574_v54 = vrot.slane %v12730_v39, 7  ;;  %v4575_v46 = vrot.slane %v12752_v55, 7  ;;  %v7946_v36 = vadd.f32 %v15157_v12, %v15156_v56 }
 0x3f7   : > { %15148 = vst [vmem:[#allocation106_spill] sm:$0xff] %v13045_v24  ;;  %v13049_v13 = vpop.f32.mrf.mxu1  ;;  %9403 = vmatprep.subr.mxu1 %v4702_v9  ;;  %9456 = vmatpush3.msra.mxu0 %v5538_v10  ;;  %v5536_v24 = vld [vmem:[#allocation7 + $0x448] sm:$0xff] }
 0x3f8   : > { %15147 = vst [vmem:[#allocation105_spill] sm:$0xff] %v13043_v34  ;;  %v13053_v51 = vpop.f32.mrf.mxu0  ;;  %9404 = vmatpush3.msra.mxu1 %v4702_v9  ;;  %9457 = vmatprep.subr.mxu0 %v5537_v19  ;;  %v4603_v9 = vmul.f32 %v15149_v22, %v13000_v25  ;;  %v5535_v22 = vld [vmem:[#allocation7 + $0x440] sm:$0xff]  ;;  %v4699_v25 = vld [vmem:[#allocation7 + $0x130] sm:$0xff] }
 0x3f9   : > { %15150 = vst [vmem:[#allocation107_spill] sm:$0xff] %v13053_v51  ;;  %v13057_v28 = vpop.f32.mrf.mxu1  ;;  %4897 = vmatmul.mubr.f32.gmra.mxu1 %v4722_v50  ;;  %5182 = vmatmul.mubr.f32.gmra.mxu0 %v12996_v2  ;;  %v13070_v51 = vsel %vm1833_vm4, %v4573_v38, %v4574_v54  ;;  %v4700_v50 = vld [vmem:[#allocation7 + $0x138] sm:$0xff]  ;;  %v13074_v2 = vsel %vm1833_vm4, %v4574_v54, %v4575_v46  ;;  %v4576_v54 = vrot.slane %v12769_v20, 7 }
 0x3fa   : > { %v13060_v34 = vpop.f32.mrf.mxu0  ;;  %4901 = vmatprep.mubr.f32.mxu1 %v12730_v39  ;;  %5186 = vmatprep.mubr.f32.mxu0 %v12679_v1  ;;  %15152 = vst [vmem:[#allocation109_spill] sm:$0xff] %v13074_v2 }
 0x3fb   : > { %15151 = vst [vmem:[#allocation108_spill] sm:$0xff] %v13060_v34  ;;  %v13064_v10 = vpop.f32.mrf.mxu1  ;;  %9405 = vmatprep.subr.mxu1 %v4701_v62  ;;  %9458 = vmatpush3.msra.mxu0 %v5537_v19  ;;  %v15154_v19 = vld [vmem:[#allocation17_spill] sm:$0xff] }
 0x3fc   : > { %9406 = vmatpush3.msra.mxu1 %v4701_v62  ;;  %9459 = vmatprep.subr.mxu0 %v5536_v24  ;;  %v13076_v16 = vpop.f32.mrf.mxu0  ;;  %v4724_v62 = vmul.f32 %v15154_v19, %v13074_v2 }
 0x3fd   : > { %15153 = vst [vmem:[#allocation110_spill] sm:$0xff] %v13076_v16  ;;  %v13078_v1 = vpop.f32.mrf.mxu1  ;;  %4902 = vmatmul.mubr.f32.gmra.mxu1 %v13070_v51  ;;  %5187 = vmatmul.mubr.f32.gmra.mxu0 %v4603_v9  ;;  %v4577_v16 = vrot.slane %v12785_v6, 7 }
 0x3fe   : > { %4906 = vmatprep.mubr.f32.mxu1 %v12752_v55  ;;  %5191 = vmatprep.mubr.f32.mxu0 %v12697_v49  ;;  %v13089_v9 = vpop.f32.mrf.mxu0  ;;  %v5534_v49 = vld [vmem:[#allocation7 + $0x438] sm:$0xff] }
 0x3ff   : > { %v13083_v38 = vpop.f32.mrf.mxu1  ;;  %9407 = vmatprep.subr.mxu1 %v4700_v50  ;;  %9460 = vmatpush3.msra.mxu0 %v5536_v24  ;;  %15155 = vst [vmem:[#allocation111_spill] sm:$0xff] %v13089_v9  ;;  %v4605_v9 = vmul.f32 %v15154_v19, %v13040_v23  ;;  %v13105_v56 = vsel %vm1833_vm4, %v4576_v54, %v4577_v16  ;;  %v15160_v19 = vld [vmem:[#allocation66_spill] sm:$0xff] }
 0x400   : > { %9408 = vmatpush3.msra.mxu1 %v4700_v50  ;;  %9461 = vmatprep.subr.mxu0 %v5535_v22  ;;  %v13098_v50 = vsel %vm1833_vm4, %v4575_v46, %v4576_v54  ;;  %v13107_v12 = vpop.f32.mrf.mxu0  ;;  %v5533_v46 = vld [vmem:[#allocation7 + $0x430] sm:$0xff]  ;;  %v4697_v54 = vld [vmem:[#allocation7 + $0x120] sm:$0xff] }
 0x401   : > { %v8056_v34 = vpop.f32.mrf.mxu1  ;;  %4907 = vmatmul.mubr.f32.gmra.mxu1 %v4724_v62  ;;  %5192 = vmatmul.mubr.f32.gmra.mxu0 %v13036_v47  ;;  %v3651_v62 = vadd.f32 %v7946_v36, %v12892_v41  ;;  %15158 = vst [vmem:[#allocation62_spill] sm:$0xff] %v13107_v12  ;;  %v15161_v12 = vld [vmem:[#allocation68_spill] sm:$0xff] }
 0x402   : > { %4911 = vmatprep.mubr.f32.mxu1 %v12769_v20  ;;  %5196 = vmatprep.mubr.f32.mxu0 %v12714_v26 }
 0x403   : > { %v8057_v24 = vpop.f32.mrf.mxu1  ;;  %9409 = vmatprep.subr.mxu1 %v4699_v25  ;;  %9462 = vmatpush3.msra.mxu0 %v5535_v22 }
 0x404   : > { %v8058_v47 = vadd.f32 %v8057_v24, %v8056_v34  ;;  %9410 = vmatpush3.msra.mxu1 %v4699_v25  ;;  %9463 = vmatprep.subr.mxu0 %v5534_v49  ;;  %v15159_v25 = vld [vmem:[#allocation18_spill] sm:$0xff]  ;;  %v4578_v34 = vrot.slane %v12807_v29, 7 }
 0x405   : > { %v8059_v26 = vpop.f32.mrf.mxu1  ;;  %4912 = vmatmul.mubr.f32.gmra.mxu1 %v13098_v50  ;;  %5197 = vmatmul.mubr.f32.gmra.mxu0 %v4605_v9  ;;  %v4726_v36 = vmul.f32 %v15159_v25, %v13105_v56  ;;  %v4579_v9 = vrot.slane %v12819_v61, 7 }
 0x406   : > { %v13110_v57 = vadd.f32 %v8058_v47, %v3651_v62  ;;  %4916 = vmatprep.mubr.f32.mxu1 %v12785_v6  ;;  %5201 = vmatprep.mubr.f32.mxu0 %v12730_v39  ;;  %v13118_v47 = vpop.f32.mrf.mxu0  ;;  %v5532_v62 = vld [vmem:[#allocation7 + $0x428] sm:$0xff]  ;;  %v7952_v39 = vadd.f32 %v15161_v12, %v15160_v19 }
 0x407   : > { %v8060_v41 = vpop.f32.mrf.mxu1  ;;  %9411 = vmatprep.subr.mxu1 %v4698_v40  ;;  %9464 = vmatpush3.msra.mxu0 %v5534_v49  ;;  %v13137_v12 = vsel %vm1833_vm4, %v4578_v34, %v4579_v9 }
 0x408   : > { %v8061_v22 = vadd.f32 %v8060_v41, %v8059_v26  ;;  %9412 = vmatpush3.msra.mxu1 %v4698_v40  ;;  %9465 = vmatprep.subr.mxu0 %v5533_v46  ;;  %v13130_v26 = vsel %vm1833_vm4, %v4577_v16, %v4578_v34  ;;  %v4607_v40 = vmul.f32 %v15159_v25, %v13074_v2  ;;  %v5531_v16 = vld [vmem:[#allocation7 + $0x420] sm:$0xff]  ;;  %v15167_v25 = vld [vmem:[#allocation71_spill] sm:$0xff] }
 0x409   : > { %v8062_v24 = vpop.f32.mrf.mxu1  ;;  %4917 = vmatmul.mubr.f32.gmra.mxu1 %v4726_v36  ;;  %5202 = vmatmul.mubr.f32.gmra.mxu0 %v13070_v51  ;;  %15162 = vst [vmem:[#allocation63_spill] sm:$0xff] %v13130_v26  ;;  %v3661_v41 = vadd.f32 %v7952_v39, %v12939_v59  ;;  %15163 = vst [vmem:[#allocation66_spill] sm:$0xff] %v13137_v12  ;;  %v13139_v36 = vpop.f32.mrf.mxu0  ;;  %v15164_v39 = vld [vmem:[#allocation19_spill] sm:$0xff] }
 0x40a   : > { %v13124_v23 = vadd.f32 %v8061_v22, %v12888_v37  ;;  %4921 = vmatprep.mubr.f32.mxu1 %v12807_v29  ;;  %5206 = vmatprep.mubr.f32.mxu0 %v12752_v55  ;;  %v4696_v37 = vld [vmem:[#allocation7 + $0x118] sm:$0xff] }
 0x40b   : > { %v8063_v49 = vpop.f32.mrf.mxu1  ;;  %9413 = vmatprep.subr.mxu1 %v4697_v54  ;;  %9466 = vmatpush3.msra.mxu0 %v5533_v46  ;;  %v4728_v46 = vmul.f32 %v15164_v39, %v13137_v12 }
 0x40c   : > { %v8064_v19 = vadd.f32 %v8063_v49, %v8062_v24  ;;  %9414 = vmatpush3.msra.mxu1 %v4697_v54  ;;  %9467 = vmatprep.subr.mxu0 %v5532_v62  ;;  %v4695_v54 = vld [vmem:[#allocation7 + $0x110] sm:$0xff]  ;;  %v13149_v24 = vrot.slane %v12864_v30, 7  ;;  %v13151_v49 = vpop.f32.mrf.mxu0 }
 0x40d   : > { %v8065_v22 = vpop.f32.mrf.mxu1  ;;  %4922 = vmatmul.mubr.f32.gmra.mxu1 %v13130_v26  ;;  %5207 = vmatmul.mubr.f32.gmra.mxu0 %v4607_v40 }
 0x40e   : > { %v13142_v55 = vadd.f32 %v8064_v19, %v3661_v41  ;;  %4926 = vmatprep.mubr.f32.mxu1 %v12819_v61  ;;  %5211 = vmatprep.mubr.f32.mxu0 %v12769_v20  ;;  %15165 = vst [vmem:[#allocation68_spill] sm:$0xff] %v13149_v24  ;;  %v5530_v41 = vld [vmem:[#allocation7 + $0x418] sm:$0xff]  ;;  %v15166_v19 = vld [vmem:[#allocation73_spill] sm:$0xff] }
 0x40f   : > { %v8066_v59 = vpop.f32.mrf.mxu1  ;;  %9415 = vmatprep.subr.mxu1 %v4696_v37  ;;  %9468 = vmatpush3.msra.mxu0 %v5532_v62  ;;  %v7958_v20 = vadd.f32 %v15167_v25, %v15166_v19  ;;  %v5529_v19 = vld [vmem:[#allocation7 + $0x410] sm:$0xff] }
 0x410   : > { %v8067_v34 = vadd.f32 %v8066_v59, %v8065_v22  ;;  %9416 = vmatpush3.msra.mxu1 %v4696_v37  ;;  %9469 = vmatprep.subr.mxu0 %v5531_v16  ;;  %v13164_v37 = vsel %vm1833_vm4, %v4579_v9, %v12898_v18  ;;  %v4609_v22 = vmul.f32 %v15164_v39, %v13105_v56 }
 0x411   : > { %v8068_v40 = vpop.f32.mrf.mxu1  ;;  %4927 = vmatmul.mubr.f32.gmra.mxu1 %v4728_v46  ;;  %5212 = vmatmul.mubr.f32.gmra.mxu0 %v13098_v50  ;;  %15168 = vst [vmem:[#allocation73_spill] sm:$0xff] %v13164_v37  ;;  %v3671_v25 = vadd.f32 %v7958_v20, %v12965_v45  ;;  %v13173_v46 = vsel %vm1833_vm4, %v12898_v18, %v13149_v24  ;;  %v15170_v45 = vld [vmem:[#allocation20_spill] sm:$0xff] }
 0x412   : > { %v13157_v2 = vadd.f32 %v8067_v34, %v12929_v17  ;;  %4931 = vmatprep.mubr.f32.mxu1 %v12840_v63  ;;  %5216 = vmatprep.mubr.f32.mxu0 %v12785_v6  ;;  %v4694_v17 = vld [vmem:[#allocation7 + $0x108] sm:$0xff]  ;;  %15169 = vst [vmem:[#allocation71_spill] sm:$0xff] %v13173_v46  ;;  %v13175_v34 = vpop.f32.mrf.mxu0  ;;  %v4730_v18 = vmul.f32 %v15170_v45, %v13173_v46 }
 0x413   : > { %v8069_v62 = vpop.f32.mrf.mxu1  ;;  %9417 = vmatprep.subr.mxu1 %v4695_v54  ;;  %9470 = vmatpush3.msra.mxu0 %v5531_v16 }
 0x414   : > { %v8070_v59 = vadd.f32 %v8069_v62, %v8068_v40  ;;  %9418 = vmatpush3.msra.mxu1 %v4695_v54  ;;  %9471 = vmatprep.subr.mxu0 %v5530_v41  ;;  %v4693_v40 = vld [vmem:[#allocation7 + $0x100] sm:$0xff]  ;;  %v13184_v62 = vpop.f32.mrf.mxu0 }
 0x415   : > { %v8071_v9 = vpop.f32.mrf.mxu1  ;;  %4932 = vmatmul.mubr.f32.gmra.mxu1 %v13164_v37  ;;  %5217 = vmatmul.mubr.f32.gmra.mxu0 %v4609_v22 }
 0x416   : > { %v13178_v16 = vadd.f32 %v8070_v59, %v3671_v25  ;;  %4936 = vmatprep.mubr.f32.mxu1 %v12864_v30  ;;  %5221 = vmatprep.mubr.f32.mxu0 %v12807_v29  ;;  %v5528_v25 = vld [vmem:[#allocation7 + $0x408] sm:$0xff]  ;;  %v7964_v59 = vadd.f32 %v12619_v5, %v12612_v15 }
 0x417   : > { %v8072_v20 = vpop.f32.mrf.mxu1  ;;  %9419 = vmatprep.subr.mxu1 %v4694_v17  ;;  %9472 = vmatpush3.msra.mxu0 %v5530_v41  ;;  %v4642_v41 = vsel %vm1882_vm11, %v12561_v31, %v12632_v14 }
 0x418   : > { %v8073_v54 = vadd.f32 %v8072_v20, %v8071_v9  ;;  %9420 = vmatpush3.msra.mxu1 %v4694_v17  ;;  %9473 = vmatprep.subr.mxu0 %v5529_v19  ;;  %v4611_v9 = vmul.f32 %v15170_v45, %v13137_v12  ;;  %v3681_v15 = vadd.f32 %v7964_v59, %v12986_v35  ;;  %v5526_v20 = vld [vmem:[#allocation7 + $0x3f8] sm:$0xff] }
 0x419   : > { %v8074_v22 = vpop.f32.mrf.mxu1  ;;  %4937 = vmatmul.mubr.f32.gmra.mxu1 %v4730_v18  ;;  %5222 = vmatmul.mubr.f32.gmra.mxu0 %v13130_v26  ;;  %v13207_v18 = vpop.f32.mrf.mxu0  ;;  %v4646_v35 = vmul.f32 %v15033_v48, %v4642_v41  ;;  %v15175_v41 = vld [vmem:[#allocation60_spill] sm:$0xff]  ;;  %v15220_v26 = vld [vmem:[#allocation98_spill] sm:$0xff] }
 0x41a   : > { %v13190_v39 = vadd.f32 %v8073_v54, %v12961_v3  ;;  %4941 = vmatprep.mubr.f32.mxu1 %v12886_v32  ;;  %5226 = vmatprep.mubr.f32.mxu0 %v12819_v61  ;;  %v13205_v3 = vsel %vm1833_vm4, %v13149_v24, %v12901_v4  ;;  %v5527_v54 = vld [vmem:[#allocation7 + $0x400] sm:$0xff]  ;;  %v5508_v32 = vld [vmem:[#allocation7 + $0x368] sm:$0xff]  ;;  %v6132_v61 = vld [vmem:[#allocation7 + $0x1d0] sm:$0xff] }
 0x41b   : > { %v8075_v17 = vpop.f32.mrf.mxu1  ;;  %9421 = vmatprep.subr.mxu1 %v4693_v40  ;;  %9474 = vmatpush3.msra.mxu0 %v5529_v19  ;;  %15171 = vst [vmem:[#allocation112_spill] sm:$0xff] %v13205_v3  ;;  %v13215_v24 = vpop.f32.mrf.mxu0 }
 0x41c   : > { %v8076_v5 = vadd.f32 %v8075_v17, %v8074_v22  ;;  %9422 = vmatpush3.msra.mxu1 %v4693_v40  ;;  %9475 = vmatprep.subr.mxu0 %v5528_v25  ;;  %v5510_v40 = vld [vmem:[#allocation7 + $0x378] sm:$0xff]  ;;  %v5525_v17 = vld [vmem:[#allocation7 + $0x3f0] sm:$0xff] }
 0x41d   : > { %v8077_v14 = vpop.f32.mrf.mxu1  ;;  %4942 = vmatmul.mubr.f32.gmra.mxu1 %v13205_v3  ;;  %5227 = vmatmul.mubr.f32.gmra.mxu0 %v4611_v9  ;;  %v5509_v9 = vld [vmem:[#allocation7 + $0x370] sm:$0xff] }
 0x41e   : > { %v13210_v19 = vadd.f32 %v8076_v5, %v3681_v15  ;;  %5231 = vmatprep.mubr.f32.mxu0 %v12840_v63  ;;  %9423 = vmatprep.mubr.f32.mxu1 %v12561_v31  ;;  %v15173_v15 = vld [vmem:[#allocation79_spill] sm:$0xff]  ;;  %v15174_v5 = vld [vmem:[#allocation84_spill] sm:$0xff] }
 0x41f   : > { %v8078_v22 = vpop.f32.mrf.mxu1  ;;  %8466 = vmatprep.subr.mxu1 %v5526_v20  ;;  %9476 = vmatpush3.msra.mxu0 %v5528_v25  ;;  %v7970_v3 = vadd.f32 %v15174_v5, %v15173_v15  ;;  %v5524_v25 = vld [vmem:[#allocation7 + $0x3e8] sm:$0xff]  ;;  %v6169_v63 = vld [vmem:[#allocation7 + $0x2f8] sm:$0xff] }
 0x420   : > { %15172 = vst [vmem:[#allocation113_spill] sm:$0xff] %v13210_v19  ;;  %v8079_v59 = vadd.f32 %v8078_v22, %v8077_v14  ;;  %9477 = vmatprep.subr.mxu0 %v5527_v54  ;;  %v15176_v14 = vld [vmem:[#allocation83_spill] sm:$0xff] }
 0x421   : > { %v8080_v45 = vpop.f32.mrf.mxu1  ;;  %5232 = vmatmul.mubr.f32.gmra.mxu0 %v13164_v37  ;;  %9424 = vmatmul.mubr.f32.vlgmr.msra.gmra.mxu1 %v4646_v35  ;;  %v4648_v22 = vmul.f32 %v15037_v52, %v15176_v14  ;;  %v5479_v35 = vmul.f32 %v15033_v48, %v12705_v11  ;;  %v3691_v15 = vadd.f32 %v7970_v3, %v13009_v43  ;;  %v5522_v14 = vld [vmem:[#allocation7 + $0x3d8] sm:$0xff]  ;;  %v15199_v48 = vld [vmem:[#allocation94_spill] sm:$0xff]  ;;  %v6136_v37 = vld [vmem:[#allocation7 + $0x1f0] sm:$0xff] }
 0x422   : > { %v13221_v4 = vadd.f32 %v8079_v59, %v12980_v44  ;;  %8467 = vmatpush3.msra.mxu1 %v5510_v40  ;;  %9426 = vmatprep.mubr.f32.mxu1 %v15175_v41  ;;  %v5523_v44 = vld [vmem:[#allocation7 + $0x3e0] sm:$0xff]  ;;  %v13230_v40 = vpop.f32.mrf.mxu0  ;;  %v4650_v43 = vmul.f32 %v15040_v42, %v12705_v11 }
 0x423   : > { %v8081_v20 = vpop.f32.mrf.mxu1  ;;  %8468 = vmatprep.subr.mxu1 %v5525_v17  ;;  %9479 = vmatprep.mubr.f32.mxu0 %v12686_v8  ;;  %v5507_v17 = vld [vmem:[#allocation7 + $0x360] sm:$0xff] }
 0x424   : > { %v8082_v5 = vadd.f32 %v8081_v20, %v8080_v45  ;;  %8469 = vmatpush3.msra.mxu1 %v5509_v9  ;;  %9478 = vmatpush3.msra.mxu0 %v5527_v54  ;;  %v5506_v45 = vld [vmem:[#allocation7 + $0x358] sm:$0xff]  ;;  %v5481_v54 = vmul.f32 %v15037_v52, %v12734_v60  ;;  %v5521_v9 = vld [vmem:[#allocation7 + $0x3d0] sm:$0xff] }
 0x425   : > { %v8083_v59 = vpop.f32.mrf.mxu1  ;;  %8470 = vmatprep.subr.mxu1 %v5524_v25  ;;  %9427 = vmatmul.mubr.f32.gmra.mxu1 %v4648_v22  ;;  %v13240_v25 = vpop.f32.mrf.mxu0  ;;  %v5505_v20 = vld [vmem:[#allocation7 + $0x350] sm:$0xff]  ;;  %v15178_v22 = vld [vmem:[#allocation69_spill] sm:$0xff] }
 0x426   : > { %v13232_v41 = vadd.f32 %v8082_v5, %v3691_v15  ;;  %8471 = vmatpush3.msra.mxu1 %v5508_v32  ;;  %9480 = vmatmul.mubr.f32.vlgmr.msra.gmra.mxu0 %v5479_v35  ;;  %v4652_v5 = vmul.f32 %v15043_v53, %v12734_v60  ;;  %v5518_v60 = vld [vmem:[#allocation7 + $0x3b8] sm:$0xff] }
 0x427   : > { %v8084_v46 = vpop.f32.mrf.mxu1  ;;  %9429 = vmatprep.mubr.f32.mxu1 %v12686_v8  ;;  %8472 = vmatprep.subr.mxu1 %v5523_v44  ;;  %v15177_v8 = vld [vmem:[#allocation67_spill] sm:$0xff]  ;;  %v5504_v44 = vld [vmem:[#allocation7 + $0x348] sm:$0xff] }
 0x428   : > { %v8085_v3 = vadd.f32 %v8084_v46, %v8083_v59  ;;  %9482 = vmatprep.mubr.f32.mxu0 %v12723_v0  ;;  %8473 = vmatpush3.msra.mxu1 %v5507_v17  ;;  %v7976_v35 = vadd.f32 %v15178_v22, %v15177_v8  ;;  %v5520_v46 = vld [vmem:[#allocation7 + $0x3c8] sm:$0xff]  ;;  %v15181_v22 = vld [vmem:[#allocation89_spill] sm:$0xff] }
 0x429   : > { %v8086_v32 = vpop.f32.mrf.mxu1  ;;  %8474 = vmatprep.subr.mxu1 %v5522_v14  ;;  %9430 = vmatmul.mubr.f32.gmra.mxu1 %v4650_v43  ;;  %v15179_v14 = vld [vmem:[#allocation74_spill] sm:$0xff]  ;;  %v15180_v43 = vld [vmem:[#allocation75_spill] sm:$0xff] }
 0x42a   : > { %v13245_v11 = vadd.f32 %v8085_v3, %v13003_v58  ;;  %8475 = vmatpush3.msra.mxu1 %v5506_v45  ;;  %9483 = vmatmul.mubr.f32.gmra.mxu0 %v5481_v54  ;;  %v3701_v59 = vadd.f32 %v7976_v35, %v13026_v33  ;;  %v5483_v58 = vmul.f32 %v15040_v42, %v15180_v43  ;;  %v5519_v45 = vld [vmem:[#allocation7 + $0x3c0] sm:$0xff]  ;;  %v13254_v3 = vpop.f32.mrf.mxu0  ;;  %v15182_v35 = vld [vmem:[#allocation40_spill] sm:$0xff] }
 0x42b   : > { %v8087_v15 = vpop.f32.mrf.mxu1  ;;  %9432 = vmatprep.mubr.f32.mxu1 %v12723_v0  ;;  %8476 = vmatprep.subr.mxu1 %v5521_v9  ;;  %v5503_v0 = vld [vmem:[#allocation7 + $0x340] sm:$0xff] }
 0x42c   : > { %v8088_v17 = vadd.f32 %v8087_v15, %v8086_v32  ;;  %9485 = vmatprep.mubr.f32.mxu0 %v15179_v14  ;;  %8477 = vmatpush3.msra.mxu1 %v5505_v20  ;;  %v4654_v32 = vmul.f32 %v15047_v27, %v15180_v43  ;;  %v5502_v20 = vld [vmem:[#allocation7 + $0x338] sm:$0xff]  ;;  %v5517_v15 = vld [vmem:[#allocation7 + $0x3b0] sm:$0xff]  ;;  %v8055_v43 = vadd.f32 %v13083_v38, %v13078_v1 }
 0x42d   : > { %v8089_v54 = vpop.f32.mrf.mxu1  ;;  %8478 = vmatprep.subr.mxu1 %v5520_v46  ;;  %9433 = vmatmul.mubr.f32.gmra.mxu1 %v4652_v5  ;;  %v5485_v46 = vmul.f32 %v15043_v53, %v15182_v35  ;;  %v13264_v5 = vpop.f32.mrf.mxu0  ;;  %v8052_v38 = vadd.f32 %v13064_v10, %v13057_v28  ;;  %v15192_v10 = vld [vmem:[#allocation36_spill] sm:$0xff] }
 0x42e   : > { %v13256_v9 = vadd.f32 %v8088_v17, %v3701_v59  ;;  %8479 = vmatpush3.msra.mxu1 %v5504_v44  ;;  %9486 = vmatmul.mubr.f32.gmra.mxu0 %v5483_v58  ;;  %v5501_v59 = vld [vmem:[#allocation7 + $0x330] sm:$0xff]  ;;  %v15183_v17 = vld [vmem:[#allocation29_spill] sm:$0xff] }
 0x42f   : > { %v8090_v33 = vpop.f32.mrf.mxu1  ;;  %9435 = vmatprep.mubr.f32.mxu1 %v15179_v14  ;;  %8480 = vmatprep.subr.mxu1 %v5519_v45  ;;  %v15184_v14 = vld [vmem:[#allocation85_spill] sm:$0xff] }
 0x430   : > { %v8091_v8 = vadd.f32 %v8090_v33, %v8089_v54  ;;  %9488 = vmatprep.mubr.f32.mxu0 %v15181_v22  ;;  %8481 = vmatpush3.msra.mxu1 %v5503_v0  ;;  %v7982_v58 = vadd.f32 %v15184_v14, %v15183_v17  ;;  %v5516_v54 = vld [vmem:[#allocation7 + $0x3a8] sm:$0xff]  ;;  %v15185_v0 = vld [vmem:[#allocation56_spill] sm:$0xff]  ;;  %v15186_v33 = vld [vmem:[#allocation57_spill] sm:$0xff] }
 0x431   : > { %v8092_v44 = vpop.f32.mrf.mxu1  ;;  %8482 = vmatprep.subr.mxu1 %v5518_v60  ;;  %9436 = vmatmul.mubr.f32.gmra.mxu1 %v4654_v32  ;;  %v7940_v53 = vadd.f32 %v15186_v33, %v15185_v0  ;;  %v15187_v60 = vld [vmem:[#allocation31_spill] sm:$0xff]  ;;  %v5500_v17 = vld [vmem:[#allocation7 + $0x328] sm:$0xff]  ;;  %v13284_v0 = vpop.f32.mrf.mxu0 }
 0x432   : > { %v13271_v45 = vadd.f32 %v8091_v8, %v13020_v7  ;;  %8483 = vmatpush3.msra.mxu1 %v5502_v20  ;;  %9489 = vmatmul.mubr.f32.gmra.mxu0 %v5485_v46  ;;  %v4656_v32 = vmul.f32 %v15187_v60, %v15182_v35  ;;  %v15188_v14 = vld [vmem:[#allocation86_spill] sm:$0xff]  ;;  %v3711_v7 = vadd.f32 %v7982_v58, %v13049_v13  ;;  %v5515_v46 = vld [vmem:[#allocation7 + $0x3a0] sm:$0xff] }
 0x433   : > { %v8093_v42 = vpop.f32.mrf.mxu1  ;;  %9438 = vmatprep.mubr.f32.mxu1 %v15181_v22  ;;  %8484 = vmatprep.subr.mxu1 %v5517_v15  ;;  %v5487_v1 = vmul.f32 %v15047_v27, %v15188_v14  ;;  %v15189_v8 = vld [vmem:[#allocation30_spill] sm:$0xff]  ;;  %v5499_v35 = vld [vmem:[#allocation7 + $0x320] sm:$0xff]  ;;  %v15190_v15 = vld [vmem:[#allocation51_spill] sm:$0xff] }
 0x434   : > { %v8094_v20 = vadd.f32 %v8093_v42, %v8092_v44  ;;  %9491 = vmatprep.mubr.f32.mxu0 %v15189_v8  ;;  %8485 = vmatpush3.msra.mxu1 %v5501_v59  ;;  %v3641_v33 = vadd.f32 %v7940_v53, %v15190_v15  ;;  %v15191_v27 = vld [vmem:[#allocation46_spill] sm:$0xff]  ;;  %v5514_v42 = vld [vmem:[#allocation7 + $0x398] sm:$0xff]  ;;  %v4658_v44 = vmul.f32 %v15192_v10, %v15188_v14  ;;  %v15193_v58 = vld [vmem:[#allocation45_spill] sm:$0xff] }
 0x435   : > { %v13286_v22 = vpop.f32.mrf.mxu1  ;;  %8486 = vmatprep.subr.mxu1 %v5516_v54  ;;  %9439 = vmatmul.mubr.f32.gmra.mxu1 %v4656_v32  ;;  %v3791_v52 = vadd.f32 %v8055_v43, %v15191_v27  ;;  %v5498_v59 = vld [vmem:[#allocation7 + $0x318] sm:$0xff]  ;;  %v4644_v53 = vsel %vm1882_vm11, %v15193_v58, %v12561_v31  ;;  %v15194_v27 = vld [vmem:[#allocation95_spill] sm:$0xff]  ;;  %v15198_v15 = vld [vmem:[#allocation93_spill] sm:$0xff] }
 0x436   : > { %v13290_v13 = vadd.f32 %v8094_v20, %v3711_v7  ;;  %8487 = vmatpush3.msra.mxu1 %v5500_v17  ;;  %9492 = vmatmul.mubr.f32.gmra.mxu0 %v5487_v1  ;;  %v15195_v43 = vld [vmem:[#allocation96_spill] sm:$0xff]  ;;  %v3786_v32 = vadd.f32 %v8052_v38, %v3641_v33  ;;  %v15196_v17 = vld [vmem:[#allocation58_spill] sm:$0xff]  ;;  %v15197_v1 = vld [vmem:[#allocation53_spill] sm:$0xff]  ;;  %v8164_v58 = vadd.f32 %v15199_v48, %v15198_v15 }
 0x437   : > { %v13292_v28 = vpop.f32.mrf.mxu1  ;;  %9441 = vmatprep.mubr.f32.mxu1 %v15189_v8  ;;  %8488 = vmatprep.subr.mxu1 %v5515_v46  ;;  %v8167_v54 = vadd.f32 %v15195_v43, %v15194_v27  ;;  %v5489_v7 = vmul.f32 %v15187_v60, %v15197_v1  ;;  %v5513_v20 = vld [vmem:[#allocation7 + $0x390] sm:$0xff]  ;;  %v13306_v8 = vpop.f32.mrf.mxu0  ;;  %v15200_v31 = vld [vmem:[#allocation37_spill] sm:$0xff]  ;;  %v5512_v38 = vld [vmem:[#allocation7 + $0x388] sm:$0xff] }
 0x438   : > { %9494 = vmatprep.mubr.f32.mxu0 %v15196_v17  ;;  %8489 = vmatpush3.msra.mxu1 %v5499_v35  ;;  %v5497_v46 = vld [vmem:[#allocation7 + $0x310] sm:$0xff]  ;;  %v3936_v30 = vadd.f32 %v15200_v31, %v3791_v52  ;;  %v15201_v35 = vld [vmem:[#allocation101_spill] sm:$0xff]  ;;  %v15202_v33 = vld [vmem:[#allocation102_spill] sm:$0xff] }
 0x439   : > { %v9313_v14 = vpop.f32.mrf.mxu1  ;;  %8490 = vmatprep.subr.mxu1 %v5514_v42  ;;  %9442 = vmatmul.mubr.f32.gmra.mxu1 %v4658_v44  ;;  %v8173_v43 = vadd.f32 %v15202_v33, %v15201_v35  ;;  %v13316_v1 = vld [vmem:[%s14555_s7] ss:$0 sm:$0xff]  ;;  %v15203_v44 = vld [vmem:[#allocation38_spill] sm:$0xff]  ;;  %v6153_v52 = vld [vmem:[#allocation7 + $0x278] sm:$0xff]  ;;  %v13322_v33 = vpop.f32.mrf.mxu0 }
 0x43a   : > { %v4386_v27 = vadd.f32 %v9313_v14, %v8167_v54  ;;  %8491 = vmatpush3.msra.mxu1 %v5498_v59  ;;  %9495 = vmatmul.mubr.f32.gmra.mxu0 %v5489_v7  ;;  %v4660_v48 = vmul.f32 %v15203_v44, %v4644_v53  ;;  %v5496_v15 = vld [vmem:[#allocation7 + $0x308] sm:$0xff]  ;;  %v15204_v59 = vld [vmem:[#allocation35_spill] sm:$0xff]  ;;  %v15205_v14 = vld [vmem:[#allocation72_spill] sm:$0xff] }
 0x43b   : > { %v4380_v42 = vpop.f32.mrf.mxu1  ;;  %9444 = vmatprep.mubr.f32.mxu1 %v15196_v17  ;;  %8492 = vmatprep.subr.mxu1 %v5513_v20  ;;  %v3931_v54 = vadd.f32 %v15204_v59, %v3786_v32  ;;  %v5511_v35 = vld [vmem:[#allocation7 + $0x380] sm:$0xff] }
 0x43c   : > { %v4460_v31 = vadd.f32 %v4386_v27, %v3936_v30  ;;  %v4381_v7 = vadd.f32 %v8164_v58, %v4380_v42  ;;  %9497 = vmatprep.mubr.f32.mxu0 %v15205_v14  ;;  %8493 = vmatpush3.msra.mxu1 %v5497_v46  ;;  %v13327_v60 = vld [vmem:[%s14555_s7 + $0x1] ss:$0 sm:$0xff]  ;;  %v6137_v30 = vld [vmem:[#allocation7 + $0x1f8] sm:$0xff]  ;;  %v6152_v42 = vld [vmem:[#allocation7 + $0x270] sm:$0xff] }
 0x43d   : > { %v15206_v17 = vld [vmem:[#allocation41_spill] sm:$0xff]  ;;  %v9316_v20 = vpop.f32.mrf.mxu1  ;;  %8494 = vmatprep.subr.mxu1 %v5512_v38  ;;  %9445 = vmatmul.mubr.f32.gmra.mxu1 %v4660_v48  ;;  %v15207_v14 = vld [vmem:[#allocation76_spill] sm:$0xff] }
 0x43e   : > { %v3946_v53 = vadd.f32 %v15206_v17, %v13124_v23  ;;  %v4481_v32 = vmul.f32 %v13316_v1, %v4460_v31  ;;  %v4459_v58 = vadd.f32 %v4381_v7, %v3931_v54  ;;  %v4396_v27 = vadd.f32 %v9316_v20, %v8173_v43  ;;  %8495 = vmatpush3.msra.mxu1 %v5496_v15  ;;  %v5495_v46 = vld [vmem:[#allocation7 + $0x300] sm:$0xff]  ;;  %v6151_v31 = vld [vmem:[#allocation7 + $0x268] sm:$0xff]  ;;  %v15208_v43 = vld [vmem:[#allocation108_spill] sm:$0xff]  ;;  %v13341_v54 = vpop.f32.mrf.mxu0 }
 0x43f   : > { %8578 = vmatprep.subr.mxu0 %v6153_v52  ;;  %v13332_v59 = vpop.f32.mrf.mxu1  ;;  %8496 = vmatprep.subr.mxu1 %v5511_v35  ;;  %v15209_v15 = vld [vmem:[#allocation110_spill] sm:$0xff]  ;;  %v6150_v20 = vld [vmem:[#allocation7 + $0x260] sm:$0xff] }
 0x440   : > { %5607 = vmatprep.mubr.f32.mxu1 %v15207_v14  ;;  %v4502_v23 = vadd.f32 %v13327_v60, %v4481_v32  ;;  %v4480_v38 = vmul.f32 %v13316_v1, %v4459_v58  ;;  %v13337_v48 = vadd.f32 %v4396_v27, %v3946_v53  ;;  %8579 = vmatpush3.msra.mxu0 %v6137_v30  ;;  %v6135_v35 = vld [vmem:[#allocation7 + $0x1e8] sm:$0xff]  ;;  %v15210_v53 = vld [vmem:[#allocation39_spill] sm:$0xff]  ;;  %v6134_v27 = vld [vmem:[#allocation7 + $0x1e0] sm:$0xff] }
 0x441   : > { %v8179_v52 = vadd.f32 %v15209_v15, %v15208_v43  ;;  %v9319_v7 = vpop.f32.mrf.mxu1  ;;  %8497 = vmatpush3.msra.mxu1 %v5495_v46  ;;  %8580 = vmatprep.subr.mxu0 %v6152_v42  ;;  %v3956_v30 = vadd.f32 %v15210_v53, %v13157_v2  ;;  %v8185_v46 = vadd.f32 %v13139_v36, %v13118_v47  ;;  %v6133_v15 = vld [vmem:[#allocation7 + $0x1d8] sm:$0xff]  ;;  %v6148_v47 = vld [vmem:[#allocation7 + $0x250] sm:$0xff] }
 0x442   : > { %v13343_v14 = vmax.f32 %v4502_v23, 0.0  ;;  %v4501_v17 = vadd.f32 %v13327_v60, %v4480_v38  ;;  %8581 = vmatpush3.msra.mxu0 %v6136_v37  ;;  %9503 = vmatprep.subr.mxu1 %v6169_v63  ;;  %v6149_v37 = vld [vmem:[#allocation7 + $0x258] sm:$0xff]  ;;  %v13357_v38 = vpop.f32.mrf.mxu0  ;;  %v15212_v53 = vld [vmem:[#allocation91_spill] sm:$0xff] }
 0x443   : > { %v4406_v32 = vadd.f32 %v9319_v7, %v8179_v52  ;;  %v13348_v58 = vpop.f32.mrf.mxu1  ;;  %8582 = vmatprep.subr.mxu0 %v6151_v31  ;;  %v15211_v31 = vld [vmem:[#allocation81_spill] sm:$0xff] }
 0x444   : > { %v13353_v42 = vrot.slane %v13343_v14, 7  ;;  %v13355_v23 = vmax.f32 %v4501_v17, 0.0  ;;  %8583 = vmatpush3.msra.mxu0 %v6135_v35  ;;  %v3966_v52 = vadd.f32 %v15211_v31, %v13190_v39  ;;  %v15214_v39 = vld [vmem:[#allocation13_spill] sm:$0xff] }
 0x445   : > { %v13359_v43 = vadd.f32 %v4406_v32, %v3956_v30  ;;  %v9322_v2 = vpop.f32.mrf.mxu1  ;;  %8584 = vmatprep.subr.mxu0 %v6150_v20  ;;  %v8207_v30 = vpop.f32.mrf.mxu0  ;;  %v8191_v20 = vadd.f32 %v13207_v18, %v13184_v62 }
 0x446   : > { %v4416_v7 = vadd.f32 %v9322_v2, %v8185_v46  ;;  %8585 = vmatpush3.msra.mxu0 %v6134_v27  ;;  %v5429_v35 = vsel %vm1833_vm4, %v13353_v42, %v15212_v53  ;;  %v13370_v17 = vrot.slane %v13355_v23, 1  ;;  %v15215_v2 = vld [vmem:[#allocation90_spill] sm:$0xff]  ;;  %v13384_v53 = vrot.slane %v13343_v14, 1 }
 0x447   : > { %v13363_v36 = vpop.f32.mrf.mxu1  ;;  %8586 = vmatprep.subr.mxu0 %v6149_v37  ;;  %v5430_v27 = vmul.f32 %v15214_v39, %v5429_v35  ;;  %v15216_v37 = vld [vmem:[#allocation48_spill] sm:$0xff]  ;;  %v8208_v19 = vpop.f32.mrf.mxu0 }
 0x448   : > { %v13374_v32 = vadd.f32 %v4416_v7, %v3966_v52  ;;  %8587 = vmatpush3.msra.mxu0 %v6133_v15  ;;  %v13381_v31 = vsel %vm1882_vm11, %v15215_v2, %v13370_v17  ;;  %v3976_v12 = vadd.f32 %v15216_v37, %v13221_v4  ;;  %v6168_v15 = vld [vmem:[#allocation7 + $0x2f0] sm:$0xff]  ;;  %v15218_v7 = vld [vmem:[#allocation100_spill] sm:$0xff]  ;;  %v8194_v4 = vadd.f32 %v13230_v40, %v13215_v24  ;;  %v15222_v40 = vld [vmem:[#allocation26_spill] sm:$0xff] }
 0x449   : > { %v9325_v46 = vpop.f32.mrf.mxu1  ;;  %8588 = vmatprep.subr.mxu0 %v6148_v47  ;;  %5608 = vmatmul.mubr.f32.vlgmr.msra.gmra.mxu1 %v5430_v27  ;;  %v5491_v18 = vmul.f32 %v15192_v10, %v13381_v31  ;;  %v15217_v52 = vld [vmem:[#allocation99_spill] sm:$0xff]  ;;  %v15221_v47 = vld [vmem:[#allocation14_spill] sm:$0xff] }
 0x44a   : > { %15213 = vst [vmem:[#allocation79_spill] sm:$0xff] %v13374_v32  ;;  %v4426_v62 = vadd.f32 %v9325_v46, %v8191_v20  ;;  %v8170_v35 = vadd.f32 %v15218_v7, %v15217_v52  ;;  %9504 = vmatpush3.msra.mxu1 %v6169_v63  ;;  %v15219_v32 = vld [vmem:[#allocation82_spill] sm:$0xff]  ;;  %v5432_v29 = vmul.f32 %v15221_v47, %v15220_v26 }
 0x44b   : > { %5612 = vmatprep.mubr.f32.mxu1 %v15219_v32  ;;  %v13393_v2 = vpop.f32.mrf.mxu1  ;;  %v8197_v20 = vadd.f32 %v13254_v3, %v13240_v25  ;;  %9498 = vmatmul.mubr.f32.gmra.mxu0 %v5491_v18  ;;  %v13405_v63 = vsel %vm1882_vm11, %v13370_v17, %v13384_v53  ;;  %v8200_v32 = vadd.f32 %v13284_v0, %v13264_v5  ;;  %v6167_v25 = vld [vmem:[#allocation7 + $0x2e8] sm:$0xff]  ;;  %v15223_v5 = vld [vmem:[#allocation97_spill] sm:$0xff] }
 0x44c   : > { %v4468_v27 = vadd.f32 %v4426_v62, %v3976_v12  ;;  %v8097_v26 = vadd.f32 %v13292_v28, %v13286_v22  ;;  %9500 = vmatprep.mubr.f32.mxu0 %v13405_v63  ;;  %9505 = vmatprep.subr.mxu1 %v6168_v15  ;;  %v5477_v12 = vsel %vm1882_vm11, %v13384_v53, %v15222_v40  ;;  %v6147_v3 = vld [vmem:[#allocation7 + $0x248] sm:$0xff]  ;;  %v15225_v18 = vld [vmem:[#allocation25_spill] sm:$0xff] }
 0x44d   : > { %v9328_v24 = vpop.f32.mrf.mxu1  ;;  %v8203_v46 = vadd.f32 %v13322_v33, %v13306_v8  ;;  %5613 = vmatmul.mubr.f32.gmra.mxu1 %v15223_v5  ;;  %8589 = vmatpush3.msra.mxu0 %v6132_v61  ;;  %v8209_v0 = vadd.f32 %v8208_v19, %v8207_v30  ;;  %v15224_v22 = vld [vmem:[#allocation50_spill] sm:$0xff]  ;;  %v5493_v7 = vmul.f32 %v15203_v44, %v5477_v12  ;;  %v15226_v8 = vld [vmem:[#allocation55_spill] sm:$0xff]  ;;  %v15227_v19 = vld [vmem:[#allocation105_spill] sm:$0xff] }
 0x44e   : > { %v4489_v37 = vmul.f32 %v13316_v1, %v4468_v27  ;;  %v3986_v28 = vadd.f32 %v15224_v22, %v13245_v11  ;;  %v4436_v62 = vadd.f32 %v9328_v24, %v8197_v20  ;;  %9506 = vmatpush3.msra.mxu1 %v6168_v15  ;;  %5617 = vmatprep.mubr.f32.mxu1 %v15225_v18  ;;  %v6131_v61 = vld [vmem:[#allocation7 + $0x1c8] sm:$0xff]  ;;  %v6146_v24 = vld [vmem:[#allocation7 + $0x240] sm:$0xff] }
 0x44f   : > { %v4430_v52 = vpop.f32.mrf.mxu1  ;;  %v3981_v33 = vadd.f32 %v15226_v8, %v13232_v41  ;;  %9507 = vmatprep.subr.mxu1 %v6167_v25  ;;  %8590 = vmatprep.subr.mxu0 %v6147_v3  ;;  %v3861_v30 = vadd.f32 %v8097_v26, %v15227_v19  ;;  %v4391_v11 = vadd.f32 %v8170_v35, %v13332_v59  ;;  %v6166_v12 = vld [vmem:[#allocation7 + $0x2e0] sm:$0xff]  ;;  %v15230_v35 = vld [vmem:[#allocation87_spill] sm:$0xff] }
 0x450   : > { %v13425_v40 = vadd.f32 %v13327_v60, %v4489_v37  ;;  %v4431_v27 = vadd.f32 %v8194_v4, %v4430_v52  ;;  %v4470_v15 = vadd.f32 %v4436_v62, %v3986_v28  ;;  %9501 = vmatmul.mubr.f32.gmra.mxu0 %v5493_v7  ;;  %9508 = vmatpush3.msra.mxu1 %v6167_v25  ;;  %v15228_v37 = vld [vmem:[#allocation61_spill] sm:$0xff]  ;;  %v15231_v25 = vld [vmem:[#allocation64_spill] sm:$0xff] }
 0x451   : > { %v9331_v20 = vpop.f32.mrf.mxu1  ;;  %6234 = vmatprep.mubr.f32.mxu0 %v13355_v23  ;;  %v3996_v41 = vadd.f32 %v15228_v37, %v13271_v45  ;;  %5618 = vmatmul.mubr.f32.gmra.mxu1 %v5432_v29  ;;  %v6130_v3 = vld [vmem:[#allocation7 + $0x1c0] sm:$0xff]  ;;  %v3991_v28 = vadd.f32 %v15231_v25, %v13256_v9  ;;  %v6145_v29 = vld [vmem:[#allocation7 + $0x238] sm:$0xff]  ;;  %v6143_v25 = vld [vmem:[#allocation7 + $0x228] sm:$0xff] }
 0x452   : > { %v4469_v5 = vadd.f32 %v4431_v27, %v3981_v33  ;;  %v4446_v4 = vadd.f32 %v9331_v20, %v8203_v46  ;;  %v15229_v22 = vld [vmem:[#allocation77_spill] sm:$0xff]  ;;  %v4491_v59 = vmul.f32 %v13316_v1, %v4470_v15  ;;  %5622 = vmatprep.mubr.f32.mxu1 %v15230_v35  ;;  %8591 = vmatpush3.msra.mxu0 %v6131_v61  ;;  %v6129_v27 = vld [vmem:[#allocation7 + $0x1b8] sm:$0xff]  ;;  %v15233_v20 = vld [vmem:[#allocation103_spill] sm:$0xff] }
 0x453   : > { %v3941_v26 = vadd.f32 %v15229_v22, %v13110_v57  ;;  %v4440_v62 = vpop.f32.mrf.mxu1  ;;  %8592 = vmatprep.subr.mxu0 %v6146_v24  ;;  %9509 = vmatprep.subr.mxu1 %v6166_v12  ;;  %v15232_v57 = vld [vmem:[#allocation44_spill] sm:$0xff]  ;;  %v15234_v24 = vld [vmem:[#allocation106_spill] sm:$0xff]  ;;  %v15238_v22 = vld [vmem:[#allocation15_spill] sm:$0xff] }
 0x454   : > { %v4490_v18 = vmul.f32 %v13316_v1, %v4469_v5  ;;  %v4472_v52 = vadd.f32 %v4446_v4, %v3996_v41  ;;  %v4441_v7 = vadd.f32 %v8200_v32, %v4440_v62  ;;  %v13442_v46 = vadd.f32 %v13327_v60, %v4491_v59  ;;  %8593 = vmatpush3.msra.mxu0 %v6130_v3  ;;  %v6165_v61 = vld [vmem:[#allocation7 + $0x2d8] sm:$0xff]  ;;  %v15235_v5 = vld [vmem:[#allocation107_spill] sm:$0xff] }
 0x455   : > { %v4461_v45 = vadd.f32 %v4391_v11, %v3941_v26  ;;  %v4006_v8 = vadd.f32 %v15232_v57, %v3861_v30  ;;  %v9334_v33 = vpop.f32.mrf.mxu1  ;;  %9510 = vmatpush3.msra.mxu1 %v6166_v12  ;;  %v6144_v11 = vld [vmem:[#allocation7 + $0x230] sm:$0xff]  ;;  %v8176_v37 = vadd.f32 %v15235_v5, %v15234_v24  ;;  %v8206_v30 = vadd.f32 %v13357_v38, %v13341_v54  ;;  %v15236_v12 = vld [vmem:[#allocation33_spill] sm:$0xff]  ;;  %v15237_v3 = vld [vmem:[#allocation104_spill] sm:$0xff] }
 0x456   : > { %v13446_v9 = vadd.f32 %v13327_v60, %v4490_v18  ;;  %v4493_v19 = vmul.f32 %v13316_v1, %v4472_v52  ;;  %v4471_v32 = vadd.f32 %v4441_v7, %v3991_v28  ;;  %v4456_v15 = vadd.f32 %v9334_v33, %v8209_v0  ;;  %5623 = vmatmul.mubr.f32.gmra.mxu1 %v15233_v20  ;;  %v6128_v4 = vld [vmem:[#allocation7 + $0x1b0] sm:$0xff]  ;;  %v15239_v54 = vld [vmem:[#allocation92_spill] sm:$0xff]  ;;  %v6127_v18 = vld [vmem:[#allocation7 + $0x1a8] sm:$0xff] }
 0x457   : > { %8594 = vmatprep.subr.mxu0 %v6145_v29  ;;  %5627 = vmatprep.mubr.f32.mxu1 %v15236_v12  ;;  %v4450_v41 = vpop.f32.mrf.mxu1  ;;  %v5434_v26 = vmul.f32 %v15238_v22, %v15237_v3  ;;  %v4482_v28 = vmul.f32 %v13316_v1, %v4461_v45  ;;  %v4001_v38 = vadd.f32 %v15239_v54, %v13290_v13  ;;  %v6164_v52 = vld [vmem:[#allocation7 + $0x2d0] sm:$0xff]  ;;  %v15240_v45 = vld [vmem:[#allocation28_spill] sm:$0xff]  ;;  %v6126_v13 = vld [vmem:[#allocation7 + $0x1a0] sm:$0xff] }
 0x458   : > { %v13458_v59 = vadd.f32 %v13327_v60, %v4493_v19  ;;  %v4492_v0 = vmul.f32 %v13316_v1, %v4471_v32  ;;  %v4474_v35 = vadd.f32 %v4456_v15, %v4006_v8  ;;  %8595 = vmatpush3.msra.mxu0 %v6129_v27  ;;  %9511 = vmatprep.subr.mxu1 %v6165_v61  ;;  %v6142_v8 = vld [vmem:[#allocation7 + $0x220] sm:$0xff]  ;;  %v15241_v27 = vld [vmem:[#allocation80_spill] sm:$0xff]  ;;  %v6163_v20 = vld [vmem:[#allocation7 + $0x2c8] sm:$0xff] }
 0x459   : > { %v4451_v62 = vadd.f32 %v8206_v30, %v4450_v41  ;;  %8596 = vmatprep.subr.mxu0 %v6144_v11  ;;  %9512 = vmatpush3.msra.mxu1 %v6165_v61  ;;  %v4401_v7 = vadd.f32 %v8176_v37, %v13348_v58  ;;  %v3951_v61 = vadd.f32 %v15241_v27, %v13142_v55  ;;  %v6141_v58 = vld [vmem:[#allocation7 + $0x218] sm:$0xff]  ;;  %v6140_v55 = vld [vmem:[#allocation7 + $0x210] sm:$0xff]  ;;  %v15244_v30 = vld [vmem:[#allocation62_spill] sm:$0xff] }
 0x45a   : > { %v13466_v29 = vadd.f32 %v13327_v60, %v4492_v0  ;;  %v4495_v57 = vmul.f32 %v13316_v1, %v4474_v35  ;;  %8597 = vmatpush3.msra.mxu0 %v6128_v4  ;;  %5628 = vmatmul.mubr.f32.gmra.mxu1 %v5434_v26  ;;  %v6125_v15 = vld [vmem:[#allocation7 + $0x198] sm:$0xff]  ;;  %v4503_v11 = vadd.f32 %v13327_v60, %v4482_v28  ;;  %v15243_v37 = vld [vmem:[#allocation111_spill] sm:$0xff]  ;;  %v13485_v26 = vrot.slane %v13355_v23, 7  ;;  %v6139_v28 = vld [vmem:[#allocation7 + $0x208] sm:$0xff] }
 0x45b   : > { %v4473_v33 = vadd.f32 %v4451_v62, %v4001_v38  ;;  %8598 = vmatprep.subr.mxu0 %v6143_v25  ;;  %5632 = vmatprep.mubr.f32.mxu1 %v15240_v45  ;;  %v4463_v24 = vadd.f32 %v4401_v7, %v3951_v61  ;;  %v8182_v12 = vadd.f32 %v15244_v30, %v15243_v37  ;;  %v15245_v4 = vld [vmem:[#allocation88_spill] sm:$0xff]  ;;  %v6124_v3 = vld [vmem:[#allocation7 + $0x190] sm:$0xff]  ;;  %v6123_v38 = vld [vmem:[#allocation7 + $0x188] sm:$0xff] }
 0x45c   : > { %v4516_v19 = vadd.f32 %v13327_v60, %v4495_v57  ;;  %8599 = vmatpush3.msra.mxu0 %v6127_v18  ;;  %9513 = vmatprep.subr.mxu1 %v6164_v52  ;;  %v15248_v35 = vld [vmem:[#allocation16_spill] sm:$0xff]  ;;  %v6162_v62 = vld [vmem:[#allocation7 + $0x2c0] sm:$0xff]  ;;  %v13493_v18 = vmax.f32 %v4503_v11, 0.0  ;;  %v4483_v27 = vmul.f32 %v13316_v1, %v13337_v48  ;;  %v8188_v48 = vadd.f32 %v13175_v34, %v13151_v49  ;;  %v6160_v34 = vld [vmem:[#allocation7 + $0x2b0] sm:$0xff] }
 0x45d   : > { %v4494_v32 = vmul.f32 %v13316_v1, %v4473_v33  ;;  %8600 = vmatprep.subr.mxu0 %v6142_v8  ;;  %9514 = vmatpush3.msra.mxu1 %v6164_v52  ;;  %v4411_v54 = vadd.f32 %v8182_v12, %v13363_v36  ;;  %v4484_v52 = vmul.f32 %v13316_v1, %v4463_v24  ;;  %v6138_v7 = vld [vmem:[#allocation7 + $0x200] sm:$0xff]  ;;  %v15249_v8 = vld [vmem:[#allocation47_spill] sm:$0xff]  ;;  %v15250_v36 = vld [vmem:[#allocation34_spill] sm:$0xff] }
 0x45e   : > { %v13475_v5 = vmax.f32 %v4516_v19, 0.0  ;;  %8601 = vmatpush3.msra.mxu0 %v6126_v13  ;;  %5633 = vmatmul.mubr.f32.gmra.mxu1 %v13070_v51  ;;  %v15247_v51 = vld [vmem:[#allocation109_spill] sm:$0xff]  ;;  %v3961_v33 = vadd.f32 %v15249_v8, %v13178_v16  ;;  %v6077_v19 = vld [vmem:[#allocation7 + $0x178] sm:$0xff]  ;;  %v13526_v49 = vsel %vm1833_vm4, %v13485_v26, %v13353_v42  ;;  %v6075_v37 = vld [vmem:[#allocation7 + $0x168] sm:$0xff]  ;;  %v4485_v30 = vmul.f32 %v13316_v1, %v13359_v43 }
 0x45f   : > { %v13481_v41 = vadd.f32 %v13327_v60, %v4494_v32  ;;  %8602 = vmatprep.subr.mxu0 %v6141_v58  ;;  %5637 = vmatprep.mubr.f32.mxu1 %v15245_v4  ;;  %v5436_v25 = vmul.f32 %v15248_v35, %v15247_v51  ;;  %v6122_v45 = vld [vmem:[#allocation7 + $0x180] sm:$0xff]  ;;  %v4505_v58 = vadd.f32 %v13327_v60, %v4484_v52  ;;  %v6161_v16 = vld [vmem:[#allocation7 + $0x2b8] sm:$0xff]  ;;  %v13509_v32 = vrot.slane %v13493_v18, 7  ;;  %v15253_v4 = vld [vmem:[#allocation43_spill] sm:$0xff] }
 0x460   : > { %15242 = vst [vmem:[#allocation84_spill] sm:$0xff] %v13475_v5  ;;  %v13488_v0 = vrot.slane %v13475_v5, 7  ;;  %8603 = vmatpush3.msra.mxu0 %v6125_v15  ;;  %9515 = vmatprep.subr.mxu1 %v6163_v20  ;;  %v4465_v61 = vadd.f32 %v4411_v54, %v3961_v33  ;;  %v6076_v15 = vld [vmem:[#allocation7 + $0x170] sm:$0xff]  ;;  %v15251_v11 = vld [vmem:[#allocation17_spill] sm:$0xff]  ;;  %v15254_v51 = vld [vmem:[#allocation78_spill] sm:$0xff]  ;;  %v4506_v52 = vadd.f32 %v13327_v60, %v4485_v30 }
 0x461   : > { %8604 = vmatprep.subr.mxu0 %v6140_v55  ;;  %9516 = vmatpush3.msra.mxu1 %v6163_v20  ;;  %v4504_v20 = vadd.f32 %v13327_v60, %v4483_v27  ;;  %v5438_v24 = vmul.f32 %v15251_v11, %v13105_v56  ;;  %v13519_v55 = vmax.f32 %v4505_v58, 0.0  ;;  %v13532_v56 = vsel %vm1833_vm4, %v13353_v42, %v13509_v32  ;;  %v15252_v12 = vld [vmem:[#allocation113_spill] sm:$0xff]  ;;  %v15255_v54 = vld [vmem:[#allocation63_spill] sm:$0xff]  ;;  %v15258_v8 = vld [vmem:[#allocation18_spill] sm:$0xff] }
 0x462   : > { %15246 = vst [vmem:[#allocation60_spill] sm:$0xff] %v13488_v0  ;;  %8605 = vmatpush3.msra.mxu0 %v6124_v3  ;;  %5638 = vmatmul.mubr.f32.gmra.mxu1 %v5436_v25  ;;  %v6084_v57 = vsel %vm1833_vm4, %v13488_v0, %v13485_v26  ;;  %v3971_v3 = vadd.f32 %v15253_v4, %v15252_v12  ;;  %v6073_v58 = vld [vmem:[#allocation7 + $0x158] sm:$0xff] }
 0x463   : > { %8606 = vmatprep.subr.mxu0 %v6139_v28  ;;  %5642 = vmatprep.mubr.f32.mxu1 %v15250_v36  ;;  %v6085_v13 = vmul.f32 %v15214_v39, %v6084_v57  ;;  %v6087_v42 = vmul.f32 %v15221_v47, %v13532_v56  ;;  %v5940_v43 = vrot.slane %v13519_v55, 7  ;;  %v15257_v57 = vld [vmem:[#allocation66_spill] sm:$0xff]  ;;  %v15265_v4 = vld [vmem:[#allocation52_spill] sm:$0xff] }
 0x464   : > { %8607 = vmatpush3.msra.mxu0 %v6123_v38  ;;  %9517 = vmatprep.subr.mxu1 %v6162_v62  ;;  %v6159_v38 = vld [vmem:[#allocation7 + $0x2a8] sm:$0xff]  ;;  %v5440_v33 = vmul.f32 %v15258_v8, %v15257_v57 }
 0x465   : > { %8608 = vmatprep.subr.mxu0 %v6138_v7  ;;  %9518 = vmatpush3.msra.mxu1 %v6162_v62  ;;  %v6074_v62 = vld [vmem:[#allocation7 + $0x160] sm:$0xff]  ;;  %v15256_v7 = vld [vmem:[#allocation32_spill] sm:$0xff]  ;;  %v13579_v12 = vpop.f32.mrf.mxu0  ;;  %v15273_v57 = vld [vmem:[#allocation42_spill] sm:$0xff] }
 0x466   : > { %8609 = vmatpush3.msra.mxu0 %v6122_v45  ;;  %5643 = vmatmul.mubr.f32.gmra.mxu1 %v13098_v50  ;;  %v4486_v50 = vmul.f32 %v13316_v1, %v4465_v61  ;;  %v6158_v61 = vld [vmem:[#allocation7 + $0x2a0] sm:$0xff]  ;;  %15264 = vst [vmem:[#allocation69_spill] sm:$0xff] %v13579_v12  ;;  %v15292_v12 = vld [vmem:[#allocation22_spill] sm:$0xff] }
 0x467   : > { %6235 = vmatmul.mubr.f32.vlgmr.msra.gmra.mxu0 %v6085_v13  ;;  %5647 = vmatprep.mubr.f32.mxu1 %v12785_v6  ;;  %v4421_v6 = vadd.f32 %v8188_v48, %v13393_v2  ;;  %v13535_v2 = vmax.f32 %v4504_v20, 0.0  ;;  %v15262_v20 = vld [vmem:[#allocation49_spill] sm:$0xff] }
 0x468   : > { %6239 = vmatprep.mubr.f32.mxu0 %v13343_v14  ;;  %9559 = vmatprep.subr.mxu0 %v6077_v19  ;;  %v4507_v25 = vadd.f32 %v13327_v60, %v4486_v50 }
 0x469   : > { %9560 = vmatpush3.msra.mxu0 %v6077_v19  ;;  %9519 = vmatprep.subr.mxu1 %v6161_v16  ;;  %v4467_v28 = vadd.f32 %v4421_v6, %v3971_v3  ;;  %v5939_v36 = vrot.slane %v13535_v2, 7  ;;  %v15263_v6 = vld [vmem:[#allocation73_spill] sm:$0xff]  ;;  %v15266_v3 = vld [vmem:[#allocation71_spill] sm:$0xff] }
 0x46a   : > { %5648 = vmatmul.mubr.f32.gmra.mxu1 %v5438_v24  ;;  %9561 = vmatprep.subr.mxu0 %v6076_v15  ;;  %v13554_v45 = vmax.f32 %v4507_v25, 0.0 }
 0x46b   : > { %6240 = vmatmul.mubr.f32.gmra.mxu0 %v13526_v49  ;;  %9520 = vmatpush3.msra.mxu1 %v6161_v16  ;;  %v4488_v13 = vmul.f32 %v13316_v1, %v4467_v28  ;;  %v13560_v27 = vsel %vm1833_vm4, %v13509_v32, %v5939_v36  ;;  %v13564_v19 = vsel %vm1833_vm4, %v5939_v36, %v5940_v43  ;;  %v13567_v16 = vmax.f32 %v4506_v52, 0.0 }
 0x46c   : > { %5652 = vmatprep.mubr.f32.mxu1 %v15254_v51  ;;  %6244 = vmatprep.mubr.f32.mxu0 %v13493_v18  ;;  %15259 = vst [vmem:[#allocation83_spill] sm:$0xff] %v13554_v45  ;;  %v6089_v24 = vmul.f32 %v15238_v22, %v13564_v19  ;;  %v15267_v51 = vld [vmem:[#allocation19_spill] sm:$0xff] }
 0x46d   : > { %9562 = vmatpush3.msra.mxu0 %v6076_v15  ;;  %9521 = vmatprep.subr.mxu1 %v6160_v34  ;;  %15260 = vst [vmem:[#allocation67_spill] sm:$0xff] %v13567_v16  ;;  %v15261_v15 = vld [vmem:[#allocation79_spill] sm:$0xff]  ;;  %v4509_v50 = vadd.f32 %v13327_v60, %v4488_v13  ;;  %v5941_v25 = vrot.slane %v13567_v16, 7 }
 0x46e   : > { %5653 = vmatmul.mubr.f32.gmra.mxu1 %v15255_v54  ;;  %9563 = vmatprep.subr.mxu0 %v6075_v37  ;;  %v4487_v48 = vmul.f32 %v13316_v1, %v15261_v15  ;;  %v6072_v1 = vld [vmem:[#allocation7 + $0x150] sm:$0xff] }
 0x46f   : > { %6245 = vmatmul.mubr.f32.gmra.mxu0 %v6087_v42  ;;  %9522 = vmatpush3.msra.mxu1 %v6160_v34  ;;  %v6157_v34 = vld [vmem:[#allocation7 + $0x298] sm:$0xff]  ;;  %v5442_v42 = vmul.f32 %v15267_v51, %v15266_v3  ;;  %v13586_v28 = vmax.f32 %v4509_v50, 0.0  ;;  %v13590_v54 = vsel %vm1833_vm4, %v5940_v43, %v5941_v25  ;;  %v13621_v50 = vrot.slane %v13493_v18, 1 }
 0x470   : > { %5657 = vmatprep.mubr.f32.mxu1 %v15256_v7  ;;  %6249 = vmatprep.mubr.f32.mxu0 %v13535_v2  ;;  %v4508_v30 = vadd.f32 %v13327_v60, %v4487_v48  ;;  %15269 = vst [vmem:[#allocation75_spill] sm:$0xff] %v13590_v54  ;;  %v6156_v60 = vld [vmem:[#allocation7 + $0x290] sm:$0xff]  ;;  %v13599_v7 = vpop.f32.mrf.mxu0  ;;  %v6070_v48 = vld [vmem:[#allocation7 + $0x140] sm:$0xff] }
 0x471   : > { %9564 = vmatpush3.msra.mxu0 %v6075_v37  ;;  %9523 = vmatprep.subr.mxu1 %v6159_v38  ;;  %v5942_v37 = vrot.slane %v13554_v45, 7  ;;  %15268 = vst [vmem:[#allocation74_spill] sm:$0xff] %v13586_v28  ;;  %15272 = vst [vmem:[#allocation29_spill] sm:$0xff] %v13599_v7  ;;  %v5944_v15 = vrot.slane %v13586_v28, 7  ;;  %v6043_v7 = vld [vmem:[#allocation7 + $0x68] sm:$0xff] }
 0x472   : > { %5658 = vmatmul.mubr.f32.gmra.mxu1 %v5440_v33  ;;  %9565 = vmatprep.subr.mxu0 %v6074_v62  ;;  %v13597_v52 = vmax.f32 %v4508_v30, 0.0  ;;  %v15274_v33 = vld [vmem:[#allocation65_spill] sm:$0xff]  ;;  %v13611_v13 = vpop.f32.mrf.mxu0  ;;  %15278 = vst [vmem:[#allocation56_spill] sm:$0xff] %v13621_v50 }
 0x473   : > { %6250 = vmatmul.mubr.f32.gmra.mxu0 %v13560_v27  ;;  %9524 = vmatpush3.msra.mxu1 %v6159_v38  ;;  %v13594_v38 = vsel %vm1833_vm4, %v5941_v25, %v5942_v37  ;;  %v13609_v36 = vsel %vm1833_vm4, %v15274_v33, %v13485_v26  ;;  %15275 = vst [vmem:[#allocation85_spill] sm:$0xff] %v13611_v13  ;;  %v6154_v30 = vld [vmem:[#allocation7 + $0x280] sm:$0xff]  ;;  %v5988_v33 = vrot.slane %v13519_v55, 1 }
 0x474   : > { %5662 = vmatprep.mubr.f32.mxu1 %v15262_v20  ;;  %6254 = vmatprep.mubr.f32.mxu0 %v13519_v55  ;;  %15270 = vst [vmem:[#allocation89_spill] sm:$0xff] %v13594_v38  ;;  %15271 = vst [vmem:[#allocation40_spill] sm:$0xff] %v13597_v52  ;;  %v6091_v43 = vmul.f32 %v15248_v35, %v13594_v38  ;;  %v15277_v20 = vld [vmem:[#allocation20_spill] sm:$0xff]  ;;  %v5943_v26 = vrot.slane %v13597_v52, 7  ;;  %v6036_v38 = vld [vmem:[#allocation7 + $0x30] sm:$0xff] }
 0x475   : > { %9566 = vmatpush3.msra.mxu0 %v6074_v62  ;;  %9525 = vmatprep.subr.mxu1 %v6158_v61  ;;  %v6071_v62 = vld [vmem:[#allocation7 + $0x148] sm:$0xff] }
 0x476   : > { %5663 = vmatmul.mubr.f32.gmra.mxu1 %v15263_v6  ;;  %9567 = vmatprep.subr.mxu0 %v6073_v58  ;;  %v13624_v6 = vmax.f32 %v13446_v9, 0.0  ;;  %v13634_v3 = vsel %vm1833_vm4, %v5943_v26, %v5944_v15  ;;  %v13638_v9 = vmax.f32 %v13425_v40, 0.0  ;;  %v6061_v40 = vld [vmem:[#allocation7 + $0xf8] sm:$0xff] }
 0x477   : > { %6255 = vmatmul.mubr.f32.gmra.mxu0 %v6089_v24  ;;  %9526 = vmatpush3.msra.mxu1 %v6158_v61  ;;  %v15276_v61 = vld [vmem:[#allocation112_spill] sm:$0xff]  ;;  %v5444_v24 = vmul.f32 %v15277_v20, %v13609_v36  ;;  %15282 = vst [vmem:[#allocation51_spill] sm:$0xff] %v13634_v3 }
 0x478   : > { %5667 = vmatprep.mubr.f32.mxu1 %v15265_v4  ;;  %6259 = vmatprep.mubr.f32.mxu0 %v13567_v16  ;;  %15279 = vst [vmem:[#allocation57_spill] sm:$0xff] %v13624_v6  ;;  %15283 = vst [vmem:[#allocation46_spill] sm:$0xff] %v13638_v9 }
 0x479   : > { %9568 = vmatpush3.msra.mxu0 %v6073_v58  ;;  %9527 = vmatprep.subr.mxu1 %v6157_v34  ;;  %v6155_v58 = vld [vmem:[#allocation7 + $0x288] sm:$0xff] }
 0x47a   : > { %5668 = vmatmul.mubr.f32.gmra.mxu1 %v5442_v42  ;;  %9569 = vmatprep.subr.mxu0 %v6072_v1  ;;  %v6069_v42 = vld [vmem:[#allocation7 + $0x138] sm:$0xff] }
 0x47b   : > { %6260 = vmatmul.mubr.f32.gmra.mxu0 %v13590_v54  ;;  %9528 = vmatpush3.msra.mxu1 %v6157_v34  ;;  %v13626_v34 = vpop.f32.mrf.mxu0  ;;  %v6050_v54 = vld [vmem:[#allocation7 + $0xa0] sm:$0xff] }
 0x47c   : > { %5672 = vmatprep.mubr.f32.mxu1 %v15273_v57  ;;  %6264 = vmatprep.mubr.f32.mxu0 %v13554_v45  ;;  %15280 = vst [vmem:[#allocation86_spill] sm:$0xff] %v13626_v34 }
 0x47d   : > { %9570 = vmatpush3.msra.mxu0 %v6072_v1  ;;  %9529 = vmatprep.subr.mxu1 %v6156_v60  ;;  %v13630_v1 = vsel %vm1833_vm4, %v5942_v37, %v5943_v26  ;;  %v13642_v25 = vpop.f32.mrf.mxu0  ;;  %v13648_v37 = vsel %vm1882_vm11, %v13384_v53, %v13621_v50  ;;  %v6045_v26 = vld [vmem:[#allocation7 + $0x78] sm:$0xff] }
 0x47e   : > { %5673 = vmatmul.mubr.f32.gmra.mxu1 %v15276_v61  ;;  %9571 = vmatprep.subr.mxu0 %v6071_v62  ;;  %15281 = vst [vmem:[#allocation30_spill] sm:$0xff] %v13630_v1  ;;  %15284 = vst [vmem:[#allocation36_spill] sm:$0xff] %v13642_v25  ;;  %v6060_v25 = vld [vmem:[#allocation7 + $0xf0] sm:$0xff] }
 0x47f   : > { %6265 = vmatmul.mubr.f32.gmra.mxu0 %v6091_v43  ;;  %9530 = vmatpush3.msra.mxu1 %v6156_v60  ;;  %v6093_v60 = vmul.f32 %v15251_v11, %v13634_v3  ;;  %v6068_v43 = vld [vmem:[#allocation7 + $0x130] sm:$0xff]  ;;  %v6041_v3 = vld [vmem:[#allocation7 + $0x58] sm:$0xff] }
 0x480   : > { %5677 = vmatprep.mubr.f32.mxu1 %v13355_v23  ;;  %6269 = vmatprep.mubr.f32.mxu0 %v13597_v52 }
 0x481   : > { %9572 = vmatpush3.msra.mxu0 %v6071_v62  ;;  %9531 = vmatprep.subr.mxu1 %v6155_v58  ;;  %v5946_v62 = vrot.slane %v13624_v6, 7 }
 0x482   : > { %5678 = vmatmul.mubr.f32.gmra.mxu1 %v5444_v24  ;;  %9573 = vmatprep.subr.mxu0 %v6070_v48  ;;  %v5945_v24 = vrot.slane %v13638_v9, 7 }
 0x483   : > { %6270 = vmatmul.mubr.f32.gmra.mxu0 %v13630_v1  ;;  %9532 = vmatpush3.msra.mxu1 %v6155_v58  ;;  %v15285_v58 = vld [vmem:[#allocation21_spill] sm:$0xff]  ;;  %v5991_v1 = vrot.slane %v13597_v52, 1 }
 0x484   : > { %5682 = vmatprep.mubr.f32.mxu1 %v13343_v14  ;;  %6274 = vmatprep.mubr.f32.mxu0 %v13586_v28  ;;  %v6107_v53 = vmul.f32 %v15285_v58, %v13648_v37  ;;  %v13671_v34 = vsel %vm1833_vm4, %v5945_v24, %v5946_v62  ;;  %v6038_v52 = vld [vmem:[#allocation7 + $0x40] sm:$0xff] }
 0x485   : > { %9574 = vmatpush3.msra.mxu0 %v6070_v48  ;;  %9533 = vmatprep.subr.mxu1 %v6154_v30  ;;  %v13659_v48 = vpop.f32.mrf.mxu0  ;;  %15289 = vst [vmem:[#allocation58_spill] sm:$0xff] %v13671_v34 }
 0x486   : > { %5683 = vmatmul.mubr.f32.gmra.mxu1 %v13526_v49  ;;  %9575 = vmatprep.subr.mxu0 %v6069_v42  ;;  %15286 = vst [vmem:[#allocation45_spill] sm:$0xff] %v13659_v48  ;;  %v13685_v48 = vmax.f32 %v13442_v46, 0.0 }
 0x487   : > { %6275 = vmatmul.mubr.f32.gmra.mxu0 %v6093_v60  ;;  %9534 = vmatpush3.msra.mxu1 %v6154_v30  ;;  %v5987_v60 = vrot.slane %v13535_v2, 1  ;;  %v13665_v30 = vsel %vm1833_vm4, %v5944_v15, %v5945_v24  ;;  %v13667_v13 = vpop.f32.mrf.mxu0  ;;  %v13688_v24 = vmax.f32 %v13466_v29, 0.0 }
 0x488   : > { %6279 = vmatprep.mubr.f32.mxu0 %v13638_v9  ;;  %9535 = vmatprep.mubr.f32.mxu1 %v13405_v63  ;;  %15287 = vst [vmem:[#allocation95_spill] sm:$0xff] %v13665_v30  ;;  %15288 = vst [vmem:[#allocation96_spill] sm:$0xff] %v13667_v13  ;;  %v5990_v13 = vrot.slane %v13554_v45, 1 }
 0x489   : > { %9576 = vmatpush3.msra.mxu0 %v6069_v42  ;;  %8690 = vmatprep.subr.mxu1 %v6061_v40  ;;  %v13677_v42 = vsel %vm1882_vm11, %v13621_v50, %v5987_v60  ;;  %v6044_v40 = vld [vmem:[#allocation7 + $0x70] sm:$0xff]  ;;  %v13681_v15 = vsel %vm1882_vm11, %v5987_v60, %v5988_v33  ;;  %15290 = vst [vmem:[#allocation53_spill] sm:$0xff] %v13685_v48  ;;  %15291 = vst [vmem:[#allocation93_spill] sm:$0xff] %v13688_v24  ;;  %v5989_v50 = vrot.slane %v13567_v16, 1  ;;  %v13697_v29 = vpop.f32.mrf.mxu0 }
 0x48a   : > { %9536 = vmatmul.mubr.f32.vlgmr.msra.gmra.mxu1 %v6107_v53  ;;  %9577 = vmatprep.subr.mxu0 %v6068_v43  ;;  %v6067_v53 = vld [vmem:[#allocation7 + $0x128] sm:$0xff]  ;;  %v6095_v60 = vmul.f32 %v15258_v8, %v13671_v34  ;;  %v6109_v46 = vmul.f32 %v15292_v12, %v13681_v15  ;;  %15293 = vst [vmem:[#allocation94_spill] sm:$0xff] %v13697_v29  ;;  %v5947_v34 = vrot.slane %v13685_v48, 7  ;;  %v6057_v29 = vld [vmem:[#allocation7 + $0xd8] sm:$0xff] }
 0x48b   : > { %6280 = vmatmul.mubr.f32.gmra.mxu0 %v13665_v30  ;;  %8691 = vmatpush3.msra.mxu1 %v6045_v26  ;;  %v6059_v26 = vld [vmem:[#allocation7 + $0xe8] sm:$0xff]  ;;  %v6058_v30 = vld [vmem:[#allocation7 + $0xe0] sm:$0xff]  ;;  %v13709_v8 = vpop.f32.mrf.mxu0 }
 0x48c   : > { %6284 = vmatprep.mubr.f32.mxu0 %v13624_v6  ;;  %9538 = vmatprep.mubr.f32.mxu1 %v13677_v42 }
 0x48d   : > { %8692 = vmatprep.subr.mxu1 %v6060_v25  ;;  %9578 = vmatpush3.msra.mxu0 %v6068_v43  ;;  %v13701_v25 = vsel %vm1882_vm11, %v5989_v50, %v5990_v13  ;;  %v13706_v43 = vsel %vm1882_vm11, %v5988_v33, %v5989_v50  ;;  %v15295_v50 = vld [vmem:[#allocation23_spill] sm:$0xff]  ;;  %v13732_v11 = vpop.f32.mrf.mxu0 }
 0x48e   : > { %8693 = vmatpush3.msra.mxu1 %v6044_v40  ;;  %9579 = vmatprep.subr.mxu0 %v6067_v53  ;;  %v6042_v40 = vld [vmem:[#allocation7 + $0x60] sm:$0xff]  ;;  %v6111_v33 = vmul.f32 %v15295_v50, %v13701_v25  ;;  %15298 = vst [vmem:[#allocation102_spill] sm:$0xff] %v13732_v11  ;;  %v13747_v11 = vmax.f32 %v13458_v59, 0.0 }
 0x48f   : > { %8694 = vmatprep.subr.mxu1 %v6059_v26  ;;  %6285 = vmatmul.mubr.f32.gmra.mxu0 %v6095_v60  ;;  %v5992_v60 = vrot.slane %v13586_v28, 1  ;;  %v6056_v26 = vld [vmem:[#allocation7 + $0xd0] sm:$0xff] }
 0x490   : > { %9539 = vmatmul.mubr.f32.gmra.mxu1 %v6109_v46  ;;  %6289 = vmatprep.mubr.f32.mxu0 %v13685_v48  ;;  %v13716_v46 = vsel %vm1833_vm4, %v5946_v62, %v5947_v34  ;;  %v6040_v28 = vld [vmem:[#allocation7 + $0x50] sm:$0xff]  ;;  %15299 = vst [vmem:[#allocation38_spill] sm:$0xff] %v13747_v11 }
 0x491   : > { %8695 = vmatpush3.msra.mxu1 %v6043_v7  ;;  %9541 = vmatprep.mubr.f32.mxu1 %v13706_v43  ;;  %15294 = vst [vmem:[#allocation37_spill] sm:$0xff] %v13716_v46  ;;  %v6066_v7 = vld [vmem:[#allocation7 + $0x120] sm:$0xff] }
 0x492   : > { %8696 = vmatprep.subr.mxu1 %v6058_v30  ;;  %9580 = vmatpush3.msra.mxu0 %v6067_v53  ;;  %v15296_v30 = vrot.slane %v13688_v24, 7  ;;  %v13730_v53 = vsel %vm1882_vm11, %v5991_v1, %v5992_v60 }
 0x493   : > { %8697 = vmatpush3.msra.mxu1 %v6042_v40  ;;  %6290 = vmatmul.mubr.f32.gmra.mxu0 %v13716_v46  ;;  %v6055_v40 = vld [vmem:[#allocation7 + $0xc8] sm:$0xff] }
 0x494   : > { %8698 = vmatprep.subr.mxu1 %v6057_v29  ;;  %9542 = vmatmul.mubr.f32.gmra.mxu1 %v6111_v33  ;;  %v13726_v62 = vsel %vm1833_vm4, %v5947_v34, %v15296_v30  ;;  %v13737_v29 = vsel %vm1882_vm11, %v5990_v13, %v5991_v1  ;;  %v5994_v33 = vrot.slane %v13624_v6, 1  ;;  %v13742_v34 = vmax.f32 %v13481_v41, 0.0  ;;  %v13744_v30 = vpop.f32.mrf.mxu0  ;;  %v15300_v1 = vld [vmem:[#allocation24_spill] sm:$0xff]  ;;  %v6039_v46 = vld [vmem:[#allocation7 + $0x48] sm:$0xff]  ;;  %v6054_v41 = vld [vmem:[#allocation7 + $0xc0] sm:$0xff] }
 0x495   : > { %15297 = vst [vmem:[#allocation101_spill] sm:$0xff] %v13726_v62  ;;  %8699 = vmatpush3.msra.mxu1 %v6041_v3  ;;  %6294 = vmatprep.mubr.f32.mxu0 %v13688_v24  ;;  %v6097_v13 = vmul.f32 %v15267_v51, %v13726_v62  ;;  %v6113_v3 = vmul.f32 %v15300_v1, %v13730_v53  ;;  %v5993_v6 = vrot.slane %v13638_v9, 1  ;;  %v6053_v62 = vld [vmem:[#allocation7 + $0xb8] sm:$0xff] }
 0x496   : > { %9544 = vmatprep.mubr.f32.mxu1 %v13737_v29  ;;  %8700 = vmatprep.subr.mxu1 %v6056_v26  ;;  %v6065_v26 = vld [vmem:[#allocation7 + $0x118] sm:$0xff]  ;;  %v15306_v45 = vrot.slane %v13742_v34, 7 }
 0x497   : > { %9581 = vmatprep.subr.mxu0 %v6066_v7  ;;  %8701 = vmatpush3.msra.mxu1 %v6040_v28  ;;  %v13756_v59 = vsel %vm1882_vm11, %v5993_v6, %v5994_v33  ;;  %v13761_v28 = vsel %vm1882_vm11, %v5992_v60, %v5993_v6  ;;  %v6037_v6 = vld [vmem:[#allocation7 + $0x38] sm:$0xff]  ;;  %v5995_v60 = vrot.slane %v13685_v48, 1  ;;  %v6035_v48 = vld [vmem:[#allocation7 + $0x28] sm:$0xff] }
 0x498   : > { %9582 = vmatpush3.msra.mxu0 %v6066_v7  ;;  %8702 = vmatprep.subr.mxu1 %v6055_v40  ;;  %v5996_v40 = vrot.slane %v13688_v24, 1  ;;  %v15304_v7 = vrot.slane %v13688_v24, 7 }
 0x499   : > { %6295 = vmatmul.mubr.f32.gmra.mxu0 %v6097_v13  ;;  %9545 = vmatmul.mubr.f32.gmra.mxu1 %v6113_v3  ;;  %v13765_v13 = vpop.f32.mrf.mxu0  ;;  %v13769_v3 = vrot.slane %v13747_v11, 7 }
 0x49a   : > { %8703 = vmatpush3.msra.mxu1 %v6039_v46  ;;  %6299 = vmatprep.mubr.f32.mxu0 %v13747_v11  ;;  %15301 = vst [vmem:[#allocation35_spill] sm:$0xff] %v13765_v13  ;;  %v15302_v46 = vld [vmem:[#allocation27_spill] sm:$0xff] }
 0x49b   : > { %9547 = vmatprep.mubr.f32.mxu1 %v13761_v28  ;;  %8704 = vmatprep.subr.mxu1 %v6054_v41  ;;  %v6115_v51 = vmul.f32 %v15302_v46, %v13756_v59  ;;  %v13781_v41 = vsel %vm1833_vm4, %v15304_v7, %v13769_v3  ;;  %v6052_v13 = vld [vmem:[#allocation7 + $0xb0] sm:$0xff]  ;;  %v6051_v7 = vld [vmem:[#allocation7 + $0xa8] sm:$0xff] }
 0x49c   : > { %9583 = vmatprep.subr.mxu0 %v6065_v26  ;;  %8705 = vmatpush3.msra.mxu1 %v6038_v52  ;;  %v13774_v9 = vpop.f32.mrf.mxu0  ;;  %15305 = vst [vmem:[#allocation76_spill] sm:$0xff] %v13781_v41  ;;  %v6064_v52 = vld [vmem:[#allocation7 + $0x110] sm:$0xff] }
 0x49d   : > { %15303 = vst [vmem:[#allocation41_spill] sm:$0xff] %v13774_v9  ;;  %9584 = vmatpush3.msra.mxu0 %v6065_v26  ;;  %8706 = vmatprep.subr.mxu1 %v6053_v62  ;;  %v13789_v26 = vsel %vm1833_vm4, %v13769_v3, %v15306_v45  ;;  %v13793_v62 = vsel %vm1882_vm11, %v5995_v60, %v5996_v40  ;;  %v13809_v9 = vrot.slane %v13747_v11, 1 }
 0x49e   : > { %6300 = vmatmul.mubr.f32.gmra.mxu0 %v13781_v41  ;;  %9548 = vmatmul.mubr.f32.gmra.mxu1 %v6115_v51  ;;  %15307 = vst [vmem:[#allocation108_spill] sm:$0xff] %v13789_v26  ;;  %v13795_v24 = vpop.f32.mrf.mxu0  ;;  %v13800_v51 = vsel %vm1882_vm11, %v5994_v33, %v5995_v60  ;;  %v6101_v41 = vrot.slane %v13742_v34, 1  ;;  %v6099_v45 = vmul.f32 %v15277_v20, %v13789_v26 }
 0x49f   : > { %15308 = vst [vmem:[#allocation110_spill] sm:$0xff] %v13795_v24  ;;  %8707 = vmatpush3.msra.mxu1 %v6037_v6  ;;  %6304 = vmatprep.mubr.f32.mxu0 %v13742_v34  ;;  %v15309_v24 = vld [vmem:[#allocation31_spill] sm:$0xff] }
 0x4a0   : > { %9550 = vmatprep.mubr.f32.mxu1 %v13800_v51  ;;  %8708 = vmatprep.subr.mxu1 %v6052_v13  ;;  %v6117_v6 = vmul.f32 %v15309_v24, %v13793_v62  ;;  %v6063_v13 = vld [vmem:[#allocation7 + $0x108] sm:$0xff]  ;;  %v13816_v26 = vsel %vm1882_vm11, %v13809_v9, %v6101_v41 }
 0x4a1   : > { %9585 = vmatprep.subr.mxu0 %v6064_v52  ;;  %8709 = vmatpush3.msra.mxu1 %v6036_v38  ;;  %v8274_v33 = vpop.f32.mrf.mxu1  ;;  %v13811_v60 = vpop.f32.mrf.mxu0  ;;  %v6034_v38 = vld [vmem:[#allocation7 + $0x20] sm:$0xff]  ;;  %15311 = vst [vmem:[#allocation81_spill] sm:$0xff] %v13816_v26 }
 0x4a2   : > { %15310 = vst [vmem:[#allocation39_spill] sm:$0xff] %v13811_v60  ;;  %9586 = vmatpush3.msra.mxu0 %v6064_v52  ;;  %8710 = vmatprep.subr.mxu1 %v6051_v7  ;;  %v13824_v52 = vsel %vm1882_vm11, %v5996_v40, %v13809_v9  ;;  %v6049_v7 = vld [vmem:[#allocation7 + $0x98] sm:$0xff]  ;;  %v15315_v40 = vrot.slane %v13742_v34, 7 }
 0x4a3   : > { %6305 = vmatmul.mubr.f32.gmra.mxu0 %v6099_v45  ;;  %9551 = vmatmul.mubr.f32.gmra.mxu1 %v6117_v6  ;;  %v8275_v20 = vpop.f32.mrf.mxu1  ;;  %v13818_v16 = vpop.f32.mrf.mxu0  ;;  %v13827_v45 = vrot.slane %v13475_v5, 1 }
 0x4a4   : > { %15312 = vst [vmem:[#allocation91_spill] sm:$0xff] %v13818_v16  ;;  %8711 = vmatpush3.msra.mxu1 %v6035_v48  ;;  %6309 = vmatprep.mubr.f32.mxu0 %v13475_v5  ;;  %v13829_v6 = vadd.f32 %v8275_v20, %v8274_v33  ;;  %v6119_v48 = vmul.f32 %v15192_v10, %v13816_v26  ;;  %v6033_v16 = vld [vmem:[#allocation7 + $0x18] sm:$0xff]  ;;  %v6048_v33 = vld [vmem:[#allocation7 + $0x90] sm:$0xff]  ;;  %v6047_v26 = vld [vmem:[#allocation7 + $0x88] sm:$0xff] }
 0x4a5   : > { %15313 = vst [vmem:[#allocation13_spill] sm:$0xff] %v13827_v45  ;;  %9553 = vmatprep.mubr.f32.mxu1 %v13824_v52  ;;  %8712 = vmatprep.subr.mxu1 %v6050_v54  ;;  %v8277_v11 = vpop.f32.mrf.mxu1  ;;  %v13832_v60 = vpop.f32.mrf.mxu0  ;;  %v13841_v20 = vsel %vm1833_vm4, %v15315_v40, %v13488_v0  ;;  %v6062_v54 = vld [vmem:[#allocation7 + $0x100] sm:$0xff] }
 0x4a6   : > { %15314 = vst [vmem:[#allocation90_spill] sm:$0xff] %v13829_v6  ;;  %9587 = vmatprep.subr.mxu0 %v6063_v13  ;;  %8713 = vmatpush3.msra.mxu1 %v6034_v38  ;;  %15316 = vst [vmem:[#allocation48_spill] sm:$0xff] %v13841_v20  ;;  %v6032_v38 = vld [vmem:[#allocation7 + $0x10] sm:$0xff] }
 0x4a7   : > { %9588 = vmatpush3.msra.mxu0 %v6063_v13  ;;  %8714 = vmatprep.subr.mxu1 %v6049_v7  ;;  %v8278_v6 = vpop.f32.mrf.mxu1  ;;  %v13843_v5 = vpop.f32.mrf.mxu0  ;;  %v13849_v13 = vsel %vm1882_vm11, %v6101_v41, %v13827_v45  ;;  %v6105_v7 = vsel %vm1882_vm11, %v13827_v45, %v13370_v17  ;;  %v6015_v41 = vmul.f32 %v15285_v58, %v13381_v31  ;;  %v6031_v17 = vld [vmem:[#allocation7 + $0x8] sm:$0xff] }
 0x4a8   : > { %15317 = vst [vmem:[#allocation99_spill] sm:$0xff] %v13843_v5  ;;  %6310 = vmatmul.mubr.f32.gmra.mxu0 %v13841_v20  ;;  %9554 = vmatmul.mubr.f32.gmra.mxu1 %v6119_v48  ;;  %15318 = vst [vmem:[#allocation100_spill] sm:$0xff] %v13849_v13  ;;  %v13855_v40 = vadd.f32 %v8278_v6, %v8277_v11  ;;  %v15320_v48 = vld [vmem:[#allocation72_spill] sm:$0xff]  ;;  %v6121_v5 = vmul.f32 %v15203_v44, %v6105_v7  ;;  %v6030_v7 = vld [vmem:[#allocation7] sm:$0xff] }
 0x4a9   : > { %8715 = vmatpush3.msra.mxu1 %v6033_v16  ;;  %9556 = vmatprep.mubr.f32.mxu1 %v13849_v13  ;;  %v8280_v0 = vpop.f32.mrf.mxu1  ;;  %v13858_v20 = vpop.f32.mrf.mxu0  ;;  %v6893_v11 = vld [vmem:[#allocation7 + $0x3f8] sm:$0xff]  ;;  %v6046_v13 = vld [vmem:[#allocation7 + $0x80] sm:$0xff] }
 0x4aa   : > { %15319 = vst [vmem:[#allocation82_spill] sm:$0xff] %v13855_v40  ;;  %8716 = vmatprep.subr.mxu1 %v6048_v33  ;;  %9589 = vmatprep.subr.mxu0 %v6062_v54  ;;  %v6877_v33 = vld [vmem:[#allocation7 + $0x378] sm:$0xff] }
 0x4ab   : > { %9591 = vmatprep.mubr.f32.mxu0 %v15320_v48  ;;  %8717 = vmatpush3.msra.mxu1 %v6032_v38  ;;  %v8281_v6 = vpop.f32.mrf.mxu1  ;;  %v13864_v16 = vpop.f32.mrf.mxu0  ;;  %v15322_v48 = vld [vmem:[#allocation68_spill] sm:$0xff] }
 0x4ac   : > { %15321 = vst [vmem:[#allocation98_spill] sm:$0xff] %v13864_v16  ;;  %9590 = vmatpush3.msra.mxu0 %v6062_v54  ;;  %8718 = vmatprep.subr.mxu1 %v6047_v26  ;;  %v13866_v40 = vadd.f32 %v8281_v6, %v8280_v0  ;;  %v5965_v38 = vsel %vm1833_vm4, %v13769_v3, %v15322_v48  ;;  %v6892_v16 = vld [vmem:[#allocation7 + $0x3f0] sm:$0xff]  ;;  %v6909_v26 = vld [vmem:[#allocation7 + $0x478] sm:$0xff]  ;;  %v6890_v48 = vld [vmem:[#allocation7 + $0x3e0] sm:$0xff] }
 0x4ad   : > { %9557 = vmatmul.mubr.f32.gmra.mxu1 %v6121_v5  ;;  %9592 = vmatmul.mubr.f32.vlgmr.msra.gmra.mxu0 %v6015_v41  ;;  %v8283_v45 = vpop.f32.mrf.mxu1  ;;  %v13868_v31 = vpop.f32.mrf.mxu0  ;;  %v6876_v0 = vld [vmem:[#allocation7 + $0x370] sm:$0xff]  ;;  %v5966_v6 = vmul.f32 %v15214_v39, %v5965_v38  ;;  %v6017_v3 = vmul.f32 %v15292_v12, %v13648_v37  ;;  %v6874_v37 = vld [vmem:[#allocation7 + $0x360] sm:$0xff] }
 0x4ae   : > { %8719 = vmatpush3.msra.mxu1 %v6031_v17  ;;  %8802 = vmatprep.subr.mxu0 %v6893_v11  ;;  %v6875_v11 = vld [vmem:[#allocation7 + $0x368] sm:$0xff] }
 0x4af   : > { %8720 = vmatprep.subr.mxu1 %v6046_v13  ;;  %6524 = vmatprep.mubr.f32.mxu1 %v15265_v4  ;;  %v8284_v5 = vpop.f32.mrf.mxu1  ;;  %v13875_v54 = vpop.f32.mrf.mxu0  ;;  %v6891_v13 = vld [vmem:[#allocation7 + $0x3e8] sm:$0xff] }
 0x4b0   : > { %9594 = vmatprep.mubr.f32.mxu0 %v13405_v63  ;;  %8803 = vmatpush3.msra.mxu0 %v6877_v33  ;;  %v13878_v41 = vadd.f32 %v8284_v5, %v8283_v45  ;;  %v6908_v63 = vld [vmem:[#allocation7 + $0x470] sm:$0xff] }
 0x4b1   : > { %8721 = vmatpush3.msra.mxu1 %v6030_v7  ;;  %8804 = vmatprep.subr.mxu0 %v6892_v16  ;;  %v8286_v17 = vpop.f32.mrf.mxu1  ;;  %v13883_v4 = vpop.f32.mrf.mxu0 }
 0x4b2   : > { %8805 = vmatpush3.msra.mxu0 %v6876_v0  ;;  %9615 = vmatprep.subr.mxu1 %v6909_v26  ;;  %v6889_v0 = vld [vmem:[#allocation7 + $0x3d8] sm:$0xff] }
 0x4b3   : > { %6525 = vmatmul.mubr.f32.vlgmr.msra.gmra.mxu1 %v5966_v6  ;;  %9595 = vmatmul.mubr.f32.gmra.mxu0 %v6017_v3  ;;  %v8287_v33 = vpop.f32.mrf.mxu1  ;;  %v13885_v45 = vpop.f32.mrf.mxu0  ;;  %v6907_v3 = vld [vmem:[#allocation7 + $0x468] sm:$0xff] }
 0x4b4   : > { %8806 = vmatprep.subr.mxu0 %v6891_v13  ;;  %9616 = vmatpush3.msra.mxu1 %v6909_v26  ;;  %v13887_v16 = vadd.f32 %v8287_v33, %v8286_v17  ;;  %v6019_v26 = vmul.f32 %v15295_v50, %v13681_v15  ;;  %v6888_v17 = vld [vmem:[#allocation7 + $0x3d0] sm:$0xff] }
 0x4b5   : > { %6529 = vmatprep.mubr.f32.mxu1 %v15273_v57  ;;  %9597 = vmatprep.mubr.f32.mxu0 %v13677_v42  ;;  %v8289_v38 = vpop.f32.mrf.mxu1  ;;  %v13891_v7 = vpop.f32.mrf.mxu0  ;;  %v6873_v57 = vld [vmem:[#allocation7 + $0x358] sm:$0xff] }
 0x4b6   : > { %8807 = vmatpush3.msra.mxu0 %v6875_v11  ;;  %9617 = vmatprep.subr.mxu1 %v6908_v63 }
 0x4b7   : > { %8808 = vmatprep.subr.mxu0 %v6890_v48  ;;  %6530 = vmatmul.mubr.f32.gmra.mxu1 %v15276_v61  ;;  %v8290_v5 = vpop.f32.mrf.mxu1  ;;  %v13896_v6 = vpop.f32.mrf.mxu0  ;;  %v6872_v61 = vld [vmem:[#allocation7 + $0x350] sm:$0xff]  ;;  %v5968_v48 = vmul.f32 %v15221_v47, %v13609_v36  ;;  %v6886_v36 = vld [vmem:[#allocation7 + $0x3c0] sm:$0xff] }
 0x4b8   : > { %8809 = vmatpush3.msra.mxu0 %v6874_v37  ;;  %9618 = vmatpush3.msra.mxu1 %v6908_v63  ;;  %v13898_v13 = vadd.f32 %v8290_v5, %v8289_v38  ;;  %v6887_v63 = vld [vmem:[#allocation7 + $0x3c8] sm:$0xff]  ;;  %v6906_v5 = vld [vmem:[#allocation7 + $0x460] sm:$0xff] }
 0x4b9   : > { %9598 = vmatmul.mubr.f32.gmra.mxu0 %v6019_v26  ;;  %8810 = vmatprep.subr.mxu0 %v6889_v0  ;;  %v8292_v11 = vpop.f32.mrf.mxu1  ;;  %v13900_v33 = vpop.f32.mrf.mxu0  ;;  %v6021_v0 = vmul.f32 %v15300_v1, %v13701_v25 }
 0x4ba   : > { %15323 = vst [vmem:[#allocation14_spill] sm:$0xff] %v13898_v13  ;;  %15324 = vst [vmem:[#allocation26_spill] sm:$0xff] %v13900_v33  ;;  %6534 = vmatprep.mubr.f32.mxu1 %v13355_v23  ;;  %9600 = vmatprep.mubr.f32.mxu0 %v13706_v43  ;;  %v6871_v23 = vld [vmem:[#allocation7 + $0x348] sm:$0xff] }
 0x4bb   : > { %8811 = vmatpush3.msra.mxu0 %v6873_v57  ;;  %9619 = vmatprep.subr.mxu1 %v6907_v3  ;;  %v8293_v37 = vpop.f32.mrf.mxu1  ;;  %v13906_v38 = vpop.f32.mrf.mxu0  ;;  %v6870_v57 = vld [vmem:[#allocation7 + $0x340] sm:$0xff] }
 0x4bc   : > { %15325 = vst [vmem:[#allocation97_spill] sm:$0xff] %v13906_v38  ;;  %8812 = vmatprep.subr.mxu0 %v6888_v17  ;;  %6535 = vmatmul.mubr.f32.gmra.mxu1 %v5968_v48  ;;  %v13910_v26 = vadd.f32 %v8293_v37, %v8292_v11  ;;  %v6885_v11 = vld [vmem:[#allocation7 + $0x3b8] sm:$0xff] }
 0x4bd   : > { %8813 = vmatpush3.msra.mxu0 %v6872_v61  ;;  %9620 = vmatpush3.msra.mxu1 %v6907_v3  ;;  %v8295_v13 = vpop.f32.mrf.mxu1  ;;  %v13912_v33 = vpop.f32.mrf.mxu0  ;;  %v6023_v61 = vmul.f32 %v15302_v46, %v13730_v53  ;;  %v15377_v38 = vld [vmem:[#allocation20_spill] sm:$0xff] }
 0x4be   : > { %15326 = vst [vmem:[#allocation50_spill] sm:$0xff] %v13910_v26  ;;  %15327 = vst [vmem:[#allocation25_spill] sm:$0xff] %v13912_v33  ;;  %9601 = vmatmul.mubr.f32.gmra.mxu0 %v6021_v0  ;;  %8814 = vmatprep.subr.mxu0 %v6887_v63  ;;  %v6905_v0 = vld [vmem:[#allocation7 + $0x458] sm:$0xff] }
 0x4bf   : > { %6539 = vmatprep.mubr.f32.mxu1 %v13343_v14  ;;  %9603 = vmatprep.mubr.f32.mxu0 %v13737_v29  ;;  %v8296_v17 = vpop.f32.mrf.mxu1  ;;  %v13916_v48 = vpop.f32.mrf.mxu0  ;;  %v6869_v14 = vld [vmem:[#allocation7 + $0x338] sm:$0xff] }
 0x4c0   : > { %15328 = vst [vmem:[#allocation55_spill] sm:$0xff] %v13916_v48  ;;  %8815 = vmatpush3.msra.mxu0 %v6871_v23  ;;  %9621 = vmatprep.subr.mxu1 %v6906_v5  ;;  %v13918_v3 = vadd.f32 %v8296_v17, %v8295_v13  ;;  %v6884_v23 = vld [vmem:[#allocation7 + $0x3b0] sm:$0xff]  ;;  %v5970_v13 = vmul.f32 %v15238_v22, %v13532_v56  ;;  %v6882_v56 = vld [vmem:[#allocation7 + $0x3a0] sm:$0xff] }
 0x4c1   : > { %8816 = vmatprep.subr.mxu0 %v6886_v36  ;;  %6540 = vmatmul.mubr.f32.gmra.mxu1 %v13526_v49  ;;  %v8298_v63 = vpop.f32.mrf.mxu1  ;;  %v13923_v37 = vpop.f32.mrf.mxu0  ;;  %v6868_v49 = vld [vmem:[#allocation7 + $0x330] sm:$0xff] }
 0x4c2   : > { %15329 = vst [vmem:[#allocation105_spill] sm:$0xff] %v13918_v3  ;;  %15330 = vst [vmem:[#allocation61_spill] sm:$0xff] %v13923_v37  ;;  %8817 = vmatpush3.msra.mxu0 %v6870_v57  ;;  %9622 = vmatpush3.msra.mxu1 %v6906_v5  ;;  %v6883_v5 = vld [vmem:[#allocation7 + $0x3a8] sm:$0xff]  ;;  %v6904_v3 = vld [vmem:[#allocation7 + $0x450] sm:$0xff] }
 0x4c3   : > { %9604 = vmatmul.mubr.f32.gmra.mxu0 %v6023_v61  ;;  %8818 = vmatprep.subr.mxu0 %v6885_v11  ;;  %v8299_v26 = vpop.f32.mrf.mxu1  ;;  %v13925_v48 = vpop.f32.mrf.mxu0  ;;  %v6025_v11 = vmul.f32 %v15309_v24, %v13756_v59  ;;  %v6867_v61 = vld [vmem:[#allocation7 + $0x328] sm:$0xff] }
 0x4c4   : > { %15331 = vst [vmem:[#allocation77_spill] sm:$0xff] %v13925_v48  ;;  %6544 = vmatprep.mubr.f32.mxu1 %v13493_v18  ;;  %9606 = vmatprep.mubr.f32.mxu0 %v13761_v28  ;;  %v13931_v36 = vadd.f32 %v8299_v26, %v8298_v63  ;;  %v6866_v63 = vld [vmem:[#allocation7 + $0x320] sm:$0xff] }
 0x4c5   : > { %8819 = vmatpush3.msra.mxu0 %v6869_v14  ;;  %9623 = vmatprep.subr.mxu1 %v6905_v0  ;;  %v8301_v57 = vpop.f32.mrf.mxu1  ;;  %v13933_v17 = vpop.f32.mrf.mxu0 }
 0x4c6   : > { %15332 = vst [vmem:[#allocation87_spill] sm:$0xff] %v13931_v36  ;;  %15333 = vst [vmem:[#allocation64_spill] sm:$0xff] %v13933_v17  ;;  %8820 = vmatprep.subr.mxu0 %v6884_v23  ;;  %6545 = vmatmul.mubr.f32.gmra.mxu1 %v5970_v13 }
 0x4c7   : > { %8821 = vmatpush3.msra.mxu0 %v6868_v49  ;;  %9624 = vmatpush3.msra.mxu1 %v6905_v0  ;;  %v8302_v48 = vpop.f32.mrf.mxu1  ;;  %v13937_v37 = vpop.f32.mrf.mxu0  ;;  %v6881_v0 = vld [vmem:[#allocation7 + $0x398] sm:$0xff] }
 0x4c8   : > { %15334 = vst [vmem:[#allocation44_spill] sm:$0xff] %v13937_v37  ;;  %9607 = vmatmul.mubr.f32.gmra.mxu0 %v6025_v11  ;;  %8822 = vmatprep.subr.mxu0 %v6883_v5  ;;  %v8303_v26 = vadd.f32 %v8302_v48, %v8301_v57  ;;  %v6027_v48 = vmul.f32 %v15192_v10, %v13793_v62  ;;  %v6865_v57 = vld [vmem:[#allocation7 + $0x318] sm:$0xff]  ;;  %v6903_v11 = vld [vmem:[#allocation7 + $0x448] sm:$0xff] }
 0x4c9   : > { %6549 = vmatprep.mubr.f32.mxu1 %v13535_v2  ;;  %9609 = vmatprep.mubr.f32.mxu0 %v13800_v51  ;;  %v8304_v14 = vpop.f32.mrf.mxu1  ;;  %v13941_v23 = vpop.f32.mrf.mxu0 }
 0x4ca   : > { %15335 = vst [vmem:[#allocation103_spill] sm:$0xff] %v13941_v23  ;;  %8823 = vmatpush3.msra.mxu0 %v6867_v61  ;;  %9625 = vmatprep.subr.mxu1 %v6904_v3  ;;  %v13944_v49 = vadd.f32 %v13709_v8, %v8303_v26  ;;  %v6880_v61 = vld [vmem:[#allocation7 + $0x390] sm:$0xff] }
 0x4cb   : > { %8824 = vmatprep.subr.mxu0 %v6882_v56  ;;  %6550 = vmatmul.mubr.f32.gmra.mxu1 %v13560_v27  ;;  %v8305_v13 = vpop.f32.mrf.mxu1  ;;  %v13949_v5 = vpop.f32.mrf.mxu0  ;;  %v15339_v8 = vld [vmem:[#allocation59_spill] sm:$0xff] }
 0x4cc   : > { %15336 = vst [vmem:[#allocation106_spill] sm:$0xff] %v13944_v49  ;;  %15337 = vst [vmem:[#allocation107_spill] sm:$0xff] %v13949_v5  ;;  %8825 = vmatpush3.msra.mxu0 %v6866_v63  ;;  %9626 = vmatpush3.msra.mxu1 %v6904_v3  ;;  %v13951_v23 = vadd.f32 %v8305_v13, %v8304_v14  ;;  %v6013_v56 = vsel %vm1882_vm11, %v13809_v9, %v15339_v8  ;;  %v6864_v3 = vld [vmem:[#allocation7 + $0x310] sm:$0xff]  ;;  %v6879_v14 = vld [vmem:[#allocation7 + $0x388] sm:$0xff] }
 0x4cd   : > { %9610 = vmatmul.mubr.f32.gmra.mxu0 %v6027_v48  ;;  %8826 = vmatprep.subr.mxu0 %v6881_v0  ;;  %v8307_v26 = vpop.f32.mrf.mxu1  ;;  %v13957_v49 = vpop.f32.mrf.mxu0  ;;  %v5972_v63 = vmul.f32 %v15248_v35, %v13564_v19  ;;  %v6029_v9 = vmul.f32 %v15203_v44, %v6013_v56  ;;  %v6863_v13 = vld [vmem:[#allocation7 + $0x308] sm:$0xff]  ;;  %v6878_v5 = vld [vmem:[#allocation7 + $0x380] sm:$0xff]  ;;  %v15345_v56 = vld [vmem:[#allocation67_spill] sm:$0xff] }
 0x4ce   : > { %15338 = vst [vmem:[#allocation33_spill] sm:$0xff] %v13951_v23  ;;  %15340 = vst [vmem:[#allocation104_spill] sm:$0xff] %v13957_v49  ;;  %6554 = vmatprep.mubr.f32.mxu1 %v13519_v55  ;;  %9612 = vmatprep.mubr.f32.mxu0 %v13824_v52  ;;  %v15342_v23 = vld [vmem:[#allocation70_spill] sm:$0xff] }
 0x4cf   : > { %8827 = vmatpush3.msra.mxu0 %v6865_v57  ;;  %9627 = vmatprep.subr.mxu1 %v6903_v11  ;;  %v8308_v0 = vpop.f32.mrf.mxu1  ;;  %v13963_v48 = vpop.f32.mrf.mxu0  ;;  %v6797_v49 = vsel %vm1833_vm4, %v15342_v23, %v13509_v32 }
 0x4d0   : > { %15341 = vst [vmem:[#allocation15_spill] sm:$0xff] %v13963_v48  ;;  %8828 = vmatprep.subr.mxu0 %v6880_v61  ;;  %6555 = vmatmul.mubr.f32.gmra.mxu1 %v5972_v63  ;;  %v8309_v8 = vadd.f32 %v8308_v0, %v8307_v26  ;;  %v6862_v48 = vld [vmem:[#allocation7 + $0x300] sm:$0xff]  ;;  %v6798_v32 = vmul.f32 %v15214_v39, %v6797_v49 }
 0x4d1   : > { %8829 = vmatpush3.msra.mxu0 %v6864_v3  ;;  %9628 = vmatpush3.msra.mxu1 %v6903_v11  ;;  %v8310_v57 = vpop.f32.mrf.mxu1  ;;  %v13970_v36 = vpop.f32.mrf.mxu0  ;;  %v6902_v61 = vld [vmem:[#allocation7 + $0x440] sm:$0xff]  ;;  %v6901_v3 = vld [vmem:[#allocation7 + $0x438] sm:$0xff] }
 0x4d2   : > { %15343 = vst [vmem:[#allocation92_spill] sm:$0xff] %v13970_v36  ;;  %9613 = vmatmul.mubr.f32.gmra.mxu0 %v6029_v9  ;;  %8830 = vmatprep.subr.mxu0 %v6879_v14  ;;  %v13973_v63 = vadd.f32 %v13744_v30, %v8309_v8  ;;  %v15349_v30 = vld [vmem:[#allocation75_spill] sm:$0xff]  ;;  %v15352_v39 = vld [vmem:[#allocation89_spill] sm:$0xff] }
 0x4d3   : > { %6559 = vmatprep.mubr.f32.mxu1 %v15345_v56  ;;  %8831 = vmatpush3.msra.mxu0 %v6863_v13  ;;  %v8311_v26 = vpop.f32.mrf.mxu1  ;;  %v13976_v0 = vpop.f32.mrf.mxu0  ;;  %v15350_v13 = vld [vmem:[#allocation83_spill] sm:$0xff] }
 0x4d4   : > { %15344 = vst [vmem:[#allocation28_spill] sm:$0xff] %v13973_v63  ;;  %15346 = vst [vmem:[#allocation80_spill] sm:$0xff] %v13976_v0  ;;  %6974 = vmatprep.mubr.f32.mxu0 %v13493_v18  ;;  %8832 = vmatprep.subr.mxu0 %v6878_v5  ;;  %v13980_v11 = vadd.f32 %v8311_v26, %v8310_v57  ;;  %v15353_v18 = vld [vmem:[#allocation17_spill] sm:$0xff]  ;;  %v15361_v0 = vld [vmem:[#allocation51_spill] sm:$0xff] }
 0x4d5   : > { %8833 = vmatpush3.msra.mxu0 %v6862_v48  ;;  %9629 = vmatprep.subr.mxu1 %v6902_v61  ;;  %v8313_v14 = vpop.f32.mrf.mxu1  ;;  %v13982_v9 = vpop.f32.mrf.mxu0  ;;  %v5974_v49 = vmul.f32 %v15353_v18, %v15352_v39  ;;  %v6900_v48 = vld [vmem:[#allocation7 + $0x430] sm:$0xff]  ;;  %v6804_v17 = vmul.f32 %v15248_v35, %v15361_v0  ;;  %v6894_v35 = vld [vmem:[#allocation7 + $0x400] sm:$0xff] }
 0x4d6   : > { %15347 = vst [vmem:[#allocation111_spill] sm:$0xff] %v13980_v11  ;;  %15348 = vst [vmem:[#allocation62_spill] sm:$0xff] %v13982_v9  ;;  %6560 = vmatmul.mubr.f32.gmra.mxu1 %v15349_v30  ;;  %6975 = vmatmul.mubr.f32.vlgmr.msra.gmra.mxu0 %v6798_v32  ;;  %v15355_v11 = vld [vmem:[#allocation40_spill] sm:$0xff]  ;;  %v15369_v36 = vld [vmem:[#allocation19_spill] sm:$0xff] }
 0x4d7   : > { %9630 = vmatpush3.msra.mxu1 %v6902_v61  ;;  %6564 = vmatprep.mubr.f32.mxu1 %v15350_v13  ;;  %v8314_v8 = vpop.f32.mrf.mxu1  ;;  %v13986_v63 = vpop.f32.mrf.mxu0  ;;  %v15354_v61 = vld [vmem:[#allocation41_spill] sm:$0xff] }
 0x4d8   : > { %15351 = vst [vmem:[#allocation88_spill] sm:$0xff] %v13986_v63  ;;  %6979 = vmatprep.mubr.f32.mxu0 %v13535_v2  ;;  %9631 = vmatprep.subr.mxu1 %v6901_v3  ;;  %v8315_v5 = vadd.f32 %v8314_v8, %v8313_v14  ;;  %v6899_v8 = vld [vmem:[#allocation7 + $0x428] sm:$0xff] }
 0x4d9   : > { %9632 = vmatpush3.msra.mxu1 %v6901_v3  ;;  %v8316_v57 = vpop.f32.mrf.mxu1  ;;  %v13991_v26 = vpop.f32.mrf.mxu0  ;;  %v6800_v3 = vmul.f32 %v15221_v47, %v13564_v19  ;;  %v15362_v47 = vld [vmem:[#allocation18_spill] sm:$0xff] }
 0x4da   : > { %6565 = vmatmul.mubr.f32.gmra.mxu1 %v5974_v49  ;;  %6980 = vmatmul.mubr.f32.gmra.mxu0 %v13560_v27  ;;  %v13995_v32 = vadd.f32 %v15354_v61, %v8315_v5  ;;  %v15358_v5 = vld [vmem:[#allocation30_spill] sm:$0xff]  ;;  %v5976_v19 = vmul.f32 %v15362_v47, %v15361_v0 }
 0x4db   : > { %6569 = vmatprep.mubr.f32.mxu1 %v15355_v11  ;;  %6984 = vmatprep.mubr.f32.mxu0 %v13519_v55  ;;  %v8317_v2 = vpop.f32.mrf.mxu1  ;;  %v13999_v63 = vpop.f32.mrf.mxu0  ;;  %v15359_v61 = vld [vmem:[#allocation74_spill] sm:$0xff] }
 0x4dc   : > { %9633 = vmatprep.subr.mxu1 %v6900_v48  ;;  %v14003_v14 = vadd.f32 %v8317_v2, %v8316_v57 }
 0x4dd   : > { %9634 = vmatpush3.msra.mxu1 %v6900_v48  ;;  %v8319_v49 = vpop.f32.mrf.mxu1  ;;  %v14005_v27 = vpop.f32.mrf.mxu0  ;;  %v6898_v48 = vld [vmem:[#allocation7 + $0x420] sm:$0xff] }
 0x4de   : > { %15356 = vst [vmem:[#allocation109_spill] sm:$0xff] %v14003_v14  ;;  %15357 = vst [vmem:[#allocation16_spill] sm:$0xff] %v14005_v27  ;;  %6570 = vmatmul.mubr.f32.gmra.mxu1 %v15358_v5  ;;  %6985 = vmatmul.mubr.f32.gmra.mxu0 %v6800_v3  ;;  %v15363_v3 = vld [vmem:[#allocation39_spill] sm:$0xff]  ;;  %v15364_v27 = vld [vmem:[#allocation46_spill] sm:$0xff] }
 0x4df   : > { %6574 = vmatprep.mubr.f32.mxu1 %v15359_v61  ;;  %6989 = vmatprep.mubr.f32.mxu0 %v15345_v56  ;;  %v8320_v55 = vpop.f32.mrf.mxu1  ;;  %v14010_v9 = vpop.f32.mrf.mxu0 }
 0x4e0   : > { %15360 = vst [vmem:[#allocation47_spill] sm:$0xff] %v14010_v9  ;;  %9635 = vmatprep.subr.mxu1 %v6899_v8  ;;  %v8321_v57 = vadd.f32 %v8320_v55, %v8319_v49  ;;  %v6897_v49 = vld [vmem:[#allocation7 + $0x418] sm:$0xff] }
 0x4e1   : > { %9636 = vmatpush3.msra.mxu1 %v6899_v8  ;;  %v14014_v2 = vpop.f32.mrf.mxu1  ;;  %v8431_v56 = vpop.f32.mrf.mxu0  ;;  %v6802_v8 = vmul.f32 %v15238_v22, %v15352_v39  ;;  %v6896_v22 = vld [vmem:[#allocation7 + $0x410] sm:$0xff] }
 0x4e2   : > { %6575 = vmatmul.mubr.f32.gmra.mxu1 %v5976_v19  ;;  %6990 = vmatmul.mubr.f32.gmra.mxu0 %v15349_v30  ;;  %v14018_v14 = vadd.f32 %v15363_v3, %v8321_v57  ;;  %v15366_v19 = vld [vmem:[#allocation95_spill] sm:$0xff]  ;;  %v15367_v30 = vld [vmem:[#allocation57_spill] sm:$0xff]  ;;  %v15368_v3 = vld [vmem:[#allocation58_spill] sm:$0xff] }
 0x4e3   : > { %6579 = vmatprep.mubr.f32.mxu1 %v15364_v27  ;;  %6994 = vmatprep.mubr.f32.mxu0 %v15350_v13  ;;  %v14022_v9 = vpop.f32.mrf.mxu1  ;;  %v8432_v57 = vpop.f32.mrf.mxu0  ;;  %v5978_v37 = vmul.f32 %v15369_v36, %v15368_v3 }
 0x4e4   : > { %9637 = vmatprep.subr.mxu1 %v6898_v48 }
 0x4e5   : > { %9638 = vmatpush3.msra.mxu1 %v6898_v48  ;;  %v14026_v55 = vpop.f32.mrf.mxu1  ;;  %v15371_v48 = vld [vmem:[#allocation53_spill] sm:$0xff] }
 0x4e6   : > { %15365 = vst [vmem:[#allocation34_spill] sm:$0xff] %v14026_v55  ;;  %6580 = vmatmul.mubr.f32.gmra.mxu1 %v15366_v19  ;;  %6995 = vmatmul.mubr.f32.gmra.mxu0 %v6802_v8  ;;  %v14040_v8 = vpop.f32.mrf.mxu0 }
 0x4e7   : > { %6584 = vmatprep.mubr.f32.mxu1 %v15367_v30  ;;  %6999 = vmatprep.mubr.f32.mxu0 %v15355_v11  ;;  %v14031_v13 = vpop.f32.mrf.mxu1 }
 0x4e8   : > { %9639 = vmatprep.subr.mxu1 %v6897_v49 }
 0x4e9   : > { %9640 = vmatpush3.msra.mxu1 %v6897_v49  ;;  %v14035_v39 = vpop.f32.mrf.mxu1  ;;  %v6895_v49 = vld [vmem:[#allocation7 + $0x408] sm:$0xff] }
 0x4ea   : > { %15370 = vst [vmem:[#allocation113_spill] sm:$0xff] %v14035_v39  ;;  %6585 = vmatmul.mubr.f32.gmra.mxu1 %v5978_v37  ;;  %7000 = vmatmul.mubr.f32.gmra.mxu0 %v15358_v5  ;;  %v15374_v39 = vld [vmem:[#allocation37_spill] sm:$0xff]  ;;  %v14051_v5 = vpop.f32.mrf.mxu0 }
 0x4eb   : > { %6589 = vmatprep.mubr.f32.mxu1 %v15371_v48  ;;  %7004 = vmatprep.mubr.f32.mxu0 %v15359_v61  ;;  %v14042_v11 = vpop.f32.mrf.mxu1  ;;  %v15375_v37 = vld [vmem:[#allocation93_spill] sm:$0xff] }
 0x4ec   : > { %15372 = vst [vmem:[#allocation43_spill] sm:$0xff] %v14042_v11  ;;  %9641 = vmatprep.subr.mxu1 %v6896_v22  ;;  %v15376_v11 = vld [vmem:[#allocation101_spill] sm:$0xff] }
 0x4ed   : > { %9642 = vmatpush3.msra.mxu1 %v6896_v22  ;;  %v14046_v33 = vpop.f32.mrf.mxu1  ;;  %v5980_v55 = vmul.f32 %v15377_v38, %v15376_v11 }
 0x4ee   : > { %15373 = vst [vmem:[#allocation78_spill] sm:$0xff] %v14046_v33  ;;  %6590 = vmatmul.mubr.f32.gmra.mxu1 %v15374_v39  ;;  %7005 = vmatmul.mubr.f32.gmra.mxu0 %v6804_v17  ;;  %v15379_v17 = vld [vmem:[#allocation38_spill] sm:$0xff]  ;;  %v8427_v33 = vadd.f32 %v13999_v63, %v13991_v26  ;;  %v6847_v63 = vmul.f32 %v15285_v58, %v13681_v15 }
 0x4ef   : > { %6594 = vmatprep.mubr.f32.mxu1 %v15375_v37  ;;  %7009 = vmatprep.mubr.f32.mxu0 %v15364_v27  ;;  %v14053_v61 = vpop.f32.mrf.mxu1  ;;  %v14062_v27 = vpop.f32.mrf.mxu0  ;;  %v8433_v26 = vadd.f32 %v8432_v57, %v8431_v56  ;;  %v6808_v58 = vmul.f32 %v15362_v47, %v15376_v11  ;;  %v6849_v15 = vmul.f32 %v15292_v12, %v13701_v25  ;;  %v15381_v25 = vld [vmem:[#allocation108_spill] sm:$0xff] }
 0x4f0   : > { %9643 = vmatprep.subr.mxu1 %v6895_v49  ;;  %v6851_v57 = vmul.f32 %v15295_v50, %v13730_v53  ;;  %v15382_v50 = vld [vmem:[#allocation84_spill] sm:$0xff] }
 0x4f1   : > { %9644 = vmatpush3.msra.mxu1 %v6895_v49  ;;  %v14057_v0 = vpop.f32.mrf.mxu1  ;;  %v6806_v49 = vmul.f32 %v15353_v18, %v15368_v3  ;;  %v5224_v18 = vadd.f32 %v8427_v33, %v13995_v32  ;;  %v5234_v33 = vadd.f32 %v8433_v26, %v14018_v14  ;;  %v6810_v14 = vmul.f32 %v15369_v36, %v15381_v25  ;;  %v15384_v36 = vld [vmem:[#allocation60_spill] sm:$0xff]  ;;  %v15389_v26 = vld [vmem:[#allocation98_spill] sm:$0xff]  ;;  %v15393_v25 = vld [vmem:[#allocation69_spill] sm:$0xff] }
 0x4f2   : > { %15378 = vst [vmem:[#allocation63_spill] sm:$0xff] %v14057_v0  ;;  %6595 = vmatmul.mubr.f32.gmra.mxu1 %v5980_v55  ;;  %7010 = vmatmul.mubr.f32.gmra.mxu0 %v15366_v19  ;;  %v15380_v55 = vld [vmem:[#allocation76_spill] sm:$0xff]  ;;  %v14075_v19 = vpop.f32.mrf.mxu0 }
 0x4f3   : > { %6599 = vmatprep.mubr.f32.mxu1 %v15379_v17  ;;  %7014 = vmatprep.mubr.f32.mxu0 %v15367_v30  ;;  %v14064_v22 = vpop.f32.mrf.mxu1 }
 0x4f4   : > { %9645 = vmatprep.subr.mxu1 %v6894_v35 }
 0x4f5   : > { %9646 = vmatpush3.msra.mxu1 %v6894_v35  ;;  %v14070_v0 = vpop.f32.mrf.mxu1 }
 0x4f6   : > { %6600 = vmatmul.mubr.f32.gmra.mxu1 %v15380_v55  ;;  %7015 = vmatmul.mubr.f32.gmra.mxu0 %v6806_v49  ;;  %v9854_v49 = vld [vmem:[#allocation2] sm:$0xff] }
 0x4f7   : > { %7019 = vmatprep.mubr.f32.mxu0 %v15371_v48  ;;  %9647 = vmatprep.mubr.f32.mxu1 %v13677_v42  ;;  %v14077_v30 = vpop.f32.mrf.mxu1  ;;  %v14087_v42 = vpop.f32.mrf.mxu0 }
 0x4f9   : > { %v9443_v3 = vpop.f32.mrf.mxu1 }
 0x4fa   : > { %7020 = vmatmul.mubr.f32.gmra.mxu0 %v15374_v39  ;;  %9648 = vmatmul.mubr.f32.vlgmr.msra.gmra.mxu1 %v6847_v63  ;;  %v14083_v35 = vadd.f32 %v9443_v3, %v5224_v18  ;;  %v8391_v18 = vadd.f32 %v15389_v26, %v13858_v20 }
 0x4fb   : > { %7024 = vmatprep.mubr.f32.mxu0 %v15375_v37  ;;  %9650 = vmatprep.mubr.f32.mxu1 %v13706_v43  ;;  %v14089_v48 = vpop.f32.mrf.mxu1  ;;  %v14100_v43 = vpop.f32.mrf.mxu0  ;;  %v15386_v37 = vld [vmem:[#allocation29_spill] sm:$0xff] }
 0x4fd   : > { %v9446_v32 = vpop.f32.mrf.mxu1  ;;  %v14107_v12 = vpop.f32.mrf.mxu0 }
 0x4fe   : > { %7025 = vmatmul.mubr.f32.gmra.mxu0 %v6808_v58  ;;  %9651 = vmatmul.mubr.f32.gmra.mxu1 %v6849_v15  ;;  %v14096_v56 = vadd.f32 %v9446_v32, %v5234_v33  ;;  %v15390_v58 = vld [vmem:[#allocation54_spill] sm:$0xff]  ;;  %v15391_v15 = vld [vmem:[#allocation13_spill] sm:$0xff] }
 0x4ff   : > { %7029 = vmatprep.mubr.f32.mxu0 %v15379_v17  ;;  %9653 = vmatprep.mubr.f32.mxu1 %v13737_v29  ;;  %v6853_v29 = vmul.f32 %v15300_v1, %v13756_v59  ;;  %v14113_v47 = vpop.f32.mrf.mxu1  ;;  %v14117_v53 = vpop.f32.mrf.mxu0  ;;  %v6783_v1 = vsel %vm1833_vm4, %v15384_v36, %v15342_v23  ;;  %v15385_v59 = vld [vmem:[#allocation48_spill] sm:$0xff]  ;;  %v15387_v17 = vld [vmem:[#allocation90_spill] sm:$0xff]  ;;  %v6831_v33 = vsel %vm1882_vm11, %v15391_v15, %v15390_v58 }
 0x500   : > { %v8394_v36 = vadd.f32 %v13875_v54, %v13868_v31 }
 0x502   : > { %7030 = vmatmul.mubr.f32.gmra.mxu0 %v15380_v55  ;;  %9654 = vmatmul.mubr.f32.gmra.mxu1 %v6851_v57  ;;  %v15392_v57 = vld [vmem:[#allocation82_spill] sm:$0xff] }
 0x503   : > { %7034 = vmatprep.mubr.f32.mxu0 %v13742_v34  ;;  %9656 = vmatprep.mubr.f32.mxu1 %v13761_v28  ;;  %v6855_v34 = vmul.f32 %v15302_v46, %v13793_v62  ;;  %v15383_v28 = vld [vmem:[#allocation99_spill] sm:$0xff]  ;;  %v14131_v46 = vpop.f32.mrf.mxu0  ;;  %v6812_v62 = vmul.f32 %v15377_v38, %v6783_v1  ;;  %v5019_v38 = vadd.f32 %v15393_v25, %v15392_v57 }
 0x504   : > { %v8388_v39 = vadd.f32 %v15383_v28, %v13832_v60  ;;  %v15388_v60 = vld [vmem:[#allocation81_spill] sm:$0xff] }
 0x505   : > { %v6857_v55 = vmul.f32 %v15309_v24, %v15388_v60  ;;  %v5164_v1 = vadd.f32 %v8391_v18, %v5019_v38  ;;  %v5850_v18 = vld [vmem:[%s11103_s10 + $0x8] sm:$0xff]  ;;  %v15398_v38 = vld [vmem:[#allocation45_spill] sm:$0xff] }
 0x506   : > { %7035 = vmatmul.mubr.f32.gmra.mxu0 %v6810_v14  ;;  %9657 = vmatmul.mubr.f32.gmra.mxu1 %v6853_v29  ;;  %v15394_v14 = vld [vmem:[#allocation100_spill] sm:$0xff]  ;;  %v14146_v29 = vpop.f32.mrf.mxu0 }
 0x507   : > { %7039 = vmatprep.mubr.f32.mxu0 %v15382_v50  ;;  %9659 = vmatprep.mubr.f32.mxu1 %v13800_v51  ;;  %v5014_v51 = vadd.f32 %v15387_v17, %v15386_v37  ;;  %v6859_v50 = vmul.f32 %v15192_v10, %v6831_v33  ;;  %v14161_v10 = vld [vmem:[%s14555_s7 + $0x2] ss:$0 sm:$0xff]  ;;  %v15396_v37 = vld [vmem:[#allocation86_spill] sm:$0xff]  ;;  %v5309_v17 = vadd.f32 %v14014_v2, %v5164_v1 }
 0x508   : > { %v5024_v21 = vadd.f32 %v13866_v40, %v15396_v37  ;;  %v14166_v31 = vpop.f32.mrf.mxu0  ;;  %v15397_v2 = vld [vmem:[#allocation85_spill] sm:$0xff]  ;;  %v8400_v33 = vadd.f32 %v13896_v6, %v13891_v7  ;;  %v15400_v7 = vld [vmem:[#allocation26_spill] sm:$0xff]  ;;  %v5852_v37 = vld [vmem:[%s11103_s10 + $0x18] sm:$0xff] }
 0x509   : > { %v8498_v11 = vpop.f32.mrf.mxu1  ;;  %v5159_v3 = vadd.f32 %v8388_v39, %v5014_v51  ;;  %v8397_v51 = vadd.f32 %v13885_v45, %v13883_v4  ;;  %v5029_v26 = vadd.f32 %v15397_v2, %v13878_v41  ;;  %v15401_v6 = vld [vmem:[#allocation97_spill] sm:$0xff] }
 0x50a   : > { %7040 = vmatmul.mubr.f32.gmra.mxu0 %v15385_v59  ;;  %9660 = vmatmul.mubr.f32.gmra.mxu1 %v6855_v34  ;;  %v15395_v34 = vld [vmem:[#allocation56_spill] sm:$0xff]  ;;  %v5169_v60 = vadd.f32 %v8394_v36, %v5024_v21 }
 0x50b   : > { %9662 = vmatprep.mubr.f32.mxu1 %v13824_v52  ;;  %7044 = vmatprep.mubr.f32.mxu0 %v9854_v49  ;;  %v8499_v63 = vpop.f32.mrf.mxu1  ;;  %v5304_v24 = vadd.f32 %v14022_v9, %v5159_v3  ;;  %v6845_v28 = vsel %vm1882_vm11, %v15390_v58, %v15395_v34  ;;  %v5174_v45 = vadd.f32 %v8397_v51, %v5029_v26 }
 0x50c   : > { %v8500_v52 = vadd.f32 %v8499_v63, %v8498_v11  ;;  %v5849_v11 = vld [vmem:[%s11103_s10] sm:$0xff]  ;;  %v8403_v34 = vadd.f32 %v15401_v6, %v15400_v7  ;;  %v5854_v6 = vld [vmem:[%s11103_s10 + $0x28] sm:$0xff] }
 0x50d   : > { %v8501_v32 = vpop.f32.mrf.mxu1 }
 0x50e   : > { %7045 = vmatmul.mubr.f32.gmra.mxu0 %v6812_v62  ;;  %9663 = vmatmul.mubr.f32.gmra.mxu1 %v6857_v55  ;;  %v5755_v20 = vadd.f32 %v8500_v52, %v14051_v5 }
 0x50f   : > { %9665 = vmatprep.mubr.f32.mxu1 %v15394_v14  ;;  %7049 = vmatprep.mubr.f32.mxu0 %v9854_v49  ;;  %v8502_v39 = vpop.f32.mrf.mxu1  ;;  %v6861_v49 = vmul.f32 %v15203_v44, %v6845_v28  ;;  %v15399_v14 = vld [vmem:[#allocation34_spill] sm:$0xff] }
 0x510   : > { %v5833_v9 = vadd.f32 %v5755_v20, %v5304_v24  ;;  %v8503_v59 = vadd.f32 %v8502_v39, %v8501_v32  ;;  %v5034_v24 = vadd.f32 %v13887_v16, %v15398_v38  ;;  %v15402_v16 = vld [vmem:[#allocation14_spill] sm:$0xff] }
 0x511   : > { %v8504_v5 = vpop.f32.mrf.mxu1 }
 0x512   : > { %7050 = vmatmul.mubr.f32.gmra.mxu0 %v15342_v23  ;;  %9666 = vmatmul.mubr.f32.gmra.mxu1 %v6859_v50  ;;  %v5865_v54 = vadd.f32 %v5849_v11, %v5833_v9  ;;  %v5760_v23 = vadd.f32 %v14040_v8, %v8503_v59  ;;  %v5314_v8 = vadd.f32 %v14031_v13, %v5169_v60  ;;  %v5851_v13 = vld [vmem:[%s11103_s10 + $0x10] sm:$0xff]  ;;  %v15403_v11 = vld [vmem:[#allocation36_spill] sm:$0xff] }
 0x513   : > { %9668 = vmatprep.mubr.f32.mxu1 %v15390_v58  ;;  %v8505_v62 = vpop.f32.mrf.mxu1  ;;  %v14178_v58 = vpop.f32.mrf.mxu0  ;;  %v5179_v39 = vadd.f32 %v8400_v33, %v5034_v24  ;;  %v15406_v60 = vld [vmem:[#allocation55_spill] sm:$0xff] }
 0x514   : > { %v5886_v55 = vadd.f32 %v14161_v10, %v5865_v54  ;;  %v5834_v40 = vadd.f32 %v5760_v23, %v5309_v17  ;;  %v8506_v63 = vadd.f32 %v8505_v62, %v8504_v5  ;;  %v5039_v5 = vadd.f32 %v15403_v11, %v15402_v16  ;;  %v15404_v17 = vld [vmem:[#allocation43_spill] sm:$0xff]  ;;  %v15405_v62 = vld [vmem:[#allocation25_spill] sm:$0xff]  ;;  %v15414_v16 = vld [vmem:[#allocation64_spill] sm:$0xff] }
 0x515   : > { %v14184_v52 = vpop.f32.mrf.mxu0  ;;  %v15415_v11 = vld [vmem:[#allocation44_spill] sm:$0xff] }
 0x516   : > { %9669 = vmatmul.mubr.f32.gmra.mxu1 %v6861_v49  ;;  %v8507_v3 = vpop.f32.mrf.mxu1  ;;  %5902 = vst [vmem:[%s11103_s10] sm:$0xff] %v5886_v55  ;;  %v5866_v44 = vadd.f32 %v5850_v18, %v5834_v40  ;;  %v5765_v4 = vadd.f32 %v8506_v63, %v14075_v19  ;;  %v5319_v19 = vadd.f32 %v15399_v14, %v5174_v45  ;;  %v5853_v18 = vld [vmem:[%s11103_s10 + $0x20] sm:$0xff] }
 0x517   : > { %v14195_v36 = vpop.f32.mrf.mxu0  ;;  %v5184_v51 = vadd.f32 %v8403_v34, %v5039_v5  ;;  %v8406_v55 = vadd.f32 %v15406_v60, %v15405_v62  ;;  %v15409_v45 = vld [vmem:[#allocation113_spill] sm:$0xff]  ;;  %v8412_v5 = vadd.f32 %v15415_v11, %v15414_v16  ;;  %v15426_v16 = vld [vmem:[#allocation63_spill] sm:$0xff] }
 0x518   : > { %v8508_v15 = vpop.f32.mrf.mxu1  ;;  %v5887_v41 = vadd.f32 %v14161_v10, %v5866_v44  ;;  %v5835_v32 = vadd.f32 %v5765_v4, %v5314_v8  ;;  %v15407_v8 = vld [vmem:[#allocation94_spill] sm:$0xff] }
 0x519   : > { %v8509_v57 = vadd.f32 %v8508_v15, %v8507_v3  ;;  %v14206_v40 = vpop.f32.mrf.mxu0  ;;  %v15408_v44 = vld [vmem:[#allocation50_spill] sm:$0xff] }
 0x51a   : > { %v8510_v25 = vpop.f32.mrf.mxu1  ;;  %5903 = vst [vmem:[%s11103_s10 + $0x8] sm:$0xff] %v5887_v41  ;;  %v5867_v20 = vadd.f32 %v5851_v13, %v5835_v32  ;;  %v5044_v4 = vadd.f32 %v15408_v44, %v15407_v8  ;;  %v15410_v41 = vld [vmem:[#allocation61_spill] sm:$0xff] }
 0x51b   : > { %v5770_v50 = vadd.f32 %v14062_v27, %v8509_v57  ;;  %v5324_v27 = vadd.f32 %v15404_v17, %v5179_v39  ;;  %v15411_v32 = vld [vmem:[#allocation77_spill] sm:$0xff]  ;;  %v14217_v38 = vpop.f32.mrf.mxu0 }
 0x51c   : > { %v8511_v28 = vpop.f32.mrf.mxu1  ;;  %v5888_v1 = vadd.f32 %v14161_v10, %v5867_v20  ;;  %v8409_v57 = vadd.f32 %v15411_v32, %v15410_v41  ;;  %v15412_v20 = vld [vmem:[#allocation105_spill] sm:$0xff] }
 0x51d   : > { %v5836_v9 = vadd.f32 %v5770_v50, %v5319_v19  ;;  %v8512_v59 = vadd.f32 %v8511_v28, %v8510_v25  ;;  %v5189_v25 = vadd.f32 %v8406_v55, %v5044_v4  ;;  %v15413_v50 = vld [vmem:[#allocation96_spill] sm:$0xff] }
 0x51e   : > { %v8513_v21 = vpop.f32.mrf.mxu1  ;;  %5904 = vst [vmem:[%s11103_s10 + $0x10] sm:$0xff] %v5888_v1  ;;  %v5049_v7 = vadd.f32 %v15413_v50, %v15412_v20  ;;  %v15422_v20 = vld [vmem:[#allocation104_spill] sm:$0xff]  ;;  %v15423_v50 = vld [vmem:[#allocation15_spill] sm:$0xff] }
 0x51f   : > { %v5868_v54 = vadd.f32 %v5852_v37, %v5836_v9  ;;  %v5775_v23 = vadd.f32 %v8512_v59, %v14100_v43  ;;  %v5329_v43 = vadd.f32 %v15409_v45, %v5184_v51  ;;  %v5334_v28 = vadd.f32 %v14053_v61, %v5189_v25  ;;  %v15416_v51 = vld [vmem:[#allocation102_spill] sm:$0xff] }
 0x520   : > { %v8514_v49 = vpop.f32.mrf.mxu1  ;;  %v5194_v9 = vadd.f32 %v8409_v57, %v5049_v7  ;;  %v8418_v7 = vadd.f32 %v15423_v50, %v15422_v20 }
 0x521   : > { %v5889_v63 = vadd.f32 %v14161_v10, %v5868_v54  ;;  %v5837_v2 = vadd.f32 %v5775_v23, %v5324_v27  ;;  %v8515_v26 = vadd.f32 %v8514_v49, %v8513_v21  ;;  %v5855_v54 = vld [vmem:[%s11103_s10 + $0x30] sm:$0xff] }
 0x522   : > { %v8516_v3 = vpop.f32.mrf.mxu1  ;;  %v15417_v49 = vld [vmem:[#allocation87_spill] sm:$0xff] }
 0x523   : > { %5905 = vst [vmem:[%s11103_s10 + $0x18] sm:$0xff] %v5889_v63  ;;  %v5869_v15 = vadd.f32 %v5853_v18, %v5837_v2  ;;  %v5780_v33 = vadd.f32 %v14087_v42, %v8515_v26  ;;  %v5054_v62 = vadd.f32 %v15417_v49, %v15416_v51  ;;  %v15419_v26 = vld [vmem:[#allocation103_spill] sm:$0xff] }
 0x524   : > { %v8517_v13 = vpop.f32.mrf.mxu1  ;;  %v15420_v18 = vld [vmem:[#allocation107_spill] sm:$0xff] }
 0x525   : > { %v5890_v24 = vadd.f32 %v14161_v10, %v5869_v15  ;;  %v5838_v14 = vadd.f32 %v5780_v33, %v5329_v43  ;;  %v8518_v19 = vadd.f32 %v8517_v13, %v8516_v3  ;;  %v8415_v3 = vadd.f32 %v15420_v18, %v15419_v26  ;;  %v5856_v33 = vld [vmem:[%s11103_s10 + $0x38] sm:$0xff] }
 0x526   : > { %v8519_v34 = vpop.f32.mrf.mxu1  ;;  %v5199_v44 = vadd.f32 %v8412_v5, %v5054_v62 }
 0x527   : > { %5906 = vst [vmem:[%s11103_s10 + $0x20] sm:$0xff] %v5890_v24  ;;  %v5870_v42 = vadd.f32 %v5854_v6, %v5838_v14  ;;  %v5785_v39 = vadd.f32 %v8518_v19, %v14117_v53  ;;  %v8610_v1 = vpop.f32.mrf.mxu0  ;;  %v15418_v53 = vld [vmem:[#allocation78_spill] sm:$0xff] }
 0x528   : > { %v8520_v59 = vpop.f32.mrf.mxu1  ;;  %v5339_v60 = vadd.f32 %v15418_v53, %v5194_v9  ;;  %v5344_v57 = vadd.f32 %v14064_v22, %v5199_v44  ;;  %v15421_v24 = vld [vmem:[#allocation106_spill] sm:$0xff]  ;;  %v15424_v9 = vld [vmem:[#allocation35_spill] sm:$0xff] }
 0x529   : > { %v5891_v37 = vadd.f32 %v14161_v10, %v5870_v42  ;;  %v5839_v21 = vadd.f32 %v5785_v39, %v5334_v28  ;;  %v8521_v17 = vadd.f32 %v8520_v59, %v8519_v34  ;;  %v8611_v27 = vpop.f32.mrf.mxu0  ;;  %v5204_v14 = vadd.f32 %v8415_v3, %v15421_v24  ;;  %v5857_v39 = vld [vmem:[%s11103_s10 + $0x40] sm:$0xff]  ;;  %v15432_v24 = vld [vmem:[#allocation110_spill] sm:$0xff] }
 0x52a   : > { %v14230_v23 = vadd.f32 %v8611_v27, %v8610_v1  ;;  %v8522_v61 = vpop.f32.mrf.mxu1  ;;  %v15425_v59 = vld [vmem:[#allocation33_spill] sm:$0xff]  ;;  %v15428_v27 = vld [vmem:[#allocation80_spill] sm:$0xff] }
 0x52b   : > { %5907 = vst [vmem:[%s11103_s10 + $0x28] sm:$0xff] %v5891_v37  ;;  %v5871_v55 = vadd.f32 %v5855_v54, %v5839_v21  ;;  %v5790_v63 = vadd.f32 %v14107_v12, %v8521_v17  ;;  %v8613_v2 = vpop.f32.mrf.mxu0  ;;  %v5349_v11 = vadd.f32 %v15426_v16, %v5204_v14  ;;  %v15427_v17 = vld [vmem:[#allocation92_spill] sm:$0xff]  ;;  %v15433_v14 = vld [vmem:[#allocation111_spill] sm:$0xff] }
 0x52c   : > { %v8523_v8 = vpop.f32.mrf.mxu1  ;;  %v8421_v54 = vadd.f32 %v15428_v27, %v15427_v17 }
 0x52d   : > { %v5892_v4 = vadd.f32 %v14161_v10, %v5871_v55  ;;  %v5840_v45 = vadd.f32 %v5790_v63, %v5339_v60  ;;  %v8524_v43 = vadd.f32 %v8523_v8, %v8522_v61  ;;  %v8614_v15 = vpop.f32.mrf.mxu0  ;;  %v5858_v55 = vld [vmem:[%s11103_s10 + $0x48] sm:$0xff]  ;;  %v15429_v8 = vld [vmem:[#allocation28_spill] sm:$0xff] }
 0x52e   : > { %v14241_v41 = vadd.f32 %v8614_v15, %v8613_v2  ;;  %v8525_v32 = vpop.f32.mrf.mxu1  ;;  %v5214_v44 = vadd.f32 %v8421_v54, %v15429_v8 }
 0x52f   : > { %5908 = vst [vmem:[%s11103_s10 + $0x30] sm:$0xff] %v5892_v4  ;;  %v5872_v12 = vadd.f32 %v5856_v33, %v5840_v45  ;;  %v5795_v13 = vadd.f32 %v8524_v43, %v14146_v29  ;;  %v8616_v25 = vpop.f32.mrf.mxu0  ;;  %v5064_v29 = vadd.f32 %v15425_v59, %v15424_v9  ;;  %v15430_v45 = vld [vmem:[#allocation62_spill] sm:$0xff]  ;;  %v15431_v43 = vld [vmem:[#allocation88_spill] sm:$0xff] }
 0x530   : > { %v8526_v19 = vpop.f32.mrf.mxu1  ;;  %v8424_v15 = vadd.f32 %v15431_v43, %v15430_v45  ;;  %v5860_v9 = vld [vmem:[%s11103_s10 + $0x58] sm:$0xff]  ;;  %v5862_v45 = vld [vmem:[%s11103_s10 + $0x68] sm:$0xff] }
 0x531   : > { %v5893_v6 = vadd.f32 %v14161_v10, %v5872_v12  ;;  %v5841_v34 = vadd.f32 %v5795_v13, %v5344_v57  ;;  %v8527_v28 = vadd.f32 %v8526_v19, %v8525_v32  ;;  %v8617_v42 = vpop.f32.mrf.mxu0  ;;  %v5209_v51 = vadd.f32 %v8418_v7, %v5064_v29  ;;  %v5859_v13 = vld [vmem:[%s11103_s10 + $0x50] sm:$0xff] }
 0x532   : > { %v14251_v22 = vadd.f32 %v8617_v42, %v8616_v25  ;;  %v8528_v1 = vpop.f32.mrf.mxu1  ;;  %v5359_v19 = vadd.f32 %v14070_v0, %v5214_v44 }
 0x533   : > { %5909 = vst [vmem:[%s11103_s10 + $0x38] sm:$0xff] %v5893_v6  ;;  %v5873_v5 = vadd.f32 %v5857_v39, %v5841_v34  ;;  %v5800_v37 = vadd.f32 %v14131_v46, %v8527_v28  ;;  %v8619_v21 = vpop.f32.mrf.mxu0  ;;  %v5354_v26 = vadd.f32 %v14077_v30, %v5209_v51 }
 0x534   : > { %v8529_v61 = vpop.f32.mrf.mxu1 }
 0x535   : > { %v5894_v49 = vadd.f32 %v14161_v10, %v5873_v5  ;;  %v5842_v62 = vadd.f32 %v5800_v37, %v5349_v11  ;;  %v8530_v53 = vadd.f32 %v8529_v61, %v8528_v1  ;;  %v8620_v60 = vpop.f32.mrf.mxu0  ;;  %v15434_v37 = vld [vmem:[#allocation16_spill] sm:$0xff] }
 0x536   : > { %v14262_v63 = vadd.f32 %v8620_v60, %v8619_v21  ;;  %v8531_v2 = vpop.f32.mrf.mxu1  ;;  %v15435_v21 = vld [vmem:[#allocation47_spill] sm:$0xff]  ;;  %v15437_v60 = vld [vmem:[#allocation109_spill] sm:$0xff] }
 0x537   : > { %5910 = vst [vmem:[%s11103_s10 + $0x40] sm:$0xff] %v5894_v49  ;;  %v5874_v46 = vadd.f32 %v5858_v55, %v5842_v62  ;;  %v5805_v18 = vadd.f32 %v8530_v53, %v14178_v58  ;;  %v8622_v3 = vpop.f32.mrf.mxu0  ;;  %v5074_v58 = vadd.f32 %v15433_v14, %v15432_v24  ;;  %v8430_v17 = vadd.f32 %v15435_v21, %v15434_v37  ;;  %v5861_v49 = vld [vmem:[%s11103_s10 + $0x60] sm:$0xff]  ;;  %v5863_v14 = vld [vmem:[%s11103_s10 + $0x70] sm:$0xff] }
 0x538   : > { %v8532_v4 = vpop.f32.mrf.mxu1 }
 0x539   : > { %v5895_v33 = vadd.f32 %v14161_v10, %v5874_v46  ;;  %v5843_v32 = vadd.f32 %v5805_v18, %v5354_v26  ;;  %v8533_v57 = vadd.f32 %v8532_v4, %v8531_v2  ;;  %v8623_v12 = vpop.f32.mrf.mxu0  ;;  %v5219_v34 = vadd.f32 %v8424_v15, %v5074_v58 }
 0x53a   : > { %v14272_v30 = vadd.f32 %v8623_v12, %v8622_v3  ;;  %v8534_v25 = vpop.f32.mrf.mxu1 }
 0x53b   : > { %5911 = vst [vmem:[%s11103_s10 + $0x48] sm:$0xff] %v5895_v33  ;;  %v5875_v20 = vadd.f32 %v5859_v13, %v5843_v32  ;;  %v5810_v50 = vadd.f32 %v14166_v31, %v8533_v57  ;;  %v8625_v7 = vpop.f32.mrf.mxu0  ;;  %v5364_v0 = vadd.f32 %v14089_v48, %v5219_v34  ;;  %v15436_v48 = vld [vmem:[#allocation91_spill] sm:$0xff] }
 0x53c   : > { %v8535_v6 = vpop.f32.mrf.mxu1  ;;  %v5084_v55 = vadd.f32 %v15437_v60, %v15436_v48 }
 0x53d   : > { %v5896_v28 = vadd.f32 %v14161_v10, %v5875_v20  ;;  %v5844_v42 = vadd.f32 %v5810_v50, %v5359_v19  ;;  %v8536_v39 = vadd.f32 %v8535_v6, %v8534_v25  ;;  %v8626_v1 = vpop.f32.mrf.mxu0 }
 0x53e   : > { %v14281_v59 = vadd.f32 %v8626_v1, %v8625_v7  ;;  %v8537_v29 = vpop.f32.mrf.mxu1  ;;  %v5229_v18 = vadd.f32 %v8430_v17, %v5084_v55 }
 0x53f   : > { %5912 = vst [vmem:[%s11103_s10 + $0x50] sm:$0xff] %v5896_v28  ;;  %v5876_v16 = vadd.f32 %v5860_v9, %v5844_v42  ;;  %v5815_v31 = vadd.f32 %v8536_v39, %v14195_v36  ;;  %v8628_v11 = vpop.f32.mrf.mxu0  ;;  %v5864_v39 = vld [vmem:[%s11103_s10 + $0x78] sm:$0xff] }
 0x540   : > { %v8538_v5 = vpop.f32.mrf.mxu1  ;;  %v5374_v33 = vadd.f32 %v14113_v47, %v5229_v18 }
 0x541   : > { %v5897_v27 = vadd.f32 %v14161_v10, %v5876_v16  ;;  %v5845_v54 = vadd.f32 %v5815_v31, %v5364_v0  ;;  %v8539_v61 = vadd.f32 %v8538_v5, %v8537_v29  ;;  %v8629_v51 = vpop.f32.mrf.mxu0 }
 0x542   : > { %v14290_v62 = vadd.f32 %v8629_v51, %v8628_v11  ;;  %v8540_v53 = vpop.f32.mrf.mxu1 }
 0x543   : > { %5913 = vst [vmem:[%s11103_s10 + $0x58] sm:$0xff] %v5897_v27  ;;  %v5877_v36 = vadd.f32 %v5861_v49, %v5845_v54  ;;  %v5820_v2 = vadd.f32 %v14184_v52, %v8539_v61  ;;  %v8631_v26 = vpop.f32.mrf.mxu0 }
 0x544   : > { %v8541_v46 = vpop.f32.mrf.mxu1 }
 0x545   : > { %v5898_v3 = vadd.f32 %v14161_v10, %v5877_v36  ;;  %v5846_v8 = vadd.f32 %v5820_v2, %v14083_v35  ;;  %v8542_v44 = vadd.f32 %v8541_v46, %v8540_v53  ;;  %v8632_v4 = vpop.f32.mrf.mxu0 }
 0x546   : > { %v8633_v43 = vadd.f32 %v8632_v4, %v8631_v26  ;;  %v8543_v15 = vpop.f32.mrf.mxu1 }
 0x547   : > { %5914 = vst [vmem:[%s11103_s10 + $0x60] sm:$0xff] %v5898_v3  ;;  %v5878_v32 = vadd.f32 %v5862_v45, %v5846_v8  ;;  %v5825_v52 = vadd.f32 %v8542_v44, %v14217_v38  ;;  %v8634_v57 = vpop.f32.mrf.mxu0 }
 0x548   : > { %v8544_v12 = vpop.f32.mrf.mxu1 }
 0x549   : > { %v5899_v13 = vadd.f32 %v14161_v10, %v5878_v32  ;;  %v5847_v25 = vadd.f32 %v5825_v52, %v5374_v33  ;;  %v8545_v35 = vadd.f32 %v8544_v12, %v8543_v15  ;;  %v8635_v24 = vpop.f32.mrf.mxu0 }
 0x54a   : > { %v8636_v58 = vadd.f32 %v8635_v24, %v8634_v57  ;;  %v9537_v19 = vpop.f32.mrf.mxu1 }
 0x54b   : > { %5915 = vst [vmem:[%s11103_s10 + $0x68] sm:$0xff] %v5899_v13  ;;  %v5879_v20 = vadd.f32 %v5863_v14, %v5847_v25  ;;  %v5830_v47 = vadd.f32 %v14206_v40, %v8545_v35  ;;  %v8637_v50 = vpop.f32.mrf.mxu0  ;;  %v14307_v7 = vadd.f32 %v9537_v19, %v14241_v41 }
 0x54c   : > { %v6381_v38 = vpop.f32.mrf.mxu1 }
 0x54d   : > { %v5900_v6 = vadd.f32 %v14161_v10, %v5879_v20  ;;  %v5848_v34 = vadd.f32 %v5830_v47, %v14096_v56  ;;  %v8638_v28 = vpop.f32.mrf.mxu0  ;;  %v6382_v42 = vadd.f32 %v14230_v23, %v6381_v38 }
 0x54e   : > { %v8639_v1 = vadd.f32 %v8638_v28, %v8637_v50 }
 0x54f   : > { %5916 = vst [vmem:[%s11103_s10 + $0x70] sm:$0xff] %v5900_v6  ;;  %v5880_v9 = vadd.f32 %v5864_v39, %v5848_v34  ;;  %v8640_v29 = vpop.f32.mrf.mxu0 }
 0x550   : > { %v9540_v0 = vpop.f32.mrf.mxu1 }
 0x551   : > { %v5901_v40 = vadd.f32 %v14161_v10, %v5880_v9  ;;  %v14316_v41 = vadd.f32 %v9540_v0, %v14262_v63  ;;  %v8641_v16 = vpop.f32.mrf.mxu0 }
 0x552   : > { %v8642_v31 = vadd.f32 %v8641_v16, %v8640_v29  ;;  %v6391_v11 = vpop.f32.mrf.mxu1 }
 0x553   : > { %5917 = vst [vmem:[%s11103_s10 + $0x78] sm:$0xff] %v5901_v40  ;;  %v6392_v56 = vadd.f32 %v14251_v22, %v6391_v11  ;;  %v8643_v5 = vpop.f32.mrf.mxu0 }
 0x554   : > { %v9543_v37 = vpop.f32.mrf.mxu1 }
 0x555   : > { %v14321_v23 = vadd.f32 %v9543_v37, %v14281_v59  ;;  %v8644_v21 = vpop.f32.mrf.mxu0 }
 0x556   : > { %v8645_v17 = vadd.f32 %v8644_v21, %v8643_v5  ;;  %v6401_v27 = vpop.f32.mrf.mxu1 }
 0x557   : > { %v14324_v54 = vadd.f32 %v14272_v30, %v6401_v27 }
 0x559   : > { %v8646_v61 = vpop.f32.mrf.mxu0  ;;  %v9546_v63 = vpop.f32.mrf.mxu1 }
 0x55a   : > { %v14326_v51 = vadd.f32 %v9546_v63, %v8633_v43 }
 0x55b   : > { %v8647_v49 = vpop.f32.mrf.mxu0  ;;  %v6411_v53 = vpop.f32.mrf.mxu1 }
 0x55c   : > { %v8648_v48 = vadd.f32 %v8647_v49, %v8646_v61  ;;  %v14329_v22 = vadd.f32 %v14290_v62, %v6411_v53 }
 0x55e   : > { %v8649_v60 = vpop.f32.mrf.mxu0  ;;  %v9549_v55 = vpop.f32.mrf.mxu1 }
 0x55f   : > { %v14331_v59 = vadd.f32 %v9549_v55, %v8639_v1 }
 0x560   : > { %v8650_v36 = vpop.f32.mrf.mxu0  ;;  %v6421_v2 = vpop.f32.mrf.mxu1 }
 0x561   : > { %v8651_v26 = vadd.f32 %v8650_v36, %v8649_v60  ;;  %v14333_v46 = vadd.f32 %v8636_v58, %v6421_v2 }
 0x563   : > { %v8652_v30 = vpop.f32.mrf.mxu0  ;;  %v9552_v18 = vpop.f32.mrf.mxu1 }
 0x564   : > { %v14335_v3 = vadd.f32 %v9552_v18, %v8645_v17 }
 0x565   : > { %v8653_v8 = vpop.f32.mrf.mxu0  ;;  %v6431_v44 = vpop.f32.mrf.mxu1 }
 0x566   : > { %v8654_v4 = vadd.f32 %v8653_v8, %v8652_v30  ;;  %v14337_v45 = vadd.f32 %v8642_v31, %v6431_v44 }
 0x568   : > { %v8655_v62 = vpop.f32.mrf.mxu0  ;;  %v9555_v43 = vpop.f32.mrf.mxu1 }
 0x569   : > { %v14339_v15 = vadd.f32 %v9555_v43, %v8651_v26 }
 0x56a   : > { %v8656_v33 = vpop.f32.mrf.mxu0  ;;  %v6441_v32 = vpop.f32.mrf.mxu1 }
 0x56b   : > { %v8657_v52 = vadd.f32 %v8656_v33, %v8655_v62  ;;  %v14341_v57 = vadd.f32 %v8648_v48, %v6441_v32 }
 0x56d   : > { %v9558_v12 = vpop.f32.mrf.mxu1  ;;  %v9593_v13 = vpop.f32.mrf.mxu0 }
 0x56e   : > { %v14343_v25 = vadd.f32 %v9558_v12, %v8657_v52 }
 0x56f   : > { %v6451_v35 = vpop.f32.mrf.mxu1  ;;  %v6671_v24 = vpop.f32.mrf.mxu0 }
 0x570   : > { %v14345_v14 = vadd.f32 %v8654_v4, %v6451_v35 }
 0x573   : > { %v8722_v58 = vpop.f32.mrf.mxu1  ;;  %v9596_v19 = vpop.f32.mrf.mxu0 }
 0x575   : > { %v8723_v20 = vpop.f32.mrf.mxu1  ;;  %v6681_v47 = vpop.f32.mrf.mxu0 }
 0x576   : > { %v8724_v50 = vadd.f32 %v8723_v20, %v8722_v58 }
 0x577   : > { %v8725_v38 = vpop.f32.mrf.mxu1 }
 0x578   : > { %v6527_v6 = vadd.f32 %v8724_v50, %v6382_v42 }
 0x579   : > { %v9599_v34 = vpop.f32.mrf.mxu0  ;;  %v8726_v28 = vpop.f32.mrf.mxu1 }
 0x57a   : > { %v8727_v39 = vadd.f32 %v8726_v28, %v8725_v38  ;;  %v14347_v1 = vadd.f32 %v6671_v24, %v6527_v6 }
 0x57b   : > { %v6691_v9 = vpop.f32.mrf.mxu0 }
 0x57c   : > { %v6532_v29 = vadd.f32 %v8727_v39, %v14307_v7  ;;  %v8728_v0 = vpop.f32.mrf.mxu1 }
 0x57e   : > { %v9602_v40 = vpop.f32.mrf.mxu0  ;;  %v8729_v16 = vpop.f32.mrf.mxu1  ;;  %v14350_v31 = vadd.f32 %v9593_v13, %v6532_v29 }
 0x57f   : > { %v8730_v11 = vadd.f32 %v8729_v16, %v8728_v0 }
 0x580   : > { %v6701_v5 = vpop.f32.mrf.mxu0 }
 0x581   : > { %v6537_v37 = vadd.f32 %v8730_v11, %v6392_v56  ;;  %v8731_v21 = vpop.f32.mrf.mxu1 }
 0x583   : > { %v9605_v17 = vpop.f32.mrf.mxu0  ;;  %v8732_v27 = vpop.f32.mrf.mxu1  ;;  %v14352_v42 = vadd.f32 %v6681_v47, %v6537_v37 }
 0x584   : > { %v8733_v61 = vadd.f32 %v8732_v27, %v8731_v21 }
 0x585   : > { %v6711_v63 = vpop.f32.mrf.mxu0 }
 0x586   : > { %v6542_v49 = vadd.f32 %v8733_v61, %v14316_v41  ;;  %v8734_v53 = vpop.f32.mrf.mxu1 }
 0x588   : > { %v9608_v48 = vpop.f32.mrf.mxu0  ;;  %v8735_v7 = vpop.f32.mrf.mxu1  ;;  %v14355_v60 = vadd.f32 %v9596_v19, %v6542_v49 }
 0x589   : > { %v8736_v55 = vadd.f32 %v8735_v7, %v8734_v53 }
 0x58a   : > { %v6721_v36 = vpop.f32.mrf.mxu0 }
 0x58b   : > { %v6547_v2 = vadd.f32 %v8736_v55, %v14324_v54  ;;  %v8737_v26 = vpop.f32.mrf.mxu1 }
 0x58d   : > { %v14358_v56 = vpop.f32.mrf.mxu0  ;;  %v8738_v30 = vpop.f32.mrf.mxu1  ;;  %v14360_v18 = vadd.f32 %v6691_v9, %v6547_v2 }
 0x58e   : > { %v8739_v8 = vadd.f32 %v8738_v30, %v8737_v26 }
 0x58f   : > { %v6731_v44 = vpop.f32.mrf.mxu0 }
 0x590   : > { %v6552_v4 = vadd.f32 %v8739_v8, %v14321_v23  ;;  %v8740_v41 = vpop.f32.mrf.mxu1 }
 0x592   : > { %v14363_v62 = vpop.f32.mrf.mxu0  ;;  %v8741_v43 = vpop.f32.mrf.mxu1  ;;  %v14365_v33 = vadd.f32 %v9599_v34, %v6552_v4 }
 0x593   : > { %v8742_v32 = vadd.f32 %v8741_v43, %v8740_v41 }
 0x594   : > { %v14367_v52 = vpop.f32.mrf.mxu0 }
 0x595   : > { %v6557_v54 = vadd.f32 %v8742_v32, %v14329_v22 }
 0x596   : > { %v8743_v12 = vpop.f32.mrf.mxu1  ;;  %v14370_v13 = vpop.f32.mrf.mxu0 }
 0x597   : > { %v14372_v35 = vadd.f32 %v6701_v5, %v6557_v54 }
 0x598   : > { %v8744_v24 = vpop.f32.mrf.mxu1  ;;  %v8835_v58 = vpop.f32.mrf.mxu0 }
 0x599   : > { %v8745_v19 = vadd.f32 %v8744_v24, %v8743_v12 }
 0x59a   : > { %v8746_v23 = vpop.f32.mrf.mxu1  ;;  %v8837_v20 = vpop.f32.mrf.mxu0 }
 0x59b   : > { %v6562_v47 = vadd.f32 %v8745_v19, %v14326_v51 }
 0x59c   : > { %v8747_v50 = vpop.f32.mrf.mxu1  ;;  %v8838_v38 = vpop.f32.mrf.mxu0 }
 0x59d   : > { %v8748_v6 = vadd.f32 %v8747_v50, %v8746_v23  ;;  %v14375_v34 = vadd.f32 %v9602_v40, %v6562_v47 }
 0x59e   : > { %v8749_v28 = vpop.f32.mrf.mxu1  ;;  %v14377_v39 = vpop.f32.mrf.mxu0 }
 0x59f   : > { %v6567_v22 = vadd.f32 %v8748_v6, %v14333_v46 }
 0x5a0   : > { %v8750_v9 = vpop.f32.mrf.mxu1  ;;  %v14380_v29 = vpop.f32.mrf.mxu0 }
 0x5a1   : > { %v8751_v0 = vadd.f32 %v8750_v9, %v8749_v28  ;;  %v14382_v16 = vadd.f32 %v6711_v63, %v6567_v22 }
 0x5a2   : > { %v8752_v11 = vpop.f32.mrf.mxu1  ;;  %v8843_v5 = vpop.f32.mrf.mxu0 }
 0x5a3   : > { %v6572_v51 = vadd.f32 %v8751_v0, %v14331_v59 }
 0x5a4   : > { %v8753_v37 = vpop.f32.mrf.mxu1  ;;  %v8844_v21 = vpop.f32.mrf.mxu0 }
 0x5a5   : > { %v8754_v27 = vadd.f32 %v8753_v37, %v8752_v11  ;;  %v14385_v40 = vadd.f32 %v9605_v17, %v6572_v51  ;;  %v8836_v37 = vadd.f32 %v8835_v58, %v14370_v13  ;;  %v8842_v58 = vadd.f32 %v14380_v29, %v14377_v39 }
 0x5a6   : > { %v8755_v61 = vpop.f32.mrf.mxu1  ;;  %v14387_v49 = vpop.f32.mrf.mxu0 }
 0x5a7   : > { %v6577_v46 = vadd.f32 %v8754_v27, %v14337_v45 }
 0x5a8   : > { %v8756_v53 = vpop.f32.mrf.mxu1  ;;  %v8847_v7 = vpop.f32.mrf.mxu0 }
 0x5a9   : > { %v8757_v55 = vadd.f32 %v8756_v53, %v8755_v61  ;;  %v14390_v2 = vadd.f32 %v6721_v36, %v6577_v46 }
 0x5aa   : > { %v8758_v63 = vpop.f32.mrf.mxu1  ;;  %v8849_v26 = vpop.f32.mrf.mxu0 }
 0x5ab   : > { %v6582_v30 = vadd.f32 %v8757_v55, %v14335_v3 }
 0x5ac   : > { %v8759_v59 = vpop.f32.mrf.mxu1  ;;  %v8850_v8 = vpop.f32.mrf.mxu0 }
 0x5ad   : > { %v8760_v4 = vadd.f32 %v8759_v59, %v8758_v63  ;;  %v14393_v41 = vadd.f32 %v9608_v48, %v6582_v30  ;;  %v8851_v59 = vadd.f32 %v8850_v8, %v8849_v26 }
 0x5ae   : > { %v8761_v17 = vpop.f32.mrf.mxu1  ;;  %v14395_v43 = vpop.f32.mrf.mxu0 }
 0x5af   : > { %v6587_v32 = vadd.f32 %v8760_v4, %v14341_v57 }
 0x5b0   : > { %v8762_v45 = vpop.f32.mrf.mxu1  ;;  %v14398_v54 = vpop.f32.mrf.mxu0 }
 0x5b1   : > { %v8763_v12 = vadd.f32 %v8762_v45, %v8761_v17  ;;  %v14400_v36 = vadd.f32 %v6731_v44, %v6587_v32  ;;  %v8839_v44 = vadd.f32 %v8838_v38, %v8837_v20  ;;  %v7219_v32 = vld [vmem:[%s11103_s10 + $0x98] sm:$0xff] }
 0x5b2   : > { %v8764_v24 = vpop.f32.mrf.mxu1  ;;  %v8855_v19 = vpop.f32.mrf.mxu0 }
 0x5b3   : > { %v6592_v3 = vadd.f32 %v8763_v12, %v14339_v15 }
 0x5b4   : > { %v8765_v23 = vpop.f32.mrf.mxu1  ;;  %v8856_v47 = vpop.f32.mrf.mxu0 }
 0x5b5   : > { %v8766_v50 = vadd.f32 %v8765_v23, %v8764_v24  ;;  %v14404_v48 = vadd.f32 %v14358_v56, %v6592_v3  ;;  %v8848_v24 = vadd.f32 %v8847_v7, %v14387_v49  ;;  %v7221_v7 = vld [vmem:[%s11103_s10 + $0xa8] sm:$0xff] }
 0x5b6   : > { %v8767_v6 = vpop.f32.mrf.mxu1  ;;  %v14406_v28 = vpop.f32.mrf.mxu0 }
 0x5b7   : > { %v6597_v57 = vadd.f32 %v8766_v50, %v14345_v14  ;;  %v8845_v14 = vadd.f32 %v8844_v21, %v8843_v5  ;;  %v7216_v5 = vld [vmem:[%s11103_s10 + $0x80] sm:$0xff]  ;;  %v8857_v50 = vadd.f32 %v8856_v47, %v8855_v19  ;;  %v8854_v19 = vadd.f32 %v14398_v54, %v14395_v43 }
 0x5b8   : > { %v8768_v22 = vpop.f32.mrf.mxu1  ;;  %v14409_v9 = vpop.f32.mrf.mxu0 }
 0x5b9   : > { %v8769_v0 = vadd.f32 %v8768_v22, %v8767_v6  ;;  %v14412_v11 = vadd.f32 %v14367_v52, %v6597_v57  ;;  %v7217_v52 = vld [vmem:[%s11103_s10 + $0x88] sm:$0xff]  ;;  %v7218_v6 = vld [vmem:[%s11103_s10 + $0x90] sm:$0xff]  ;;  %v8860_v43 = vadd.f32 %v14409_v9, %v14406_v28 }
 0x5ba   : > { %v8861_v15 = vpop.f32.mrf.mxu0  ;;  %v9649_v51 = vpop.f32.mrf.mxu1  ;;  %v7225_v9 = vld [vmem:[%s11103_s10 + $0xc8] sm:$0xff] }
 0x5bb   : > { %v6602_v56 = vadd.f32 %v8769_v0, %v14343_v25  ;;  %v7127_v27 = vadd.f32 %v9649_v51, %v8839_v44 }
 0x5bc   : > { %v8862_v61 = vpop.f32.mrf.mxu0  ;;  %v7121_v46 = vpop.f32.mrf.mxu1 }
 0x5bd   : > { %v7201_v53 = vadd.f32 %v7127_v27, %v14350_v31  ;;  %v7122_v55 = vadd.f32 %v8836_v37, %v7121_v46  ;;  %v14418_v20 = vadd.f32 %v14363_v62, %v6602_v56  ;;  %v7220_v56 = vld [vmem:[%s11103_s10 + $0xa0] sm:$0xff]  ;;  %v8863_v46 = vadd.f32 %v8862_v61, %v8861_v15 }
 0x5be   : > { %v14421_v38 = vpop.f32.mrf.mxu0  ;;  %v9652_v63 = vpop.f32.mrf.mxu1 }
 0x5bf   : > { %v7233_v30 = vadd.f32 %v7217_v52, %v7201_v53  ;;  %v7200_v13 = vadd.f32 %v7122_v55, %v14347_v1  ;;  %v7137_v25 = vadd.f32 %v9652_v63, %v8845_v14 }
 0x5c0   : > { %v14427_v21 = vpop.f32.mrf.mxu0  ;;  %v7131_v31 = vpop.f32.mrf.mxu1 }
 0x5c1   : > { %v7254_v62 = vadd.f32 %v14161_v10, %v7233_v30  ;;  %v7232_v4 = vadd.f32 %v7216_v5, %v7200_v13  ;;  %v7203_v17 = vadd.f32 %v7137_v25, %v14355_v60  ;;  %v7132_v45 = vadd.f32 %v8842_v58, %v7131_v31  ;;  %v7222_v31 = vld [vmem:[%s11103_s10 + $0xb0] sm:$0xff] }
 0x5c2   : > { %v8867_v12 = vpop.f32.mrf.mxu0  ;;  %v9655_v1 = vpop.f32.mrf.mxu1 }
 0x5c3   : > { %7270 = vst [vmem:[%s11103_s10 + $0x88] sm:$0xff] %v7254_v62  ;;  %v7253_v39 = vadd.f32 %v14161_v10, %v7232_v4  ;;  %v7235_v29 = vadd.f32 %v7219_v32, %v7203_v17  ;;  %v7147_v26 = vadd.f32 %v9655_v1, %v8851_v59  ;;  %v7202_v8 = vadd.f32 %v7132_v45, %v14352_v42 }
 0x5c4   : > { %v8868_v3 = vpop.f32.mrf.mxu0  ;;  %v7141_v23 = vpop.f32.mrf.mxu1 }
 0x5c5   : > { %7269 = vst [vmem:[%s11103_s10 + $0x80] sm:$0xff] %v7253_v39  ;;  %v7256_v60 = vadd.f32 %v14161_v10, %v7235_v29  ;;  %v7205_v57 = vadd.f32 %v7147_v26, %v14365_v33  ;;  %v7142_v22 = vadd.f32 %v8848_v24, %v7141_v23  ;;  %v7234_v49 = vadd.f32 %v7218_v6, %v7202_v8  ;;  %v7224_v24 = vld [vmem:[%s11103_s10 + $0xc0] sm:$0xff] }
 0x5c6   : > { %v8870_v44 = vpop.f32.mrf.mxu0  ;;  %v9658_v0 = vpop.f32.mrf.mxu1  ;;  %v8869_v58 = vadd.f32 %v8868_v3, %v8867_v12  ;;  %v8866_v12 = vadd.f32 %v14427_v21, %v14421_v38 }
 0x5c7   : > { %7272 = vst [vmem:[%s11103_s10 + $0x98] sm:$0xff] %v7256_v60  ;;  %v7237_v51 = vadd.f32 %v7221_v7, %v7205_v57  ;;  %v7204_v42 = vadd.f32 %v7142_v22, %v14360_v18  ;;  %v7157_v37 = vadd.f32 %v9658_v0, %v8857_v50  ;;  %v7255_v47 = vadd.f32 %v14161_v10, %v7234_v49  ;;  %v7223_v18 = vld [vmem:[%s11103_s10 + $0xb8] sm:$0xff]  ;;  %v7226_v0 = vld [vmem:[%s11103_s10 + $0xd0] sm:$0xff] }
 0x5c8   : > { %v8871_v33 = vpop.f32.mrf.mxu0  ;;  %v7151_v27 = vpop.f32.mrf.mxu1 }
 0x5c9   : > { %v7258_v14 = vadd.f32 %v14161_v10, %v7237_v51  ;;  %v7236_v53 = vadd.f32 %v7220_v56, %v7204_v42  ;;  %v7207_v55 = vadd.f32 %v7157_v37, %v14375_v34  ;;  %7271 = vst [vmem:[%s11103_s10 + $0x90] sm:$0xff] %v7255_v47  ;;  %v7152_v52 = vadd.f32 %v8854_v19, %v7151_v27  ;;  %v7229_v19 = vld [vmem:[%s11103_s10 + $0xe8] sm:$0xff] }
 0x5ca   : > { %v8873_v63 = vpop.f32.mrf.mxu0  ;;  %v9661_v30 = vpop.f32.mrf.mxu1  ;;  %v8872_v38 = vadd.f32 %v8871_v33, %v8870_v44 }
 0x5cb   : > { %7274 = vst [vmem:[%s11103_s10 + $0xa8] sm:$0xff] %v7258_v14  ;;  %v7257_v54 = vadd.f32 %v14161_v10, %v7236_v53  ;;  %v7239_v15 = vadd.f32 %v7223_v18, %v7207_v55  ;;  %v7167_v61 = vadd.f32 %v9661_v30, %v8863_v46  ;;  %v7206_v13 = vadd.f32 %v7152_v52, %v14372_v35 }
 0x5cc   : > { %v8874_v25 = vpop.f32.mrf.mxu0  ;;  %v7161_v34 = vpop.f32.mrf.mxu1 }
 0x5cd   : > { %7273 = vst [vmem:[%s11103_s10 + $0xa0] sm:$0xff] %v7257_v54  ;;  %v7260_v5 = vadd.f32 %v14161_v10, %v7239_v15  ;;  %v7209_v59 = vadd.f32 %v7167_v61, %v14385_v40  ;;  %v7162_v62 = vadd.f32 %v8860_v43, %v7161_v34  ;;  %v7238_v28 = vadd.f32 %v7222_v31, %v7206_v13 }
 0x5ce   : > { %v8876_v4 = vpop.f32.mrf.mxu0  ;;  %v9664_v17 = vpop.f32.mrf.mxu1  ;;  %v8875_v26 = vadd.f32 %v8874_v25, %v8873_v63  ;;  %v7231_v63 = vld [vmem:[%s11103_s10 + $0xf8] sm:$0xff] }
 0x5cf   : > { %7276 = vst [vmem:[%s11103_s10 + $0xb8] sm:$0xff] %v7260_v5  ;;  %v7241_v32 = vadd.f32 %v7225_v9, %v7209_v59  ;;  %v7208_v35 = vadd.f32 %v7162_v62, %v14382_v16  ;;  %v7177_v45 = vadd.f32 %v9664_v17, %v8869_v58  ;;  %v7259_v1 = vadd.f32 %v14161_v10, %v7238_v28  ;;  %v7227_v16 = vld [vmem:[%s11103_s10 + $0xd8] sm:$0xff] }
 0x5d0   : > { %v8877_v40 = vpop.f32.mrf.mxu0  ;;  %v7171_v39 = vpop.f32.mrf.mxu1 }
 0x5d1   : > { %v7262_v29 = vadd.f32 %v14161_v10, %v7241_v32  ;;  %v7240_v8 = vadd.f32 %v7224_v24, %v7208_v35  ;;  %v7211_v3 = vadd.f32 %v7177_v45, %v14393_v41  ;;  %7275 = vst [vmem:[%s11103_s10 + $0xb0] sm:$0xff] %v7259_v1  ;;  %v7172_v23 = vadd.f32 %v8866_v12, %v7171_v39 }
 0x5d2   : > { %v8879_v50 = vpop.f32.mrf.mxu0  ;;  %v9667_v60 = vpop.f32.mrf.mxu1  ;;  %v8878_v56 = vadd.f32 %v8877_v40, %v8876_v4 }
 0x5d3   : > { %7278 = vst [vmem:[%s11103_s10 + $0xc8] sm:$0xff] %v7262_v29  ;;  %v7261_v21 = vadd.f32 %v14161_v10, %v7240_v8  ;;  %v7243_v6 = vadd.f32 %v7227_v16, %v7211_v3  ;;  %v7187_v57 = vadd.f32 %v9667_v60, %v8875_v26  ;;  %v7210_v22 = vadd.f32 %v7172_v23, %v14390_v2 }
 0x5d4   : > { %v8880_v49 = vpop.f32.mrf.mxu0  ;;  %v7181_v7 = vpop.f32.mrf.mxu1 }
 0x5d5   : > { %7277 = vst [vmem:[%s11103_s10 + $0xc0] sm:$0xff] %v7261_v21  ;;  %v7264_v41 = vadd.f32 %v14161_v10, %v7243_v6  ;;  %v7213_v51 = vadd.f32 %v7187_v57, %v14404_v48  ;;  %v8881_v42 = vadd.f32 %v8880_v49, %v8879_v50  ;;  %v7182_v37 = vadd.f32 %v8872_v38, %v7181_v7  ;;  %v7228_v48 = vld [vmem:[%s11103_s10 + $0xe0] sm:$0xff] }
 0x5d6   : > { %v7242_v44 = vadd.f32 %v7226_v0, %v7210_v22  ;;  %v9670_v47 = vpop.f32.mrf.mxu1 }
 0x5d7   : > { %7280 = vst [vmem:[%s11103_s10 + $0xd8] sm:$0xff] %v7264_v41  ;;  %v7245_v2 = vadd.f32 %v7229_v19, %v7213_v51  ;;  %v7212_v33 = vadd.f32 %v7182_v37, %v14400_v36  ;;  %v7197_v27 = vadd.f32 %v9670_v47, %v8881_v42  ;;  %v9855_v36 = vld [vmem:[%s14555_s7 + $0x2] ss:$0 sm:$0xff] }
 0x5d8   : > { %v7263_v46 = vadd.f32 %v14161_v10, %v7242_v44  ;;  %v7191_v14 = vpop.f32.mrf.mxu1 }
 0x5d9   : > { %v7266_v53 = vadd.f32 %v14161_v10, %v7245_v2  ;;  %v7244_v55 = vadd.f32 %v7228_v48, %v7212_v33  ;;  %v7215_v18 = vadd.f32 %v7197_v27, %v14418_v20  ;;  %v7192_v52 = vadd.f32 %v8878_v56, %v7191_v14  ;;  %v7230_v10 = vld [vmem:[%s11103_s10 + $0xf0] sm:$0xff] }
 0x5da   : > { %7279 = vst [vmem:[%s11103_s10 + $0xd0] sm:$0xff] %v7263_v46 }
 0x5db   : > { %7282 = vst [vmem:[%s11103_s10 + $0xe8] sm:$0xff] %v7266_v53  ;;  %v7265_v30 = vadd.f32 %v9855_v36, %v7244_v55  ;;  %v7247_v43 = vadd.f32 %v7231_v63, %v7215_v18  ;;  %v7214_v54 = vadd.f32 %v7192_v52, %v14412_v11 }
 0x5dd   : > { %7281 = vst [vmem:[%s11103_s10 + $0xe0] sm:$0xff] %v7265_v30  ;;  %v7268_v20 = vadd.f32 %v9855_v36, %v7247_v43  ;;  %v7246_v15 = vadd.f32 %v7230_v10, %v7214_v54 }
 0x5df   : > { %7284 = vst [vmem:[%s11103_s10 + $0xf8] sm:$0xff] %v7268_v20  ;;  %v7267_v61 = vadd.f32 %v9855_v36, %v7246_v15 }
 0x5e1   : > { %7283 = vst [vmem:[%s11103_s10 + $0xf0] sm:$0xff] %v7267_v61 }
 0x5e2   : > { %9921 = shalt.err (!%p9918_p3)
}
 0x5e3   : > { %s9922_s24 = scalar_lea.hbm %s14499_s17, 4096  ;;  %s9926_s13 = scalar_lea.hbm %s14556_s8, 8192 }
 0x5e4   : > { %p9923_p2 = scmp.ne.s32.totalorder %s14499_s17, %s9922_s24  ;;  %p9927_p7 = scmp.lt.s32.totalorder %s14499_s17, %s14556_s8 }
 0x5e5   : > { %p9928_p6 = scmp.lt.s32.totalorder %s9926_s13, %s9922_s24 }
 0x5e6   : > { %p9924_p4 = pnand %p9923_p2, %p10076_p5 }
 0x5e7   : > { %p9929_p9 = por %p9928_p6, %p9927_p7 }
 0x5e8   : > { %p9925_p13 = pneg %p9924_p4 }
 0x5ea   : > { %p9930_p10 = pnand %p9929_p9, %p9925_p13 }
 0x5ec   : > { %9933 = shalt.err (!%p9930_p10)
}
 0x5ed   : > { %s9992_s22 = smov 128  }
 0x5ee   : > { %9679 = dma.vmem_to_hbm [thread:$0]  (%p10076_p5), %s14502_s18, 4096, %s14499_s17, %s14507_s9, %s9992_s22, %s9992_s22, %s9982_s19  }
 0x5ef PF: > { %p9696_p12 = scmp.ge.s32.totalorder %s9976_s30, 2  ;;  %s7314_s23 = sand.u32 1, %s9964_s27  }
 0x5f0   : > { %p15438_p8 = scmp.ne.s32.totalorder %s14804_s16, 0  ;;  %s7315_s25 = scalar_lea.sflag [#allocation6], %s7314_s23 }
 0x5f2   : > { %p9689_p11 = pnand %p9696_p12, %p15438_p8 }
 0x5f4   : > { %p9690_p0 = pneg %p9689_p11 }
 0x5f6   : > { %9959 = dma.done.wait (%p9690_p0), %s7315_s25, 4096  }
 0x5f7   : > { %9961 = vsyncadd (%p9690_p0), %s7315_s25, 4294963200  ;;  %p20_p1 = scmp.ge.s32.totalorder %s10063_s11, 4   ;;  %s15439_s27 = smov %s9968_s28 }
 0x5f8   : > { %s15440_s28 = smov %s9972_s29  ;;  %s15441_s29 = smov %s10074_s14 }
 0x5f9   : > { %s15442_s30 = smov %s10063_s11  ;;  %22 = sbr.rel (!%p20_p1) target bundleno = 5 (0x5), region = 103 }
 0x5fe   :  { %7320 = vsyncpa [#allocation5], 1 }
 0x5ff   :  { %7322 = vsyncpa [#allocation5 + $0x1], 1 }
 0x600   :  { %7323 = vsyncpa [#allocation8], 1 }
 0x601   :  { %7324 = vsyncpa [#allocation6], 1 }
 0x602   :  { %7326 = vsyncpa [#allocation6 + $0x1], 1 }

</bundles_post_ra>
